<compile_context>
chip_gen: v5e
topology: v5e:2x2
jax: 0.10.0
libtpu: 0.0.40
codegen_flags: <defaults>
</compile_context>

<pallas_src>
import math

import jax
import jax.numpy as jnp
from jax.experimental import pallas as pl
from jax.experimental.pallas import tpu as pltpu

_K = 5  # conv kernel size for all three layers


def _encoder_fused_kernel(norm_ref, x_ref, w1_ref, b1_ref, w2_ref, b2_ref,
                          w3_ref, b3_ref, o_ref):
    """Fused (normalize -> conv1 -> conv2 -> conv3), all ReLU, one batch block.

    norm_ref: SMEM (2,)  = [mean, 1/std]
    x_ref:    VMEM (BB, H, W)            layer-1 input, Cin==1 squeezed out
    wN_ref:   VMEM (KH*KW*Cin, Cout)     dense 2D weight slab
    bN_ref:   VMEM (1, Cout)
    o_ref:    VMEM (BB, Ho3, Wo3, 128)
    """
    mean = norm_ref[0]
    inv_std = norm_ref[1]
    BB, H, W = x_ref.shape

    # ---- layer 1: Cin = 1, full im2col -> (BB*Ho*Wo, 25) @ (25, 32) ----
    x = (x_ref[...].astype(jnp.float32) - mean) * inv_std        # (BB, H, W)
    Ho, Wo = H - _K + 1, W - _K + 1
    cols = [x[:, kh:kh + Ho, kw:kw + Wo]
            for kh in range(_K) for kw in range(_K)]             # 25 x (BB,Ho,Wo)
    patches = jnp.stack(cols, axis=-1).reshape(BB * Ho * Wo, _K * _K)
    a = jnp.dot(patches, w1_ref[...], preferred_element_type=jnp.float32)
    a = jnp.maximum(a + b1_ref[...], 0.0)
    a = a.reshape(BB, Ho, Wo, w1_ref.shape[-1])                  # stays in VMEM

    # ---- layers 2 & 3: im2col with contraction K = 25 * Cin ----
    for w_ref, b_ref in ((w2_ref, b2_ref), (w3_ref, b3_ref)):
        _, H, W, Cin = a.shape
        Ho, Wo = H - _K + 1, W - _K + 1
        cols = [a[:, kh:kh + Ho, kw:kw + Wo, :]
                for kh in range(_K) for kw in range(_K)]
        patches = jnp.concatenate(cols, axis=-1)                 # (BB,Ho,Wo,25*Cin)
        patches = patches.reshape(BB * Ho * Wo, _K * _K * Cin)
        a = jnp.dot(patches, w_ref[...], preferred_element_type=jnp.float32)
        a = jnp.maximum(a + b_ref[...], 0.0)
        a = a.reshape(BB, Ho, Wo, w_ref.shape[-1])

    o_ref[...] = a                                               # lane-dense (Cout=128)


def _pick_batch_block(n):
    """Images per grid step: amortize per-step overhead, but keep >=2 grid
    steps (v7x has 2 TensorCores) and cap at 8 for VMEM headroom (v7x 64MiB,
    v5e 16MiB scoped default)."""
    if n <= 1:
        return 1
    return min(8, max(1, n // 2))


def encoder_forward(x_nchw, params, mean, std):
    """PyTorch-equivalent Encoder.forward; input/output are NCHW, Cin must be 1."""
    N, Cin, H, W = x_nchw.shape
    assert Cin == 1, "Encoder expects a single input channel"
    x = x_nchw[:, 0, :, :].astype(jnp.float32)                   # (N, H, W)

    (w1, b1), (w2, b2), (w3, b3) = params
    Cout = w3.shape[-1]
    Ho3 = H - 3 * (_K - 1)
    Wo3 = W - 3 * (_K - 1)

    # batch blocking (pad N up to a multiple of the block)
    BB = _pick_batch_block(N)
    nb = -(-N // BB)
    Npad = nb * BB
    if Npad != N:
        x = jnp.pad(x, ((0, Npad - N), (0, 0), (0, 0)))

    # scalars -> SMEM; divide replaced by multiply with precomputed reciprocal
    norm = jnp.array([mean, 1.0 / std], jnp.float32)

    # weights as dense 2D slabs (KH*KW*Cin, Cout); biases as (1, Cout)
    flat = []
    for w, b in params:
        kh, kw, cin, cout = w.shape
        flat.append(w.reshape(kh * kw * cin, cout))
        flat.append(b.reshape(1, cout))

    out = pl.pallas_call(
        _encoder_fused_kernel,
        out_shape=jax.ShapeDtypeStruct((Npad, Ho3, Wo3, Cout), jnp.float32),
        grid=(nb,),
        in_specs=[
            pl.BlockSpec(memory_space=pltpu.MemorySpace.SMEM),    # [mean, 1/std]
            pl.BlockSpec((BB, H, W), lambda n: (n, 0, 0)),        # images
        ] + [
            # weight/bias blocks: same block index every step -> fetched once
            pl.BlockSpec(a.shape, lambda n: (0, 0)) for a in flat
        ],
        out_specs=pl.BlockSpec((BB, Ho3, Wo3, Cout), lambda n: (n, 0, 0, 0)),
        compiler_params=pltpu.CompilerParams(
            dimension_semantics=("parallel",)),
    )(norm, x, *flat)

    out = out[:N]
    return jnp.transpose(out, (0, 3, 1, 2))                      # -> NCHW


def init_encoder_params(key):
    """Xavier-normal weights (gain=sqrt(2) for ReLU), zero biases. HWIO layout."""
    gain = math.sqrt(2.0)
    shapes = [(_K, _K, 1, 32), (_K, _K, 32, 64), (_K, _K, 64, 128)]
    params = []
    for i, (kh, kw, cin, cout) in enumerate(shapes):
        k = jax.random.fold_in(key, i)
        fan_in = cin * kh * kw
        fan_out = cout * kh * kw
        std = gain * math.sqrt(2.0 / (fan_in + fan_out))
        w = std * jax.random.normal(k, (kh, kw, cin, cout), jnp.float32)
        b = jnp.zeros((cout,), jnp.float32)
        params.append((w, b))
    return params


def _reference_forward(x_nchw, params, mean, std):
    """Plain-JAX reference (lax conv) for the correctness check."""
    x = jnp.transpose(x_nchw, (0, 2, 3, 1)).astype(jnp.float32)
    x = (x - mean) / std
    for w, b in params:
        x = jax.lax.conv_general_dilated(
            x, w, window_strides=(1, 1), padding="VALID",
            dimension_numbers=("NHWC", "HWIO", "NHWC"))
        x = jnp.maximum(x + b.reshape(1, 1, 1, -1), 0.0)
    return jnp.transpose(x, (0, 3, 1, 2))


if __name__ == "__main__":
    key = jax.random.PRNGKey(0)
    k_x, k_p = jax.random.split(key)

    mean, std = 0.5, 0.25
    x = jax.random.uniform(k_x, (2, 1, 16, 16), jnp.float32)     # NCHW, Cin=1
    params = init_encoder_params(k_p)

    out = jax.block_until_ready(encoder_forward(x, params, mean, std))
    assert out.shape == (2, 128, 4, 4), out.shape

    ref = jax.block_until_ready(_reference_forward(x, params, mean, std))
    assert jnp.allclose(out, ref, atol=1e-4, rtol=1e-4), (
        float(jnp.max(jnp.abs(out - ref))))

    print("KERNEL_OK")
</pallas_src>

<mosaic_0001>
module attributes {stable_mosaic.version = 11 : i64} {
  func.func @_encoder_fused_kernel(%arg0: i32, %arg1: memref<2xf32, #tpu.memory_space<smem>>, %arg2: memref<1x16x16xf32, #tpu.memory_space<vmem>>, %arg3: memref<25x32xf32, #tpu.memory_space<vmem>>, %arg4: memref<1x32xf32, #tpu.memory_space<vmem>>, %arg5: memref<800x64xf32, #tpu.memory_space<vmem>>, %arg6: memref<1x64xf32, #tpu.memory_space<vmem>>, %arg7: memref<1600x128xf32, #tpu.memory_space<vmem>>, %arg8: memref<1x128xf32, #tpu.memory_space<vmem>>, %arg9: memref<1x4x4x128xf32, #tpu.memory_space<vmem>>) attributes {dimension_semantics = [#tpu.dimension_semantics<parallel>], iteration_bounds = array<i64: 2>, scalar_prefetch = 0 : i64, scratch_operands = 0 : i64, tpu.core_type = #tpu.core_type<tc>, window_params = [{transform_indices = @transform_0, window_bounds = array<i64: 2>}, {transform_indices = @transform_1, window_bounds = array<i64: 1, 16, 16>}, {pipeline_mode = #tpu.pipeline_mode<synchronous>, transform_indices = @transform_2, window_bounds = array<i64: 25, 32>}, {pipeline_mode = #tpu.pipeline_mode<synchronous>, transform_indices = @transform_3, window_bounds = array<i64: 1, 32>}, {pipeline_mode = #tpu.pipeline_mode<synchronous>, transform_indices = @transform_4, window_bounds = array<i64: 800, 64>}, {pipeline_mode = #tpu.pipeline_mode<synchronous>, transform_indices = @transform_5, window_bounds = array<i64: 1, 64>}, {pipeline_mode = #tpu.pipeline_mode<synchronous>, transform_indices = @transform_6, window_bounds = array<i64: 1600, 128>}, {pipeline_mode = #tpu.pipeline_mode<synchronous>, transform_indices = @transform_7, window_bounds = array<i64: 1, 128>}, {transform_indices = @transform_8, window_bounds = array<i64: 1, 4, 4, 128>}]} {
    %c0 = arith.constant 0 : index
    %0 = memref.load %arg1[%c0] : memref<2xf32, #tpu.memory_space<smem>>
    %c1 = arith.constant 1 : index
    %1 = memref.load %arg1[%c1] : memref<2xf32, #tpu.memory_space<smem>>
    %c0_0 = arith.constant 0 : index
    %c0_1 = arith.constant 0 : index
    %c0_2 = arith.constant 0 : index
    %2 = vector.load %arg2[%c0_0, %c0_1, %c0_2] : memref<1x16x16xf32, #tpu.memory_space<vmem>>, vector<1x16x16xf32>
    %3 = vector.broadcast %0 : f32 to vector<1x16x16xf32>
    %4 = arith.subf %2, %3 : vector<1x16x16xf32>
    %5 = vector.broadcast %1 : f32 to vector<1x16x16xf32>
    %6 = arith.mulf %4, %5 : vector<1x16x16xf32>
    %7 = vector.extract_strided_slice %6 {offsets = [0, 0, 0], sizes = [1, 12, 12], strides = [1, 1, 1]} : vector<1x16x16xf32> to vector<1x12x12xf32>
    %8 = vector.extract_strided_slice %6 {offsets = [0, 0, 1], sizes = [1, 12, 12], strides = [1, 1, 1]} : vector<1x16x16xf32> to vector<1x12x12xf32>
    %9 = vector.extract_strided_slice %6 {offsets = [0, 0, 2], sizes = [1, 12, 12], strides = [1, 1, 1]} : vector<1x16x16xf32> to vector<1x12x12xf32>
    %10 = vector.extract_strided_slice %6 {offsets = [0, 0, 3], sizes = [1, 12, 12], strides = [1, 1, 1]} : vector<1x16x16xf32> to vector<1x12x12xf32>
    %11 = vector.extract_strided_slice %6 {offsets = [0, 0, 4], sizes = [1, 12, 12], strides = [1, 1, 1]} : vector<1x16x16xf32> to vector<1x12x12xf32>
    %12 = vector.extract_strided_slice %6 {offsets = [0, 1, 0], sizes = [1, 12, 12], strides = [1, 1, 1]} : vector<1x16x16xf32> to vector<1x12x12xf32>
    %13 = vector.extract_strided_slice %6 {offsets = [0, 1, 1], sizes = [1, 12, 12], strides = [1, 1, 1]} : vector<1x16x16xf32> to vector<1x12x12xf32>
    %14 = vector.extract_strided_slice %6 {offsets = [0, 1, 2], sizes = [1, 12, 12], strides = [1, 1, 1]} : vector<1x16x16xf32> to vector<1x12x12xf32>
    %15 = vector.extract_strided_slice %6 {offsets = [0, 1, 3], sizes = [1, 12, 12], strides = [1, 1, 1]} : vector<1x16x16xf32> to vector<1x12x12xf32>
    %16 = vector.extract_strided_slice %6 {offsets = [0, 1, 4], sizes = [1, 12, 12], strides = [1, 1, 1]} : vector<1x16x16xf32> to vector<1x12x12xf32>
    %17 = vector.extract_strided_slice %6 {offsets = [0, 2, 0], sizes = [1, 12, 12], strides = [1, 1, 1]} : vector<1x16x16xf32> to vector<1x12x12xf32>
    %18 = vector.extract_strided_slice %6 {offsets = [0, 2, 1], sizes = [1, 12, 12], strides = [1, 1, 1]} : vector<1x16x16xf32> to vector<1x12x12xf32>
    %19 = vector.extract_strided_slice %6 {offsets = [0, 2, 2], sizes = [1, 12, 12], strides = [1, 1, 1]} : vector<1x16x16xf32> to vector<1x12x12xf32>
    %20 = vector.extract_strided_slice %6 {offsets = [0, 2, 3], sizes = [1, 12, 12], strides = [1, 1, 1]} : vector<1x16x16xf32> to vector<1x12x12xf32>
    %21 = vector.extract_strided_slice %6 {offsets = [0, 2, 4], sizes = [1, 12, 12], strides = [1, 1, 1]} : vector<1x16x16xf32> to vector<1x12x12xf32>
    %22 = vector.extract_strided_slice %6 {offsets = [0, 3, 0], sizes = [1, 12, 12], strides = [1, 1, 1]} : vector<1x16x16xf32> to vector<1x12x12xf32>
    %23 = vector.extract_strided_slice %6 {offsets = [0, 3, 1], sizes = [1, 12, 12], strides = [1, 1, 1]} : vector<1x16x16xf32> to vector<1x12x12xf32>
    %24 = vector.extract_strided_slice %6 {offsets = [0, 3, 2], sizes = [1, 12, 12], strides = [1, 1, 1]} : vector<1x16x16xf32> to vector<1x12x12xf32>
    %25 = vector.extract_strided_slice %6 {offsets = [0, 3, 3], sizes = [1, 12, 12], strides = [1, 1, 1]} : vector<1x16x16xf32> to vector<1x12x12xf32>
    %26 = vector.extract_strided_slice %6 {offsets = [0, 3, 4], sizes = [1, 12, 12], strides = [1, 1, 1]} : vector<1x16x16xf32> to vector<1x12x12xf32>
    %27 = vector.extract_strided_slice %6 {offsets = [0, 4, 0], sizes = [1, 12, 12], strides = [1, 1, 1]} : vector<1x16x16xf32> to vector<1x12x12xf32>
    %28 = vector.extract_strided_slice %6 {offsets = [0, 4, 1], sizes = [1, 12, 12], strides = [1, 1, 1]} : vector<1x16x16xf32> to vector<1x12x12xf32>
    %29 = vector.extract_strided_slice %6 {offsets = [0, 4, 2], sizes = [1, 12, 12], strides = [1, 1, 1]} : vector<1x16x16xf32> to vector<1x12x12xf32>
    %30 = vector.extract_strided_slice %6 {offsets = [0, 4, 3], sizes = [1, 12, 12], strides = [1, 1, 1]} : vector<1x16x16xf32> to vector<1x12x12xf32>
    %31 = vector.extract_strided_slice %6 {offsets = [0, 4, 4], sizes = [1, 12, 12], strides = [1, 1, 1]} : vector<1x16x16xf32> to vector<1x12x12xf32>
    %32 = vector.shape_cast %7 : vector<1x12x12xf32> to vector<1x12x12x1xf32>
    %33 = vector.shape_cast %8 : vector<1x12x12xf32> to vector<1x12x12x1xf32>
    %34 = vector.shape_cast %9 : vector<1x12x12xf32> to vector<1x12x12x1xf32>
    %35 = vector.shape_cast %10 : vector<1x12x12xf32> to vector<1x12x12x1xf32>
    %36 = vector.shape_cast %11 : vector<1x12x12xf32> to vector<1x12x12x1xf32>
    %37 = vector.shape_cast %12 : vector<1x12x12xf32> to vector<1x12x12x1xf32>
    %38 = vector.shape_cast %13 : vector<1x12x12xf32> to vector<1x12x12x1xf32>
    %39 = vector.shape_cast %14 : vector<1x12x12xf32> to vector<1x12x12x1xf32>
    %40 = vector.shape_cast %15 : vector<1x12x12xf32> to vector<1x12x12x1xf32>
    %41 = vector.shape_cast %16 : vector<1x12x12xf32> to vector<1x12x12x1xf32>
    %42 = vector.shape_cast %17 : vector<1x12x12xf32> to vector<1x12x12x1xf32>
    %43 = vector.shape_cast %18 : vector<1x12x12xf32> to vector<1x12x12x1xf32>
    %44 = vector.shape_cast %19 : vector<1x12x12xf32> to vector<1x12x12x1xf32>
    %45 = vector.shape_cast %20 : vector<1x12x12xf32> to vector<1x12x12x1xf32>
    %46 = vector.shape_cast %21 : vector<1x12x12xf32> to vector<1x12x12x1xf32>
    %47 = vector.shape_cast %22 : vector<1x12x12xf32> to vector<1x12x12x1xf32>
    %48 = vector.shape_cast %23 : vector<1x12x12xf32> to vector<1x12x12x1xf32>
    %49 = vector.shape_cast %24 : vector<1x12x12xf32> to vector<1x12x12x1xf32>
    %50 = vector.shape_cast %25 : vector<1x12x12xf32> to vector<1x12x12x1xf32>
    %51 = vector.shape_cast %26 : vector<1x12x12xf32> to vector<1x12x12x1xf32>
    %52 = vector.shape_cast %27 : vector<1x12x12xf32> to vector<1x12x12x1xf32>
    %53 = vector.shape_cast %28 : vector<1x12x12xf32> to vector<1x12x12x1xf32>
    %54 = vector.shape_cast %29 : vector<1x12x12xf32> to vector<1x12x12x1xf32>
    %55 = vector.shape_cast %30 : vector<1x12x12xf32> to vector<1x12x12x1xf32>
    %56 = vector.shape_cast %31 : vector<1x12x12xf32> to vector<1x12x12x1xf32>
    %57 = tpu.concatenate %32, %33, %34, %35, %36, %37, %38, %39, %40, %41, %42, %43, %44, %45, %46, %47 in 3 : vector<1x12x12x1xf32>, vector<1x12x12x1xf32>, vector<1x12x12x1xf32>, vector<1x12x12x1xf32>, vector<1x12x12x1xf32>, vector<1x12x12x1xf32>, vector<1x12x12x1xf32>, vector<1x12x12x1xf32>, vector<1x12x12x1xf32>, vector<1x12x12x1xf32>, vector<1x12x12x1xf32>, vector<1x12x12x1xf32>, vector<1x12x12x1xf32>, vector<1x12x12x1xf32>, vector<1x12x12x1xf32>, vector<1x12x12x1xf32> -> vector<1x12x12x16xf32>
    %58 = tpu.concatenate %48, %49, %50, %51, %52, %53, %54, %55, %56 in 3 : vector<1x12x12x1xf32>, vector<1x12x12x1xf32>, vector<1x12x12x1xf32>, vector<1x12x12x1xf32>, vector<1x12x12x1xf32>, vector<1x12x12x1xf32>, vector<1x12x12x1xf32>, vector<1x12x12x1xf32>, vector<1x12x12x1xf32> -> vector<1x12x12x9xf32>
    %59 = tpu.concatenate %57, %58 in 3 : vector<1x12x12x16xf32>, vector<1x12x12x9xf32> -> vector<1x12x12x25xf32>
    %60 = vector.shape_cast %59 : vector<1x12x12x25xf32> to vector<144x25xf32>
    %c0_3 = arith.constant 0 : index
    %c0_4 = arith.constant 0 : index
    %61 = vector.load %arg3[%c0_3, %c0_4] : memref<25x32xf32, #tpu.memory_space<vmem>>, vector<25x32xf32>
    %cst = arith.constant dense<0.000000e+00> : vector<144x32xf32>
    %62 = tpu.matmul %60, %61, %cst {dimension_numbers = #tpu.dot_dimension_numbers<[1], [0], [0], [1], [0, 0, 1, 1], [], []>} : vector<144x25xf32>, vector<25x32xf32>, vector<144x32xf32> -> vector<144x32xf32>
    %c0_5 = arith.constant 0 : index
    %c0_6 = arith.constant 0 : index
    %63 = vector.load %arg4[%c0_5, %c0_6] : memref<1x32xf32, #tpu.memory_space<vmem>>, vector<1x32xf32>
    %64 = vector.broadcast %63 : vector<1x32xf32> to vector<144x32xf32>
    %65 = arith.addf %62, %64 : vector<144x32xf32>
    %cst_7 = arith.constant 0.000000e+00 : f32
    %66 = vector.broadcast %cst_7 : f32 to vector<144x32xf32>
    %67 = arith.maximumf %65, %66 : vector<144x32xf32>
    %68 = vector.shape_cast %67 : vector<144x32xf32> to vector<1x12x12x32xf32>
    %69 = vector.extract_strided_slice %68 {offsets = [0, 0, 0, 0], sizes = [1, 8, 8, 32], strides = [1, 1, 1, 1]} : vector<1x12x12x32xf32> to vector<1x8x8x32xf32>
    %70 = vector.extract_strided_slice %68 {offsets = [0, 0, 1, 0], sizes = [1, 8, 8, 32], strides = [1, 1, 1, 1]} : vector<1x12x12x32xf32> to vector<1x8x8x32xf32>
    %71 = vector.extract_strided_slice %68 {offsets = [0, 0, 2, 0], sizes = [1, 8, 8, 32], strides = [1, 1, 1, 1]} : vector<1x12x12x32xf32> to vector<1x8x8x32xf32>
    %72 = vector.extract_strided_slice %68 {offsets = [0, 0, 3, 0], sizes = [1, 8, 8, 32], strides = [1, 1, 1, 1]} : vector<1x12x12x32xf32> to vector<1x8x8x32xf32>
    %73 = vector.extract_strided_slice %68 {offsets = [0, 0, 4, 0], sizes = [1, 8, 8, 32], strides = [1, 1, 1, 1]} : vector<1x12x12x32xf32> to vector<1x8x8x32xf32>
    %74 = vector.extract_strided_slice %68 {offsets = [0, 1, 0, 0], sizes = [1, 8, 8, 32], strides = [1, 1, 1, 1]} : vector<1x12x12x32xf32> to vector<1x8x8x32xf32>
    %75 = vector.extract_strided_slice %68 {offsets = [0, 1, 1, 0], sizes = [1, 8, 8, 32], strides = [1, 1, 1, 1]} : vector<1x12x12x32xf32> to vector<1x8x8x32xf32>
    %76 = vector.extract_strided_slice %68 {offsets = [0, 1, 2, 0], sizes = [1, 8, 8, 32], strides = [1, 1, 1, 1]} : vector<1x12x12x32xf32> to vector<1x8x8x32xf32>
    %77 = vector.extract_strided_slice %68 {offsets = [0, 1, 3, 0], sizes = [1, 8, 8, 32], strides = [1, 1, 1, 1]} : vector<1x12x12x32xf32> to vector<1x8x8x32xf32>
    %78 = vector.extract_strided_slice %68 {offsets = [0, 1, 4, 0], sizes = [1, 8, 8, 32], strides = [1, 1, 1, 1]} : vector<1x12x12x32xf32> to vector<1x8x8x32xf32>
    %79 = vector.extract_strided_slice %68 {offsets = [0, 2, 0, 0], sizes = [1, 8, 8, 32], strides = [1, 1, 1, 1]} : vector<1x12x12x32xf32> to vector<1x8x8x32xf32>
    %80 = vector.extract_strided_slice %68 {offsets = [0, 2, 1, 0], sizes = [1, 8, 8, 32], strides = [1, 1, 1, 1]} : vector<1x12x12x32xf32> to vector<1x8x8x32xf32>
    %81 = vector.extract_strided_slice %68 {offsets = [0, 2, 2, 0], sizes = [1, 8, 8, 32], strides = [1, 1, 1, 1]} : vector<1x12x12x32xf32> to vector<1x8x8x32xf32>
    %82 = vector.extract_strided_slice %68 {offsets = [0, 2, 3, 0], sizes = [1, 8, 8, 32], strides = [1, 1, 1, 1]} : vector<1x12x12x32xf32> to vector<1x8x8x32xf32>
    %83 = vector.extract_strided_slice %68 {offsets = [0, 2, 4, 0], sizes = [1, 8, 8, 32], strides = [1, 1, 1, 1]} : vector<1x12x12x32xf32> to vector<1x8x8x32xf32>
    %84 = vector.extract_strided_slice %68 {offsets = [0, 3, 0, 0], sizes = [1, 8, 8, 32], strides = [1, 1, 1, 1]} : vector<1x12x12x32xf32> to vector<1x8x8x32xf32>
    %85 = vector.extract_strided_slice %68 {offsets = [0, 3, 1, 0], sizes = [1, 8, 8, 32], strides = [1, 1, 1, 1]} : vector<1x12x12x32xf32> to vector<1x8x8x32xf32>
    %86 = vector.extract_strided_slice %68 {offsets = [0, 3, 2, 0], sizes = [1, 8, 8, 32], strides = [1, 1, 1, 1]} : vector<1x12x12x32xf32> to vector<1x8x8x32xf32>
    %87 = vector.extract_strided_slice %68 {offsets = [0, 3, 3, 0], sizes = [1, 8, 8, 32], strides = [1, 1, 1, 1]} : vector<1x12x12x32xf32> to vector<1x8x8x32xf32>
    %88 = vector.extract_strided_slice %68 {offsets = [0, 3, 4, 0], sizes = [1, 8, 8, 32], strides = [1, 1, 1, 1]} : vector<1x12x12x32xf32> to vector<1x8x8x32xf32>
    %89 = vector.extract_strided_slice %68 {offsets = [0, 4, 0, 0], sizes = [1, 8, 8, 32], strides = [1, 1, 1, 1]} : vector<1x12x12x32xf32> to vector<1x8x8x32xf32>
    %90 = vector.extract_strided_slice %68 {offsets = [0, 4, 1, 0], sizes = [1, 8, 8, 32], strides = [1, 1, 1, 1]} : vector<1x12x12x32xf32> to vector<1x8x8x32xf32>
    %91 = vector.extract_strided_slice %68 {offsets = [0, 4, 2, 0], sizes = [1, 8, 8, 32], strides = [1, 1, 1, 1]} : vector<1x12x12x32xf32> to vector<1x8x8x32xf32>
    %92 = vector.extract_strided_slice %68 {offsets = [0, 4, 3, 0], sizes = [1, 8, 8, 32], strides = [1, 1, 1, 1]} : vector<1x12x12x32xf32> to vector<1x8x8x32xf32>
    %93 = vector.extract_strided_slice %68 {offsets = [0, 4, 4, 0], sizes = [1, 8, 8, 32], strides = [1, 1, 1, 1]} : vector<1x12x12x32xf32> to vector<1x8x8x32xf32>
    %94 = tpu.concatenate %69, %70, %71, %72, %73, %74, %75, %76, %77, %78, %79, %80, %81, %82, %83, %84 in 3 : vector<1x8x8x32xf32>, vector<1x8x8x32xf32>, vector<1x8x8x32xf32>, vector<1x8x8x32xf32>, vector<1x8x8x32xf32>, vector<1x8x8x32xf32>, vector<1x8x8x32xf32>, vector<1x8x8x32xf32>, vector<1x8x8x32xf32>, vector<1x8x8x32xf32>, vector<1x8x8x32xf32>, vector<1x8x8x32xf32>, vector<1x8x8x32xf32>, vector<1x8x8x32xf32>, vector<1x8x8x32xf32>, vector<1x8x8x32xf32> -> vector<1x8x8x512xf32>
    %95 = tpu.concatenate %85, %86, %87, %88, %89, %90, %91, %92, %93 in 3 : vector<1x8x8x32xf32>, vector<1x8x8x32xf32>, vector<1x8x8x32xf32>, vector<1x8x8x32xf32>, vector<1x8x8x32xf32>, vector<1x8x8x32xf32>, vector<1x8x8x32xf32>, vector<1x8x8x32xf32>, vector<1x8x8x32xf32> -> vector<1x8x8x288xf32>
    %96 = tpu.concatenate %94, %95 in 3 : vector<1x8x8x512xf32>, vector<1x8x8x288xf32> -> vector<1x8x8x800xf32>
    %97 = vector.shape_cast %96 : vector<1x8x8x800xf32> to vector<64x800xf32>
    %c0_8 = arith.constant 0 : index
    %c0_9 = arith.constant 0 : index
    %98 = vector.load %arg5[%c0_8, %c0_9] : memref<800x64xf32, #tpu.memory_space<vmem>>, vector<800x64xf32>
    %cst_10 = arith.constant dense<0.000000e+00> : vector<64x64xf32>
    %99 = tpu.matmul %97, %98, %cst_10 {dimension_numbers = #tpu.dot_dimension_numbers<[1], [0], [0], [1], [0, 0, 1, 1], [], []>} : vector<64x800xf32>, vector<800x64xf32>, vector<64x64xf32> -> vector<64x64xf32>
    %c0_11 = arith.constant 0 : index
    %c0_12 = arith.constant 0 : index
    %100 = vector.load %arg6[%c0_11, %c0_12] : memref<1x64xf32, #tpu.memory_space<vmem>>, vector<1x64xf32>
    %101 = vector.broadcast %100 : vector<1x64xf32> to vector<64x64xf32>
    %102 = arith.addf %99, %101 : vector<64x64xf32>
    %cst_13 = arith.constant 0.000000e+00 : f32
    %103 = vector.broadcast %cst_13 : f32 to vector<64x64xf32>
    %104 = arith.maximumf %102, %103 : vector<64x64xf32>
    %105 = vector.shape_cast %104 : vector<64x64xf32> to vector<1x8x8x64xf32>
    %106 = vector.extract_strided_slice %105 {offsets = [0, 0, 0, 0], sizes = [1, 4, 4, 64], strides = [1, 1, 1, 1]} : vector<1x8x8x64xf32> to vector<1x4x4x64xf32>
    %107 = vector.extract_strided_slice %105 {offsets = [0, 0, 1, 0], sizes = [1, 4, 4, 64], strides = [1, 1, 1, 1]} : vector<1x8x8x64xf32> to vector<1x4x4x64xf32>
    %108 = vector.extract_strided_slice %105 {offsets = [0, 0, 2, 0], sizes = [1, 4, 4, 64], strides = [1, 1, 1, 1]} : vector<1x8x8x64xf32> to vector<1x4x4x64xf32>
    %109 = vector.extract_strided_slice %105 {offsets = [0, 0, 3, 0], sizes = [1, 4, 4, 64], strides = [1, 1, 1, 1]} : vector<1x8x8x64xf32> to vector<1x4x4x64xf32>
    %110 = vector.extract_strided_slice %105 {offsets = [0, 0, 4, 0], sizes = [1, 4, 4, 64], strides = [1, 1, 1, 1]} : vector<1x8x8x64xf32> to vector<1x4x4x64xf32>
    %111 = vector.extract_strided_slice %105 {offsets = [0, 1, 0, 0], sizes = [1, 4, 4, 64], strides = [1, 1, 1, 1]} : vector<1x8x8x64xf32> to vector<1x4x4x64xf32>
    %112 = vector.extract_strided_slice %105 {offsets = [0, 1, 1, 0], sizes = [1, 4, 4, 64], strides = [1, 1, 1, 1]} : vector<1x8x8x64xf32> to vector<1x4x4x64xf32>
    %113 = vector.extract_strided_slice %105 {offsets = [0, 1, 2, 0], sizes = [1, 4, 4, 64], strides = [1, 1, 1, 1]} : vector<1x8x8x64xf32> to vector<1x4x4x64xf32>
    %114 = vector.extract_strided_slice %105 {offsets = [0, 1, 3, 0], sizes = [1, 4, 4, 64], strides = [1, 1, 1, 1]} : vector<1x8x8x64xf32> to vector<1x4x4x64xf32>
    %115 = vector.extract_strided_slice %105 {offsets = [0, 1, 4, 0], sizes = [1, 4, 4, 64], strides = [1, 1, 1, 1]} : vector<1x8x8x64xf32> to vector<1x4x4x64xf32>
    %116 = vector.extract_strided_slice %105 {offsets = [0, 2, 0, 0], sizes = [1, 4, 4, 64], strides = [1, 1, 1, 1]} : vector<1x8x8x64xf32> to vector<1x4x4x64xf32>
    %117 = vector.extract_strided_slice %105 {offsets = [0, 2, 1, 0], sizes = [1, 4, 4, 64], strides = [1, 1, 1, 1]} : vector<1x8x8x64xf32> to vector<1x4x4x64xf32>
    %118 = vector.extract_strided_slice %105 {offsets = [0, 2, 2, 0], sizes = [1, 4, 4, 64], strides = [1, 1, 1, 1]} : vector<1x8x8x64xf32> to vector<1x4x4x64xf32>
    %119 = vector.extract_strided_slice %105 {offsets = [0, 2, 3, 0], sizes = [1, 4, 4, 64], strides = [1, 1, 1, 1]} : vector<1x8x8x64xf32> to vector<1x4x4x64xf32>
    %120 = vector.extract_strided_slice %105 {offsets = [0, 2, 4, 0], sizes = [1, 4, 4, 64], strides = [1, 1, 1, 1]} : vector<1x8x8x64xf32> to vector<1x4x4x64xf32>
    %121 = vector.extract_strided_slice %105 {offsets = [0, 3, 0, 0], sizes = [1, 4, 4, 64], strides = [1, 1, 1, 1]} : vector<1x8x8x64xf32> to vector<1x4x4x64xf32>
    %122 = vector.extract_strided_slice %105 {offsets = [0, 3, 1, 0], sizes = [1, 4, 4, 64], strides = [1, 1, 1, 1]} : vector<1x8x8x64xf32> to vector<1x4x4x64xf32>
    %123 = vector.extract_strided_slice %105 {offsets = [0, 3, 2, 0], sizes = [1, 4, 4, 64], strides = [1, 1, 1, 1]} : vector<1x8x8x64xf32> to vector<1x4x4x64xf32>
    %124 = vector.extract_strided_slice %105 {offsets = [0, 3, 3, 0], sizes = [1, 4, 4, 64], strides = [1, 1, 1, 1]} : vector<1x8x8x64xf32> to vector<1x4x4x64xf32>
    %125 = vector.extract_strided_slice %105 {offsets = [0, 3, 4, 0], sizes = [1, 4, 4, 64], strides = [1, 1, 1, 1]} : vector<1x8x8x64xf32> to vector<1x4x4x64xf32>
    %126 = vector.extract_strided_slice %105 {offsets = [0, 4, 0, 0], sizes = [1, 4, 4, 64], strides = [1, 1, 1, 1]} : vector<1x8x8x64xf32> to vector<1x4x4x64xf32>
    %127 = vector.extract_strided_slice %105 {offsets = [0, 4, 1, 0], sizes = [1, 4, 4, 64], strides = [1, 1, 1, 1]} : vector<1x8x8x64xf32> to vector<1x4x4x64xf32>
    %128 = vector.extract_strided_slice %105 {offsets = [0, 4, 2, 0], sizes = [1, 4, 4, 64], strides = [1, 1, 1, 1]} : vector<1x8x8x64xf32> to vector<1x4x4x64xf32>
    %129 = vector.extract_strided_slice %105 {offsets = [0, 4, 3, 0], sizes = [1, 4, 4, 64], strides = [1, 1, 1, 1]} : vector<1x8x8x64xf32> to vector<1x4x4x64xf32>
    %130 = vector.extract_strided_slice %105 {offsets = [0, 4, 4, 0], sizes = [1, 4, 4, 64], strides = [1, 1, 1, 1]} : vector<1x8x8x64xf32> to vector<1x4x4x64xf32>
    %131 = tpu.concatenate %106, %107, %108, %109, %110, %111, %112, %113, %114, %115, %116, %117, %118, %119, %120, %121 in 3 : vector<1x4x4x64xf32>, vector<1x4x4x64xf32>, vector<1x4x4x64xf32>, vector<1x4x4x64xf32>, vector<1x4x4x64xf32>, vector<1x4x4x64xf32>, vector<1x4x4x64xf32>, vector<1x4x4x64xf32>, vector<1x4x4x64xf32>, vector<1x4x4x64xf32>, vector<1x4x4x64xf32>, vector<1x4x4x64xf32>, vector<1x4x4x64xf32>, vector<1x4x4x64xf32>, vector<1x4x4x64xf32>, vector<1x4x4x64xf32> -> vector<1x4x4x1024xf32>
    %132 = tpu.concatenate %122, %123, %124, %125, %126, %127, %128, %129, %130 in 3 : vector<1x4x4x64xf32>, vector<1x4x4x64xf32>, vector<1x4x4x64xf32>, vector<1x4x4x64xf32>, vector<1x4x4x64xf32>, vector<1x4x4x64xf32>, vector<1x4x4x64xf32>, vector<1x4x4x64xf32>, vector<1x4x4x64xf32> -> vector<1x4x4x576xf32>
    %133 = tpu.concatenate %131, %132 in 3 : vector<1x4x4x1024xf32>, vector<1x4x4x576xf32> -> vector<1x4x4x1600xf32>
    %134 = vector.shape_cast %133 : vector<1x4x4x1600xf32> to vector<16x1600xf32>
    %c0_14 = arith.constant 0 : index
    %c0_15 = arith.constant 0 : index
    %135 = vector.load %arg7[%c0_14, %c0_15] : memref<1600x128xf32, #tpu.memory_space<vmem>>, vector<1600x128xf32>
    %cst_16 = arith.constant dense<0.000000e+00> : vector<16x128xf32>
    %136 = tpu.matmul %134, %135, %cst_16 {dimension_numbers = #tpu.dot_dimension_numbers<[1], [0], [0], [1], [0, 0, 1, 1], [], []>} : vector<16x1600xf32>, vector<1600x128xf32>, vector<16x128xf32> -> vector<16x128xf32>
    %c0_17 = arith.constant 0 : index
    %c0_18 = arith.constant 0 : index
    %137 = vector.load %arg8[%c0_17, %c0_18] : memref<1x128xf32, #tpu.memory_space<vmem>>, vector<1x128xf32>
    %138 = vector.broadcast %137 : vector<1x128xf32> to vector<16x128xf32>
    %139 = arith.addf %136, %138 : vector<16x128xf32>
    %cst_19 = arith.constant 0.000000e+00 : f32
    %140 = vector.broadcast %cst_19 : f32 to vector<16x128xf32>
    %141 = arith.maximumf %139, %140 : vector<16x128xf32>
    %142 = vector.shape_cast %141 : vector<16x128xf32> to vector<1x4x4x128xf32>
    %c0_20 = arith.constant 0 : index
    %c0_21 = arith.constant 0 : index
    %c0_22 = arith.constant 0 : index
    %c0_23 = arith.constant 0 : index
    %143 = vector.load %arg9[%c0_20, %c0_21, %c0_22, %c0_23] : memref<1x4x4x128xf32, #tpu.memory_space<vmem>>, vector<1x4x4x128xf32>
    tpu.vector_store %arg9[%c0_20, %c0_21, %c0_22, %c0_23], %142 {strides = array<i32>} : memref<1x4x4x128xf32, #tpu.memory_space<vmem>>, vector<1x4x4x128xf32>,
    return
  }
  func.func @transform_0(%arg0: i32) -> i32 {
    %c0_i32 = arith.constant 0 : i32
    %c0_i32_0 = arith.constant 0 : i32
    return %c0_i32 : i32
  }
  func.func @transform_1(%arg0: i32) -> (i32, i32, i32) {
    %c0_i32 = arith.constant 0 : i32
    %c0_i32_0 = arith.constant 0 : i32
    %c0_i32_1 = arith.constant 0 : i32
    return %arg0, %c0_i32, %c0_i32_0 : i32, i32, i32
  }
  func.func @transform_2(%arg0: i32) -> (i32, i32) {
    %c0_i32 = arith.constant 0 : i32
    %c0_i32_0 = arith.constant 0 : i32
    %c0_i32_1 = arith.constant 0 : i32
    return %c0_i32, %c0_i32_0 : i32, i32
  }
  func.func @transform_3(%arg0: i32) -> (i32, i32) {
    %c0_i32 = arith.constant 0 : i32
    %c0_i32_0 = arith.constant 0 : i32
    %c0_i32_1 = arith.constant 0 : i32
    return %c0_i32, %c0_i32_0 : i32, i32
  }
  func.func @transform_4(%arg0: i32) -> (i32, i32) {
    %c0_i32 = arith.constant 0 : i32
    %c0_i32_0 = arith.constant 0 : i32
    %c0_i32_1 = arith.constant 0 : i32
    return %c0_i32, %c0_i32_0 : i32, i32
  }
  func.func @transform_5(%arg0: i32) -> (i32, i32) {
    %c0_i32 = arith.constant 0 : i32
    %c0_i32_0 = arith.constant 0 : i32
    %c0_i32_1 = arith.constant 0 : i32
    return %c0_i32, %c0_i32_0 : i32, i32
  }
  func.func @transform_6(%arg0: i32) -> (i32, i32) {
    %c0_i32 = arith.constant 0 : i32
    %c0_i32_0 = arith.constant 0 : i32
    %c0_i32_1 = arith.constant 0 : i32
    return %c0_i32, %c0_i32_0 : i32, i32
  }
  func.func @transform_7(%arg0: i32) -> (i32, i32) {
    %c0_i32 = arith.constant 0 : i32
    %c0_i32_0 = arith.constant 0 : i32
    %c0_i32_1 = arith.constant 0 : i32
    return %c0_i32, %c0_i32_0 : i32, i32
  }
  func.func @transform_8(%arg0: i32) -> (i32, i32, i32, i32) {
    %c0_i32 = arith.constant 0 : i32
    %c0_i32_0 = arith.constant 0 : i32
    %c0_i32_1 = arith.constant 0 : i32
    %c0_i32_2 = arith.constant 0 : i32
    return %arg0, %c0_i32, %c0_i32_0, %c0_i32_1 : i32, i32, i32, i32
  }
}

</mosaic_0001>

<bundles_post_ra>
// kernel: tpu_custom_call.1
= control target key start
LH: loop header
LB: loop body
LE: loop exit
PB: predicated region body
PF: predicated region fallthrough
CT: control target
= control target key end

     0   :  { %13 = vsyncpa [#allocation5], 0  ;;  %s11663_s0 = inlined_call_operand.vmem [shape: f32[2], index: 0, kind: input, shape index: {}]   ;;  %s11664_s1 = inlined_call_operand.vmem [shape: f32[2,16,16], index: 1, kind: input, shape index: {}]   ;;  %s11665_s2 = inlined_call_operand.vmem [shape: f32[25,32], index: 2, kind: input, shape index: {}]   ;;  %s11666_s3 = inlined_call_operand.vmem [shape: f32[1,32], index: 3, kind: input, shape index: {}]   ;;  %s11667_s4 = inlined_call_operand.vmem [shape: f32[800,64], index: 4, kind: input, shape index: {}]   ;;  %s11668_s5 = inlined_call_operand.vmem [shape: f32[1,64], index: 5, kind: input, shape index: {}]   ;;  %s11669_s6 = inlined_call_operand.hbm [shape: f32[1600,128], index: 6, kind: input, shape index: {}]   ;;  %s11670_s7 = inlined_call_operand.vmem [shape: f32[1,128], index: 7, kind: input, shape index: {}]   ;;  %s11671_s8 = inlined_call_operand.hbm [shape: f32[2,4,4,128], index: 8, kind: output, shape index: {}]  }
   0x1   :  { %14 = vsyncpa [#allocation3], 0 }
   0x2   :  { %15 = vsyncpa [#allocation4], 0 }
   0x3   :  { %17 = vsyncpa [#allocation4 + $0x1], 0  ;;  %s6844_s27 = smov 0   ;;  %s6846_s28 = smov 0  }
   0x4   :  { %s6848_s29 = smov 0   ;;  %s6850_s30 = smov 0  }
   0x5 LB: > { %s6865_s9 = sadd.s32 4294967295, %s6788_s30   ;;  %s5945_s10 = sadd.s32 4294967294, %s6788_s30   ;;  %s6788_s30 = sphi %s6850_s30, %s12291_s30   ;;  %s6784_s29 = sphi %s6848_s29, %s12290_s29   ;;  %s6780_s28 = sphi %s6846_s28, %s12289_s28   ;;  %s6776_s27 = sphi %s6844_s27, %s12288_s27  }
   0x6   : > { %s6869_s11 = sadd.s32 1, %s6788_s30   ;;  %s203_s12 = sadd.s32 1, %s6784_s29 }
   0x7   : > { %s200_s13 = ssub.s32 %s6788_s30, %s6869_s11  ;;  %p213_p0 = scmp.ne.s32.totalorder %s6784_s29, %s6780_s28 }
   0x8   : > { %p201_p1 = scmp.eq.s32.totalorder %s200_s13, 0  ;;  %p214_p2 = scmp.eq.s32.totalorder %s6865_s9, 1 }
   0x9   : > { %p219_p3 = scmp.ne.s32.totalorder %s6780_s28, %s6776_s27  ;;  %p220_p4 = scmp.eq.s32.totalorder %s5945_s10, 1 }
   0xa   : > { %s6880_s14 = scalar_select %p201_p1, %s6784_s29, %s203_s12  }
   0xb   : > { %p6882_p5 = por %p214_p2, %p213_p0  ;;  %p6886_p6 = por %p220_p4, %p219_p3 }
   0xc   : > { %p5946_p7 = scmp.ge.s32.totalorder %s6788_s30, 1  ;;  %p227_p8 = scmp.lt.s32.totalorder %s6788_s30, 3 }
   0xd   : > { %p6047_p9 = scmp.eq.s32.totalorder %s6865_s9, 0  ;;  %s239_s20 = sshll.u32 %s11663_s0, 4  ;;  %s240_s20 = int_to_ptr.vmem [resolvable:$true] %s239_s20 }
   0xe   : > { %p6893_p10 = pnand %p5946_p7, %p227_p8  ;;  %s260_s23 = sshll.u32 %s11669_s6, 4  ;;  %s261_s23 = int_to_ptr.hbm [resolvable:$true] %s260_s23 }
   0xf   : > { %s6790_s24 = smov [#allocation6]   ;;  %s6791_s26 = smov [#allocation2]  }
  0x10   : > { %p6036_p11 = pneg %p6893_p10  ;;  %s262_s25 = sshll.u32 %s6790_s24, 4  ;;  %s263_s25 = int_to_ptr.vmem [resolvable:$true] %s262_s25 }
  0x11   : > { %s6792_s10 = smov 128   ;;  %s6793_s12 = smov 8  }
  0x12   : > { %p6037_p12 = pnand %p6047_p9, %p6036_p11  ;;  %289 = sbr.rel (%p6893_p10) target bundleno = 2663 (0xa67), region = 52 }
  0x14   : > { %6039 = dma.vmem_to_smem (!%p6037_p12), %s240_s20, 16, %s6791_s26, [#allocation5]  }
  0x15   : > { %6042 = dma.hbm_to_vmem [thread:$0]  (!%p6037_p12), %s261_s23, 25600, %s263_s25, [#allocation3], %s6792_s10, %s6792_s10, %s6793_s12  }
  0x17   : > { %6763 = dma.done.wait (%p6047_p9), [#allocation5], 16  }
  0x18   : > { %6765 = vsyncadd (%p6047_p9), [#allocation5], 4294967280 }
  0x19   : > { %6767 = dma.done.wait (%p6047_p9), [#allocation3], 25600  }
  0x1a   : > { %6769 = vsyncadd (%p6047_p9), [#allocation3], 4294941696 }
  0x1b   : > { %301 = sfence }
  0x1c   : > { %v346_v0 = vlaneseq  ;;  %p330_p13 = scmp.lt.s32.totalorder %s6865_s9, 1  ;;  %s335_s13 = sld [smem:[#allocation2]]  ;;  %vm1321_vm0 = vcmask 7168   ;;  %vm1346_vm1 = vcmask 15360   ;;  %vm1371_vm2 = vcmask 23552  }
  0x1d   : > { %s5956_s17 = sld [smem:[#allocation2 + $0x1]]  ;;  %vm1396_vm3 = vcmask 31744   ;;  %vm1421_vm4 = vcmask 39936   ;;  %vm11740_vm5 = vcmask 48128   ;;  %vm1471_vm6 = vcmask 56320   ;;  %s6794_s23 = smov 16  }
  0x1e   : > { %v6918_v1 = vshrl.u32 %v346_v0, 7  ;;  %s331_s18 = scalar_select %p330_p13, %s6865_s9, 1  ;;  %vm1496_vm7 = vcmask 64512   ;;  %vm2151_vm8 = vcmask 1040384   ;;  %vm1521_vm9 = vcmask 72704  }
  0x1f   : > { %vm1546_vm10 = vcmask 80896   ;;  %vm1571_vm11 = vcmask 89088   ;;  %vm11752_vm12 = vcmask 97280   ;;  %vm1621_vm13 = vcmask 105472   ;;  %s6795_s21 = smov 32   ;;  %s6009_s20 = sshll.u32 %s6865_s9, 4 }
  0x20   : > { %11808 = vst [vmem:[#allocation11_spill] sm:$0xff] %v6918_v1  ;;  %6095 = vset.pattern.permute.xlu2 %v6918_v1  ;;  %6094 = vset.pattern.permute.xlu1 %v6918_v1  ;;  %s6008_s19 = sshll.u32 %s331_s18, 4  ;;  %v6937_v11 = vadd.s32 8, %v6918_v1  ;;  %v6974_v20 = vadd.s32 1, %v6918_v1  ;;  %v6991_v23 = vadd.s32 9, %v6918_v1  ;;  %v7006_v25 = vadd.s32 10, %v6918_v1  ;;  %s5855_s26 = scalar_lea.hbm %s11671_s8, %s6009_s20 }
  0x21   : > { %6093 = vset.pattern.permute.xlu0 %v6918_v1  ;;  %s334_s22 = scalar_lea.vmem %s11664_s1, %s6008_s19  ;;  %v7018_v26 = vadd.s32 3, %v6918_v1  ;;  %v7030_v27 = vadd.s32 2, %v6918_v1  ;;  %v7068_v33 = vadd.s32 4, %v6918_v1  ;;  %v7088_v38 = vadd.s32 12, %v6918_v1  ;;  %s327_s18 = sand.u32 1, %s6780_s28  }
  0x22   : > { %v337_v2 = vld [vmem:[%s334_s22] sm:$0xff]  ;;  %v339_v3 = vstv %s335_s13  ;;  %v338_v10 = vld [vmem:[%s334_s22 + $0x8] sm:$0xff]  ;;  %11809 = vst [vmem:[#allocation12_spill] sm:$0xff] %v6937_v11  ;;  %v7117_v46 = vadd.s32 11, %v6918_v1  ;;  %vm11729_vm14 = vcmask 113664   ;;  %vm1984_vm15 = vcmask 130048  }
  0x23   : > { %v340_v4 = vsub.f32 %v337_v2, %v339_v3  ;;  %v342_v5 = vstv %s5956_s17  ;;  %v341_v13 = vsub.f32 %v338_v10, %v339_v3  ;;  %11811 = vst [vmem:[#allocation14_spill] sm:$0xff] %v6974_v20  ;;  %s6796_s22 = smov 64   ;;  %s5953_s19 = sshll.u32 %s327_s18, 4 }
  0x24   : > { %11812 = vst [vmem:[#allocation15_spill] sm:$0xff] %v6991_v23  ;;  %s329_s24 = scalar_lea.vmem [#allocation7], %s5953_s19  ;;  %s5844_s9 = scalar_lea.sflag [#allocation4], %s327_s18 }
  0x25   : > { %v343_v6 = vmul.f32 %v342_v5, %v340_v4  ;;  %v6944_v14 = vmul.f32 %v342_v5, %v341_v13  ;;  %11813 = vst [vmem:[#allocation16_spill] sm:$0xff] %v7018_v26  ;;  %s5856_s10 = sshll.u32 %s329_s24, 4  ;;  %s6738_s20 = scalar_lea.hbm %s11671_s8, 32  ;;  %s5857_s10 = int_to_ptr.vmem [resolvable:$true] %s5856_s10 }
  0x26   : > { %11814 = vst [vmem:[#allocation17_spill] sm:$0xff] %v7030_v27 }
  0x27   : > { %v6927_v7 = vperm.slane %v343_v6, 2  ;;  %v6929_v8 = vperm.slane %v343_v6, 1  ;;  %v6931_v9 = vperm.slane %v343_v6, 0  ;;  %v6939_v12 = vperm.slane %v343_v6, 4  ;;  %11810 = vst [vmem:[#allocation13_spill] sm:$0xff] %v6944_v14 }
  0x28   : > { %v6947_v15 = vperm.slane %v6944_v14, 1  ;;  %v6952_v16 = vperm.slane %v343_v6, 3  ;;  %v6960_v17 = vperm.slane %v343_v6, 5  ;;  %v6962_v18 = vperm.slane %v343_v6, 6  ;;  %11816 = vst [vmem:[#allocation19_spill] sm:$0xff] %v7068_v33 }
  0x29   : > { %376 = vperm.xlu2 %6095, %v6927_v7   ;;  %363 = vperm.xlu1 %6094, %v6929_v8   ;;  %v6968_v19 = vperm.slane %v6944_v14, 3  ;;  %v6979_v21 = vperm.slane %v343_v6, 7  ;;  %v6985_v22 = vperm.slane %v6944_v14, 0  ;;  %v6997_v24 = vperm.slane %v6944_v14, 2  ;;  %11821 = vst [vmem:[#allocation24_spill] sm:$0xff] %v7088_v38 }
  0x2a   : > { %350 = vperm.xlu0 %6093, %v6931_v9   ;;  %11828 = vst [vmem:[#allocation31_spill] sm:$0xff] %v7117_v46 }
  0x31   : > { %6098 = vset.pattern.permute.xlu2 %v6937_v11  ;;  %6096 = vset.pattern.permute.xlu1 %v6937_v11 }
  0x32   : > { %402 = vperm.xlu0 %6093, %v6939_v12  }
  0x39   : > { %382 = vperm.xlu2 %6098, %v6927_v7   ;;  %369 = vperm.xlu1 %6096, %v6929_v8  }
  0x3a   : > { %467 = vperm.xlu0 %6093, %v6947_v15  }
  0x41   : > { %395 = vperm.xlu2 %6098, %v6952_v16   ;;  %6097 = vset.pattern.permute.xlu1 %v6918_v1 }
  0x42   : > { %6103 = vset.pattern.permute.xlu0 %v6937_v11 }
  0x49   : > { %6100 = vset.pattern.permute.xlu2 %v6918_v1  ;;  %389 = vperm.xlu1 %6097, %v6952_v16  }
  0x4a   : > { %356 = vperm.xlu0 %6103, %v6931_v9  }
  0x51   : > { %415 = vperm.xlu2 %6100, %v6960_v17   ;;  %6099 = vset.pattern.permute.xlu1 %v6937_v11 }
  0x52   : > { %434 = vperm.xlu0 %6103, %v6962_v18  }
  0x59   : > { %428 = vperm.xlu2 %6100, %v6962_v18   ;;  %408 = vperm.xlu1 %6099, %v6939_v12  }
  0x5a   : > { %499 = vperm.xlu0 %6103, %v6968_v19  }
  0x61   : > { %6102 = vset.pattern.permute.xlu2 %v6937_v11  ;;  %421 = vperm.xlu1 %6099, %v6960_v17  }
  0x62   : > { %6108 = vset.pattern.permute.xlu0 %v6974_v20 }
  0x69   : > { %447 = vperm.xlu2 %6102, %v6979_v21   ;;  %6101 = vset.pattern.permute.xlu1 %v6918_v1 }
  0x6a   : > { %529 = vperm.xlu0 %6108, %v6927_v7  }
  0x71   : > { %460 = vperm.xlu2 %6102, %v6985_v22   ;;  %441 = vperm.xlu1 %6101, %v6979_v21  }
  0x72   : > { %589 = vperm.xlu0 %6108, %v6979_v21  }
  0x79   : > { %6105 = vset.pattern.permute.xlu2 %v6918_v1  ;;  %454 = vperm.xlu1 %6101, %v6985_v22  }
  0x7a   : > { %6113 = vset.pattern.permute.xlu0 %v6991_v23 }
  0x81   : > { %480 = vperm.xlu2 %6105, %v6997_v24   ;;  %6104 = vset.pattern.permute.xlu1 %v6937_v11 }
  0x82   : > { %559 = vperm.xlu0 %6113, %v6939_v12  }
  0x83   : > { %v7057_v29 = vpop.permute.xlu2 %376 }
  0x89   : > { %493 = vperm.xlu2 %6105, %v6968_v19   ;;  %473 = vperm.xlu1 %6104, %v6947_v15  }
  0x8a   : > { %619 = vperm.xlu0 %6113, %v6947_v15  }
  0x91   : > { %6107 = vset.pattern.permute.xlu2 %v6991_v23  ;;  %486 = vperm.xlu1 %6104, %v6997_v24  }
  0x92   : > { %6120 = vset.pattern.permute.xlu0 %v7006_v25 }
  0x93   : > { %v7063_v31 = vpop.permute.xlu2 %382 }
  0x94   : > { %11815 = vst [vmem:[#allocation18_spill] sm:$0xff] %v7063_v31 }
  0x99   : > { %6106 = vset.pattern.permute.xlu1 %v6974_v20  ;;  %511 = vperm.xlu2 %6107, %v6931_v9  }
  0x9a   : > { %679 = vperm.xlu0 %6120, %v6927_v7  }
  0x9b   : > { %v7053_v28 = vpop.permute.xlu1 %363  ;;  %v7075_v35 = vpop.permute.xlu2 %395 }
  0x9c   : > { %11818 = vst [vmem:[#allocation21_spill] sm:$0xff] %v7075_v35  ;;  %v7121_v47 = vpop.permute.xlu0 %350 }
  0xa1   : > { %523 = vperm.xlu2 %6107, %v6929_v8   ;;  %505 = vperm.xlu1 %6106, %v6931_v9  }
  0xa2   : > { %703 = vperm.xlu0 %6120, %v6939_v12  }
  0xa4   : > { %v7130_v50 = vpop.permute.xlu0 %402 }
  0xa9   : > { %6110 = vset.pattern.permute.xlu2 %v6974_v20  ;;  %517 = vperm.xlu1 %6106, %v6929_v8  }
  0xaa   : > { %6128 = vset.pattern.permute.xlu0 %v7018_v26 }
  0xab   : > { %v7059_v30 = vpop.permute.xlu1 %369  ;;  %v7085_v37 = vpop.permute.xlu2 %415 }
  0xac   : > { %11820 = vst [vmem:[#allocation23_spill] sm:$0xff] %v7085_v37  ;;  %v7138_v53 = vpop.permute.xlu0 %467 }
  0xad   : > { %11831 = vst [vmem:[#allocation34_spill] sm:$0xff] %v7138_v53 }
  0xb1   : > { %541 = vperm.xlu2 %6110, %v6952_v16   ;;  %6109 = vset.pattern.permute.xlu1 %v6991_v23 }
  0xb2   : > { %841 = vperm.xlu0 %6128, %v6939_v12  }
  0xb3   : > { %v7095_v40 = vpop.permute.xlu2 %428 }
  0xb9   : > { %553 = vperm.xlu2 %6110, %v6939_v12   ;;  %535 = vperm.xlu1 %6109, %v6927_v7  }
  0xba   : > { %865 = vperm.xlu0 %6128, %v6962_v18  }
  0xbb   : > { %v7065_v32 = vpop.permute.xlu1 %389 }
  0xbc   : > { %v7146_v56 = vpop.permute.xlu0 %356 }
  0xc1   : > { %6112 = vset.pattern.permute.xlu2 %v6991_v23  ;;  %547 = vperm.xlu1 %6109, %v6952_v16  }
  0xc2   : > { %6137 = vset.pattern.permute.xlu0 %v7030_v27 }
  0xc3   : > { %v7102_v42 = vpop.permute.xlu2 %447 }
  0xc4   : > { %11824 = vst [vmem:[#allocation27_spill] sm:$0xff] %v7102_v42  ;;  %v7160_v61 = vpop.permute.xlu0 %434 }
  0xc9   : > { %571 = vperm.xlu2 %6112, %v6960_v17   ;;  %6111 = vset.pattern.permute.xlu1 %v6974_v20 }
  0xca   : > { %649 = vperm.xlu0 %6137, %v6931_v9  }
  0xcb   : > { %v7073_v34 = vpop.permute.xlu1 %408  ;;  %v7109_v44 = vpop.permute.xlu2 %460 }
  0xcc   : > { %11817 = vst [vmem:[#allocation20_spill] sm:$0xff] %v7073_v34  ;;  %v7168_v0 = vpop.permute.xlu0 %499 }
  0xcd   : > { %11826 = vst [vmem:[#allocation29_spill] sm:$0xff] %v7109_v44 }
  0xce   : > { %11836 = vst [vmem:[#allocation39_spill] sm:$0xff] %v7168_v0 }
  0xd1   : > { %583 = vperm.xlu2 %6112, %v6962_v18   ;;  %565 = vperm.xlu1 %6111, %v6960_v17  }
  0xd2   : > { %733 = vperm.xlu0 %6137, %v6979_v21  }
  0xd3   : > { %v7080_v36 = vpop.permute.xlu1 %421 }
  0xd4   : > { %11819 = vst [vmem:[#allocation22_spill] sm:$0xff] %v7080_v36 }
  0xd9   : > { %6115 = vset.pattern.permute.xlu2 %v6974_v20  ;;  %577 = vperm.xlu1 %6111, %v6962_v18  }
  0xda   : > { %6141 = vset.pattern.permute.xlu0 %v7068_v33 }
  0xdb   : > { %v7124_v48 = vpop.permute.xlu2 %480 }
  0xdc   : > { %11829 = vst [vmem:[#allocation32_spill] sm:$0xff] %v7124_v48  ;;  %v7176_v4 = vpop.permute.xlu0 %529 }
  0xe1   : > { %601 = vperm.xlu2 %6115, %v6985_v22   ;;  %6114 = vset.pattern.permute.xlu1 %v6991_v23 }
  0xe2   : > { %997 = vperm.xlu0 %6141, %v6960_v17  }
  0xe3   : > { %v7090_v39 = vpop.permute.xlu1 %441  ;;  %v7132_v51 = vpop.permute.xlu2 %493 }
  0xe4   : > { %11822 = vst [vmem:[#allocation25_spill] sm:$0xff] %v7090_v39  ;;  %v7184_v10 = vpop.permute.xlu0 %589 }
  0xe5   : > { %11830 = vst [vmem:[#allocation33_spill] sm:$0xff] %v7132_v51 }
  0xe6   : > { %11838 = vst [vmem:[#allocation41_spill] sm:$0xff] %v7184_v10 }
  0xe9   : > { %613 = vperm.xlu2 %6115, %v6947_v15   ;;  %595 = vperm.xlu1 %6114, %v6979_v21  }
  0xea   : > { %961 = vperm.xlu0 %6141, %v6927_v7  }
  0xeb   : > { %v7100_v41 = vpop.permute.xlu1 %454 }
  0xec   : > { %11823 = vst [vmem:[#allocation26_spill] sm:$0xff] %v7100_v41 }
  0xf1   : > { %6117 = vset.pattern.permute.xlu2 %v6991_v23  ;;  %607 = vperm.xlu1 %6114, %v6985_v22  }
  0xf2   : > { %6149 = vset.pattern.permute.xlu0 %v7088_v38 }
  0xf3   : > { %v7140_v54 = vpop.permute.xlu2 %511 }
  0xf9   : > { %631 = vperm.xlu2 %6117, %v6997_v24   ;;  %6116 = vset.pattern.permute.xlu1 %v6974_v20 }
  0xfa   : > { %1015 = vperm.xlu0 %6149, %v6962_v18  }
  0xfb   : > { %v7107_v43 = vpop.permute.xlu1 %473  ;;  %v7148_v57 = vpop.permute.xlu2 %523 }
  0xfc   : > { %11825 = vst [vmem:[#allocation28_spill] sm:$0xff] %v7107_v43 }
  0xfd   : > { %11833 = vst [vmem:[#allocation36_spill] sm:$0xff] %v7148_v57 }
 0x101   : > { %643 = vperm.xlu2 %6117, %v6968_v19   ;;  %625 = vperm.xlu1 %6116, %v6997_v24  }
 0x102   : > { %1027 = vperm.xlu0 %6149, %v6979_v21  }
 0x103   : > { %v7114_v45 = vpop.permute.xlu1 %486 }
 0x104   : > { %11827 = vst [vmem:[#allocation30_spill] sm:$0xff] %v7114_v45 }
 0x109   : > { %6119 = vset.pattern.permute.xlu2 %v7030_v27  ;;  %637 = vperm.xlu1 %6116, %v6968_v19  }
 0x10a   : > { %967 = vperm.xlu0 %6149, %v6927_v7  }
 0x10b   : > { %v7154_v59 = vpop.permute.xlu2 %541 }
 0x111   : > { %661 = vperm.xlu2 %6119, %v6929_v8   ;;  %6118 = vset.pattern.permute.xlu1 %v7006_v25 }
 0x112   : > { %6160 = vset.pattern.permute.xlu0 %v7117_v46 }
 0x113   : > { %v7126_v49 = vpop.permute.xlu1 %505  ;;  %v7162_v62 = vpop.permute.xlu2 %553 }
 0x114   : > { %11835 = vst [vmem:[#allocation38_spill] sm:$0xff] %v7162_v62 }
 0x119   : > { %673 = vperm.xlu2 %6119, %v6927_v7   ;;  %655 = vperm.xlu1 %6118, %v6931_v9  }
 0x11b   : > { %v7134_v52 = vpop.permute.xlu1 %517 }
 0x121   : > { %6122 = vset.pattern.permute.xlu2 %v7018_v26  ;;  %667 = vperm.xlu1 %6118, %v6929_v8  }
 0x123   : > { %v7172_v2 = vpop.permute.xlu2 %571 }
 0x129   : > { %829 = vperm.xlu2 %6122, %v6952_v16   ;;  %6121 = vset.pattern.permute.xlu1 %v7030_v27 }
 0x12b   : > { %v7142_v55 = vpop.permute.xlu1 %535  ;;  %v7180_v5 = vpop.permute.xlu2 %583 }
 0x12c   : > { %11832 = vst [vmem:[#allocation35_spill] sm:$0xff] %v7142_v55 }
 0x131   : > { %6124 = vset.pattern.permute.xlu2 %v7030_v27  ;;  %685 = vperm.xlu1 %6121, %v6952_v16  }
 0x133   : > { %v7150_v58 = vpop.permute.xlu1 %547 }
 0x134   : > { %11834 = vst [vmem:[#allocation37_spill] sm:$0xff] %v7150_v58 }
 0x139   : > { %697 = vperm.xlu2 %6124, %v6939_v12   ;;  %6123 = vset.pattern.permute.xlu1 %v7068_v33 }
 0x141   : > { %6125 = vset.pattern.permute.xlu2 %v7006_v25  ;;  %973 = vperm.xlu1 %6123, %v6952_v16  }
 0x143   : > { %v7156_v60 = vpop.permute.xlu1 %565 }
 0x149   : > { %691 = vperm.xlu2 %6125, %v6952_v16   ;;  %985 = vperm.xlu1 %6123, %v6939_v12  }
 0x14b   : > { %v7166_v63 = vpop.permute.xlu1 %577 }
 0x151   : > { %6127 = vset.pattern.permute.xlu2 %v7088_v38  ;;  %6126 = vset.pattern.permute.xlu1 %v7117_v46 }
 0x159   : > { %979 = vperm.xlu2 %6127, %v6952_v16   ;;  %835 = vperm.xlu1 %6126, %v6952_v16   ;;  %v7192_v16 = vpop.permute.xlu0 %559 }
 0x15b   : > { %v7174_v3 = vpop.permute.xlu1 %595 }
 0x161   : > { %6130 = vset.pattern.permute.xlu2 %v7117_v46  ;;  %6129 = vset.pattern.permute.xlu1 %v7030_v27  ;;  %v7202_v0 = vpop.permute.xlu0 %619 }
 0x162   : > { %11843 = vst [vmem:[#allocation46_spill] sm:$0xff] %v7202_v0 }
 0x163   : > { %v7182_v6 = vpop.permute.xlu1 %607 }
 0x164   : > { %11837 = vst [vmem:[#allocation40_spill] sm:$0xff] %v7182_v6 }
 0x169   : > { %847 = vperm.xlu2 %6130, %v6939_v12   ;;  %709 = vperm.xlu1 %6129, %v6960_v17   ;;  %v7210_v45 = vpop.permute.xlu0 %679 }
 0x16a   : > { %11845 = vst [vmem:[#allocation48_spill] sm:$0xff] %v7210_v45 }
 0x171   : > { %6132 = vset.pattern.permute.xlu2 %v7088_v38  ;;  %6131 = vset.pattern.permute.xlu1 %v7018_v26 }
 0x173   : > { %v7190_v13 = vpop.permute.xlu1 %625 }
 0x174   : > { %11840 = vst [vmem:[#allocation43_spill] sm:$0xff] %v7190_v13 }
 0x179   : > { %991 = vperm.xlu2 %6132, %v6939_v12   ;;  %853 = vperm.xlu1 %6131, %v6960_v17   ;;  %v7188_v12 = vpop.permute.xlu2 %601 }
 0x17a   : > { %11839 = vst [vmem:[#allocation42_spill] sm:$0xff] %v7188_v12 }
 0x17b   : > { %v7198_v11 = vpop.permute.xlu1 %637 }
 0x17c   : > { %11842 = vst [vmem:[#allocation45_spill] sm:$0xff] %v7198_v11  ;;  %v7218_v11 = vpop.permute.xlu0 %703 }
 0x181   : > { %6134 = vset.pattern.permute.xlu2 %v7117_v46  ;;  %6133 = vset.pattern.permute.xlu1 %v7006_v25  ;;  %v7196_v23 = vpop.permute.xlu2 %613 }
 0x182   : > { %11841 = vst [vmem:[#allocation44_spill] sm:$0xff] %v7196_v23 }
 0x184   : > { %v7226_v48 = vpop.permute.xlu0 %841 }
 0x185   : > { %11848 = vst [vmem:[#allocation51_spill] sm:$0xff] %v7226_v48 }
 0x189   : > { %859 = vperm.xlu2 %6134, %v6960_v17   ;;  %715 = vperm.xlu1 %6133, %v6960_v17  }
 0x18b   : > { %v7206_v1 = vpop.permute.xlu1 %655 }
 0x18c   : > { %v7234_v43 = vpop.permute.xlu0 %865 }
 0x191   : > { %6136 = vset.pattern.permute.xlu2 %v7030_v27  ;;  %6135 = vset.pattern.permute.xlu1 %v7088_v38 }
 0x193   : > { %v7214_v51 = vpop.permute.xlu1 %667 }
 0x194   : > { %11847 = vst [vmem:[#allocation50_spill] sm:$0xff] %v7214_v51  ;;  %v7242_v20 = vpop.permute.xlu0 %649 }
 0x199   : > { %721 = vperm.xlu2 %6136, %v6962_v18   ;;  %1003 = vperm.xlu1 %6135, %v6960_v17   ;;  %v7204_v17 = vpop.permute.xlu2 %631 }
 0x19a   : > { %11844 = vst [vmem:[#allocation47_spill] sm:$0xff] %v7204_v17 }
 0x19c   : > { %v7255_v12 = vpop.permute.xlu0 %733 }
 0x19d   : > { %11852 = vst [vmem:[#allocation55_spill] sm:$0xff] %v7255_v12 }
 0x1a1   : > { %6139 = vset.pattern.permute.xlu2 %v7018_v26  ;;  %6138 = vset.pattern.permute.xlu1 %v7068_v33  ;;  %v7212_v14 = vpop.permute.xlu2 %643 }
 0x1a2   : > { %11846 = vst [vmem:[#allocation49_spill] sm:$0xff] %v7212_v14 }
 0x1a3   : > { %v7222_v17 = vpop.permute.xlu1 %685 }
 0x1a4   : > { %v7267_v31 = vpop.permute.xlu0 %997 }
 0x1a9   : > { %793 = vperm.xlu2 %6139, %v6931_v9   ;;  %1009 = vperm.xlu1 %6138, %v6962_v18   ;;  %v7220_v13 = vpop.permute.xlu2 %661 }
 0x1b1   : > { %6140 = vset.pattern.permute.xlu2 %v7006_v25  ;;  %937 = vperm.xlu1 %6138, %v6931_v9   ;;  %v7232_v14 = vpop.permute.xlu2 %673 }
 0x1b3   : > { %v7228_v0 = vpop.permute.xlu1 %973 }
 0x1b9   : > { %727 = vperm.xlu2 %6140, %v6962_v18   ;;  %6142 = vset.pattern.permute.xlu1 %v7018_v26  ;;  %v7238_v23 = vpop.permute.xlu2 %829 }
 0x1bb   : > { %v7240_v53 = vpop.permute.xlu1 %985 }
 0x1bc   : > { %11849 = vst [vmem:[#allocation52_spill] sm:$0xff] %v7240_v53 }
 0x1c1   : > { %6143 = vset.pattern.permute.xlu2 %v7117_v46  ;;  %805 = vperm.xlu1 %6142, %v6929_v8   ;;  %v7248_v6 = vpop.permute.xlu2 %697 }
 0x1c2   : > { %11851 = vst [vmem:[#allocation54_spill] sm:$0xff] %v7248_v6  ;;  %v1698_v44 = vsel %vm1321_vm0, %v7162_v62, %v7248_v6 }
 0x1c3   : > { %v1722_v41 = vsel %vm1346_vm1, %v1698_v44, %v7226_v48 }
 0x1c4   : > { %v1746_v45 = vsel %vm1371_vm2, %v1722_v41, %v7240_v53 }
 0x1c5   : > { %v1770_v55 = vsel %vm1396_vm3, %v1746_v45, %v7085_v37 }
 0x1c6   : > { %v1794_v44 = vsel %vm1421_vm4, %v1770_v55, %v7156_v60  ;;  %v1696_v55 = vsel %vm1321_vm0, %v7154_v59, %v7222_v17 }
 0x1c9   : > { %871 = vperm.xlu2 %6143, %v6962_v18   ;;  %877 = vperm.xlu1 %6142, %v6979_v21  }
 0x1cb   : > { %v7246_v18 = vpop.permute.xlu1 %835 }
 0x1cc   : > { %11850 = vst [vmem:[#allocation53_spill] sm:$0xff] %v7246_v18 }
 0x1d1   : > { %6144 = vset.pattern.permute.xlu2 %v7068_v33  ;;  %6145 = vset.pattern.permute.xlu1 %v7068_v33 }
 0x1d9   : > { %949 = vperm.xlu2 %6144, %v6929_v8   ;;  %1021 = vperm.xlu1 %6145, %v6979_v21  }
 0x1db   : > { %v7259_v35 = vpop.permute.xlu1 %709 }
 0x1dc   : > { %v1818_v41 = vsel %vm11740_vm5, %v1794_v44, %v7259_v35  ;;  %v1720_v44 = vsel %vm1346_vm1, %v1696_v55, %v7238_v23 }
 0x1e1   : > { %6146 = vset.pattern.permute.xlu2 %v7117_v46  ;;  %6147 = vset.pattern.permute.xlu1 %v7018_v26 }
 0x1e9   : > { %799 = vperm.xlu2 %6146, %v6931_v9   ;;  %817 = vperm.xlu1 %6147, %v6927_v7  }
 0x1eb   : > { %v7271_v12 = vpop.permute.xlu1 %853 }
 0x1ec   : > { %v1842_v45 = vsel %vm1471_vm6, %v1818_v41, %v7271_v12  ;;  %v1744_v41 = vsel %vm1371_vm2, %v1720_v44, %v7228_v0 }
 0x1ed   : > { %v1866_v37 = vsel %vm1496_vm7, %v1842_v45, %v7267_v31  ;;  %v1768_v45 = vsel %vm1396_vm3, %v1744_v41, %v7130_v50 }
 0x1ee   : > { %1916 = vrot.lane.b32.xlu0 %v1866_v37, %s6794_s23  ;;  %v7292_v37 = vpop.permute.xlu2 %691  ;;  %v1792_v51 = vsel %vm1421_vm4, %v1768_v45, %v7162_v62 }
 0x1ef   : > { %11853 = vst [vmem:[#allocation56_spill] sm:$0xff] %v7292_v37  ;;  %v1816_v55 = vsel %vm11740_vm5, %v1792_v51, %v7248_v6  ;;  %v1697_v45 = vsel %vm1321_vm0, %v7150_v58, %v7292_v37 }
 0x1f0   : > { %v1840_v10 = vsel %vm1471_vm6, %v1816_v55, %v7226_v48  ;;  %v1721_v55 = vsel %vm1346_vm1, %v1697_v45, %v7246_v18 }
 0x1f1   : > { %6148 = vset.pattern.permute.xlu2 %v7088_v38  ;;  %6150 = vset.pattern.permute.xlu1 %v7006_v25 }
 0x1f6   : > { %895 = vperm.xlu0 %6160, %v6985_v22   ;;  %v7301_v44 = vpop.permute.xlu2 %979 }
 0x1f7   : > { %11854 = vst [vmem:[#allocation57_spill] sm:$0xff] %v7301_v44 }
 0x1f9   : > { %943 = vperm.xlu2 %6148, %v6931_v9   ;;  %739 = vperm.xlu1 %6150, %v6979_v21   ;;  %v1864_v9 = vsel %vm1496_vm7, %v1840_v10, %v7240_v53 }
 0x1fe   : > { %6164 = vset.pattern.permute.xlu0 %v7006_v25  ;;  %v7312_v51 = vpop.permute.xlu2 %847 }
 0x201   : > { %6152 = vset.pattern.permute.xlu2 %v7117_v46  ;;  %6151 = vset.pattern.permute.xlu1 %v7117_v46 }
 0x202   : > { %1912 = vrot.lane.b32.xlu2 %v1864_v9, %s6794_s23  ;;  %v1745_v9 = vsel %vm1371_vm2, %v1721_v55, %v7301_v44  ;;  %v7366_v44 = vpop.permute.xlu0 %961 }
 0x203   : > { %v1769_v48 = vsel %vm1396_vm3, %v1745_v9, %v7073_v34 }
 0x204   : > { %v1793_v45 = vsel %vm1421_vm4, %v1769_v48, %v7192_v16 }
 0x205   : > { %v1817_v62 = vsel %vm11740_vm5, %v1793_v45, %v7218_v11 }
 0x206   : > { %763 = vperm.xlu0 %6164, %v6947_v15   ;;  %v7317_v41 = vpop.permute.xlu2 %991  ;;  %v1841_v9 = vsel %vm1471_vm6, %v1817_v62, %v7312_v51  ;;  %v1322_v62 = vsel %vm1321_vm0, %v7121_v47, %v7126_v49  ;;  %v2048_v47 = vld [vmem:[%s11665_s2 + $0x18] sm:$0x1] }
 0x207   : > { %5957 = vmatpush.msk.msra.mxu0 %vm2151_vm8, %v2048_v47  ;;  %v1324_v47 = vsel %vm1321_vm0, %v7053_v28, %v7134_v52  ;;  %vm1671_vm8 = vcmask 121856  }
 0x209   : > { %883 = vperm.xlu1 %6151, %v6979_v21   ;;  %v7326_v21 = vpop.permute.xlu1 %715 }
 0x20a   : > { %811 = vperm.xlu2 %6152, %v6929_v8   ;;  %v7385_v49 = vpop.permute.xlu0 %1015 }
 0x20b   : > { %11857 = vst [vmem:[#allocation60_spill] sm:$0xff] %v7385_v49 }
 0x20e   : > { %6168 = vset.pattern.permute.xlu0 %v7018_v26  ;;  %v7322_v10 = vpop.permute.xlu2 %859 }
 0x211   : > { %6153 = vset.pattern.permute.xlu1 %v7088_v38  ;;  %v7340_v53 = vpop.permute.xlu1 %1003 }
 0x212   : > { %6154 = vset.pattern.permute.xlu2 %v7030_v27 }
 0x216   : > { %913 = vperm.xlu0 %6168, %v6997_v24  }
 0x219   : > { %955 = vperm.xlu1 %6153, %v6929_v8   ;;  %v7335_v8 = vpop.permute.xlu2 %721 }
 0x21a   : > { %745 = vperm.xlu2 %6154, %v6985_v22  }
 0x21b   : > { %v7351_v55 = vpop.permute.xlu1 %1009 }
 0x21e   : > { %6171 = vset.pattern.permute.xlu0 %v7030_v27 }
 0x221   : > { %6155 = vset.pattern.permute.xlu1 %v7117_v46  ;;  %v794_v6 = vpop.permute.xlu2 %793 }
 0x222   : > { %6156 = vset.pattern.permute.xlu2 %v7018_v26 }
 0x223   : > { %v938_v34 = vpop.permute.xlu1 %937 }
 0x226   : > { %781 = vperm.xlu0 %6171, %v6968_v19  }
 0x229   : > { %823 = vperm.xlu1 %6155, %v6927_v7   ;;  %v1865_v7 = vsel %vm1496_vm7, %v1841_v9, %v7317_v41  ;;  %v7360_v48 = vpop.permute.xlu2 %727  ;;  %v1699_v9 = vsel %vm1321_vm0, %v7192_v16, %v7218_v11 }
 0x22a   : > { %889 = vperm.xlu2 %6156, %v6985_v22   ;;  %11855 = vst [vmem:[#allocation58_spill] sm:$0xff] %v7360_v48  ;;  %v1723_v57 = vsel %vm1346_vm1, %v1699_v9, %v7312_v51 }
 0x22e   : > { %6177 = vset.pattern.permute.xlu0 %v7117_v46 }
 0x231   : > { %6157 = vset.pattern.permute.xlu1 %v7068_v33  ;;  %v7364_v45 = vpop.permute.xlu2 %871 }
 0x232   : > { %6159 = vset.pattern.permute.xlu2 %v7030_v27  ;;  %11856 = vst [vmem:[#allocation59_spill] sm:$0xff] %v7364_v45 }
 0x233   : > { %1914 = vrot.lane.b32.xlu2 %v1865_v7, %s6794_s23  ;;  %v806_v18 = vpop.permute.xlu1 %805  ;;  %v1347_v7 = vsel %vm1346_vm1, %v1322_v62, %v7242_v20  ;;  %v2047_v20 = vld [vmem:[%s11665_s2 + $0x10] sm:$0xff] }
 0x234   : > { %v1372_v37 = vsel %vm1371_vm2, %v1347_v7, %v794_v6  ;;  %v1747_v6 = vsel %vm1371_vm2, %v1723_v57, %v7317_v41  ;;  %2168 = vmatpush.msra.mxu0 %v2047_v20  ;;  %v1349_v20 = vsel %vm1346_vm1, %v1324_v47, %v7220_v13 }
 0x235   : > { %v1397_v39 = vsel %vm1396_vm3, %v1372_v37, %v938_v34  ;;  %v2046_v34 = vld [vmem:[%s11665_s2 + $0x8] sm:$0xff]  ;;  %v2045_v37 = vld [vmem:[%s11665_s2] sm:$0xff] }
 0x236   : > { %v1422_v62 = vsel %vm1421_vm4, %v1397_v39, %v7053_v28  ;;  %2169 = vmatpush.msra.mxu0 %v2046_v34  ;;  %v1771_v39 = vsel %vm1396_vm3, %v1747_v6, %v7080_v36  ;;  %v7421_v36 = vpop.permute.xlu0 %1027 }
 0x237   : > { %v1447_v9 = vsel %vm11740_vm5, %v1422_v62, %v7134_v52  ;;  %v1795_v34 = vsel %vm1421_vm4, %v1771_v39, %v7172_v2 }
 0x238   : > { %2170 = vmatpush.msra.mxu0 %v2045_v37  ;;  %v1472_v62 = vsel %vm1471_vm6, %v1447_v9, %v7220_v13  ;;  %v1819_v37 = vsel %vm11740_vm5, %v1795_v34, %v7326_v21 }
 0x239   : > { %1033 = vperm.xlu1 %6157, %v6985_v22   ;;  %v950_v58 = vpop.permute.xlu2 %949  ;;  %v1497_v6 = vsel %vm1496_vm7, %v1472_v62, %v806_v18  ;;  %v1843_v13 = vsel %vm1471_vm6, %v1819_v37, %v7322_v10 }
 0x23a   : > { %v1522_v52 = vsel %vm1521_vm9, %v1497_v6, %v950_v58 }
 0x23b   : > { %757 = vperm.xlu2 %6159, %v6947_v15   ;;  %v7403_v7 = vpop.permute.xlu1 %877 }
 0x23c   : > { %11858 = vst [vmem:[#allocation61_spill] sm:$0xff] %v7403_v7 }
 0x23e   : > { %v7446_v34 = vpop.permute.xlu0 %967 }
 0x241   : > { %6158 = vset.pattern.permute.xlu1 %v7006_v25 }
 0x243   : > { %6162 = vset.pattern.permute.xlu2 %v7088_v38  ;;  %v7408_v57 = vpop.permute.xlu2 %799 }
 0x249   : > { %751 = vperm.xlu1 %6158, %v6985_v22  }
 0x24b   : > { %1039 = vperm.xlu2 %6162, %v6985_v22   ;;  %v1374_v22 = vsel %vm1371_vm2, %v1349_v20, %v806_v18  ;;  %v7430_v9 = vpop.permute.xlu1 %1021  ;;  %v1867_v18 = vsel %vm1496_vm7, %v1843_v13, %v7340_v53 }
 0x24c   : > { %v1399_v28 = vsel %vm1396_vm3, %v1374_v22, %v950_v58  ;;  %11859 = vst [vmem:[#allocation62_spill] sm:$0xff] %v7430_v9  ;;  %v1547_v58 = vsel %vm1546_vm10, %v1522_v52, %v7057_v29 }
 0x24d   : > { %v1424_v47 = vsel %vm1421_vm4, %v1399_v28, %v7057_v29  ;;  %v1572_v62 = vsel %vm1571_vm11, %v1547_v58, %v7176_v4 }
 0x24e   : > { %v1449_v20 = vsel %vm11740_vm5, %v1424_v47, %v7176_v4  ;;  %v1597_v37 = vsel %vm11752_vm12, %v1572_v62, %v7232_v14 }
 0x24f   : > { %v1474_v6 = vsel %vm1471_vm6, %v1449_v20, %v7232_v14 }
 0x251   : > { %6161 = vset.pattern.permute.xlu1 %v7018_v26 }
 0x253   : > { %6165 = vset.pattern.permute.xlu2 %v7117_v46  ;;  %v7436_v39 = vpop.permute.xlu2 %943 }
 0x254   : > { %1918 = vrot.lane.b32.xlu2 %v1867_v18, %s6794_s23 }
 0x259   : > { %901 = vperm.xlu1 %6161, %v6947_v15  }
 0x25b   : > { %v7449_v22 = vpop.permute.xlu1 %817 }
 0x25c   : > { %907 = vperm.xlu2 %6165, %v6947_v15   ;;  %v1499_v28 = vsel %vm1496_vm7, %v1474_v6, %v7449_v22  ;;  %v1622_v52 = vsel %vm1621_vm13, %v1597_v37, %v7449_v22  ;;  %v1913_v58 = vpop.permute.xlu2 %1912 }
 0x25d   : > { %v1524_v13 = vsel %vm1521_vm9, %v1499_v28, %v7366_v44  ;;  %v1647_v18 = vsel %vm11729_vm14, %v1622_v52, %v7366_v44 }
 0x25e   : > { %v1549_v47 = vsel %vm1546_vm10, %v1524_v13, %v7065_v32  ;;  %v1672_v20 = vsel %vm1671_vm8, %v1647_v18, %v7065_v32  ;;  %v1700_v13 = vsel %vm1321_vm0, %v7156_v60, %v7259_v35 }
 0x25f   : > { %v1574_v62 = vsel %vm1571_vm11, %v1549_v47, %v7154_v59  ;;  %v1985_v6 = vsel %vm1984_vm15, %v1672_v20, %v1913_v58  ;;  %v1724_v47 = vsel %vm1346_vm1, %v1700_v13, %v7271_v12 }
 0x260   : > { %v2033_v37 = vrot.slane %v1985_v6, 4  ;;  %2053 = vst [vmem:[#allocation1] ss:$2 sm:$0xff] %v1985_v6  ;;  %v1599_v28 = vsel %vm11752_vm12, %v1574_v62, %v7222_v17  ;;  %v1917_v20 = vpop.permute.xlu0 %1916  ;;  %v1701_v6 = vsel %vm1321_vm0, %v7172_v2, %v7326_v21 }
 0x261   : > { %v1624_v52 = vsel %vm1621_vm13, %v1599_v28, %v7238_v23  ;;  %6163 = vset.pattern.permute.xlu1 %v7068_v33 }
 0x262   : > { %2055 = vst [vmem:[#allocation1 + $0x1] ss:$2 sm:$0xff] %v2033_v37  ;;  %v1649_v18 = vsel %vm11729_vm14, %v1624_v52, %v7228_v0  ;;  %v1748_v37 = vsel %vm1371_vm2, %v1724_v47, %v7267_v31  ;;  %vm11753_vm14 = vcmask 203776   ;;  %v1725_v52 = vsel %vm1346_vm1, %v1701_v6, %v7322_v10 }
 0x263   : > { %v1674_v58 = vsel %vm1671_vm8, %v1649_v18, %v7130_v50  ;;  %v1749_v13 = vsel %vm1371_vm2, %v1725_v52, %v7340_v53 }
 0x264   : > { %v1987_v62 = vsel %vm1984_vm15, %v1674_v58, %v1917_v20  ;;  %6167 = vset.pattern.permute.xlu2 %v7030_v27  ;;  %v1772_v58 = vsel %vm1396_vm3, %v1748_v37, %v7095_v40  ;;  %v1773_v20 = vsel %vm1396_vm3, %v1749_v13, %v7160_v61 }
 0x265   : > { %v2034_v28 = vrot.slane %v1987_v62, 4  ;;  %2059 = vst [vmem:[#allocation1 + $0x11] ss:$2 sm:$0xff] %v1987_v62  ;;  %v1796_v47 = vsel %vm1421_vm4, %v1772_v58, %v7166_v63  ;;  %v1797_v6 = vsel %vm1421_vm4, %v1773_v20, %v7180_v5 }
 0x266   : > { %v1820_v62 = vsel %vm11740_vm5, %v1796_v47, %v7335_v8  ;;  %v1821_v52 = vsel %vm11740_vm5, %v1797_v6, %v7360_v48 }
 0x267   : > { %2061 = vst [vmem:[#allocation1 + $0x20] ss:$2 sm:$0xff] %v2034_v28  ;;  %v1703_v28 = vsel %vm1321_vm0, %v7180_v5, %v7360_v48  ;;  %v1844_v37 = vsel %vm1471_vm6, %v1820_v62, %v7234_v43  ;;  %v1845_v58 = vsel %vm1471_vm6, %v1821_v52, %v7364_v45 }
 0x268   : > { %v1868_v13 = vsel %vm1496_vm7, %v1844_v37, %v7351_v55  ;;  %v1869_v62 = vsel %vm1496_vm7, %v1845_v58, %v7385_v49 }
 0x269   : > { %v2068_v18 = vld.sshfl [vmem:[#allocation1] sm:$0xff pattern:$0x75316420]  ;;  %1045 = vperm.xlu1 %6163, %v6947_v15  }
 0x26a   : > { %5958 = vmatmul.msk.f32.vlgmr.msra.gmra.mxu0 %vm11753_vm14, %v2068_v18  ;;  %v1727_v18 = vsel %vm1346_vm1, %v1703_v28, %v7364_v45  ;;  %v812_v28 = vpop.permute.xlu2 %811 }
 0x26b   : > { %v7524_v47 = vpop.permute.xlu1 %739  ;;  %v1751_v20 = vsel %vm1371_vm2, %v1727_v18, %v7385_v49  ;;  %v11864_v49 = vld [vmem:[#allocation55_spill] sm:$0xff] }
 0x26c   : > { %769 = vperm.xlu2 %6167, %v6997_v24   ;;  %v1775_v6 = vsel %vm1396_vm3, %v1751_v20, %v7102_v42 }
 0x26d   : > { %v1799_v37 = vsel %vm1421_vm4, %v1775_v6, %v7174_v3 }
 0x26e   : > { %v1823_v18 = vsel %vm11740_vm5, %v1799_v37, %v7524_v47 }
 0x271   : > { %6166 = vset.pattern.permute.xlu1 %v7088_v38 }
 0x272   : > { %1920 = vrot.lane.b32.xlu1 %v1868_v13, %s6794_s23 }
 0x274   : > { %6170 = vset.pattern.permute.xlu2 %v7006_v25  ;;  %v7547_v20 = vpop.permute.xlu2 %745 }
 0x275   : > { %1922 = vrot.lane.b32.xlu2 %v1869_v62, %s6794_s23  ;;  %v1323_v62 = vsel %vm1321_vm0, %v7146_v56, %v7140_v54  ;;  %v11860_v56 = vld [vmem:[#allocation25_spill] sm:$0xff] }
 0x276   : > { %v1348_v6 = vsel %vm1346_vm1, %v1323_v62, %v7206_v1  ;;  %v11861_v62 = vld [vmem:[#allocation36_spill] sm:$0xff] }
 0x27a   : > { %1051 = vperm.xlu1 %6166, %v6947_v15   ;;  %v1702_v15 = vsel %vm1321_vm0, %v7166_v63, %v7335_v8 }
 0x27b   : > { %v7537_v52 = vpop.permute.xlu1 %883  ;;  %v1726_v37 = vsel %vm1346_vm1, %v1702_v15, %v7234_v43 }
 0x27c   : > { %v1847_v13 = vsel %vm1471_vm6, %v1823_v18, %v7537_v52  ;;  %v1373_v18 = vsel %vm1371_vm2, %v1348_v6, %v7408_v57  ;;  %v11862_v6 = vld [vmem:[#allocation41_spill] sm:$0xff] }
 0x27d   : > { %775 = vperm.xlu2 %6170, %v6997_v24   ;;  %v1871_v58 = vsel %vm1496_vm7, %v1847_v13, %v7421_v36  ;;  %v1750_v13 = vsel %vm1371_vm2, %v1726_v37, %v7351_v55 }
 0x27e   : > { %1926 = vrot.lane.b32.xlu0 %v1871_v58, %s6794_s23  ;;  %v1398_v58 = vsel %vm1396_vm3, %v1373_v18, %v7436_v39  ;;  %v1774_v15 = vsel %vm1396_vm3, %v1750_v13, %v11860_v56  ;;  %v1325_v39 = vsel %vm1321_vm0, %v7059_v30, %v11861_v62 }
 0x27f   : > { %v1423_v1 = vsel %vm1421_vm4, %v1398_v58, %v7059_v30  ;;  %v1798_v37 = vsel %vm1421_vm4, %v1774_v15, %v11862_v6  ;;  %v11863_v58 = vld [vmem:[#allocation50_spill] sm:$0xff] }
 0x280   : > { %v1448_v57 = vsel %vm11740_vm5, %v1423_v1, %v11861_v62  ;;  %v1350_v42 = vsel %vm1346_vm1, %v1325_v39, %v11863_v58  ;;  %v1822_v1 = vsel %vm11740_vm5, %v1798_v37, %v11864_v49  ;;  %v11865_v37 = vld [vmem:[#allocation18_spill] sm:$0xff]  ;;  %v11866_v39 = vld [vmem:[#allocation35_spill] sm:$0xff] }
 0x281   : > { %v1473_v13 = vsel %vm1471_vm6, %v1448_v57, %v11863_v58  ;;  %v1375_v45 = vsel %vm1371_vm2, %v1350_v42, %v812_v28  ;;  %v11867_v58 = vld [vmem:[#allocation48_spill] sm:$0xff] }
 0x282   : > { %6169 = vset.pattern.permute.xlu1 %v7068_v33  ;;  %v1498_v15 = vsel %vm1496_vm7, %v1473_v13, %v812_v28 }
 0x284   : > { %v7568_v54 = vpop.permute.xlu2 %889 }
 0x285   : > { %6173 = vset.pattern.permute.xlu2 %v7018_v26 }
 0x286   : > { %931 = vperm.xlu0 %6177, %v6968_v19  }
 0x28a   : > { %1057 = vperm.xlu1 %6169, %v6997_v24  }
 0x28b   : > { %v956_v18 = vpop.permute.xlu1 %955 }
 0x28c   : > { %v1400_v48 = vsel %vm1396_vm3, %v1375_v45, %v956_v18  ;;  %v1523_v30 = vsel %vm1521_vm9, %v1498_v15, %v956_v18 }
 0x28d   : > { %925 = vperm.xlu2 %6173, %v6968_v19   ;;  %v1915_v57 = vpop.permute.xlu2 %1914  ;;  %v1425_v42 = vsel %vm1421_vm4, %v1400_v48, %v11865_v37  ;;  %v1548_v28 = vsel %vm1546_vm10, %v1523_v30, %v11865_v37 }
 0x28e   : > { %6189 = vset.pattern.permute.xlu0 %v7018_v26  ;;  %v1846_v26 = vsel %vm1471_vm6, %v1822_v1, %v7403_v7  ;;  %v1450_v45 = vsel %vm11740_vm5, %v1425_v42, %v11866_v39  ;;  %v1573_v18 = vsel %vm1571_vm11, %v1548_v28, %v11866_v39  ;;  %vm11868_vm5 = vcmask 113664   ;;  %v11869_v28 = vld [vmem:[#allocation21_spill] sm:$0xff] }
 0x28f   : > { %v1870_v62 = vsel %vm1496_vm7, %v1846_v26, %v7430_v9  ;;  %v1475_v13 = vsel %vm1471_vm6, %v1450_v45, %v11867_v58  ;;  %v1598_v48 = vsel %vm11752_vm12, %v1573_v18, %v11867_v58 }
 0x292   : > { %6172 = vset.pattern.permute.xlu1 %v7117_v46 }
 0x293   : > { %1924 = vrot.lane.b32.xlu1 %v1870_v62, %s6794_s23 }
 0x295   : > { %6175 = vset.pattern.permute.xlu2 %v7068_v33  ;;  %v7616_v30 = vpop.permute.xlu2 %757 }
 0x29b   : > { %919 = vperm.xlu1 %6172, %v6997_v24   ;;  %v824_v26 = vpop.permute.xlu1 %823 }
 0x29c   : > { %v1500_v1 = vsel %vm1496_vm7, %v1475_v13, %v824_v26  ;;  %v1623_v15 = vsel %vm1621_vm13, %v1598_v48, %v824_v26  ;;  %v1704_v48 = vsel %vm1321_vm0, %v11862_v6, %v11864_v49 }
 0x29d   : > { %1069 = vperm.xlu2 %6175, %v6968_v19   ;;  %v1525_v62 = vsel %vm1521_vm9, %v1500_v1, %v7446_v34  ;;  %v1648_v42 = vsel %vm11868_vm5, %v1623_v15, %v7446_v34  ;;  %v1728_v46 = vsel %vm1346_vm1, %v1704_v48, %v7403_v7  ;;  %v11870_v1 = vld [vmem:[#allocation37_spill] sm:$0xff]  ;;  %v1327_v48 = vsel %vm1321_vm0, %v11865_v37, %v11866_v39  ;;  %v11875_v7 = vld [vmem:[#allocation42_spill] sm:$0xff] }
 0x29e   : > { %v1673_v45 = vsel %vm1671_vm8, %v1648_v42, %v11869_v28  ;;  %v1550_v18 = vsel %vm1546_vm10, %v1525_v62, %v11869_v28  ;;  %v1752_v15 = vsel %vm1371_vm2, %v1728_v46, %v7430_v9  ;;  %v11872_v62 = vld [vmem:[#allocation56_spill] sm:$0xff]  ;;  %v11874_v46 = vld [vmem:[#allocation53_spill] sm:$0xff]  ;;  %vm11876_vm5 = vcmask 48128  }
 0x29f   : > { %v1986_v13 = vsel %vm1984_vm15, %v1673_v45, %v1915_v57  ;;  %v1575_v33 = vsel %vm1571_vm11, %v1550_v18, %v11870_v1  ;;  %v11873_v45 = vld [vmem:[#allocation26_spill] sm:$0xff]  ;;  %v11878_v39 = vld [vmem:[#allocation57_spill] sm:$0xff] }
 0x2a0   : > { %2057 = vst [vmem:[#allocation1 + $0x10] ss:$2 sm:$0xff] %v1986_v13  ;;  %v1600_v57 = vsel %vm11752_vm12, %v1575_v33, %v11872_v62  ;;  %v1776_v13 = vsel %vm1396_vm3, %v1752_v15, %v11873_v45  ;;  %v1352_v33 = vsel %vm1346_vm1, %v1327_v48, %v11867_v58  ;;  %vm11879_vm12 = vcmask 113664  }
 0x2a1   : > { %v1625_v9 = vsel %vm1621_vm13, %v1600_v57, %v11874_v46  ;;  %v1800_v49 = vsel %vm1421_vm4, %v1776_v13, %v11875_v7  ;;  %v1377_v15 = vsel %vm1371_vm2, %v1352_v33, %v824_v26  ;;  %v11880_v26 = vld [vmem:[#allocation20_spill] sm:$0xff] }
 0x2a3   : > { %6174 = vset.pattern.permute.xlu1 %v7088_v38 }
 0x2a5   : > { %v7638_v42 = vpop.permute.xlu2 %1039  ;;  %6180 = vset.pattern.permute.xlu2 %v7030_v27  ;;  %v1824_v27 = vsel %vm11876_vm5, %v1800_v49, %v7547_v20  ;;  %v1402_v49 = vsel %vm1396_vm3, %v1377_v15, %v7446_v34 }
 0x2a6   : > { %11871 = vst [vmem:[#allocation25_spill] sm:$0xff] %v7638_v42  ;;  %v1848_v57 = vsel %vm1471_vm6, %v1824_v27, %v7568_v54  ;;  %v1427_v27 = vsel %vm1421_vm4, %v1402_v49, %v11869_v28 }
 0x2a7   : > { %v2069_v18 = vld.sshfl [vmem:[#allocation1 + $0x10] sm:$0xff pattern:$0x75316420] }
 0x2a8   : > { %5959 = vmatmul.msk.f32.gmra.mxu0 %vm11753_vm14, %v2069_v18  ;;  %v1650_v18 = vsel %vm11879_vm12, %v1625_v9, %v11878_v39  ;;  %v1705_v9 = vsel %vm1321_vm0, %v7174_v3, %v7524_v47  ;;  %vm11881_vm12 = vmmov %vm11876_vm5 }
 0x2a9   : > { %v1729_v33 = vsel %vm1346_vm1, %v1705_v9, %v7537_v52  ;;  %v1452_v34 = vsel %vm11881_vm12, %v1427_v27, %v11870_v1  ;;  %v7697_v27 = vpop.permute.xlu0 %895  ;;  %vm11887_vm12 = vcmask 97280  }
 0x2aa   : > { %v1753_v15 = vsel %vm1371_vm2, %v1729_v33, %v7421_v36  ;;  %11885 = vst [vmem:[#allocation50_spill] sm:$0xff] %v7697_v27 }
 0x2ab   : > { %1063 = vperm.xlu1 %6174, %v6997_v24   ;;  %v7659_v37 = vpop.permute.xlu1 %1033  ;;  %v1675_v24 = vsel %vm1671_vm8, %v1650_v18, %v11880_v26  ;;  %v1477_v18 = vsel %vm1471_vm6, %v1452_v34, %v11872_v62 }
 0x2ac   : > { %11877 = vst [vmem:[#allocation36_spill] sm:$0xff] %v7659_v37  ;;  %v1872_v13 = vsel %vm1496_vm7, %v1848_v57, %v7659_v37 }
 0x2ad   : > { %1928 = vrot.lane.b32.xlu2 %v1872_v13, %s6794_s23  ;;  %v11882_v13 = vld [vmem:[#allocation29_spill] sm:$0xff] }
 0x2ae   : > { %v1919_v58 = vpop.permute.xlu2 %1918  ;;  %v1777_v49 = vsel %vm1396_vm3, %v1753_v15, %v11882_v13 }
 0x2af   : > { %v1988_v48 = vsel %vm1984_vm15, %v1675_v24, %v1919_v58  ;;  %v1502_v58 = vsel %vm1496_vm7, %v1477_v18, %v11874_v46  ;;  %v1326_v18 = vsel %vm1321_vm0, %v7057_v29, %v7176_v4 }
 0x2b0   : > { %2063 = vst [vmem:[#allocation1 + $0x21] ss:$2 sm:$0xff] %v1988_v48  ;;  %v11884_v48 = vld [vmem:[#allocation40_spill] sm:$0xff]  ;;  %v1527_v15 = vsel %vm1521_vm9, %v1502_v58, %v11878_v39  ;;  %v1351_v45 = vsel %vm1346_vm1, %v1326_v18, %v7232_v14 }
 0x2b1   : > { %v1801_v9 = vsel %vm1421_vm4, %v1777_v49, %v11884_v48  ;;  %v1552_v58 = vsel %vm1546_vm10, %v1527_v15, %v11880_v26 }
 0x2b2   : > { %v1577_v29 = vsel %vm1571_vm11, %v1552_v58, %v7192_v16  ;;  %v11889_v58 = vld [vmem:[#allocation22_spill] sm:$0xff] }
 0x2b3   : > { %6176 = vset.pattern.permute.xlu1 %v7006_v25 }
 0x2b7   : > { %v2070_v57 = vld.sshfl [vmem:[#allocation1 + $0x20] sm:$0xff pattern:$0x75316420] }
 0x2b8   : > { %5960 = vmatmul.msk.f32.gmra.mxu0 %vm11753_vm14, %v2070_v57  ;;  %v7708_v57 = vpop.permute.xlu2 %907  ;;  %vm11888_vm14 = vcmask 113664  }
 0x2bb   : > { %787 = vperm.xlu1 %6176, %v6968_v19   ;;  %v7693_v24 = vpop.permute.xlu1 %751 }
 0x2bc   : > { %11883 = vst [vmem:[#allocation41_spill] sm:$0xff] %v7693_v24  ;;  %v1825_v33 = vsel %vm11876_vm5, %v1801_v9, %v7693_v24  ;;  %v1376_v9 = vsel %vm1371_vm2, %v1351_v45, %v7449_v22 }
 0x2bd   : > { %v1849_v34 = vsel %vm1471_vm6, %v1825_v33, %v7697_v27  ;;  %v1401_v33 = vsel %vm1396_vm3, %v1376_v9, %v7366_v44 }
 0x2be   : > { %v1873_v49 = vsel %vm1496_vm7, %v1849_v34, %v7638_v42  ;;  %v1426_v4 = vsel %vm1421_vm4, %v1401_v33, %v7065_v32  ;;  %v1602_v34 = vsel %vm11887_vm12, %v1577_v29, %v7218_v11  ;;  %vm11895_vm12 = vmmov %vm11876_vm5 }
 0x2bf   : > { %1930 = vrot.lane.b32.xlu2 %v1873_v49, %s6794_s23  ;;  %v1451_v22 = vsel %vm11876_vm5, %v1426_v4, %v7154_v59  ;;  %v1627_v45 = vsel %vm1621_vm13, %v1602_v34, %v7312_v51  ;;  %v1706_v49 = vsel %vm1321_vm0, %v11875_v7, %v7547_v20 }
 0x2c0   : > { %v1476_v44 = vsel %vm1471_vm6, %v1451_v22, %v7222_v17  ;;  %v1652_v15 = vsel %vm11888_vm14, %v1627_v45, %v7317_v41  ;;  %v1730_v29 = vsel %vm1346_vm1, %v1706_v49, %v7568_v54  ;;  %vm11894_vm14 = vmmov %vm11876_vm5  ;;  %vm11897_vm5 = vcmask 97280  }
 0x2c1   : > { %v1501_v18 = vsel %vm1496_vm7, %v1476_v44, %v7238_v23  ;;  %v1677_v33 = vsel %vm1671_vm8, %v1652_v15, %v11889_v58  ;;  %v1754_v22 = vsel %vm1371_vm2, %v1730_v29, %v7659_v37  ;;  %v11893_v29 = vld [vmem:[#allocation38_spill] sm:$0xff] }
 0x2c2   : > { %v1526_v44 = vsel %vm1521_vm9, %v1501_v18, %v7228_v0 }
 0x2c3   : > { %6178 = vset.pattern.permute.xlu1 %v7088_v38 }
 0x2c6   : > { %v7726_v14 = vpop.permute.xlu2 %769 }
 0x2c7   : > { %11886 = vst [vmem:[#allocation18_spill] sm:$0xff] %v7726_v14 }
 0x2cb   : > { %1075 = vperm.xlu1 %6178, %v6968_v19   ;;  %v1329_v19 = vsel %vm1321_vm0, %v11869_v28, %v11870_v1  ;;  %v7760_v15 = vpop.permute.xlu1 %901  ;;  %v11890_v28 = vld [vmem:[#allocation14_spill] sm:$0xff] }
 0x2cc   : > { %v1354_v34 = vsel %vm1346_vm1, %v1329_v19, %v11872_v62  ;;  %v11891_v1 = vld [vmem:[#allocation34_spill] sm:$0xff]  ;;  %v11892_v19 = vld [vmem:[#allocation44_spill] sm:$0xff] }
 0x2cd   : > { %v1379_v45 = vsel %vm1371_vm2, %v1354_v34, %v11874_v46  ;;  %v1778_v49 = vsel %vm1396_vm3, %v1754_v22, %v11891_v1  ;;  %v1707_v34 = vsel %vm1321_vm0, %v11884_v48, %v7693_v24  ;;  %v11899_v48 = vld [vmem:[#allocation51_spill] sm:$0xff] }
 0x2ce   : > { %v1404_v62 = vsel %vm1396_vm3, %v1379_v45, %v11878_v39  ;;  %v1802_v46 = vsel %vm1421_vm4, %v1778_v49, %v11892_v19  ;;  %v11896_v49 = vld [vmem:[#allocation54_spill] sm:$0xff]  ;;  %v1731_v24 = vsel %vm1346_vm1, %v1707_v34, %v7697_v27 }
 0x2cf   : > { %v1923_v9 = vpop.permute.xlu2 %1922  ;;  %v1429_v18 = vsel %vm1421_vm4, %v1404_v62, %v11880_v26  ;;  %v1826_v39 = vsel %vm11894_vm14, %v1802_v46, %v7616_v30  ;;  %vm11901_vm14 = vcmask 113664  }
 0x2d0   : > { %v1990_v4 = vsel %vm1984_vm15, %v1677_v33, %v1923_v9  ;;  %v1551_v9 = vsel %vm1546_vm10, %v1526_v44, %v7130_v50  ;;  %v7769_v33 = vpop.permute.xlu0 %763  ;;  %v1454_v22 = vsel %vm11895_vm12, %v1429_v18, %v7192_v16  ;;  %v1850_v44 = vsel %vm1471_vm6, %v1826_v39, %v7760_v15 }
 0x2d1   : > { %2072 = vst [vmem:[#allocation1] ss:$2 sm:$0xff] %v1990_v4  ;;  %v1576_v4 = vsel %vm1571_vm11, %v1551_v9, %v11893_v29  ;;  %v1479_v46 = vsel %vm1471_vm6, %v1454_v22, %v7218_v11  ;;  %v1755_v39 = vsel %vm1371_vm2, %v1731_v24, %v7638_v42  ;;  %v1328_v24 = vsel %vm1321_vm0, %v7065_v32, %v7154_v59  ;;  %v11904_v42 = vld [vmem:[#allocation46_spill] sm:$0xff] }
 0x2d2   : > { %v1601_v62 = vsel %vm11897_vm5, %v1576_v4, %v11896_v49  ;;  %v1504_v4 = vsel %vm1496_vm7, %v1479_v46, %v7312_v51  ;;  %v1330_v32 = vsel %vm1321_vm0, %v7130_v50, %v11893_v29 }
 0x2d3   : > { %6179 = vset.pattern.permute.xlu1 %v11890_v28  ;;  %v1626_v38 = vsel %vm1621_vm13, %v1601_v62, %v11899_v48  ;;  %v1529_v34 = vsel %vm1521_vm9, %v1504_v4, %v7317_v41  ;;  %v11903_v28 = vld [vmem:[#allocation23_spill] sm:$0xff] }
 0x2d4   : > { %v1554_v62 = vsel %vm1546_vm10, %v1529_v34, %v11889_v58 }
 0x2d8   : > { %v7797_v18 = vpop.permute.xlu0 %913 }
 0x2d9   : > { %11898 = vst [vmem:[#allocation35_spill] sm:$0xff] %v7797_v18 }
 0x2db   : > { %v7784_v45 = vpop.permute.xlu1 %1045 }
 0x2dc   : > { %v1874_v9 = vsel %vm1496_vm7, %v1850_v44, %v7784_v45  ;;  %v11900_v44 = vld [vmem:[#allocation52_spill] sm:$0xff] }
 0x2dd   : > { %1932 = vrot.lane.b32.xlu1 %v1874_v9, %s6794_s23  ;;  %v1651_v1 = vsel %vm11901_vm14, %v1626_v38, %v11900_v44  ;;  %v11902_v9 = vld [vmem:[#allocation28_spill] sm:$0xff]  ;;  %v1353_v38 = vsel %vm1346_vm1, %v1328_v24, %v7222_v17 }
 0x2de   : > { %v1779_v22 = vsel %vm1396_vm3, %v1755_v39, %v11902_v9  ;;  %v1676_v37 = vsel %vm1671_vm8, %v1651_v1, %v11903_v28  ;;  %v1579_v1 = vsel %vm1571_vm11, %v1554_v62, %v7172_v2  ;;  %v1378_v59 = vsel %vm1371_vm2, %v1353_v38, %v7238_v23 }
 0x2df   : > { %v1803_v39 = vsel %vm1421_vm4, %v1779_v22, %v11904_v42  ;;  %v1403_v34 = vsel %vm1396_vm3, %v1378_v59, %v7228_v0 }
 0x2e0   : > { %v7823_v9 = vpop.permute.xlu0 %781  ;;  %v1827_v17 = vsel %vm11895_vm12, %v1803_v39, %v7769_v33  ;;  %v1428_v62 = vsel %vm1421_vm4, %v1403_v34, %v7130_v50  ;;  %v1708_v39 = vsel %vm1321_vm0, %v11892_v19, %v7616_v30 }
 0x2e1   : > { %v1851_v24 = vsel %vm1471_vm6, %v1827_v17, %v7708_v57  ;;  %v1732_v50 = vsel %vm1346_vm1, %v1708_v39, %v7760_v15  ;;  %v1453_v59 = vsel %vm11895_vm12, %v1428_v62, %v11893_v29  ;;  %v11910_v39 = vld [vmem:[#allocation43_spill] sm:$0xff] }
 0x2e2   : > { %v1756_v17 = vsel %vm1371_vm2, %v1732_v50, %v7784_v45 }
 0x2e4   : > { %v1921_v27 = vpop.permute.xlu1 %1920 }
 0x2e5   : > { %v1989_v46 = vsel %vm1984_vm15, %v1676_v37, %v1921_v27  ;;  %v1604_v37 = vsel %vm11897_vm5, %v1579_v1, %v7326_v21  ;;  %v1355_v27 = vsel %vm1346_vm1, %v1330_v32, %v11896_v49  ;;  %v7862_v1 = vpop.permute.xlu2 %775  ;;  %vm11907_vm5 = vcmask 203776  }
 0x2e6   : > { %v2035_v4 = vrot.slane %v1989_v46, 4  ;;  %2065 = vst [vmem:[#allocation1 + $0x30] ss:$2 sm:$0xff] %v1989_v46  ;;  %v1629_v23 = vsel %vm1621_vm13, %v1604_v37, %v7322_v10  ;;  %v1380_v46 = vsel %vm1371_vm2, %v1355_v27, %v11899_v48 }
 0x2e7   : > { %v1654_v0 = vsel %vm11901_vm14, %v1629_v23, %v7340_v53  ;;  %11906 = vst [vmem:[#allocation21_spill] sm:$0xff] %v7862_v1  ;;  %v1478_v23 = vsel %vm1471_vm6, %v1453_v59, %v11896_v49  ;;  %vm11909_vm14 = vmmov %vm11895_vm12 }
 0x2e8   : > { %2067 = vst [vmem:[#allocation1 + $0x31] ss:$2 sm:$0xff] %v2035_v4  ;;  %v1405_v4 = vsel %vm1396_vm3, %v1380_v46, %v11900_v44  ;;  %v1679_v37 = vsel %vm1671_vm8, %v1654_v0, %v7160_v61  ;;  %v11908_v46 = vld [vmem:[#allocation32_spill] sm:$0xff]  ;;  %v1503_v0 = vsel %vm1496_vm7, %v1478_v23, %v11899_v48  ;;  %v1331_v23 = vsel %vm1321_vm0, %v11880_v26, %v7192_v16 }
 0x2e9   : > { %v1430_v34 = vsel %vm1421_vm4, %v1405_v4, %v11903_v28  ;;  %v1780_v29 = vsel %vm1396_vm3, %v1756_v17, %v11908_v46  ;;  %v1528_v49 = vsel %vm1521_vm9, %v1503_v0, %v11900_v44  ;;  %v1710_v17 = vsel %vm1321_vm0, %v11910_v39, %v7726_v14 }
 0x2ea   : > { %v1455_v62 = vsel %vm11909_vm14, %v1430_v34, %v7156_v60  ;;  %v1804_v50 = vsel %vm1421_vm4, %v1780_v29, %v11910_v39  ;;  %v1734_v44 = vsel %vm1346_vm1, %v1710_v17, %v7797_v18  ;;  %v1356_v0 = vsel %vm1346_vm1, %v1331_v23, %v7218_v11  ;;  %vm11915_vm14 = vmmov %vm11895_vm12 }
 0x2eb   : > { %v1828_v48 = vsel %vm11895_vm12, %v1804_v50, %v7726_v14  ;;  %v1381_v26 = vsel %vm1371_vm2, %v1356_v0, %v7312_v51 }
 0x2ec   : > { %v7840_v22 = vpop.permute.xlu1 %1051 }
 0x2ed   : > { %11905 = vst [vmem:[#allocation48_spill] sm:$0xff] %v7840_v22  ;;  %v1875_v38 = vsel %vm1496_vm7, %v1851_v24, %v7840_v22 }
 0x2ee   : > { %1934 = vrot.lane.b32.xlu2 %v1875_v38, %s6794_s23  ;;  %v1480_v38 = vsel %vm1471_vm6, %v1455_v62, %v7259_v35 }
 0x2ef   : > { %v2071_v32 = vld.sshfl [vmem:[#allocation1 + $0x30] sm:$0xff pattern:$0x75316420]  ;;  %v1505_v4 = vsel %vm1496_vm7, %v1480_v38, %v7271_v12 }
 0x2f0   : > { %5961 = vmatmul.msk.f32.gmra.mxu0 %vm11907_vm5, %v2071_v32  ;;  %v1927_v27 = vpop.permute.xlu0 %1926  ;;  %v7890_v32 = vpop.permute.xlu2 %925  ;;  %v1530_v59 = vsel %vm1521_vm9, %v1505_v4, %v7267_v31  ;;  %v11912_v4 = vld [vmem:[#allocation33_spill] sm:$0xff]  ;;  %vm11913_vm5 = vcmask 97280  }
 0x2f1   : > { %v1992_v24 = vsel %vm1984_vm15, %v1679_v37, %v1927_v27  ;;  %v1553_v37 = vsel %vm1546_vm10, %v1528_v49, %v11903_v28  ;;  %v1555_v27 = vsel %vm1546_vm10, %v1530_v59, %v7095_v40  ;;  %v11914_v59 = vld [vmem:[#allocation45_spill] sm:$0xff]  ;;  %vm11916_vm12 = vmmov %vm11913_vm5 }
 0x2f2   : > { %2075 = vst [vmem:[#allocation1 + $0x11] ss:$2 sm:$0xff] %v1992_v24  ;;  %v1852_v24 = vsel %vm1471_vm6, %v1828_v48, %v7797_v18  ;;  %v1578_v38 = vsel %vm1571_vm11, %v1553_v37, %v7156_v60  ;;  %v1580_v11 = vsel %vm1571_vm11, %v1555_v27, %v7166_v63  ;;  %v1406_v37 = vsel %vm1396_vm3, %v1381_v26, %v7317_v41 }
 0x2f3   : > { %v1603_v16 = vsel %vm11913_vm5, %v1578_v38, %v7259_v35  ;;  %v1605_v51 = vsel %vm11916_vm12, %v1580_v11, %v7335_v8  ;;  %vm11917_vm5 = vcmask 113664   ;;  %v1431_v27 = vsel %vm1421_vm4, %v1406_v37, %v11889_v58  ;;  %v11920_v37 = vld [vmem:[#allocation13_spill] sm:$0xff] }
 0x2f4   : > { %v1628_v48 = vsel %vm1621_vm13, %v1603_v16, %v7271_v12  ;;  %v1630_v41 = vsel %vm1621_vm13, %v1605_v51, %v7234_v43  ;;  %vm11919_vm12 = vcmask 48128  }
 0x2f8   : > { %v7927_v49 = vpop.permute.xlu2 %1069 }
 0x2fc   : > { %v7903_v34 = vpop.permute.xlu1 %1057 }
 0x2fd   : > { %11911 = vst [vmem:[#allocation37_spill] sm:$0xff] %v7903_v34  ;;  %v1758_v29 = vsel %vm1371_vm2, %v1734_v44, %v7903_v34  ;;  %v1876_v62 = vsel %vm1496_vm7, %v1852_v24, %v7903_v34 }
 0x2fe   : > { %1936 = vrot.lane.b32.xlu0 %v1876_v62, %s6794_s23  ;;  %v1782_v50 = vsel %vm1396_vm3, %v1758_v29, %v11912_v4  ;;  %v1653_v29 = vsel %vm11917_vm5, %v1628_v48, %v7267_v31  ;;  %v11931_v4 = vld [vmem:[#allocation47_spill] sm:$0xff] }
 0x2ff   : > { %v1806_v17 = vsel %vm1421_vm4, %v1782_v50, %v11914_v59  ;;  %v1678_v0 = vsel %vm1671_vm8, %v1653_v29, %v7095_v40  ;;  %v1456_v50 = vsel %vm11919_vm12, %v1431_v27, %v7172_v2  ;;  %vm11928_vm12 = vcmask 113664  }
 0x300   : > { %v1830_v44 = vsel %vm11915_vm14, %v1806_v17, %v7823_v9  ;;  %vm11918_vm14 = vmmov %vm11917_vm5  ;;  %v1481_v26 = vsel %vm1471_vm6, %v1456_v50, %v7326_v21  ;;  %vm11921_vm5 = vcmask 203776   ;;  %v11922_v50 = vld [vmem:[#allocation58_spill] sm:$0xff] }
 0x301   : > { %v1854_v24 = vsel %vm1471_vm6, %v1830_v44, %v7890_v32  ;;  %v1655_v62 = vsel %vm11918_vm14, %v1630_v41, %v7351_v55  ;;  %v7964_v44 = vperm.slane %v11920_v37, 4  ;;  %vm11923_vm14 = vcmask 97280  }
 0x302   : > { %v1878_v23 = vsel %vm1496_vm7, %v1854_v24, %v7927_v49  ;;  %v1680_v48 = vsel %vm1671_vm8, %v1655_v62, %v11860_v56  ;;  %v1709_v62 = vsel %vm1321_vm0, %v11904_v42, %v7769_v33 }
 0x303   : > { %1940 = vrot.lane.b32.xlu2 %v1878_v23, %s6794_s23  ;;  %v1506_v23 = vsel %vm1496_vm7, %v1481_v26, %v7322_v10 }
 0x304   : > { %v1531_v29 = vsel %vm1521_vm9, %v1506_v23, %v7340_v53  ;;  %v11927_v23 = vld [vmem:[#allocation60_spill] sm:$0xff] }
 0x305   : > { %v1925_v38 = vpop.permute.xlu1 %1924  ;;  %v1556_v27 = vsel %vm1546_vm10, %v1531_v29, %v7160_v61 }
 0x306   : > { %v1991_v16 = vsel %vm1984_vm15, %v1678_v0, %v1925_v38  ;;  %v1581_v38 = vsel %vm1571_vm11, %v1556_v27, %v7180_v5  ;;  %v1733_v0 = vsel %vm1346_vm1, %v1709_v62, %v7708_v57  ;;  %v11929_v27 = vld [vmem:[#allocation30_spill] sm:$0xff]  ;;  %v11930_v62 = vld [vmem:[#allocation27_spill] sm:$0xff] }
 0x307   : > { %v2036_v17 = vrot.slane %v1991_v16, 4  ;;  %2073 = vst [vmem:[#allocation1 + $0x1] ss:$2 sm:$0xff] %v1991_v16  ;;  %v1929_v11 = vpop.permute.xlu2 %1928  ;;  %v1606_v16 = vsel %vm11923_vm14, %v1581_v38, %v11922_v50  ;;  %v1757_v26 = vsel %vm1371_vm2, %v1733_v0, %v7840_v22  ;;  %vm11932_vm14 = vcmask 48128  }
 0x308   : > { %v1993_v51 = vsel %vm1984_vm15, %v1680_v48, %v1929_v11  ;;  %v11925_v48 = vld [vmem:[#allocation59_spill] sm:$0xff] }
 0x309   : > { %2074 = vst [vmem:[#allocation1 + $0x10] ss:$2 sm:$0xff] %v2036_v17  ;;  %v2037_v24 = vrot.slane %v1993_v51, 4  ;;  %v11924_v17 = vld [vmem:[#allocation19_spill] sm:$0xff]  ;;  %v1631_v11 = vsel %vm1621_vm13, %v1606_v16, %v11925_v48 }
 0x30a   : > { %2076 = vst [vmem:[#allocation1 + $0x20] ss:$2 sm:$0xff] %v1993_v51  ;;  %v1656_v29 = vsel %vm11928_vm12, %v1631_v11, %v11927_v23  ;;  %vm11934_vm12 = vmmov %vm11921_vm5 }
 0x30b   : > { %2077 = vst [vmem:[#allocation1 + $0x21] ss:$2 sm:$0xff] %v2037_v24  ;;  %1106 = vperm.xlu2 %6180, %v7964_v44   ;;  %v1681_v38 = vsel %vm1671_vm8, %v1656_v29, %v11930_v62 }
 0x30d   : > { %v7989_v51 = vpop.permute.xlu1 %919 }
 0x30e   : > { %v2080_v41 = vld.sshfl [vmem:[#allocation1] sm:$0xff pattern:$0x75316420]  ;;  %11926 = vst [vmem:[#allocation56_spill] sm:$0xff] %v7989_v51 }
 0x30f   : > { %5962 = vmatmul.msk.f32.gmra.mxu0 %vm11921_vm5, %v2080_v41  ;;  %v1781_v41 = vsel %vm1396_vm3, %v1757_v26, %v11929_v27 }
 0x310   : > { %v2081_v24 = vld.sshfl [vmem:[#allocation1 + $0x10] sm:$0xff pattern:$0x75316420]  ;;  %v1805_v34 = vsel %vm1421_vm4, %v1781_v41, %v11931_v4  ;;  %v11935_v41 = vld [vmem:[#allocation11_spill] sm:$0xff] }
 0x311   : > { %v1829_v11 = vsel %vm11932_vm14, %v1805_v34, %v7862_v1  ;;  %v1333_v34 = vsel %vm1321_vm0, %v11889_v58, %v7172_v2  ;;  %v1711_v2 = vsel %vm1321_vm0, %v11931_v4, %v7862_v1  ;;  %v11952_v4 = vld [vmem:[#allocation26_spill] sm:$0xff] }
 0x312   : > { %v1853_v26 = vsel %vm1471_vm6, %v1829_v11, %v7989_v51 }
 0x313   : > { %6182 = vset.pattern.permute.xlu2 %v11924_v17 }
 0x317   : > { %5963 = vmatmul.msk.f32.gmra.mxu0 %vm11921_vm5, %v2081_v24  ;;  %v2082_v24 = vld.sshfl [vmem:[#allocation1 + $0x20] sm:$0xff pattern:$0x75316420]  ;;  %vm11937_vm5 = vmmov %vm11932_vm14 }
 0x318   : > { %vm11942_vm14 = vmmov %vm11937_vm5 }
 0x319   : > { %v1931_v0 = vpop.permute.xlu2 %1930 }
 0x31a   : > { %v1994_v16 = vsel %vm1984_vm15, %v1681_v38, %v1931_v0  ;;  %v8015_v38 = vperm.slane %v11920_v37, 5  ;;  %v1358_v0 = vsel %vm1346_vm1, %v1333_v34, %v7326_v21 }
 0x31b   : > { %2078 = vst [vmem:[#allocation1 + $0x30] ss:$2 sm:$0xff] %v1994_v16  ;;  %1130 = vperm.xlu2 %6182, %v7964_v44   ;;  %v1383_v16 = vsel %vm1371_vm2, %v1358_v0, %v7322_v10  ;;  %v1735_v10 = vsel %vm1346_vm1, %v1711_v2, %v7989_v51  ;;  %v11939_v0 = vld [vmem:[#allocation39_spill] sm:$0xff]  ;;  %v11951_v51 = vld [vmem:[#allocation62_spill] sm:$0xff] }
 0x31c   : > { %v1408_v11 = vsel %vm1396_vm3, %v1383_v16, %v7340_v53 }
 0x31d   : > { %v8004_v18 = vpop.permute.xlu1 %1063  ;;  %v1433_v58 = vsel %vm1421_vm4, %v1408_v11, %v7160_v61 }
 0x31e   : > { %11933 = vst [vmem:[#allocation53_spill] sm:$0xff] %v8004_v18  ;;  %v1877_v29 = vsel %vm1496_vm7, %v1853_v26, %v8004_v18  ;;  %v11936_v26 = vld [vmem:[#allocation16_spill] sm:$0xff] }
 0x31f   : > { %1938 = vrot.lane.b32.xlu1 %v1877_v29, %s6794_s23  ;;  %5964 = vmatmul.msk.f32.gmra.mxu0 %vm11934_vm12, %v2082_v24  ;;  %v1332_v24 = vsel %vm1321_vm0, %v11903_v28, %v7156_v60  ;;  %v1759_v29 = vsel %vm1371_vm2, %v1735_v10, %v8004_v18  ;;  %v1458_v60 = vsel %vm11937_vm5, %v1433_v58, %v7180_v5  ;;  %vm11943_vm12 = vmmov %vm11937_vm5  ;;  %vm11946_vm5 = vcmask 97280   ;;  %v11949_v18 = vld [vmem:[#allocation61_spill] sm:$0xff] }
 0x320   : > { %v1357_v21 = vsel %vm1346_vm1, %v1332_v24, %v7259_v35  ;;  %v1483_v34 = vsel %vm1471_vm6, %v1458_v60, %v11922_v50  ;;  %v1783_v16 = vsel %vm1396_vm3, %v1759_v29, %v11939_v0  ;;  %v11940_v24 = vld [vmem:[#allocation49_spill] sm:$0xff]  ;;  %v11956_v0 = vld [vmem:[#allocation14_spill] sm:$0xff] }
 0x321   : > { %v1382_v53 = vsel %vm1371_vm2, %v1357_v21, %v7271_v12  ;;  %v1508_v12 = vsel %vm1496_vm7, %v1483_v34, %v11925_v48  ;;  %v1807_v2 = vsel %vm1421_vm4, %v1783_v16, %v11940_v24  ;;  %v8064_v21 = vpop.permute.xlu0 %931  ;;  %v11945_v16 = vld [vmem:[#allocation12_spill] sm:$0xff] }
 0x322   : > { %v1407_v35 = vsel %vm1396_vm3, %v1382_v53, %v7267_v31  ;;  %v1533_v31 = vsel %vm1521_vm9, %v1508_v12, %v11927_v23  ;;  %11941 = vst [vmem:[#allocation57_spill] sm:$0xff] %v8064_v21 }
 0x323   : > { %6184 = vset.pattern.permute.xlu2 %v11935_v41  ;;  %v1432_v11 = vsel %vm1421_vm4, %v1407_v35, %v7095_v40  ;;  %v1558_v29 = vsel %vm1546_vm10, %v1533_v31, %v11930_v62 }
 0x324   : > { %v1457_v10 = vsel %vm11943_vm12, %v1432_v11, %v7166_v63  ;;  %v1583_v11 = vsel %vm1571_vm11, %v1558_v29, %v7174_v3  ;;  %vm11953_vm12 = vmmov %vm11946_vm5 }
 0x325   : > { %v1482_v53 = vsel %vm1471_vm6, %v1457_v10, %v7335_v8  ;;  %v1608_v31 = vsel %vm11946_vm5, %v1583_v11, %v7524_v47  ;;  %v1336_v10 = vsel %vm1321_vm0, %v11860_v56, %v11862_v6  ;;  %vm11954_vm5 = vcmask 48128  }
 0x326   : > { %v1507_v12 = vsel %vm1496_vm7, %v1482_v53, %v7234_v43 }
 0x327   : > { %1094 = vperm.xlu1 %6179, %v7964_v44  }
 0x32b   : > { %1143 = vperm.xlu2 %6184, %v8015_v38  }
 0x32d   : > { %v8047_v28 = vpop.permute.xlu1 %787 }
 0x32e   : > { %11938 = vst [vmem:[#allocation42_spill] sm:$0xff] %v8047_v28  ;;  %v1831_v58 = vsel %vm11942_vm14, %v1807_v2, %v8047_v28  ;;  %v1532_v2 = vsel %vm1521_vm9, %v1507_v12, %v7351_v55  ;;  %vm11950_vm14 = vcmask 113664  }
 0x32f   : > { %6181 = vset.pattern.permute.xlu1 %v11936_v26  ;;  %v1855_v35 = vsel %vm1471_vm6, %v1831_v58, %v8064_v21  ;;  %v1633_v58 = vsel %vm1621_vm13, %v1608_v31, %v7537_v52  ;;  %v1557_v29 = vsel %vm1546_vm10, %v1532_v2, %v11860_v56 }
 0x330   : > { %v1658_v11 = vsel %vm11950_vm14, %v1633_v58, %v7421_v36  ;;  %v1582_v1 = vsel %vm1571_vm11, %v1557_v29, %v11862_v6 }
 0x333   : > { %6186 = vset.pattern.permute.xlu2 %v7006_v25 }
 0x337   : > { %1118 = vperm.xlu1 %6181, %v7964_v44  }
 0x33b   : > { %1112 = vperm.xlu2 %6186, %v7964_v44  }
 0x33d   : > { %v8075_v60 = vpop.permute.xlu1 %1075 }
 0x33e   : > { %11944 = vst [vmem:[#allocation20_spill] sm:$0xff] %v8075_v60  ;;  %v1879_v34 = vsel %vm1496_vm7, %v1855_v35, %v8075_v60  ;;  %v11947_v35 = vld [vmem:[#allocation31_spill] sm:$0xff]  ;;  %v11957_v60 = vld [vmem:[#allocation34_spill] sm:$0xff] }
 0x33f   : > { %6183 = vset.pattern.permute.xlu1 %v11945_v16  ;;  %1942 = vrot.lane.b32.xlu0 %v1879_v34, %s6794_s23  ;;  %v11948_v34 = vld [vmem:[#allocation55_spill] sm:$0xff] }
 0x340   : > { %v1361_v53 = vsel %vm1346_vm1, %v1336_v10, %v11948_v34  ;;  %v1683_v10 = vsel %vm1671_vm8, %v1658_v11, %v11882_v13  ;;  %v1607_v58 = vsel %vm11953_vm12, %v1582_v1, %v11948_v34 }
 0x341   : > { %v1386_v12 = vsel %vm1371_vm2, %v1361_v53, %v11949_v18  ;;  %v1632_v29 = vsel %vm1621_vm13, %v1607_v58, %v11949_v18 }
 0x342   : > { %v1411_v31 = vsel %vm1396_vm3, %v1386_v12, %v11951_v51  ;;  %v8120_v12 = vperm.slane %v11920_v37, 6 }
 0x343   : > { %6188 = vset.pattern.permute.xlu2 %v11947_v35  ;;  %v1436_v53 = vsel %vm1421_vm4, %v1411_v31, %v11952_v4  ;;  %v1657_v31 = vsel %vm11950_vm14, %v1632_v29, %v11951_v51 }
 0x344   : > { %v1461_v11 = vsel %vm11954_vm5, %v1436_v53, %v11875_v7  ;;  %v1682_v53 = vsel %vm1671_vm8, %v1657_v31, %v11952_v4  ;;  %vm11960_vm5 = vcmask 203776  }
 0x347   : > { %1088 = vperm.xlu1 %6183, %v7964_v44   ;;  %1179 = vperm.xlu0 %6189, %v8015_v38  }
 0x348   : > { %v1935_v2 = vpop.permute.xlu2 %1934 }
 0x349   : > { %v1996_v14 = vsel %vm1984_vm15, %v1683_v10, %v1935_v2  ;;  %v11955_v10 = vld [vmem:[#allocation36_spill] sm:$0xff] }
 0x34a   : > { %2085 = vst [vmem:[#allocation1 + $0x1] ss:$2 sm:$0xff] %v1996_v14  ;;  %v1486_v14 = vsel %vm1471_vm6, %v1461_v11, %v7547_v20 }
 0x34b   : > { %1124 = vperm.xlu2 %6188, %v7964_v44   ;;  %v1511_v1 = vsel %vm1496_vm7, %v1486_v14, %v7568_v54  ;;  %v11958_v14 = vld [vmem:[#allocation17_spill] sm:$0xff] }
 0x34c   : > { %v1536_v2 = vsel %vm1521_vm9, %v1511_v1, %v11955_v10  ;;  %v1334_v1 = vsel %vm1321_vm0, %v7095_v40, %v7166_v63 }
 0x34d   : > { %v1561_v11 = vsel %vm1546_vm10, %v1536_v2, %v11957_v60  ;;  %v1359_v21 = vsel %vm1346_vm1, %v1334_v1, %v7335_v8 }
 0x34e   : > { %v1586_v31 = vsel %vm1571_vm11, %v1561_v11, %v11892_v19 }
 0x34f   : > { %6185 = vset.pattern.permute.xlu1 %v11956_v0  ;;  %1240 = vperm.xlu0 %6189, %v8120_v12   ;;  %v1933_v58 = vpop.permute.xlu1 %1932 }
 0x350   : > { %v1995_v39 = vsel %vm1984_vm15, %v1682_v53, %v1933_v58  ;;  %v11959_v58 = vld [vmem:[#allocation15_spill] sm:$0xff]  ;;  %v1611_v53 = vsel %vm11953_vm12, %v1586_v31, %v7616_v30  ;;  %vm11961_vm12 = vcmask 48128  }
 0x351   : > { %v2038_v29 = vrot.slane %v1995_v39, 4  ;;  %2079 = vst [vmem:[#allocation1 + $0x31] ss:$2 sm:$0xff] %v1995_v39  ;;  %v1384_v39 = vsel %vm1371_vm2, %v1359_v21, %v7234_v43  ;;  %v1636_v63 = vsel %vm1621_vm13, %v1611_v53, %v7760_v15 }
 0x352   : > { %v1409_v40 = vsel %vm1396_vm3, %v1384_v39, %v7351_v55  ;;  %v1661_v8 = vsel %vm11950_vm14, %v1636_v63, %v7784_v45  ;;  %vm11962_vm14 = vcmask 97280  }
 0x353   : > { %2084 = vst [vmem:[#allocation1] ss:$2 sm:$0xff] %v2038_v29  ;;  %6191 = vset.pattern.permute.xlu2 %v11958_v14  ;;  %v1434_v43 = vsel %vm1421_vm4, %v1409_v40, %v11860_v56  ;;  %v1686_v21 = vsel %vm1671_vm8, %v1661_v8, %v11908_v46  ;;  %v1335_v8 = vsel %vm1321_vm0, %v7160_v61, %v7180_v5 }
 0x354   : > { %v1459_v55 = vsel %vm11961_vm12, %v1434_v43, %v11862_v6  ;;  %vm11963_vm12 = vcmask 113664  }
 0x355   : > { %v1484_v56 = vsel %vm1471_vm6, %v1459_v55, %v11948_v34 }
 0x356   : > { %v1509_v39 = vsel %vm1496_vm7, %v1484_v56, %v11949_v18 }
 0x357   : > { %1155 = vperm.xlu1 %6185, %v8015_v38   ;;  %6194 = vset.pattern.permute.xlu0 %v11959_v58  ;;  %v1534_v6 = vsel %vm1521_vm9, %v1509_v39, %v11951_v51  ;;  %v11967_v39 = vld [vmem:[#allocation40_spill] sm:$0xff] }
 0x358   : > { %v2083_v2 = vld.sshfl [vmem:[#allocation1 + $0x30] sm:$0xff pattern:$0x75316420] }
 0x359   : > { %5965 = vmatmul.msk.f32.gmra.mxu0 %vm11960_vm5, %v2083_v2  ;;  %v1559_v2 = vsel %vm1546_vm10, %v1534_v6, %v11952_v4 }
 0x35a   : > { %v2092_v31 = vld.sshfl [vmem:[#allocation1] sm:$0xff pattern:$0x75316420]  ;;  %v1584_v53 = vsel %vm1571_vm11, %v1559_v2, %v11875_v7  ;;  %v11968_v2 = vld [vmem:[#allocation41_spill] sm:$0xff] }
 0x35b   : > { %1228 = vperm.xlu2 %6191, %v8120_v12   ;;  %v1609_v18 = vsel %vm11962_vm14, %v1584_v53, %v7547_v20  ;;  %vm11965_vm14 = vcmask 203776  }
 0x35c   : > { %v1634_v34 = vsel %vm1621_vm13, %v1609_v18, %v7568_v54  ;;  %v11970_v18 = vld [vmem:[#allocation50_spill] sm:$0xff] }
 0x35d   : > { %v1941_v29 = vpop.permute.xlu2 %1940  ;;  %v1659_v51 = vsel %vm11963_vm12, %v1634_v34, %v11955_v10  ;;  %vm11969_vm12 = vcmask 97280  }
 0x35e   : > { %v1999_v11 = vsel %vm1984_vm15, %v1686_v21, %v1941_v29  ;;  %v1684_v40 = vsel %vm1671_vm8, %v1659_v51, %v11957_v60  ;;  %v1360_v21 = vsel %vm1346_vm1, %v1335_v8, %v11922_v50  ;;  %v8214_v50 = vperm.slane %v11920_v37, 7  ;;  %v11971_v51 = vld [vmem:[#allocation25_spill] sm:$0xff] }
 0x35f   : > { %v2040_v1 = vrot.slane %v1999_v11, 4  ;;  %2089 = vst [vmem:[#allocation1 + $0x21] ss:$2 sm:$0xff] %v1999_v11  ;;  %6187 = vset.pattern.permute.xlu1 %v11958_v14  ;;  %1100 = vperm.xlu0 %6194, %v7964_v44   ;;  %v1385_v11 = vsel %vm1371_vm2, %v1360_v21, %v11925_v48 }
 0x360   : > { %v1410_v55 = vsel %vm1396_vm3, %v1385_v11, %v11927_v23 }
 0x361   : > { %2090 = vst [vmem:[#allocation1 + $0x30] ss:$2 sm:$0xff] %v2040_v1  ;;  %5966 = vmatmul.msk.f32.gmra.mxu0 %vm11960_vm5, %v2092_v31  ;;  %v1435_v61 = vsel %vm1421_vm4, %v1410_v55, %v11930_v62  ;;  %vm11964_vm5 = vcmask 48128   ;;  %v11966_v31 = vld [vmem:[#allocation24_spill] sm:$0xff] }
 0x362   : > { %v1460_v48 = vsel %vm11964_vm5, %v1435_v61, %v7174_v3  ;;  %vm11972_vm5 = vcmask 113664  }
 0x363   : > { %6193 = vset.pattern.permute.xlu2 %v11924_v17  ;;  %v1485_v23 = vsel %vm1471_vm6, %v1460_v48, %v7524_v47 }
 0x364   : > { %v1510_v1 = vsel %vm1496_vm7, %v1485_v23, %v7537_v52 }
 0x365   : > { %v1535_v56 = vsel %vm1521_vm9, %v1510_v1, %v7421_v36 }
 0x366   : > { %v1560_v37 = vsel %vm1546_vm10, %v1535_v56, %v11882_v13 }
 0x367   : > { %1167 = vperm.xlu1 %6187, %v8015_v38   ;;  %1222 = vperm.xlu0 %6194, %v8120_v12   ;;  %v1585_v6 = vsel %vm1571_vm11, %v1560_v37, %v11967_v39 }
 0x368   : > { %v1610_v53 = vsel %vm11969_vm12, %v1585_v6, %v11968_v2  ;;  %vm11975_vm12 = vcmask 203776  }
 0x369   : > { %v1635_v34 = vsel %vm1621_vm13, %v1610_v53, %v11970_v18 }
 0x36b   : > { %1191 = vperm.xlu2 %6193, %v8015_v38  }
 0x36f   : > { %6190 = vset.pattern.permute.xlu1 %v11956_v0  ;;  %6197 = vset.pattern.permute.xlu0 %v11935_v41 }
 0x370   : > { %v1937_v63 = vpop.permute.xlu0 %1936 }
 0x371   : > { %v1997_v43 = vsel %vm1984_vm15, %v1684_v40, %v1937_v63  ;;  %v1660_v40 = vsel %vm11972_vm5, %v1635_v34, %v11971_v51  ;;  %vm11976_vm5 = vcmask 97280  }
 0x372   : > { %v2039_v29 = vrot.slane %v1997_v43, 4  ;;  %2086 = vst [vmem:[#allocation1 + $0x10] ss:$2 sm:$0xff] %v1997_v43  ;;  %v11973_v43 = vld [vmem:[#allocation28_spill] sm:$0xff] }
 0x373   : > { %6196 = vset.pattern.permute.xlu2 %v7006_v25  ;;  %v1685_v21 = vsel %vm1671_vm8, %v1660_v40, %v11973_v43  ;;  %v8298_v40 = vpop.permute.xlu2 %1106 }
 0x374   : > { %2087 = vst [vmem:[#allocation1 + $0x11] ss:$2 sm:$0xff] %v2039_v29 }
 0x377   : > { %1216 = vperm.xlu1 %6190, %v8120_v12   ;;  %1082 = vperm.xlu0 %6197, %v7964_v44  }
 0x37b   : > { %v2093_v5 = vld.sshfl [vmem:[#allocation1 + $0x10] sm:$0xff pattern:$0x75316420]  ;;  %1173 = vperm.xlu2 %6196, %v8015_v38  }
 0x37c   : > { %5967 = vmatmul.msk.f32.gmra.mxu0 %vm11965_vm14, %v2093_v5  ;;  %vm11974_vm14 = vcmask 48128  }
 0x37f   : > { %6192 = vset.pattern.permute.xlu1 %v11966_v31  ;;  %1265 = vperm.xlu0 %6197, %v8214_v50  }
 0x383   : > { %6199 = vset.pattern.permute.xlu2 %v11924_v17 }
 0x387   : > { %1136 = vperm.xlu1 %6192, %v7964_v44   ;;  %6206 = vset.pattern.permute.xlu0 %v11945_v16  ;;  %v1337_v44 = vsel %vm1321_vm0, %v11930_v62, %v7174_v3 }
 0x388   : > { %v1362_v63 = vsel %vm1346_vm1, %v1337_v44, %v7524_v47 }
 0x389   : > { %v1387_v8 = vsel %vm1371_vm2, %v1362_v63, %v7537_v52  ;;  %v8304_v63 = vpop.permute.xlu2 %1130 }
 0x38a   : > { %v1412_v3 = vsel %vm1396_vm3, %v1387_v8, %v7421_v36 }
 0x38b   : > { %1252 = vperm.xlu2 %6199, %v8120_v12   ;;  %v1437_v62 = vsel %vm1421_vm4, %v1412_v3, %v11882_v13 }
 0x38c   : > { %v1462_v47 = vsel %vm11974_vm14, %v1437_v62, %v11967_v39  ;;  %vm11977_vm14 = vcmask 113664  }
 0x38d   : > { %v1487_v55 = vsel %vm1471_vm6, %v1462_v47, %v11968_v2 }
 0x38e   : > { %v1512_v36 = vsel %vm1496_vm7, %v1487_v55, %v11970_v18 }
 0x38f   : > { %6195 = vset.pattern.permute.xlu1 %v11959_v58  ;;  %1271 = vperm.xlu0 %6206, %v8214_v50  }
 0x391   : > { %v1939_v29 = vpop.permute.xlu1 %1938 }
 0x392   : > { %v1998_v11 = vsel %vm1984_vm15, %v1685_v21, %v1939_v29 }
 0x393   : > { %2088 = vst [vmem:[#allocation1 + $0x20] ss:$2 sm:$0xff] %v1998_v11  ;;  %6201 = vset.pattern.permute.xlu2 %v11947_v35 }
 0x397   : > { %1161 = vperm.xlu1 %6195, %v8015_v38   ;;  %6211 = vset.pattern.permute.xlu0 %v11924_v17  ;;  %v1537_v17 = vsel %vm1521_vm9, %v1512_v36, %v11971_v51 }
 0x398   : > { %v1562_v61 = vsel %vm1546_vm10, %v1537_v17, %v11973_v43 }
 0x399   : > { %v1587_v5 = vsel %vm1571_vm11, %v1562_v61, %v11904_v42  ;;  %v8311_v21 = vpop.permute.xlu1 %1094 }
 0x39a   : > { %v2094_v52 = vld.sshfl [vmem:[#allocation1 + $0x20] sm:$0xff pattern:$0x75316420]  ;;  %v1612_v48 = vsel %vm11976_vm5, %v1587_v5, %v7769_v33  ;;  %vm11979_vm5 = vcmask 48128  }
 0x39b   : > { %5968 = vmatmul.msk.f32.gmra.mxu0 %vm11975_vm12, %v2094_v52  ;;  %1246 = vperm.xlu2 %6201, %v8120_v12   ;;  %v1637_v23 = vsel %vm1621_vm13, %v1612_v48, %v7708_v57  ;;  %v1714_v48 = vsel %vm1321_vm0, %v8311_v21, %v8298_v40 }
 0x39c   : > { %v1662_v1 = vsel %vm11977_vm14, %v1637_v23, %v7840_v22  ;;  %vm11981_vm14 = vmmov %vm11979_vm5  ;;  %v11988_v22 = vld [vmem:[#allocation39_spill] sm:$0xff] }
 0x39d   : > { %v1687_v56 = vsel %vm1671_vm8, %v1662_v1, %v11929_v27 }
 0x39f   : > { %6198 = vset.pattern.permute.xlu1 %v7006_v25  ;;  %1313 = vperm.xlu0 %6211, %v8214_v50  }
 0x3a3   : > { %6203 = vset.pattern.permute.xlu2 %v11966_v31 }
 0x3a7   : > { %1234 = vperm.xlu1 %6198, %v8120_v12   ;;  %6666 = vset.pattern.permute.xlu0 %v11966_v31 }
 0x3a9   : > { %v8319_v11 = vpop.permute.xlu1 %1118 }
 0x3aa   : > { %v1738_v23 = vsel %vm1346_vm1, %v1714_v48, %v8319_v11 }
 0x3ab   : > { %1258 = vperm.xlu2 %6203, %v8120_v12  }
 0x3af   : > { %6200 = vset.pattern.permute.xlu1 %v11947_v35 }
 0x3b1   : > { %v1943_v37 = vpop.permute.xlu0 %1942 }
 0x3b2   : > { %v2000_v6 = vsel %vm1984_vm15, %v1687_v56, %v1943_v37  ;;  %v1762_v56 = vsel %vm1371_vm2, %v1738_v23, %v8304_v63 }
 0x3b3   : > { %2091 = vst [vmem:[#allocation1 + $0x31] ss:$2 sm:$0xff] %v2000_v6  ;;  %6205 = vset.pattern.permute.xlu2 %v11945_v16 }
 0x3b7   : > { %1185 = vperm.xlu1 %6200, %v8015_v38  }
 0x3b9   : > { %v8295_v34 = vpop.permute.xlu0 %1179  ;;  %v8330_v62 = vpop.permute.xlu1 %1088 }
 0x3ba   : > { %v2095_v53 = vld.sshfl [vmem:[#allocation1 + $0x30] sm:$0xff pattern:$0x75316420]  ;;  %11978 = vst [vmem:[#allocation29_spill] sm:$0xff] %v8295_v34 }
 0x3bb   : > { %5969 = vmatmul.msk.f32.gmra.mxu0 %vm11975_vm12, %v2095_v53  ;;  %1210 = vperm.xlu2 %6205, %v8120_v12   ;;  %vm11985_vm12 = vmmov %vm11979_vm5 }
 0x3bf   : > { %6202 = vset.pattern.permute.xlu1 %v11966_v31 }
 0x3c1   : > { %v8302_v44 = vpop.permute.xlu0 %1240 }
 0x3c3   : > { %6208 = vset.pattern.permute.xlu2 %v11959_v58  ;;  %v8313_v58 = vpop.permute.xlu2 %1143 }
 0x3c4   : > { %v1786_v37 = vsel %vm1396_vm3, %v1762_v56, %v8313_v58 }
 0x3c7   : > { %1197 = vperm.xlu1 %6202, %v8015_v38  }
 0x3c9   : > { %v8351_v5 = vpop.permute.xlu1 %1155 }
 0x3ca   : > { %v1810_v6 = vsel %vm1421_vm4, %v1786_v37, %v8351_v5 }
 0x3cb   : > { %1283 = vperm.xlu2 %6208, %v8214_v50   ;;  %v8321_v3 = vpop.permute.xlu2 %1112 }
 0x3cf   : > { %6204 = vset.pattern.permute.xlu1 %v11956_v0 }
 0x3d1   : > { %v8308_v8 = vpop.permute.xlu0 %1100 }
 0x3d3   : > { %6210 = vset.pattern.permute.xlu2 %v7006_v25  ;;  %v1712_v25 = vsel %vm1321_vm0, %v11914_v59, %v7823_v9 }
 0x3d4   : > { %v1736_v0 = vsel %vm1346_vm1, %v1712_v25, %v7890_v32 }
 0x3d7   : > { %1277 = vperm.xlu1 %6204, %v8214_v50  }
 0x3d9   : > { %v8317_v29 = vpop.permute.xlu0 %1222 }
 0x3db   : > { %1295 = vperm.xlu2 %6210, %v8214_v50  }
 0x3df   : > { %6207 = vset.pattern.permute.xlu1 %v11958_v14  ;;  %v1760_v14 = vsel %vm1371_vm2, %v1736_v0, %v7927_v49 }
 0x3e3   : > { %6213 = vset.pattern.permute.xlu2 %v11966_v31  ;;  %v8338_v31 = vpop.permute.xlu2 %1124 }
 0x3e7   : > { %1289 = vperm.xlu1 %6207, %v8214_v50  }
 0x3e9   : > { %v8334_v47 = vpop.permute.xlu0 %1082 }
 0x3ea   : > { %v1784_v52 = vsel %vm1396_vm3, %v1760_v14, %v8334_v47 }
 0x3eb   : > { %v1808_v55 = vsel %vm1421_vm4, %v1784_v52, %v8311_v21  ;;  %1319 = vperm.xlu2 %6213, %v8214_v50   ;;  %v8359_v1 = vpop.permute.xlu2 %1228 }
 0x3ec   : > { %v1832_v36 = vsel %vm11979_vm5, %v1808_v55, %v8298_v40 }
 0x3ed   : > { %v1856_v17 = vsel %vm1471_vm6, %v1832_v36, %v8319_v11  ;;  %v11984_v36 = vld [vmem:[#allocation20_spill] sm:$0xff] }
 0x3ee   : > { %v1880_v61 = vsel %vm1496_vm7, %v1856_v17, %v8304_v63 }
 0x3ef   : > { %6209 = vset.pattern.permute.xlu1 %v11936_v26  ;;  %1944 = vrot.lane.b32.xlu0 %v1880_v61, %s6794_s23  ;;  %v8364_v26 = vpop.permute.xlu1 %1167 }
 0x3f0   : > { %11980 = vst [vmem:[#allocation22_spill] sm:$0xff] %v8364_v26 }
 0x3f3   : > { %6215 = vset.pattern.permute.xlu2 %v11945_v16  ;;  %v1834_v16 = vsel %vm11981_vm14, %v1810_v6, %v8364_v26  ;;  %v8373_v53 = vpop.permute.xlu2 %1191  ;;  %vm11987_vm14 = vmmov %vm11979_vm5 }
 0x3f4   : > { %11982 = vst [vmem:[#allocation44_spill] sm:$0xff] %v8373_v53  ;;  %v1858_v25 = vsel %vm1471_vm6, %v1834_v16, %v8295_v34 }
 0x3f5   : > { %v1882_v0 = vsel %vm1496_vm7, %v1858_v25, %v8373_v53  ;;  %v1340_v53 = vsel %vm1321_vm0, %v11957_v60, %v11892_v19 }
 0x3f6   : > { %v1365_v34 = vsel %vm1346_vm1, %v1340_v53, %v7616_v30 }
 0x3f7   : > { %1301 = vperm.xlu1 %6209, %v8214_v50   ;;  %v8388_v52 = vpop.permute.xlu1 %1216  ;;  %v1390_v27 = vsel %vm1371_vm2, %v1365_v34, %v7760_v15 }
 0x3fb   : > { %1149 = vperm.xlu2 %6215, %v8015_v38   ;;  %v8382_v14 = vpop.permute.xlu2 %1173  ;;  %v1713_v38 = vsel %vm1321_vm0, %v11940_v24, %v8047_v28 }
 0x3ff   : > { %6212 = vset.pattern.permute.xlu1 %v11947_v35  ;;  %v11983_v35 = vld [vmem:[#allocation57_spill] sm:$0xff]  ;;  %v8401_v48 = vpop.permute.xlu1 %1136 }
 0x400   : > { %v1737_v55 = vsel %vm1346_vm1, %v1713_v38, %v11983_v35 }
 0x401   : > { %v1761_v17 = vsel %vm1371_vm2, %v1737_v55, %v11984_v36 }
 0x403   : > { %1948 = vrot.lane.b32.xlu2 %v1882_v0, %s6794_s23  ;;  %v8394_v61 = vpop.permute.xlu2 %1252 }
 0x407   : > { %1307 = vperm.xlu1 %6212, %v8214_v50   ;;  %v1785_v50 = vsel %vm1396_vm3, %v1761_v17, %v8330_v62 }
 0x409   : > { %v1162_v16 = vpop.permute.xlu1 %1161 }
 0x40a   : > { %v1717_v55 = vsel %vm1321_vm0, %v1162_v16, %v8382_v14 }
 0x40b   : > { %v8405_v56 = vpop.permute.xlu2 %1246 }
 0x40f   : > { %6214 = vset.pattern.permute.xlu1 %v11935_v41  ;;  %v1809_v41 = vsel %vm1421_vm4, %v1785_v50, %v8308_v8 }
 0x410   : > { %v1833_v23 = vsel %vm11985_vm12, %v1809_v41, %v8321_v3  ;;  %vm11990_vm12 = vmmov %vm11979_vm5 }
 0x411   : > { %v1857_v37 = vsel %vm1471_vm6, %v1833_v23, %v8338_v31 }
 0x412   : > { %v1881_v6 = vsel %vm1496_vm7, %v1857_v37, %v8401_v48 }
 0x413   : > { %v8412_v25 = vpop.permute.xlu2 %1258 }
 0x417   : > { %1204 = vperm.xlu1 %6214, %v8120_v12  }
 0x419   : > { %v8414_v0 = vpop.permute.xlu1 %1234 }
 0x41b   : > { %v8416_v12 = vpop.permute.xlu2 %1210 }
 0x41f   : > { %1946 = vrot.lane.b32.xlu1 %v1881_v6, %s6794_s23 }
 0x425   : > { %v8428_v23 = vpop.permute.xlu2 %1283 }
 0x429   : > { %v8418_v38 = vpop.permute.xlu1 %1185 }
 0x42a   : > { %v1741_v17 = vsel %vm1346_vm1, %v1717_v55, %v8418_v38 }
 0x435   : > { %v8455_v26 = vpop.permute.xlu2 %1295 }
 0x439   : > { %v8424_v50 = vpop.permute.xlu1 %1197 }
 0x43a   : > { %v1765_v41 = vsel %vm1371_vm2, %v1741_v17, %v8424_v50 }
 0x43b   : > { %v1789_v37 = vsel %vm1396_vm3, %v1765_v41, %v8416_v12 }
 0x43c   : > { %v1813_v6 = vsel %vm1421_vm4, %v1789_v37, %v8317_v29  ;;  %v1415_v37 = vsel %vm1396_vm3, %v1390_v27, %v7784_v45 }
 0x43d   : > { %v1837_v55 = vsel %vm11979_vm5, %v1813_v6, %v8414_v0  ;;  %v1338_v6 = vsel %vm1321_vm0, %v11952_v4, %v11875_v7  ;;  %v1440_v53 = vsel %vm1421_vm4, %v1415_v37, %v11908_v46  ;;  %v1345_v7 = vsel %vm1321_vm0, %v11988_v22, %v11940_v24  ;;  %v8468_v4 = vpop.permute.xlu0 %1265 }
 0x43e   : > { %v1861_v17 = vsel %vm1471_vm6, %v1837_v55, %v8405_v56  ;;  %v1363_v34 = vsel %vm1346_vm1, %v1338_v6, %v7547_v20  ;;  %v1370_v37 = vsel %vm1346_vm1, %v1345_v7, %v8047_v28  ;;  %v11989_v6 = vld [vmem:[#allocation18_spill] sm:$0xff]  ;;  %v11992_v28 = vld [vmem:[#allocation37_spill] sm:$0xff] }
 0x43f   : > { %v1885_v41 = vsel %vm1496_vm7, %v1861_v17, %v8412_v25  ;;  %v1388_v55 = vsel %vm1371_vm2, %v1363_v34, %v7568_v54  ;;  %v11986_v17 = vld [vmem:[#allocation43_spill] sm:$0xff] }
 0x440   : > { %1954 = vrot.lane.b32.xlu1 %v1885_v41, %s6794_s23  ;;  %v1413_v27 = vsel %vm1396_vm3, %v1388_v55, %v11955_v10  ;;  %v1465_v41 = vsel %vm11987_vm14, %v1440_v53, %v11986_v17  ;;  %v1395_v10 = vsel %vm1371_vm2, %v1370_v37, %v11983_v35  ;;  %v11991_v55 = vld [vmem:[#allocation35_spill] sm:$0xff]  ;;  %vm11994_vm14 = vcmask 97280  }
 0x441   : > { %v1438_v20 = vsel %vm1421_vm4, %v1413_v27, %v11957_v60  ;;  %v1490_v54 = vsel %vm1471_vm6, %v1465_v41, %v11989_v6  ;;  %v1420_v7 = vsel %vm1396_vm3, %v1395_v10, %v11984_v36  ;;  %v1715_v10 = vsel %vm1321_vm0, %v8308_v8, %v8321_v3 }
 0x442   : > { %v1463_v53 = vsel %vm11990_vm12, %v1438_v20, %v11892_v19  ;;  %v1515_v24 = vsel %vm1496_vm7, %v1490_v54, %v11991_v55  ;;  %v1445_v27 = vsel %vm1421_vm4, %v1420_v7, %v8330_v62  ;;  %v11993_v20 = vld [vmem:[#allocation33_spill] sm:$0xff]  ;;  %vm11995_vm12 = vmmov %vm11994_vm14 }
 0x443   : > { %v1540_v60 = vsel %vm1521_vm9, %v1515_v24, %v11992_v28  ;;  %v1470_v41 = vsel %vm11979_vm5, %v1445_v27, %v8308_v8  ;;  %v1488_v37 = vsel %vm1471_vm6, %v1463_v53, %v7616_v30 }
 0x444   : > { %v1513_v19 = vsel %vm1496_vm7, %v1488_v37, %v7760_v15  ;;  %v1565_v54 = vsel %vm1546_vm10, %v1540_v60, %v11993_v20  ;;  %v1495_v7 = vsel %vm1471_vm6, %v1470_v41, %v8321_v3  ;;  %v1739_v60 = vsel %vm1346_vm1, %v1715_v10, %v8338_v31 }
 0x445   : > { %v8478_v34 = vpop.permute.xlu2 %1319  ;;  %v8494_v35 = vpop.permute.xlu0 %1271  ;;  %v1538_v24 = vsel %vm1521_vm9, %v1513_v19, %v7784_v45  ;;  %v1590_v30 = vsel %vm1571_vm11, %v1565_v54, %v11914_v59  ;;  %v1520_v15 = vsel %vm1496_vm7, %v1495_v7, %v8338_v31  ;;  %v1763_v41 = vsel %vm1371_vm2, %v1739_v60, %v8401_v48 }
 0x446   : > { %v1563_v53 = vsel %vm1546_vm10, %v1538_v24, %v11908_v46  ;;  %v1545_v27 = vsel %vm1521_vm9, %v1520_v15, %v8401_v48  ;;  %v1615_v54 = vsel %vm11994_vm14, %v1590_v30, %v7823_v9  ;;  %vm11996_vm14 = vmmov %vm11995_vm12 }
 0x447   : > { %v1588_v15 = vsel %vm1571_vm11, %v1563_v53, %v11986_v17  ;;  %v1640_v30 = vsel %vm1621_vm13, %v1615_v54, %v7890_v32 }
 0x448   : > { %v1613_v53 = vsel %vm11996_vm14, %v1588_v15, %v11989_v6 }
 0x449   : > { %v1278_v46 = vpop.permute.xlu1 %1277 }
 0x44d   : > { %v1314_v7 = vpop.permute.xlu0 %1313 }
 0x455   : > { %v8515_v45 = vpop.permute.xlu2 %1149 }
 0x456   : > { %v1570_v37 = vsel %vm1546_vm10, %v1545_v27, %v8515_v45  ;;  %v1787_v19 = vsel %vm1396_vm3, %v1763_v41, %v8515_v45 }
 0x457   : > { %v1595_v24 = vsel %vm1571_vm11, %v1570_v37, %v1162_v16  ;;  %v1811_v10 = vsel %vm1421_vm4, %v1787_v19, %v1162_v16 }
 0x458   : > { %v1620_v60 = vsel %vm11995_vm12, %v1595_v24, %v8382_v14  ;;  %v1835_v27 = vsel %vm11979_vm5, %v1811_v10, %v8382_v14  ;;  %vm11997_vm12 = vcmask 113664   ;;  %v1638_v10 = vsel %vm1621_vm13, %v1613_v53, %v11991_v55 }
 0x459   : > { %v1859_v41 = vsel %vm1471_vm6, %v1835_v27, %v8418_v38  ;;  %v1645_v16 = vsel %vm1621_vm13, %v1620_v60, %v8418_v38  ;;  %vm11998_vm5 = vmmov %vm11997_vm12  ;;  %v1290_v27 = vpop.permute.xlu1 %1289 }
 0x45a   : > { %v1883_v37 = vsel %vm1496_vm7, %v1859_v41, %v8424_v50  ;;  %v1670_v19 = vsel %vm11997_vm12, %v1645_v16, %v8424_v50  ;;  %v1665_v54 = vsel %vm11998_vm5, %v1640_v30, %v7927_v49  ;;  %vm11999_vm14 = vmmov %vm11998_vm5  ;;  %vm12000_vm12 = vcmask 48128  }
 0x45b   : > { %1950 = vrot.lane.b32.xlu1 %v1883_v37, %s6794_s23  ;;  %v8550_v14 = vsel %vm1671_vm8, %v1670_v19, %v8416_v12  ;;  %v1690_v38 = vsel %vm1671_vm8, %v1665_v54, %v8334_v47  ;;  %v1663_v50 = vsel %vm11999_vm14, %v1638_v10, %v11992_v28  ;;  %v1718_v12 = vsel %vm1321_vm0, %v8388_v52, %v8359_v1  ;;  %vm12002_vm14 = vmmov %vm12000_vm12 }
 0x45c   : > { %v1688_v41 = vsel %vm1671_vm8, %v1663_v50, %v11993_v20  ;;  %v1742_v37 = vsel %vm1346_vm1, %v1718_v12, %v8302_v44  ;;  %vm12001_vm5 = vcmask 203776  }
 0x45d   : > { %v1949_v24 = vpop.permute.xlu2 %1948  ;;  %v1766_v19 = vsel %vm1371_vm2, %v1742_v37, %v8394_v61 }
 0x45e   : > { %v2003_v15 = vsel %vm1984_vm15, %v1690_v38, %v1949_v24  ;;  %v1790_v54 = vsel %vm1396_vm3, %v1766_v19, %v8468_v4 }
 0x45f   : > { %v2042_v60 = vrot.slane %v2003_v15, 4  ;;  %2099 = vst [vmem:[#allocation1 + $0x11] ss:$2 sm:$0xff] %v2003_v15  ;;  %v1814_v24 = vsel %vm1421_vm4, %v1790_v54, %v1278_v46  ;;  %v1344_v15 = vsel %vm1321_vm0, %v11993_v20, %v11914_v59 }
 0x460   : > { %v1838_v38 = vsel %vm12000_vm12, %v1814_v24, %v1290_v27 }
 0x461   : > { %2100 = vst [vmem:[#allocation1 + $0x20] ss:$2 sm:$0xff] %v2042_v60  ;;  %v1945_v30 = vpop.permute.xlu0 %1944  ;;  %v1369_v60 = vsel %vm1346_vm1, %v1344_v15, %v7823_v9 }
 0x462   : > { %v2001_v16 = vsel %vm1984_vm15, %v1688_v41, %v1945_v30  ;;  %v1394_v41 = vsel %vm1371_vm2, %v1369_v60, %v7890_v32  ;;  %v1719_v30 = vsel %vm1321_vm0, %v8317_v29, %v8414_v0  ;;  %v12005_v60 = vld [vmem:[#allocation22_spill] sm:$0xff] }
 0x463   : > { %v2041_v53 = vrot.slane %v2001_v16, 4  ;;  %2096 = vst [vmem:[#allocation1] ss:$2 sm:$0xff] %v2001_v16  ;;  %v1419_v46 = vsel %vm1396_vm3, %v1394_v41, %v7927_v49 }
 0x464   : > { %v1444_v27 = vsel %vm1421_vm4, %v1419_v46, %v8334_v47  ;;  %v12007_v46 = vld [vmem:[#allocation30_spill] sm:$0xff] }
 0x465   : > { %2097 = vst [vmem:[#allocation1 + $0x1] ss:$2 sm:$0xff] %v2041_v53  ;;  %v1469_v37 = vsel %vm12002_vm14, %v1444_v27, %v8311_v21  ;;  %v1743_v53 = vsel %vm1346_vm1, %v1719_v30, %v8405_v56  ;;  %vm12006_vm14 = vcmask 97280   ;;  %v12008_v30 = vld [vmem:[#allocation29_spill] sm:$0xff] }
 0x466   : > { %v1494_v54 = vsel %vm1471_vm6, %v1469_v37, %v8298_v40  ;;  %v1767_v29 = vsel %vm1371_vm2, %v1743_v53, %v8412_v25  ;;  %v12009_v53 = vld [vmem:[#allocation44_spill] sm:$0xff] }
 0x469   : > { %v1302_v10 = vpop.permute.xlu1 %1301 }
 0x46a   : > { %v1862_v50 = vsel %vm1471_vm6, %v1838_v38, %v1302_v10 }
 0x46b   : > { %v1886_v12 = vsel %vm1496_vm7, %v1862_v50, %v1314_v7  ;;  %v1339_v7 = vsel %vm1321_vm0, %v11882_v13, %v11967_v39  ;;  %v1519_v39 = vsel %vm1496_vm7, %v1494_v54, %v8319_v11  ;;  %v12004_v50 = vld [vmem:[#allocation48_spill] sm:$0xff]  ;;  %v12011_v54 = vld [vmem:[#allocation47_spill] sm:$0xff] }
 0x46c   : > { %v2104_v4 = vld.sshfl [vmem:[#allocation1] sm:$0xff pattern:$0x75316420]  ;;  %1956 = vrot.lane.b32.xlu0 %v1886_v12, %s6794_s23  ;;  %v1364_v16 = vsel %vm1346_vm1, %v1339_v7, %v11968_v2  ;;  %v1791_v2 = vsel %vm1396_vm3, %v1767_v29, %v8494_v35  ;;  %v1544_v25 = vsel %vm1521_vm9, %v1519_v39, %v8304_v63  ;;  %v1716_v12 = vsel %vm1321_vm0, %v8351_v5, %v12005_v60 }
 0x46d   : > { %5970 = vmatmul.msk.f32.gmra.mxu0 %vm12001_vm5, %v2104_v4  ;;  %v1389_v19 = vsel %vm1371_vm2, %v1364_v16, %v11970_v18  ;;  %v1815_v56 = vsel %vm1421_vm4, %v1791_v2, %v8428_v23  ;;  %vm12003_vm5 = vmmov %vm12000_vm12  ;;  %v1569_v23 = vsel %vm1546_vm10, %v1544_v25, %v8313_v58  ;;  %v8643_v4 = vpop.f32.mrf.mxu0  ;;  %v1740_v16 = vsel %vm1346_vm1, %v1716_v12, %v12008_v30  ;;  %v12013_v25 = vld [vmem:[#allocation56_spill] sm:$0xff] }
 0x46e   : > { %v1414_v13 = vsel %vm1396_vm3, %v1389_v19, %v11971_v51  ;;  %v1839_v0 = vsel %vm12000_vm12, %v1815_v56, %v8455_v26  ;;  %v1594_v10 = vsel %vm1571_vm11, %v1569_v23, %v8351_v5  ;;  %vm12010_vm12 = vcmask 113664   ;;  %v12014_v23 = vld [vmem:[#allocation53_spill] sm:$0xff] }
 0x46f   : > { %v1439_v18 = vsel %vm1421_vm4, %v1414_v13, %v11973_v43  ;;  %v1619_v41 = vsel %vm12006_vm14, %v1594_v10, %v12005_v60  ;;  %v1764_v5 = vsel %vm1371_vm2, %v1740_v16, %v12009_v53  ;;  %v12018_v16 = vld [vmem:[#allocation42_spill] sm:$0xff] }
 0x470   : > { %v1464_v35 = vsel %vm12003_vm5, %v1439_v18, %v11904_v42  ;;  %v1644_v7 = vsel %vm1621_vm13, %v1619_v41, %v12008_v30  ;;  %v12012_v18 = vld [vmem:[#allocation21_spill] sm:$0xff] }
 0x471   : > { %v1489_v26 = vsel %vm1471_vm6, %v1464_v35, %v7769_v33  ;;  %v1669_v19 = vsel %vm12010_vm12, %v1644_v7, %v12009_v53  ;;  %v12016_v30 = vld [vmem:[#allocation49_spill] sm:$0xff] }
 0x472   : > { %v1514_v15 = vsel %vm1496_vm7, %v1489_v26, %v7708_v57 }
 0x479   : > { %v1308_v24 = vpop.permute.xlu1 %1307 }
 0x47a   : > { %v1863_v51 = vsel %vm1471_vm6, %v1839_v0, %v1308_v24 }
 0x47b   : > { %v1887_v38 = vsel %vm1496_vm7, %v1863_v51, %v8478_v34  ;;  %v1539_v34 = vsel %vm1521_vm9, %v1514_v15, %v12004_v50  ;;  %v1343_v15 = vsel %vm1321_vm0, %v12007_v46, %v12011_v54 }
 0x47c   : > { %1958 = vrot.lane.b32.xlu2 %v1887_v38, %s6794_s23  ;;  %v1564_v27 = vsel %vm1546_vm10, %v1539_v34, %v12007_v46  ;;  %v8671_v38 = vpop.f32.mrf.mxu0 }
 0x47d   : > { %v1589_v29 = vsel %vm1571_vm11, %v1564_v27, %v12011_v54 }
 0x47e   : > { %v1614_v0 = vsel %vm12006_vm14, %v1589_v29, %v12012_v18  ;;  %vm12017_vm14 = vcmask 48128  }
 0x47f   : > { %v1639_v51 = vsel %vm1621_vm13, %v1614_v0, %v12013_v25 }
 0x489   : > { %v1205_v37 = vpop.permute.xlu1 %1204 }
 0x48a   : > { %v8658_v13 = vsel %vm1671_vm8, %v1669_v19, %v1205_v37  ;;  %v1788_v39 = vsel %vm1396_vm3, %v1764_v5, %v1205_v37  ;;  %v12019_v19 = vld [vmem:[#allocation57_spill] sm:$0xff] }
 0x48b   : > { %v1812_v2 = vsel %vm1421_vm4, %v1788_v39, %v8388_v52  ;;  %v1664_v52 = vsel %vm12010_vm12, %v1639_v51, %v12014_v23  ;;  %vm12020_vm12 = vcmask 97280  }
 0x48c   : > { %v1836_v56 = vsel %vm12003_vm5, %v1812_v2, %v8359_v1  ;;  %v1689_v1 = vsel %vm1671_vm8, %v1664_v52, %v11988_v22  ;;  %vm12015_vm5 = vcmask 203776  }
 0x48d   : > { %v1860_v24 = vsel %vm1471_vm6, %v1836_v56, %v8302_v44  ;;  %v8681_v44 = vpop.f32.mrf.mxu0 }
 0x48e   : > { %v1884_v35 = vsel %vm1496_vm7, %v1860_v24, %v8394_v61  ;;  %v1368_v61 = vsel %vm1346_vm1, %v1343_v15, %v12012_v18 }
 0x48f   : > { %1952 = vrot.lane.b32.xlu0 %v1884_v35, %s6794_s23  ;;  %v1393_v60 = vsel %vm1371_vm2, %v1368_v61, %v12013_v25  ;;  %s6797_s23 = smov 96  }
 0x490   : > { %v1418_v12 = vsel %vm1396_vm3, %v1393_v60, %v12014_v23 }
 0x491   : > { %v1947_v26 = vpop.permute.xlu1 %1946  ;;  %v1443_v27 = vsel %vm1421_vm4, %v1418_v12, %v11988_v22 }
 0x492   : > { %v2002_v10 = vsel %vm1984_vm15, %v1689_v1, %v1947_v26  ;;  %v1468_v7 = vsel %vm12017_vm14, %v1443_v27, %v12016_v30  ;;  %v1341_v1 = vsel %vm1321_vm0, %v11973_v43, %v11904_v42 }
 0x493   : > { %2098 = vst [vmem:[#allocation1 + $0x10] ss:$2 sm:$0xff] %v2002_v10  ;;  %v1493_v37 = vsel %vm1471_vm6, %v1468_v7, %v12018_v16 }
 0x494   : > { %v1518_v5 = vsel %vm1496_vm7, %v1493_v37, %v12019_v19 }
 0x495   : > { %v2181_v41 = vpop.f32.mrf.mxu0  ;;  %v1543_v29 = vsel %vm1521_vm9, %v1518_v5, %v11984_v36 }
 0x496   : > { %v1568_v39 = vsel %vm1546_vm10, %v1543_v29, %v8330_v62 }
 0x497   : > { %v1593_v2 = vsel %vm1571_vm11, %v1568_v39, %v8308_v8 }
 0x498   : > { %v1618_v56 = vsel %vm12020_vm12, %v1593_v2, %v8321_v3  ;;  %v1366_v3 = vsel %vm1346_vm1, %v1341_v1, %v7769_v33 }
 0x499   : > { %v1643_v24 = vsel %vm1621_vm13, %v1618_v56, %v8338_v31  ;;  %v1391_v31 = vsel %vm1371_vm2, %v1366_v3, %v7708_v57 }
 0x49a   : > { %v2105_v34 = vld.sshfl [vmem:[#allocation1 + $0x10] sm:$0xff pattern:$0x75316420] }
 0x49b   : > { %5971 = vmatmul.msk.f32.gmra.mxu0 %vm12015_vm5, %v2105_v34  ;;  %vm12021_vm5 = vcmask 113664  }
 0x49c   : > { %v1668_v51 = vsel %vm12021_vm5, %v1643_v24, %v8401_v48  ;;  %v1416_v48 = vsel %vm1396_vm3, %v1391_v31, %v12004_v50 }
 0x49d   : > { %v8699_v53 = vpop.f32.mrf.mxu0  ;;  %v1693_v35 = vsel %vm1671_vm8, %v1668_v51, %v8515_v45  ;;  %v1441_v45 = vsel %vm1421_vm4, %v1416_v48, %v12007_v46 }
 0x49e   : > { %v1466_v10 = vsel %vm12017_vm14, %v1441_v45, %v12011_v54  ;;  %vm12022_vm14 = vcmask 203776  }
 0x49f   : > { %v1491_v42 = vsel %vm1471_vm6, %v1466_v10, %v12012_v18  ;;  %v8750_v18 = vld [vmem:[%s11666_s3] ss:$0 sm:$0xff] }
 0x4a0   : > { %v1516_v33 = vsel %vm1496_vm7, %v1491_v42, %v12013_v25  ;;  %v2182_v61 = vadd.f32 %v8750_v18, %v2181_v41  ;;  %v2173_v2 = vadd.f32 %v8750_v18, %v8643_v4 }
 0x4a1   : > { %v1541_v43 = vsel %vm1521_vm9, %v1516_v33, %v12014_v23 }
 0x4a2   : > { %v1566_v50 = vsel %vm1546_vm10, %v1541_v43, %v11988_v22  ;;  %v8758_v12 = vmax.f32 %v2182_v61, 0.0  ;;  %v8788_v24 = vmax.f32 %v2173_v2, 0.0  ;;  %v12023_v43 = vld [vmem:[#allocation32_spill] sm:$0xff] }
 0x4a3   : > { %v1591_v46 = vsel %vm1571_vm11, %v1566_v50, %v12016_v30 }
 0x4a4   : > { %v1616_v15 = vsel %vm12020_vm12, %v1591_v46, %v12018_v16  ;;  %v8761_v30 = vrot.slane %v8758_v12, 4  ;;  %v8803_v1 = vrot.slane %v8788_v24, 4 }
 0x4a5   : > { %v8711_v0 = vpop.f32.mrf.mxu0  ;;  %v1641_v54 = vsel %vm1621_vm13, %v1616_v15, %v12019_v19  ;;  %v2176_v19 = vadd.f32 %v8750_v18, %v8671_v38  ;;  %v2179_v38 = vadd.f32 %v8750_v18, %v8681_v44 }
 0x4a6   : > { %v1666_v23 = vsel %vm12021_vm5, %v1641_v54, %v11984_v36  ;;  %v2188_v31 = vadd.f32 %v8750_v18, %v8711_v0  ;;  %v1342_v0 = vsel %vm1321_vm0, %v12023_v43, %v11986_v17  ;;  %vm12024_vm0 = vcmask 48128  }
 0x4a7   : > { %v1691_v22 = vsel %vm1671_vm8, %v1666_v23, %v8330_v62  ;;  %v8784_v56 = vmax.f32 %v2176_v19, 0.0 }
 0x4a8   : > { %v8825_v10 = vmax.f32 %v2188_v31, 0.0 }
 0x4a9   : > { %v8791_v51 = vrot.slane %v8784_v56, 4 }
 0x4ad   : > { %v2190_v26 = vpop.f32.mrf.mxu0 }
 0x4b2   : > { %v1955_v52 = vpop.permute.xlu1 %1954 }
 0x4b3   : > { %v2006_v8 = vsel %vm1984_vm15, %v1693_v35, %v1955_v52  ;;  %v2185_v35 = vadd.f32 %v8750_v18, %v8699_v53 }
 0x4b4   : > { %2108 = vst [vmem:[#allocation1] ss:$2 sm:$0xff] %v2006_v8  ;;  %v2191_v8 = vadd.f32 %v8750_v18, %v2190_v26 }
 0x4b5   : > { %v2193_v57 = vpop.f32.mrf.mxu0  ;;  %v8810_v3 = vmax.f32 %v2185_v35, 0.0 }
 0x4b6   : > { %v2194_v53 = vadd.f32 %v8750_v18, %v2193_v57  ;;  %v8818_v48 = vmax.f32 %v2191_v8, 0.0  ;;  %v1367_v57 = vsel %vm1346_vm1, %v1342_v0, %v11989_v6  ;;  %vm12025_vm1 = vmmov %vm12020_vm12 }
 0x4b7   : > { %v8821_v45 = vrot.slane %v8810_v3, 4  ;;  %v1392_v6 = vsel %vm1371_vm2, %v1367_v57, %v11991_v55  ;;  %vm12026_vm2 = vmmov %vm12021_vm5 }
 0x4b8   : > { %v8823_v26 = vmax.f32 %v2194_v53, 0.0  ;;  %v8837_v50 = vrot.slane %v8818_v48, 4  ;;  %v1417_v23 = vsel %vm1396_vm3, %v1392_v6, %v11992_v28  ;;  %vm12027_vm3 = vmmov %vm12022_vm14 }
 0x4ba   : > { %v8843_v15 = vrot.slane %v8823_v26, 4 }
 0x4bd   : > { %v2196_v25 = vpop.f32.mrf.mxu0 }
 0x4be   : > { %v2197_v42 = vadd.f32 %v8750_v18, %v2196_v25 }
 0x4c0   : > { %v8846_v25 = vmax.f32 %v2197_v42, 0.0 }
 0x4c5   : > { %v2199_v27 = vpop.f32.mrf.mxu0 }
 0x4c6   : > { %v2200_v37 = vadd.f32 %v8750_v18, %v2199_v27 }
 0x4c8   : > { %v8769_v36 = vmax.f32 %v2200_v37, 0.0 }
 0x4ca   : > { %v8774_v5 = vrot.slane %v8769_v36, 4 }
 0x4cd   : > { %v1951_v34 = vpop.permute.xlu1 %1950  ;;  %v2202_v54 = vpop.f32.mrf.mxu0 }
 0x4ce   : > { %v2004_v60 = vsel %vm1984_vm15, %v1691_v22, %v1951_v34  ;;  %v1442_v22 = vsel %vm1421_vm4, %v1417_v23, %v11993_v20  ;;  %v2203_v34 = vadd.f32 %v8750_v18, %v2202_v54  ;;  %vm12028_vm4 = vmmov %vm12027_vm3 }
 0x4cf   : > { %2101 = vst [vmem:[#allocation1 + $0x21] ss:$2 sm:$0xff] %v2004_v60  ;;  %v1467_v27 = vsel %vm12024_vm0, %v1442_v22, %v11914_v59 }
 0x4d0   : > { %v8869_v28 = vmax.f32 %v2203_v34, 0.0 }
 0x4d2   : > { %v8879_v37 = vrot.slane %v8869_v28, 4 }
 0x4d5   : > { %v2205_v60 = vpop.f32.mrf.mxu0 }
 0x4d6   : > { %v2106_v7 = vld.sshfl [vmem:[#allocation1 + $0x20] sm:$0xff pattern:$0x75316420]  ;;  %v1959_v16 = vpop.permute.xlu2 %1958  ;;  %v2206_v20 = vadd.f32 %v8750_v18, %v2205_v60 }
 0x4d7   : > { %2290 = vst [vmem:[#allocation1 + $0x20] ss:$2 sm:$0xff] %v8758_v12  ;;  %v2008_v62 = vsel %vm1984_vm15, %v8550_v14, %v1959_v16  ;;  %5972 = vmatmul.msk.f32.gmra.mxu0 %vm12022_vm14, %v2106_v7  ;;  %v1492_v16 = vsel %vm1471_vm6, %v1467_v27, %v7823_v9  ;;  %vm12029_vm6 = vmmov %vm12027_vm3 }
 0x4d8   : > { %2292 = vst [vmem:[#allocation1 + $0x21] ss:$2 sm:$0xff] %v8761_v30  ;;  %v1517_v59 = vsel %vm1496_vm7, %v1492_v16, %v7890_v32  ;;  %vm2364_vm7 = vcmask 1046528  }
 0x4d9   : > { %2111 = vst [vmem:[#allocation1 + $0x11] ss:$2 sm:$0xff] %v2008_v62  ;;  %v8883_v62 = vmax.f32 %v2206_v20, 0.0 }
 0x4de   : > { %v1957_v41 = vpop.permute.xlu0 %1956 }
 0x4df   : > { %v8776_v29 = vld.sshfl [vmem:[#allocation1 + $0x20] sm:$0xff pattern:$0x75316420]  ;;  %v2007_v39 = vsel %vm1984_vm15, %v8658_v13, %v1957_v41  ;;  %v8793_v13 = vmax.f32 %v2179_v38, 0.0 }
 0x4e0   : > { %2305 = vst [vmem:[#allocation1 + $0x20] ss:$2 sm:$0xff] %v8769_v36  ;;  %v2044_v14 = vrot.slane %v2007_v39, 4 }
 0x4e1   : > { %2306 = vst [vmem:[#allocation1 + $0x21] ss:$2 sm:$0xff] %v8774_v5  ;;  %v8974_v20 = vrot.slane %v8793_v13, 4 }
 0x4e2   : > { %2109 = vst [vmem:[#allocation1 + $0x1] ss:$2 sm:$0xff] %v2007_v39  ;;  %v1542_v39 = vsel %vm1521_vm9, %v1517_v59, %v7927_v49  ;;  %vm2458_vm9 = vcmask 1045504  }
 0x4e3   : > { %2110 = vst [vmem:[#allocation1 + $0x10] ss:$2 sm:$0xff] %v2044_v14  ;;  %v1567_v32 = vsel %vm1546_vm10, %v1542_v39, %v8334_v47  ;;  %v8990_v39 = vrot.slane %v8825_v10, 4  ;;  %vm2552_vm10 = vcmask 1044480  }
 0x4e4   : > { %v1592_v14 = vsel %vm1571_vm11, %v1567_v32, %v8311_v21  ;;  %vm3441_vm11 = vcmask 261120  }
 0x4e5   : > { %v1617_v38 = vsel %vm12025_vm1, %v1592_v14, %v8298_v40 }
 0x4e6   : > { %v1642_v21 = vsel %vm1621_vm13, %v1617_v38, %v8319_v11  ;;  %vm3450_vm13 = vcmask 523264  }
 0x4e7   : > { %v1667_v40 = vsel %vm12026_vm2, %v1642_v21, %v8304_v63 }
 0x4e8   : > { %v8797_v52 = vld.sshfl [vmem:[#allocation1 + $0x20] sm:$0xff pattern:$0x75316420]  ;;  %v1692_v8 = vsel %vm1671_vm8, %v1667_v40, %v8313_v58  ;;  %vm5214_vm8 = vcmask 1043456  }
 0x4e9   : > { %2327 = vst [vmem:[#allocation1 + $0x20] ss:$2 sm:$0xff] %v8791_v51  ;;  %v8800_v4 = vld.sshfl [vmem:[#allocation1] sm:$0xff pattern:$0x75316420] }
 0x4ea   : > { %2329 = vst [vmem:[#allocation1 + $0x21] ss:$2 sm:$0xff] %v8793_v13  ;;  %v8806_v44 = vld.sshfl [vmem:[#allocation1 + $0x10] sm:$0xff pattern:$0x75316420] }
 0x4eb   : > { %2280 = vst [vmem:[#allocation1] ss:$2 sm:$0xff] %v8788_v24 }
 0x4ec   : > { %2282 = vst [vmem:[#allocation1 + $0x1] ss:$2 sm:$0xff] %v8803_v1 }
 0x4ed   : > { %2285 = vst [vmem:[#allocation1 + $0x10] ss:$2 sm:$0xff] %v8791_v51 }
 0x4ee   : > { %2287 = vst [vmem:[#allocation1 + $0x11] ss:$2 sm:$0xff] %v8793_v13 }
 0x4f1   : > { %v8828_v33 = vld.sshfl [vmem:[#allocation1 + $0x20] sm:$0xff pattern:$0x75316420] }
 0x4f2   : > { %2339 = vst [vmem:[#allocation1 + $0x20] ss:$2 sm:$0xff] %v8821_v45  ;;  %v2368_v21 = vrot.slane %v8828_v33, 1 }
 0x4f3   : > { %2340 = vst [vmem:[#allocation1 + $0x21] ss:$2 sm:$0xff] %v8825_v10  ;;  %v8840_v46 = vld.sshfl [vmem:[#allocation1] sm:$0xff pattern:$0x75316420] }
 0x4f4   : > { %2299 = vst [vmem:[#allocation1] ss:$2 sm:$0xff] %v8818_v48 }
 0x4f5   : > { %v8848_v17 = vld.sshfl [vmem:[#allocation1 + $0x10] sm:$0xff pattern:$0x75316420]  ;;  %2300 = vst [vmem:[#allocation1 + $0x1] ss:$2 sm:$0xff] %v8837_v50 }
 0x4f6   : > { %2302 = vst [vmem:[#allocation1 + $0x10] ss:$2 sm:$0xff] %v8843_v15 }
 0x4f7   : > { %2303 = vst [vmem:[#allocation1 + $0x11] ss:$2 sm:$0xff] %v8846_v25 }
 0x4fa   : > { %v8860_v61 = vld.sshfl [vmem:[#allocation1 + $0x20] sm:$0xff pattern:$0x75316420] }
 0x4fb   : > { %2349 = vst [vmem:[#allocation1 + $0x20] ss:$2 sm:$0xff] %v8843_v15 }
 0x4fc   : > { %2350 = vst [vmem:[#allocation1 + $0x21] ss:$2 sm:$0xff] %v8846_v25  ;;  %v8864_v55 = vld.sshfl [vmem:[#allocation1] sm:$0xff pattern:$0x75316420] }
 0x4fd   : > { %2319 = vst [vmem:[#allocation1] ss:$2 sm:$0xff] %v8788_v24 }
 0x4fe   : > { %v8871_v7 = vld.sshfl [vmem:[#allocation1 + $0x10] sm:$0xff pattern:$0x75316420]  ;;  %2321 = vst [vmem:[#allocation1 + $0x1] ss:$2 sm:$0xff] %v8803_v1 }
 0x4ff   : > { %2323 = vst [vmem:[#allocation1 + $0x10] ss:$2 sm:$0xff] %v8784_v56 }
 0x501   : > { %v1953_v53 = vpop.permute.xlu0 %1952 }
 0x502   : > { %v2005_v42 = vsel %vm1984_vm15, %v1692_v8, %v1953_v53  ;;  %vm3459_vm15 = vcmask 785408  }
 0x503   : > { %v8885_v41 = vld.sshfl [vmem:[#allocation1 + $0x20] sm:$0xff pattern:$0x75316420]  ;;  %v2043_v43 = vrot.slane %v2005_v42, 4  ;;  %2102 = vst [vmem:[#allocation1 + $0x30] ss:$2 sm:$0xff] %v2005_v42 }
 0x504   : > { %2359 = vst [vmem:[#allocation1 + $0x20] ss:$2 sm:$0xff] %v8879_v37 }
 0x505   : > { %2360 = vst [vmem:[#allocation1 + $0x21] ss:$2 sm:$0xff] %v8883_v62  ;;  %v8889_v19 = vld.sshfl [vmem:[#allocation1] sm:$0xff pattern:$0x75316420] }
 0x506   : > { %v8893_v9 = vld.sshfl [vmem:[#allocation1 + $0x10] sm:$0xff pattern:$0x75316420]  ;;  %2334 = vst [vmem:[#allocation1] ss:$2 sm:$0xff] %v8758_v12  ;;  %v2365_v38 = vrot.slane %v8889_v19, 1 }
 0x507   : > { %2335 = vst [vmem:[#allocation1 + $0x1] ss:$2 sm:$0xff] %v8761_v30 }
 0x508   : > { %2336 = vst [vmem:[#allocation1 + $0x10] ss:$2 sm:$0xff] %v8810_v3 }
 0x509   : > { %2103 = vst [vmem:[#allocation1 + $0x31] ss:$2 sm:$0xff] %v2043_v43 }
 0x50c   : > { %v8902_v2 = vld.sshfl [vmem:[#allocation1 + $0x20] sm:$0xff pattern:$0x75316420] }
 0x50d   : > { %2421 = vst [vmem:[#allocation1 + $0x20] ss:$2 sm:$0xff] %v8791_v51 }
 0x50e   : > { %2423 = vst [vmem:[#allocation1 + $0x21] ss:$2 sm:$0xff] %v8793_v13  ;;  %v8908_v49 = vld.sshfl [vmem:[#allocation1] sm:$0xff pattern:$0x75316420] }
 0x50f   : > { %v8910_v35 = vld.sshfl [vmem:[#allocation1 + $0x10] sm:$0xff pattern:$0x75316420]  ;;  %2344 = vst [vmem:[#allocation1] ss:$2 sm:$0xff] %v8818_v48 }
 0x510   : > { %2345 = vst [vmem:[#allocation1 + $0x1] ss:$2 sm:$0xff] %v8837_v50  ;;  %v2107_v57 = vld.sshfl [vmem:[#allocation1 + $0x30] sm:$0xff pattern:$0x75316420] }
 0x511   : > { %2346 = vst [vmem:[#allocation1 + $0x10] ss:$2 sm:$0xff] %v8823_v26  ;;  %5973 = vmatmul.msk.f32.gmra.mxu0 %vm12027_vm3, %v2107_v57  ;;  %v9015_v57 = vrot.slane %v8846_v25, 4 }
 0x512   : > { %2295 = vst [vmem:[#allocation1 + $0x30] ss:$2 sm:$0xff] %v8821_v45 }
 0x513   : > { %2297 = vst [vmem:[#allocation1 + $0x31] ss:$2 sm:$0xff] %v8825_v10 }
 0x515   : > { %v8919_v47 = vld.sshfl [vmem:[#allocation1 + $0x20] sm:$0xff pattern:$0x75316420] }
 0x516   : > { %2433 = vst [vmem:[#allocation1 + $0x20] ss:$2 sm:$0xff] %v8821_v45 }
 0x517   : > { %2434 = vst [vmem:[#allocation1 + $0x21] ss:$2 sm:$0xff] %v8825_v10  ;;  %v8925_v31 = vld.sshfl [vmem:[#allocation1] sm:$0xff pattern:$0x75316420] }
 0x518   : > { %v8928_v11 = vld.sshfl [vmem:[#allocation1 + $0x10] sm:$0xff pattern:$0x75316420]  ;;  %2354 = vst [vmem:[#allocation1] ss:$2 sm:$0xff] %v8769_v36 }
 0x519   : > { %2355 = vst [vmem:[#allocation1 + $0x1] ss:$2 sm:$0xff] %v8774_v5  ;;  %5974 = vmatmul.msk.f32.gmra.mxu0 %vm12028_vm4, %v8800_v4 }
 0x51a   : > { %2356 = vst [vmem:[#allocation1 + $0x10] ss:$2 sm:$0xff] %v8869_v28  ;;  %v8958_v22 = vld.sshfl [vmem:[#allocation1 + $0x30] sm:$0xff pattern:$0x75316420] }
 0x51b   : > { %2308 = vst [vmem:[#allocation1 + $0x30] ss:$2 sm:$0xff] %v8879_v37 }
 0x51c   : > { %2309 = vst [vmem:[#allocation1 + $0x31] ss:$2 sm:$0xff] %v8883_v62 }
 0x51e   : > { %v8933_v63 = vld.sshfl [vmem:[#allocation1 + $0x20] sm:$0xff pattern:$0x75316420] }
 0x51f   : > { %2443 = vst [vmem:[#allocation1 + $0x20] ss:$2 sm:$0xff] %v8843_v15 }
 0x520   : > { %2444 = vst [vmem:[#allocation1 + $0x21] ss:$2 sm:$0xff] %v8846_v25  ;;  %v8937_v58 = vld.sshfl [vmem:[#allocation1] sm:$0xff pattern:$0x75316420] }
 0x521   : > { %v8939_v0 = vld.sshfl [vmem:[#allocation1 + $0x10] sm:$0xff pattern:$0x75316420]  ;;  %2413 = vst [vmem:[#allocation1] ss:$2 sm:$0xff] %v8788_v24  ;;  %5975 = vmatmul.msk.f32.gmra.mxu0 %vm12029_vm6, %v8806_v44  ;;  %v2366_v44 = vrot.slane %v8893_v9, 1 }
 0x522   : > { %2415 = vst [vmem:[#allocation1 + $0x1] ss:$2 sm:$0xff] %v8803_v1  ;;  %v2372_v9 = vrot.slane %v8910_v35, 1 }
 0x523   : > { %2417 = vst [vmem:[#allocation1 + $0x10] ss:$2 sm:$0xff] %v8784_v56  ;;  %v8980_v4 = vld.sshfl [vmem:[#allocation1 + $0x30] sm:$0xff pattern:$0x75316420]  ;;  %v2367_v8 = vsel %vm2364_vm7, %v2365_v38, %v2366_v44  ;;  %v2374_v38 = vrot.slane %v8860_v61, 1 }
 0x524   : > { %2331 = vst [vmem:[#allocation1 + $0x30] ss:$2 sm:$0xff] %v8974_v20  ;;  %v2378_v61 = vrot.slane %v8928_v11, 1 }
 0x527   : > { %v8947_v54 = vld.sshfl [vmem:[#allocation1 + $0x20] sm:$0xff pattern:$0x75316420] }
 0x528   : > { %2453 = vst [vmem:[#allocation1 + $0x20] ss:$2 sm:$0xff] %v8879_v37 }
 0x529   : > { %2454 = vst [vmem:[#allocation1 + $0x21] ss:$2 sm:$0xff] %v8883_v62  ;;  %v8951_v6 = vld.sshfl [vmem:[#allocation1] sm:$0xff pattern:$0x75316420] }
 0x52a   : > { %v8953_v23 = vld.sshfl [vmem:[#allocation1 + $0x10] sm:$0xff pattern:$0x75316420]  ;;  %2428 = vst [vmem:[#allocation1] ss:$2 sm:$0xff] %v8758_v12 }
 0x52b   : > { %2429 = vst [vmem:[#allocation1 + $0x1] ss:$2 sm:$0xff] %v8761_v30  ;;  %v2333_v14 = vld.sshfl [vmem:[#allocation1 + $0x30] sm:$0xff pattern:$0x75316420] }
 0x52c   : > { %2430 = vst [vmem:[#allocation1 + $0x10] ss:$2 sm:$0xff] %v8810_v3  ;;  %v2369_v40 = vrot.slane %v2333_v14, 1  ;;  %v2371_v14 = vrot.slane %v8908_v49, 1 }
 0x52d   : > { %2341 = vst [vmem:[#allocation1 + $0x30] ss:$2 sm:$0xff] %v8990_v39 }
 0x52e   : > { %v2370_v53 = vsel %vm2364_vm7, %v2368_v21, %v2369_v40  ;;  %v2373_v40 = vsel %vm2364_vm7, %v2371_v14, %v2372_v9  ;;  %v2380_v14 = vrot.slane %v8885_v41, 1  ;;  %v2384_v41 = vrot.slane %v8939_v0, 1 }
 0x52f   : > { %v6216_v42 = vpack.i.bf16 %v2370_v53, %v2367_v8 }
 0x530   : > { %v8964_v34 = vld.sshfl [vmem:[#allocation1 + $0x20] sm:$0xff pattern:$0x75316420] }
 0x531   : > { %2515 = vst [vmem:[#allocation1 + $0x20] ss:$2 sm:$0xff] %v8791_v51  ;;  %6217 = vrot.lane.b32.xlu2 %v6216_v42, %s6795_s21  ;;  %v9037_v42 = vrot.slane %v8883_v62, 4 }
 0x532   : > { %2517 = vst [vmem:[#allocation1 + $0x21] ss:$2 sm:$0xff] %v8793_v13  ;;  %v8968_v60 = vld.sshfl [vmem:[#allocation1] sm:$0xff pattern:$0x75316420] }
 0x533   : > { %v8970_v27 = vld.sshfl [vmem:[#allocation1 + $0x10] sm:$0xff pattern:$0x75316420]  ;;  %2438 = vst [vmem:[#allocation1] ss:$2 sm:$0xff] %v8818_v48 }
 0x534   : > { %2439 = vst [vmem:[#allocation1 + $0x1] ss:$2 sm:$0xff] %v8837_v50  ;;  %v2343_v44 = vld.sshfl [vmem:[#allocation1 + $0x30] sm:$0xff pattern:$0x75316420] }
 0x535   : > { %2440 = vst [vmem:[#allocation1 + $0x10] ss:$2 sm:$0xff] %v8823_v26  ;;  %v2375_v21 = vrot.slane %v2343_v44, 1  ;;  %v2377_v44 = vrot.slane %v8925_v31, 1 }
 0x536   : > { %2351 = vst [vmem:[#allocation1 + $0x30] ss:$2 sm:$0xff] %v9015_v57 }
 0x539   : > { %v8983_v16 = vld.sshfl [vmem:[#allocation1 + $0x20] sm:$0xff pattern:$0x75316420] }
 0x53a   : > { %2527 = vst [vmem:[#allocation1 + $0x20] ss:$2 sm:$0xff] %v8821_v45 }
 0x53b   : > { %2528 = vst [vmem:[#allocation1 + $0x21] ss:$2 sm:$0xff] %v8825_v10  ;;  %v8987_v59 = vld.sshfl [vmem:[#allocation1] sm:$0xff pattern:$0x75316420] }
 0x53c   : > { %v8992_v32 = vld.sshfl [vmem:[#allocation1 + $0x10] sm:$0xff pattern:$0x75316420]  ;;  %2448 = vst [vmem:[#allocation1] ss:$2 sm:$0xff] %v8769_v36 }
 0x53d   : > { %2449 = vst [vmem:[#allocation1 + $0x1] ss:$2 sm:$0xff] %v8774_v5  ;;  %v2353_v9 = vld.sshfl [vmem:[#allocation1 + $0x30] sm:$0xff pattern:$0x75316420] }
 0x53e   : > { %2450 = vst [vmem:[#allocation1 + $0x10] ss:$2 sm:$0xff] %v8869_v28 }
 0x53f   : > { %2361 = vst [vmem:[#allocation1 + $0x30] ss:$2 sm:$0xff] %v9037_v42 }
 0x542   : > { %v9003_v43 = vld.sshfl [vmem:[#allocation1 + $0x20] sm:$0xff pattern:$0x75316420] }
 0x543   : > { %2537 = vst [vmem:[#allocation1 + $0x20] ss:$2 sm:$0xff] %v8843_v15 }
 0x544   : > { %2538 = vst [vmem:[#allocation1 + $0x21] ss:$2 sm:$0xff] %v8846_v25  ;;  %v9008_v19 = vld.sshfl [vmem:[#allocation1] sm:$0xff pattern:$0x75316420] }
 0x545   : > { %v9010_v33 = vld.sshfl [vmem:[#allocation1 + $0x10] sm:$0xff pattern:$0x75316420]  ;;  %2507 = vst [vmem:[#allocation1] ss:$2 sm:$0xff] %v8788_v24  ;;  %v2376_v24 = vsel %vm2364_vm7, %v2374_v38, %v2375_v21  ;;  %v2381_v38 = vrot.slane %v2353_v9, 1  ;;  %v2379_v21 = vsel %vm2364_vm7, %v2377_v44, %v2378_v61 }
 0x546   : > { %2509 = vst [vmem:[#allocation1 + $0x1] ss:$2 sm:$0xff] %v8803_v1  ;;  %v6221_v35 = vpack.i.bf16 %v2376_v24, %v2373_v40  ;;  %v2363_v61 = vld.sshfl [vmem:[#allocation1 + $0x30] sm:$0xff pattern:$0x75316420]  ;;  %v2383_v9 = vrot.slane %v8937_v58, 1 }
 0x547   : > { %2511 = vst [vmem:[#allocation1 + $0x10] ss:$2 sm:$0xff] %v8784_v56  ;;  %v2382_v40 = vsel %vm2364_vm7, %v2380_v14, %v2381_v38  ;;  %v2386_v44 = vrot.slane %v8902_v2, 1  ;;  %v2387_v14 = vrot.slane %v2363_v61, 1  ;;  %v2460_v2 = vrot.slane %v8953_v23, 2 }
 0x548   : > { %6222 = vrot.lane.b32.xlu0 %v6221_v35, %s6795_s21  ;;  %v6226_v11 = vpack.i.bf16 %v2382_v40, %v2379_v21  ;;  %2425 = vst [vmem:[#allocation1 + $0x30] ss:$2 sm:$0xff] %v8974_v20  ;;  %v2385_v38 = vsel %vm2364_vm7, %v2383_v9, %v2384_v41  ;;  %v2459_v61 = vrot.slane %v8951_v6, 2  ;;  %v2462_v9 = vrot.slane %v8919_v47, 2 }
 0x549   : > { %v2388_v21 = vsel %vm2364_vm7, %v2386_v44, %v2387_v14  ;;  %v2466_v23 = vrot.slane %v8970_v27, 2 }
 0x54a   : > { %6227 = vrot.lane.b32.xlu1 %v6226_v11, %s6795_s21  ;;  %v6231_v40 = vpack.i.bf16 %v2388_v21, %v2385_v38  ;;  %v2461_v14 = vsel %vm2458_vm9, %v2459_v61, %v2460_v2  ;;  %v2468_v61 = vrot.slane %v8933_v63, 2 }
 0x54b   : > { %v9024_v8 = vld.sshfl [vmem:[#allocation1 + $0x20] sm:$0xff pattern:$0x75316420] }
 0x54c   : > { %2547 = vst [vmem:[#allocation1 + $0x20] ss:$2 sm:$0xff] %v8879_v37  ;;  %6232 = vrot.lane.b32.xlu2 %v6231_v40, %s6795_s21 }
 0x54d   : > { %2548 = vst [vmem:[#allocation1 + $0x21] ss:$2 sm:$0xff] %v8883_v62  ;;  %v9029_v53 = vld.sshfl [vmem:[#allocation1] sm:$0xff pattern:$0x75316420] }
 0x54e   : > { %v9031_v49 = vld.sshfl [vmem:[#allocation1 + $0x10] sm:$0xff pattern:$0x75316420]  ;;  %2522 = vst [vmem:[#allocation1] ss:$2 sm:$0xff] %v8758_v12 }
 0x54f   : > { %2523 = vst [vmem:[#allocation1 + $0x1] ss:$2 sm:$0xff] %v8761_v30  ;;  %v2427_v41 = vld.sshfl [vmem:[#allocation1 + $0x30] sm:$0xff pattern:$0x75316420] }
 0x550   : > { %2524 = vst [vmem:[#allocation1 + $0x10] ss:$2 sm:$0xff] %v8810_v3  ;;  %v2463_v44 = vrot.slane %v2427_v41, 2  ;;  %v2465_v41 = vrot.slane %v8968_v60, 2 }
 0x551   : > { %2435 = vst [vmem:[#allocation1 + $0x30] ss:$2 sm:$0xff] %v8990_v39 }
 0x552   : > { %v2464_v38 = vsel %vm2458_vm9, %v2462_v9, %v2463_v44  ;;  %v2467_v44 = vsel %vm2458_vm9, %v2465_v41, %v2466_v23  ;;  %v2474_v23 = vrot.slane %v8947_v54, 2 }
 0x553   : > { %v6236_v21 = vpack.i.bf16 %v2464_v38, %v2461_v14  ;;  %v2472_v38 = vrot.slane %v8992_v32, 2 }
 0x554   : > { %v9045_v24 = vld.sshfl [vmem:[#allocation1 + $0x20] sm:$0xff pattern:$0x75316420] }
 0x555   : > { %2611 = vst [vmem:[#allocation1 + $0x20] ss:$2 sm:$0xff] %v8761_v30  ;;  %6237 = vrot.lane.b32.xlu0 %v6236_v21, %s6796_s22  ;;  %v2471_v21 = vrot.slane %v8987_v59, 2  ;;  %v2478_v59 = vrot.slane %v9010_v33, 2 }
 0x556   : > { %2613 = vst [vmem:[#allocation1 + $0x21] ss:$2 sm:$0xff] %v8810_v3  ;;  %v9050_v35 = vld.sshfl [vmem:[#allocation1] sm:$0xff pattern:$0x75316420] }
 0x557   : > { %v9052_v31 = vld.sshfl [vmem:[#allocation1 + $0x10] sm:$0xff pattern:$0x75316420]  ;;  %2532 = vst [vmem:[#allocation1] ss:$2 sm:$0xff] %v8818_v48 }
 0x558   : > { %2533 = vst [vmem:[#allocation1 + $0x1] ss:$2 sm:$0xff] %v8837_v50  ;;  %v2437_v2 = vld.sshfl [vmem:[#allocation1 + $0x30] sm:$0xff pattern:$0x75316420] }
 0x559   : > { %2534 = vst [vmem:[#allocation1 + $0x10] ss:$2 sm:$0xff] %v8823_v26  ;;  %v2469_v9 = vrot.slane %v2437_v2, 2 }
 0x55a   : > { %2445 = vst [vmem:[#allocation1 + $0x30] ss:$2 sm:$0xff] %v9015_v57 }
 0x55d   : > { %v9063_v11 = vld.sshfl [vmem:[#allocation1 + $0x20] sm:$0xff pattern:$0x75316420] }
 0x55e   : > { %2626 = vst [vmem:[#allocation1 + $0x20] ss:$2 sm:$0xff] %v8774_v5 }
 0x55f   : > { %2627 = vst [vmem:[#allocation1 + $0x21] ss:$2 sm:$0xff] %v8869_v28  ;;  %v9068_v0 = vld.sshfl [vmem:[#allocation1] sm:$0xff pattern:$0x75316420] }
 0x560   : > { %v9070_v58 = vld.sshfl [vmem:[#allocation1 + $0x10] sm:$0xff pattern:$0x75316420]  ;;  %2542 = vst [vmem:[#allocation1] ss:$2 sm:$0xff] %v8769_v36 }
 0x561   : > { %2543 = vst [vmem:[#allocation1 + $0x1] ss:$2 sm:$0xff] %v8774_v5  ;;  %v2447_v60 = vld.sshfl [vmem:[#allocation1 + $0x30] sm:$0xff pattern:$0x75316420] }
 0x562   : > { %2544 = vst [vmem:[#allocation1 + $0x10] ss:$2 sm:$0xff] %v8869_v28  ;;  %v2475_v2 = vrot.slane %v2447_v60, 2  ;;  %v2480_v60 = vrot.slane %v8964_v34, 2  ;;  %v2554_v34 = vrot.slane %v9031_v49, 3 }
 0x563   : > { %2455 = vst [vmem:[#allocation1 + $0x30] ss:$2 sm:$0xff] %v9037_v42 }
 0x566   : > { %v9081_v40 = vld.sshfl [vmem:[#allocation1 + $0x20] sm:$0xff pattern:$0x75316420] }
 0x567   : > { %12030 = vst [vmem:[#allocation38_spill] sm:$0xff] %v9081_v40 }
 0x568   : > { %2650 = vst [vmem:[#allocation1 + $0x20] ss:$2 sm:$0xff] %v8821_v45  ;;  %v9086_v6 = vld.sshfl [vmem:[#allocation1] sm:$0xff pattern:$0x75316420] }
 0x569   : > { %2652 = vst [vmem:[#allocation1 + $0x21] ss:$2 sm:$0xff] %v8825_v10  ;;  %v9088_v47 = vld.sshfl [vmem:[#allocation1 + $0x10] sm:$0xff pattern:$0x75316420] }
 0x56a   : > { %2601 = vst [vmem:[#allocation1] ss:$2 sm:$0xff] %v8803_v1  ;;  %v2470_v1 = vsel %vm2458_vm9, %v2468_v61, %v2469_v9  ;;  %v2473_v61 = vsel %vm2458_vm9, %v2471_v21, %v2472_v38  ;;  %v2476_v9 = vsel %vm2458_vm9, %v2474_v23, %v2475_v2  ;;  %v2457_v54 = vld.sshfl [vmem:[#allocation1 + $0x30] sm:$0xff pattern:$0x75316420] }
 0x56b   : > { %2603 = vst [vmem:[#allocation1 + $0x1] ss:$2 sm:$0xff] %v8784_v56  ;;  %v6241_v14 = vpack.i.bf16 %v2470_v1, %v2467_v44  ;;  %v6246_v32 = vpack.i.bf16 %v2476_v9, %v2473_v61  ;;  %v2481_v38 = vrot.slane %v2457_v54, 2  ;;  %v2556_v54 = vrot.slane %v8983_v16, 3 }
 0x56c   : > { %2606 = vst [vmem:[#allocation1 + $0x10] ss:$2 sm:$0xff] %v8793_v13 }
 0x56d   : > { %2608 = vst [vmem:[#allocation1 + $0x11] ss:$2 sm:$0xff] %v8974_v20  ;;  %6242 = vrot.lane.b32.xlu1 %v6241_v14, %s6796_s22  ;;  %6247 = vrot.lane.b32.xlu2 %v6246_v32, %s6796_s22  ;;  %v2477_v14 = vrot.slane %v9008_v19, 2  ;;  %v2482_v2 = vsel %vm2458_vm9, %v2480_v60, %v2481_v38  ;;  %v2553_v32 = vrot.slane %v9029_v53, 3 }
 0x56e   : > { %2519 = vst [vmem:[#allocation1 + $0x30] ss:$2 sm:$0xff] %v8974_v20 }
 0x56f   : > { %v2479_v23 = vsel %vm2458_vm9, %v2477_v14, %v2478_v59  ;;  %v2208_v14 = vpop.f32.mrf.mxu0  ;;  %v2555_v60 = vsel %vm2552_vm10, %v2553_v32, %v2554_v34  ;;  %v2560_v34 = vrot.slane %v9052_v31, 3  ;;  %v2559_v32 = vrot.slane %v9050_v35, 3 }
 0x570   : > { %v9100_v27 = vld.sshfl [vmem:[#allocation1 + $0x20] sm:$0xff pattern:$0x75316420]  ;;  %v6251_v61 = vpack.i.bf16 %v2482_v2, %v2479_v23  ;;  %v2209_v2 = vadd.f32 %v8750_v18, %v2208_v14  ;;  %v2566_v35 = vrot.slane %v9070_v58, 3 }
 0x571   : > { %2666 = vst [vmem:[#allocation1 + $0x21] ss:$2 sm:$0xff] %v8883_v62 }
 0x572   : > { %2665 = vst [vmem:[#allocation1 + $0x20] ss:$2 sm:$0xff] %v8879_v37  ;;  %v9105_v56 = vld.sshfl [vmem:[#allocation1] sm:$0xff pattern:$0x75316420]  ;;  %6252 = vrot.lane.b32.xlu0 %v6251_v61, %s6796_s22  ;;  %v9165_v16 = vmax.f32 %v2209_v2, 0.0 }
 0x573   : > { %12031 = vst [vmem:[#allocation54_spill] sm:$0xff] %v9105_v56 }
 0x574   : > { %2620 = vst [vmem:[#allocation1] ss:$2 sm:$0xff] %v8837_v50  ;;  %v9108_v63 = vld.sshfl [vmem:[#allocation1 + $0x10] sm:$0xff pattern:$0x75316420]  ;;  %v9175_v14 = vrot.slane %v9165_v16, 4 }
 0x575   : > { %12032 = vst [vmem:[#allocation51_spill] sm:$0xff] %v9108_v63  ;;  %v2521_v33 = vld.sshfl [vmem:[#allocation1 + $0x30] sm:$0xff pattern:$0x75316420] }
 0x576   : > { %2621 = vst [vmem:[#allocation1 + $0x1] ss:$2 sm:$0xff] %v8823_v26  ;;  %v2557_v59 = vrot.slane %v2521_v33, 3 }
 0x577   : > { %2623 = vst [vmem:[#allocation1 + $0x10] ss:$2 sm:$0xff] %v8846_v25 }
 0x578   : > { %2624 = vst [vmem:[#allocation1 + $0x11] ss:$2 sm:$0xff] %v9015_v57  ;;  %v2558_v38 = vsel %vm2552_vm10, %v2556_v54, %v2557_v59  ;;  %v2562_v54 = vrot.slane %v9003_v43, 3 }
 0x579   : > { %v9117_v41 = vld.sshfl [vmem:[#allocation1 + $0x20] sm:$0xff pattern:$0x75316420]  ;;  %2529 = vst [vmem:[#allocation1 + $0x30] ss:$2 sm:$0xff] %v8990_v39  ;;  %v6256_v49 = vpack.i.bf16 %v2558_v38, %v2555_v60  ;;  %v2561_v38 = vsel %vm2552_vm10, %v2559_v32, %v2560_v34  ;;  %v2568_v32 = vrot.slane %v9024_v8, 3 }
 0x57a   : > { %2703 = vst [vmem:[#allocation1 + $0x20] ss:$2 sm:$0xff] %v8758_v12 }
 0x57b   : > { %2705 = vst [vmem:[#allocation1 + $0x21] ss:$2 sm:$0xff] %v8761_v30  ;;  %6257 = vrot.lane.b32.xlu1 %v6256_v49, %s6797_s23 }
 0x57d   : > { %v9122_v44 = vld.sshfl [vmem:[#allocation1] sm:$0xff pattern:$0x75316420] }
 0x57e   : > { %2640 = vst [vmem:[#allocation1] ss:$2 sm:$0xff] %v8791_v51 }
 0x57f   : > { %v9126_v1 = vld.sshfl [vmem:[#allocation1 + $0x10] sm:$0xff pattern:$0x75316420]  ;;  %2642 = vst [vmem:[#allocation1 + $0x1] ss:$2 sm:$0xff] %v8793_v13 }
 0x580   : > { %2645 = vst [vmem:[#allocation1 + $0x10] ss:$2 sm:$0xff] %v8758_v12  ;;  %v2531_v33 = vld.sshfl [vmem:[#allocation1 + $0x30] sm:$0xff pattern:$0x75316420] }
 0x581   : > { %2647 = vst [vmem:[#allocation1 + $0x11] ss:$2 sm:$0xff] %v8761_v30  ;;  %v2563_v59 = vrot.slane %v2531_v33, 3  ;;  %v2565_v33 = vrot.slane %v9068_v0, 3  ;;  %v2572_v0 = vrot.slane %v9088_v47, 3 }
 0x582   : > { %v9136_v21 = vld.sshfl [vmem:[#allocation1 + $0x20] sm:$0xff pattern:$0x75316420]  ;;  %2539 = vst [vmem:[#allocation1 + $0x30] ss:$2 sm:$0xff] %v9015_v57 }
 0x583   : > { %2715 = vst [vmem:[#allocation1 + $0x20] ss:$2 sm:$0xff] %v8818_v48  ;;  %v2564_v49 = vsel %vm2552_vm10, %v2562_v54, %v2563_v59  ;;  %v2567_v59 = vsel %vm2552_vm10, %v2565_v33, %v2566_v35 }
 0x584   : > { %2716 = vst [vmem:[#allocation1 + $0x21] ss:$2 sm:$0xff] %v8837_v50  ;;  %v6261_v31 = vpack.i.bf16 %v2564_v49, %v2561_v38 }
 0x586   : > { %v9141_v9 = vld.sshfl [vmem:[#allocation1] sm:$0xff pattern:$0x75316420]  ;;  %6262 = vrot.lane.b32.xlu2 %v6261_v31, %s6797_s23 }
 0x587   : > { %2659 = vst [vmem:[#allocation1] ss:$2 sm:$0xff] %v8843_v15 }
 0x588   : > { %2660 = vst [vmem:[#allocation1 + $0x1] ss:$2 sm:$0xff] %v8846_v25  ;;  %v2648_v19 = vld.sshfl [vmem:[#allocation1 + $0x10] sm:$0xff pattern:$0x75316420] }
 0x589   : > { %2662 = vst [vmem:[#allocation1 + $0x10] ss:$2 sm:$0xff] %v8769_v36  ;;  %v2541_v34 = vld.sshfl [vmem:[#allocation1 + $0x30] sm:$0xff pattern:$0x75316420]  ;;  %v6276_v40 = vpack.i.bf16 %v2648_v19, %v9141_v9  ;;  %v2571_v9 = vrot.slane %v9086_v6, 3 }
 0x58a   : > { %2663 = vst [vmem:[#allocation1 + $0x11] ss:$2 sm:$0xff] %v8774_v5  ;;  %v2569_v54 = vrot.slane %v2541_v34, 3  ;;  %v2574_v19 = vrot.slane %v9045_v24, 3 }
 0x58b   : > { %v9155_v23 = vld.sshfl [vmem:[#allocation1 + $0x20] sm:$0xff pattern:$0x75316420]  ;;  %2549 = vst [vmem:[#allocation1 + $0x30] ss:$2 sm:$0xff] %v9037_v42 }
 0x58c   : > { %2725 = vst [vmem:[#allocation1 + $0x20] ss:$2 sm:$0xff] %v8769_v36  ;;  %v2570_v38 = vsel %vm2552_vm10, %v2568_v32, %v2569_v54 }
 0x58d   : > { %2726 = vst [vmem:[#allocation1 + $0x21] ss:$2 sm:$0xff] %v8774_v5  ;;  %v6266_v31 = vpack.i.bf16 %v2570_v38, %v2567_v59 }
 0x58e   : > { %6277 = vrot.lane.b32.xlu2 %v6276_v40, %s6795_s21  ;;  %v2573_v40 = vsel %vm2552_vm10, %v2571_v9, %v2572_v0 }
 0x58f   : > { %v9159_v53 = vld.sshfl [vmem:[#allocation1] sm:$0xff pattern:$0x75316420]  ;;  %6267 = vrot.lane.b32.xlu0 %v6266_v31, %s6797_s23 }
 0x590   : > { %2695 = vst [vmem:[#allocation1] ss:$2 sm:$0xff] %v8791_v51 }
 0x591   : > { %2697 = vst [vmem:[#allocation1 + $0x1] ss:$2 sm:$0xff] %v8793_v13  ;;  %v9167_v61 = vld.sshfl [vmem:[#allocation1 + $0x10] sm:$0xff pattern:$0x75316420] }
 0x592   : > { %2699 = vst [vmem:[#allocation1 + $0x10] ss:$2 sm:$0xff] %v8974_v20  ;;  %v2551_v35 = vld.sshfl [vmem:[#allocation1 + $0x30] sm:$0xff pattern:$0x75316420]  ;;  %v6281_v59 = vpack.i.bf16 %v9167_v61, %v9159_v53 }
 0x593   : > { %v2575_v34 = vrot.slane %v2551_v35, 3  ;;  %2616 = vst [vmem:[#allocation1 + $0x30] ss:$2 sm:$0xff] %v8825_v10 }
 0x594   : > { %v9177_v60 = vld.sshfl [vmem:[#allocation1 + $0x20] sm:$0xff pattern:$0x75316420]  ;;  %2618 = vst [vmem:[#allocation1 + $0x31] ss:$2 sm:$0xff] %v8990_v39 }
 0x595   : > { %2735 = vst [vmem:[#allocation1 + $0x20] ss:$2 sm:$0xff] %v9165_v16  ;;  %v2576_v33 = vsel %vm2552_vm10, %v2574_v19, %v2575_v34 }
 0x596   : > { %2736 = vst [vmem:[#allocation1 + $0x21] ss:$2 sm:$0xff] %v9175_v14  ;;  %v6271_v32 = vpack.i.bf16 %v2576_v33, %v2573_v40 }
 0x598   : > { %v9182_v2 = vld.sshfl [vmem:[#allocation1] sm:$0xff pattern:$0x75316420]  ;;  %6272 = vrot.lane.b32.xlu1 %v6271_v32, %s6797_s23 }
 0x599   : > { %2710 = vst [vmem:[#allocation1] ss:$2 sm:$0xff] %v8821_v45  ;;  %v9188_v43 = vld.sshfl [vmem:[#allocation1 + $0x10] sm:$0xff pattern:$0x75316420] }
 0x59a   : > { %2711 = vst [vmem:[#allocation1 + $0x1] ss:$2 sm:$0xff] %v8825_v10  ;;  %v2741_v63 = vrot.slane %v9188_v43, 1 }
 0x59b   : > { %2712 = vst [vmem:[#allocation1 + $0x10] ss:$2 sm:$0xff] %v8990_v39  ;;  %v9230_v6 = vld.sshfl [vmem:[#allocation1 + $0x30] sm:$0xff pattern:$0x75316420] }
 0x59c   : > { %2629 = vst [vmem:[#allocation1 + $0x30] ss:$2 sm:$0xff] %v8883_v62 }
 0x59d   : > { %v9197_v49 = vld.sshfl [vmem:[#allocation1 + $0x20] sm:$0xff pattern:$0x75316420]  ;;  %2630 = vst [vmem:[#allocation1 + $0x31] ss:$2 sm:$0xff] %v9037_v42 }
 0x59e   : > { %2796 = vst [vmem:[#allocation1 + $0x20] ss:$2 sm:$0xff] %v8758_v12 }
 0x59f   : > { %2798 = vst [vmem:[#allocation1 + $0x21] ss:$2 sm:$0xff] %v8761_v30 }
 0x5a0   : > { %6282 = vrot.lane.b32.xlu1 %v6281_v59, %s6795_s21 }
 0x5a1   : > { %v9201_v58 = vld.sshfl [vmem:[#allocation1] sm:$0xff pattern:$0x75316420] }
 0x5a2   : > { %2720 = vst [vmem:[#allocation1] ss:$2 sm:$0xff] %v8843_v15  ;;  %v9207_v8 = vld.sshfl [vmem:[#allocation1 + $0x10] sm:$0xff pattern:$0x75316420] }
 0x5a3   : > { %2721 = vst [vmem:[#allocation1 + $0x1] ss:$2 sm:$0xff] %v8846_v25 }
 0x5a4   : > { %2722 = vst [vmem:[#allocation1 + $0x10] ss:$2 sm:$0xff] %v9015_v57  ;;  %v9248_v35 = vld.sshfl [vmem:[#allocation1 + $0x30] sm:$0xff pattern:$0x75316420] }
 0x5a5   : > { %12034 = vst [vmem:[#allocation23_spill] sm:$0xff] %v9248_v35 }
 0x5a6   : > { %v9218_v47 = vld.sshfl [vmem:[#allocation1 + $0x20] sm:$0xff pattern:$0x75316420]  ;;  %2655 = vst [vmem:[#allocation1 + $0x30] ss:$2 sm:$0xff] %v8818_v48 }
 0x5a7   : > { %2808 = vst [vmem:[#allocation1 + $0x20] ss:$2 sm:$0xff] %v8818_v48 }
 0x5a8   : > { %2809 = vst [vmem:[#allocation1 + $0x21] ss:$2 sm:$0xff] %v8837_v50 }
 0x5a9   : > { %2657 = vst [vmem:[#allocation1 + $0x31] ss:$2 sm:$0xff] %v8837_v50 }
 0x5aa   : > { %v9222_v54 = vld.sshfl [vmem:[#allocation1] sm:$0xff pattern:$0x75316420] }
 0x5ab   : > { %2730 = vst [vmem:[#allocation1] ss:$2 sm:$0xff] %v8879_v37  ;;  %v9226_v24 = vld.sshfl [vmem:[#allocation1 + $0x10] sm:$0xff pattern:$0x75316420] }
 0x5ac   : > { %2731 = vst [vmem:[#allocation1 + $0x1] ss:$2 sm:$0xff] %v8883_v62 }
 0x5ad   : > { %2732 = vst [vmem:[#allocation1 + $0x10] ss:$2 sm:$0xff] %v9037_v42 }
 0x5af   : > { %v9236_v38 = vld.sshfl [vmem:[#allocation1 + $0x20] sm:$0xff pattern:$0x75316420] }
 0x5b0   : > { %12033 = vst [vmem:[#allocation52_spill] sm:$0xff] %v9236_v38  ;;  %v2658_v19 = vld.sshfl [vmem:[#allocation1 + $0x30] sm:$0xff pattern:$0x75316420] }
 0x5b1   : > { %2818 = vst [vmem:[#allocation1 + $0x20] ss:$2 sm:$0xff] %v8769_v36  ;;  %v6286_v34 = vpack.i.bf16 %v2658_v19, %v9100_v27 }
 0x5b2   : > { %2819 = vst [vmem:[#allocation1 + $0x21] ss:$2 sm:$0xff] %v8774_v5 }
 0x5b3   : > { %v9240_v31 = vld.sshfl [vmem:[#allocation1] sm:$0xff pattern:$0x75316420]  ;;  %2668 = vst [vmem:[#allocation1 + $0x30] ss:$2 sm:$0xff] %v9165_v16  ;;  %6287 = vrot.lane.b32.xlu0 %v6286_v34, %s6795_s21 }
 0x5b4   : > { %2788 = vst [vmem:[#allocation1] ss:$2 sm:$0xff] %v8791_v51  ;;  %v9244_v0 = vld.sshfl [vmem:[#allocation1 + $0x10] sm:$0xff pattern:$0x75316420] }
 0x5b5   : > { %2790 = vst [vmem:[#allocation1 + $0x1] ss:$2 sm:$0xff] %v8793_v13 }
 0x5b6   : > { %2792 = vst [vmem:[#allocation1 + $0x10] ss:$2 sm:$0xff] %v8974_v20 }
 0x5b7   : > { %2669 = vst [vmem:[#allocation1 + $0x31] ss:$2 sm:$0xff] %v9175_v14 }
 0x5b9   : > { %v9252_v53 = vld.sshfl [vmem:[#allocation1 + $0x20] sm:$0xff pattern:$0x75316420] }
 0x5ba   : > { %12035 = vst [vmem:[#allocation46_spill] sm:$0xff] %v9252_v53 }
 0x5bb   : > { %2828 = vst [vmem:[#allocation1 + $0x20] ss:$2 sm:$0xff] %v9165_v16 }
 0x5bc   : > { %v9255_v61 = vld.sshfl [vmem:[#allocation1] sm:$0xff pattern:$0x75316420]  ;;  %2829 = vst [vmem:[#allocation1 + $0x21] ss:$2 sm:$0xff] %v9175_v14 }
 0x5bd   : > { %2803 = vst [vmem:[#allocation1] ss:$2 sm:$0xff] %v8821_v45  ;;  %v9259_v9 = vld.sshfl [vmem:[#allocation1 + $0x10] sm:$0xff pattern:$0x75316420] }
 0x5be   : > { %2804 = vst [vmem:[#allocation1 + $0x1] ss:$2 sm:$0xff] %v8825_v10  ;;  %v2670_v27 = vld.sshfl [vmem:[#allocation1 + $0x30] sm:$0xff pattern:$0x75316420] }
 0x5bf   : > { %2805 = vst [vmem:[#allocation1 + $0x10] ss:$2 sm:$0xff] %v8990_v39  ;;  %v6291_v59 = vpack.i.bf16 %v2670_v27, %v9117_v41  ;;  %v2740_v41 = vrot.slane %v9182_v2, 1  ;;  %v2743_v27 = vrot.slane %v9136_v21, 1  ;;  %v2747_v2 = vrot.slane %v9207_v8, 1 }
 0x5c0   : > { %2707 = vst [vmem:[#allocation1 + $0x30] ss:$2 sm:$0xff] %v8810_v3 }
 0x5c1   : > { %6292 = vrot.lane.b32.xlu2 %v6291_v59, %s6795_s21 }
 0x5c3   : > { %v9267_v40 = vld.sshfl [vmem:[#allocation1 + $0x20] sm:$0xff pattern:$0x75316420] }
 0x5c4   : > { %12036 = vst [vmem:[#allocation45_spill] sm:$0xff] %v9267_v40 }
 0x5c5   : > { %2889 = vst [vmem:[#allocation1 + $0x20] ss:$2 sm:$0xff] %v8758_v12  ;;  %v9270_v33 = vld.sshfl [vmem:[#allocation1] sm:$0xff pattern:$0x75316420] }
 0x5c6   : > { %2891 = vst [vmem:[#allocation1 + $0x21] ss:$2 sm:$0xff] %v8761_v30  ;;  %v9274_v32 = vld.sshfl [vmem:[#allocation1 + $0x10] sm:$0xff pattern:$0x75316420] }
 0x5c7   : > { %2813 = vst [vmem:[#allocation1] ss:$2 sm:$0xff] %v8843_v15  ;;  %v2709_v53 = vld.sshfl [vmem:[#allocation1 + $0x30] sm:$0xff pattern:$0x75316420] }
 0x5c8   : > { %2814 = vst [vmem:[#allocation1 + $0x1] ss:$2 sm:$0xff] %v8846_v25  ;;  %v2744_v59 = vrot.slane %v2709_v53, 1  ;;  %v2749_v53 = vrot.slane %v9155_v23, 1 }
 0x5c9   : > { %2815 = vst [vmem:[#allocation1 + $0x10] ss:$2 sm:$0xff] %v9015_v57 }
 0x5ca   : > { %2717 = vst [vmem:[#allocation1 + $0x30] ss:$2 sm:$0xff] %v8823_v26  ;;  %v2745_v56 = vsel %vm2364_vm7, %v2743_v27, %v2744_v59 }
 0x5cd   : > { %v9281_v19 = vld.sshfl [vmem:[#allocation1 + $0x20] sm:$0xff pattern:$0x75316420] }
 0x5ce   : > { %12037 = vst [vmem:[#allocation13_spill] sm:$0xff] %v9281_v19  ;;  %v2742_v19 = vsel %vm2364_vm7, %v2740_v41, %v2741_v63 }
 0x5cf   : > { %2901 = vst [vmem:[#allocation1 + $0x20] ss:$2 sm:$0xff] %v8818_v48  ;;  %v9284_v34 = vld.sshfl [vmem:[#allocation1] sm:$0xff pattern:$0x75316420]  ;;  %v6296_v38 = vpack.i.bf16 %v2745_v56, %v2742_v19  ;;  %v2746_v56 = vrot.slane %v9201_v58, 1  ;;  %v2211_v19 = vpop.f32.mrf.mxu0 }
 0x5d0   : > { %2902 = vst [vmem:[#allocation1 + $0x21] ss:$2 sm:$0xff] %v8837_v50  ;;  %v9288_v40 = vld.sshfl [vmem:[#allocation1 + $0x10] sm:$0xff pattern:$0x75316420]  ;;  %v2212_v8 = vadd.f32 %v8750_v18, %v2211_v19  ;;  %v2752_v18 = vrot.slane %v9222_v54, 1 }
 0x5d1   : > { %2823 = vst [vmem:[#allocation1] ss:$2 sm:$0xff] %v8879_v37  ;;  %6297 = vrot.lane.b32.xlu0 %v6296_v38, %s6796_s22  ;;  %v2719_v63 = vld.sshfl [vmem:[#allocation1 + $0x30] sm:$0xff pattern:$0x75316420]  ;;  %v2748_v41 = vsel %vm2364_vm7, %v2746_v56, %v2747_v2  ;;  %v2753_v2 = vrot.slane %v9226_v24, 1 }
 0x5d2   : > { %2824 = vst [vmem:[#allocation1 + $0x1] ss:$2 sm:$0xff] %v8883_v62  ;;  %v2750_v38 = vrot.slane %v2719_v63, 1  ;;  %v9329_v56 = vmax.f32 %v2212_v8, 0.0  ;;  %v4534_v24 = vld [vmem:[%s11667_s4 + $0x78] sm:$0xff]  ;;  %v4533_v54 = vld [vmem:[%s11667_s4 + $0x70] sm:$0xff] }
 0x5d3   : > { %2825 = vst [vmem:[#allocation1 + $0x10] ss:$2 sm:$0xff] %v9037_v42  ;;  %v2754_v19 = vsel %vm2364_vm7, %v2752_v18, %v2753_v2  ;;  %4639 = vmatpush.msra.mxu1 %v4534_v24  ;;  %v4532_v8 = vld [vmem:[%s11667_s4 + $0x68] sm:$0xff] }
 0x5d4   : > { %2727 = vst [vmem:[#allocation1 + $0x30] ss:$2 sm:$0xff] %v8869_v28 }
 0x5d5   : > { %4640 = vmatpush.msra.mxu1 %v4533_v54 }
 0x5d7   : > { %v9298_v35 = vld.sshfl [vmem:[#allocation1 + $0x20] sm:$0xff pattern:$0x75316420]  ;;  %4641 = vmatpush.msra.mxu1 %v4532_v8 }
 0x5d8   : > { %12038 = vst [vmem:[#allocation58_spill] sm:$0xff] %v9298_v35 }
 0x5d9   : > { %2911 = vst [vmem:[#allocation1 + $0x20] ss:$2 sm:$0xff] %v8769_v36  ;;  %v9302_v43 = vld.sshfl [vmem:[#allocation1] sm:$0xff pattern:$0x75316420] }
 0x5da   : > { %2912 = vst [vmem:[#allocation1 + $0x21] ss:$2 sm:$0xff] %v8774_v5  ;;  %v9306_v21 = vld.sshfl [vmem:[#allocation1 + $0x10] sm:$0xff pattern:$0x75316420] }
 0x5db   : > { %2881 = vst [vmem:[#allocation1] ss:$2 sm:$0xff] %v8791_v51  ;;  %v2751_v51 = vsel %vm2364_vm7, %v2749_v53, %v2750_v38  ;;  %v2729_v63 = vld.sshfl [vmem:[#allocation1 + $0x30] sm:$0xff pattern:$0x75316420]  ;;  %v2755_v53 = vrot.slane %v9177_v60, 1 }
 0x5dc   : > { %2883 = vst [vmem:[#allocation1 + $0x1] ss:$2 sm:$0xff] %v8793_v13  ;;  %v6301_v27 = vpack.i.bf16 %v2751_v51, %v2748_v41  ;;  %v2756_v38 = vrot.slane %v2729_v63, 1  ;;  %v2759_v63 = vrot.slane %v9244_v0, 1  ;;  %v4530_v0 = vld [vmem:[%s11667_s4 + $0x58] sm:$0xff] }
 0x5dd   : > { %2885 = vst [vmem:[#allocation1 + $0x10] ss:$2 sm:$0xff] %v8974_v20 }
 0x5de   : > { %6302 = vrot.lane.b32.xlu1 %v6301_v27, %s6796_s22  ;;  %2737 = vst [vmem:[#allocation1 + $0x30] ss:$2 sm:$0xff] %v9329_v56  ;;  %v2757_v41 = vsel %vm2364_vm7, %v2755_v53, %v2756_v38  ;;  %v4531_v53 = vld [vmem:[%s11667_s4 + $0x60] sm:$0xff]  ;;  %v2758_v38 = vrot.slane %v9240_v31, 1  ;;  %v4529_v31 = vld [vmem:[%s11667_s4 + $0x50] sm:$0xff] }
 0x5df   : > { %v6306_v51 = vpack.i.bf16 %v2757_v41, %v2754_v19  ;;  %v2761_v19 = vrot.slane %v9197_v49, 1  ;;  %4642 = vmatpush.msra.mxu1 %v4531_v53  ;;  %v9376_v49 = vpop.permute.xlu1 %6227  ;;  %v2834_v53 = vrot.slane %v9259_v9, 2  ;;  %v2833_v9 = vrot.slane %v9255_v61, 2 }
 0x5e0   : > { %v2760_v24 = vsel %vm2364_vm7, %v2758_v38, %v2759_v63  ;;  %v4528_v63 = vld [vmem:[%s11667_s4 + $0x48] sm:$0xff] }
 0x5e1   : > { %v9316_v59 = vld.sshfl [vmem:[#allocation1 + $0x20] sm:$0xff pattern:$0x75316420]  ;;  %6307 = vrot.lane.b32.xlu2 %v6306_v51, %s6796_s22  ;;  %4643 = vmatpush.msra.mxu1 %v4530_v0  ;;  %v9393_v0 = vpop.permute.xlu0 %6222 }
 0x5e2   : > { %12039 = vst [vmem:[#allocation19_spill] sm:$0xff] %v9316_v59  ;;  %v4525_v59 = vld [vmem:[%s11667_s4 + $0x30] sm:$0xff] }
 0x5e3   : > { %2921 = vst [vmem:[#allocation1 + $0x20] ss:$2 sm:$0xff] %v9165_v16  ;;  %v9321_v58 = vld.sshfl [vmem:[#allocation1] sm:$0xff pattern:$0x75316420]  ;;  %4644 = vmatpush.msra.mxu1 %v4529_v31  ;;  %v4526_v31 = vld [vmem:[%s11667_s4 + $0x38] sm:$0xff] }
 0x5e4   : > { %12040 = vst [vmem:[#allocation59_spill] sm:$0xff] %v9321_v58  ;;  %v9325_v23 = vld.sshfl [vmem:[#allocation1 + $0x10] sm:$0xff pattern:$0x75316420]  ;;  %v9533_v58 = vrot.slane %v9329_v56, 4 }
 0x5e5   : > { %2922 = vst [vmem:[#allocation1 + $0x21] ss:$2 sm:$0xff] %v9175_v14  ;;  %v2739_v18 = vld.sshfl [vmem:[#allocation1 + $0x30] sm:$0xff pattern:$0x75316420]  ;;  %4645 = vmatpush.msra.mxu1 %v4528_v63  ;;  %v2835_v63 = vsel %vm2458_vm9, %v2833_v9, %v2834_v53 }
 0x5e6   : > { %2896 = vst [vmem:[#allocation1] ss:$2 sm:$0xff] %v8821_v45  ;;  %v2762_v41 = vrot.slane %v2739_v18, 1 }
 0x5e7   : > { %12041 = vst [vmem:[#allocation60_spill] sm:$0xff] %v9325_v23 }
 0x5e8   : > { %2897 = vst [vmem:[#allocation1 + $0x1] ss:$2 sm:$0xff] %v8825_v10  ;;  %v2763_v51 = vsel %vm2364_vm7, %v2761_v19, %v2762_v41  ;;  %v4527_v19 = vld [vmem:[%s11667_s4 + $0x40] sm:$0xff] }
 0x5e9   : > { %2898 = vst [vmem:[#allocation1 + $0x10] ss:$2 sm:$0xff] %v8990_v39  ;;  %v6311_v54 = vpack.i.bf16 %v2763_v51, %v2760_v24  ;;  %4646 = vmatpush.msra.mxu1 %v4527_v19  ;;  %v9396_v24 = vpop.permute.xlu2 %6217  ;;  %v2836_v51 = vrot.slane %v9218_v47, 2  ;;  %v9411_v47 = vpop.permute.xlu1 %6242 }
 0x5ea   : > { %2800 = vst [vmem:[#allocation1 + $0x30] ss:$2 sm:$0xff] %v8810_v3 }
 0x5eb   : > { %6312 = vrot.lane.b32.xlu0 %v6311_v54, %s6796_s22  ;;  %4647 = vmatpush.msra.mxu1 %v4526_v31  ;;  %v4522_v31 = vld [vmem:[%s11667_s4 + $0x18] sm:$0xff] }
 0x5ec   : > { %v9340_v27 = vld.sshfl [vmem:[#allocation1 + $0x20] sm:$0xff pattern:$0x75316420] }
 0x5ed   : > { %12042 = vst [vmem:[#allocation27_spill] sm:$0xff] %v9340_v27  ;;  %4648 = vmatpush.msra.mxu1 %v4525_v59  ;;  %v4523_v59 = vld [vmem:[%s11667_s4 + $0x20] sm:$0xff] }
 0x5ee   : > { %2968 = vst [vmem:[#allocation1 + $0x20] ss:$2 sm:$0xff] %v8825_v10 }
 0x5ef   : > { %v9347_v60 = vld.sshfl [vmem:[#allocation1] sm:$0xff pattern:$0x75316420]  ;;  %2970 = vst [vmem:[#allocation1 + $0x21] ss:$2 sm:$0xff] %v8990_v39 }
 0x5f0   : > { %12043 = vst [vmem:[#allocation11_spill] sm:$0xff] %v9347_v60  ;;  %v9354_v2 = vld.sshfl [vmem:[#allocation1 + $0x10] sm:$0xff pattern:$0x75316420] }
 0x5f1   : > { %2906 = vst [vmem:[#allocation1] ss:$2 sm:$0xff] %v8843_v15  ;;  %v2802_v41 = vld.sshfl [vmem:[#allocation1 + $0x30] sm:$0xff pattern:$0x75316420] }
 0x5f2   : > { %12044 = vst [vmem:[#allocation16_spill] sm:$0xff] %v9354_v2  ;;  %v2837_v54 = vrot.slane %v2802_v41, 2  ;;  %v4524_v41 = vld [vmem:[%s11667_s4 + $0x28] sm:$0xff] }
 0x5f3   : > { %2907 = vst [vmem:[#allocation1 + $0x1] ss:$2 sm:$0xff] %v8846_v25  ;;  %4649 = vmatpush.msra.mxu1 %v4524_v41  ;;  %v4520_v41 = vld [vmem:[%s11667_s4 + $0x8] sm:$0xff] }
 0x5f4   : > { %2908 = vst [vmem:[#allocation1 + $0x10] ss:$2 sm:$0xff] %v9015_v57  ;;  %v2838_v19 = vsel %vm2458_vm9, %v2836_v51, %v2837_v54  ;;  %v6238_v51 = vpop.permute.xlu0 %6237 }
 0x5f5   : > { %2810 = vst [vmem:[#allocation1 + $0x30] ss:$2 sm:$0xff] %v8823_v26  ;;  %4650 = vmatpush.msra.mxu1 %v4523_v59 }
 0x5f6   : > { %v9373_v8 = vld.sshfl [vmem:[#allocation1 + $0x20] sm:$0xff pattern:$0x75316420] }
 0x5f7   : > { %2983 = vst [vmem:[#allocation1 + $0x20] ss:$2 sm:$0xff] %v8883_v62  ;;  %4651 = vmatpush.msra.mxu1 %v4522_v31 }
 0x5f8   : > { %2984 = vst [vmem:[#allocation1 + $0x21] ss:$2 sm:$0xff] %v9037_v42 }
 0x5fa   : > { %v9382_v18 = vld.sshfl [vmem:[#allocation1] sm:$0xff pattern:$0x75316420] }
 0x5fb   : > { %12045 = vst [vmem:[#allocation12_spill] sm:$0xff] %v9382_v18  ;;  %v9387_v38 = vld.sshfl [vmem:[#allocation1 + $0x10] sm:$0xff pattern:$0x75316420]  ;;  %v6316_v18 = vpack.i.bf16 %v2838_v19, %v2835_v63  ;;  %v6219_v63 = vunpack.i.l.bf16 %v9396_v24  ;;  %v6258_v19 = vpop.permute.xlu1 %6257 }
 0x5fc   : > { %2917 = vst [vmem:[#allocation1 + $0x1] ss:$2 sm:$0xff] %v8883_v62  ;;  %v9428_v54 = vld.sshfl [vmem:[#allocation1 + $0x30] sm:$0xff pattern:$0x75316420]  ;;  %v9492_v2 = vpop.permute.xlu0 %6252 }
 0x5fd   : > { %12046 = vst [vmem:[#allocation31_spill] sm:$0xff] %v9387_v38  ;;  %6317 = vrot.lane.b32.xlu1 %v6316_v18, %s6797_s23  ;;  %v9430_v18 = vpop.permute.xlu2 %6232  ;;  %v3442_v31 = vsel %vm3441_vm11, %v8840_v46, %v6219_v63  ;;  %v6220_v63 = vunpack.i.h.bf16 %v9396_v24 }
 0x5fe   : > { %2916 = vst [vmem:[#allocation1] ss:$2 sm:$0xff] %v8879_v37 }
 0x5ff   : > { %2918 = vst [vmem:[#allocation1 + $0x10] ss:$2 sm:$0xff] %v9037_v42  ;;  %v9409_v61 = vld.sshfl [vmem:[#allocation1 + $0x20] sm:$0xff pattern:$0x75316420] }
 0x600   : > { %3023 = vst [vmem:[#allocation1 + $0x20] ss:$2 sm:$0xff] %v8818_v48 }
 0x601   : > { %3025 = vst [vmem:[#allocation1 + $0x21] ss:$2 sm:$0xff] %v8837_v50 }
 0x602   : > { %2820 = vst [vmem:[#allocation1 + $0x30] ss:$2 sm:$0xff] %v8869_v28 }
 0x605   : > { %v9418_v53 = vld.sshfl [vmem:[#allocation1] sm:$0xff pattern:$0x75316420] }
 0x606   : > { %12047 = vst [vmem:[#allocation55_spill] sm:$0xff] %v9418_v53  ;;  %v9425_v9 = vld.sshfl [vmem:[#allocation1 + $0x10] sm:$0xff pattern:$0x75316420]  ;;  %v6259_v53 = vunpack.i.l.bf16 %v6258_v19 }
 0x607   : > { %2958 = vst [vmem:[#allocation1] ss:$2 sm:$0xff] %v8793_v13  ;;  %v6239_v13 = vunpack.i.l.bf16 %v6238_v51 }
 0x608   : > { %12048 = vst [vmem:[#allocation61_spill] sm:$0xff] %v9425_v9  ;;  %v9445_v59 = vld.sshfl [vmem:[#allocation1 + $0x20] sm:$0xff pattern:$0x75316420] }
 0x609   : > { %2960 = vst [vmem:[#allocation1 + $0x1] ss:$2 sm:$0xff] %v8974_v20  ;;  %v4521_v20 = vld [vmem:[%s11667_s4 + $0x10] sm:$0xff]  ;;  %v4519_v9 = vld [vmem:[%s11667_s4] sm:$0xff] }
 0x60a   : > { %2963 = vst [vmem:[#allocation1 + $0x10] ss:$2 sm:$0xff] %v8761_v30  ;;  %4652 = vmatpush.msra.mxu1 %v4521_v20  ;;  %v3451_v20 = vsel %vm3450_vm13, %v3442_v31, %v6239_v13  ;;  %v9462_v13 = vld.sshfl [vmem:[#allocation1 + $0x30] sm:$0xff pattern:$0x75316420]  ;;  %v6240_v31 = vunpack.i.h.bf16 %v6238_v51 }
 0x60b   : > { %2965 = vst [vmem:[#allocation1 + $0x11] ss:$2 sm:$0xff] %v8810_v3  ;;  %v3460_v35 = vsel %vm3459_vm15, %v3451_v20, %v6259_v53 }
 0x60c   : > { %4653 = vmatpush.msra.mxu1 %v4520_v41  ;;  %3038 = vst [vmem:[#allocation1 + $0x20] ss:$2 sm:$0xff] %v9165_v16  ;;  %v9457_v41 = vpop.permute.xlu2 %6247 }
 0x60d   : > { %3039 = vst [vmem:[#allocation1 + $0x21] ss:$2 sm:$0xff] %v9175_v14 }
 0x60e   : > { %4654 = vmatpush.msra.mxu1 %v4519_v9  ;;  %v6260_v9 = vunpack.i.h.bf16 %v6258_v19  ;;  %2830 = vst [vmem:[#allocation1 + $0x30] ss:$2 sm:$0xff] %v9329_v56  ;;  %v6244_v19 = vunpack.i.l.bf16 %v9411_v47 }
 0x60f   : > { %4655 = vmatmul.f32.vlgmr.msra.gmra.mxu1 %v3460_v35  ;;  %v3443_v35 = vsel %vm3441_vm11, %v8848_v17, %v6220_v63 }
 0x610   : > { %v2961_v38 = vld.sshfl [vmem:[#allocation1] sm:$0xff pattern:$0x75316420]  ;;  %v3452_v24 = vsel %vm3450_vm13, %v3443_v35, %v6240_v31 }
 0x611   : > { %2977 = vst [vmem:[#allocation1] ss:$2 sm:$0xff] %v8846_v25  ;;  %v3461_v20 = vsel %vm3459_vm15, %v3452_v24, %v6260_v9 }
 0x612   : > { %2978 = vst [vmem:[#allocation1 + $0x1] ss:$2 sm:$0xff] %v9015_v57  ;;  %v2966_v46 = vld.sshfl [vmem:[#allocation1 + $0x10] sm:$0xff pattern:$0x75316420] }
 0x613   : > { %2980 = vst [vmem:[#allocation1 + $0x10] ss:$2 sm:$0xff] %v8774_v5  ;;  %v6321_v60 = vpack.i.bf16 %v2966_v46, %v2961_v38 }
 0x614   : > { %2981 = vst [vmem:[#allocation1 + $0x11] ss:$2 sm:$0xff] %v8869_v28  ;;  %v9469_v53 = vld.sshfl [vmem:[#allocation1 + $0x20] sm:$0xff pattern:$0x75316420]  ;;  %v6263_v38 = vpop.permute.xlu2 %6262 }
 0x615   : > { %6322 = vrot.lane.b32.xlu2 %v6321_v60, %s6795_s21  ;;  %3076 = vst [vmem:[#allocation1 + $0x20] ss:$2 sm:$0xff] %v8821_v45  ;;  %v6224_v60 = vunpack.i.l.bf16 %v9393_v0  ;;  %v9480_v46 = vld.sshfl [vmem:[#allocation1 + $0x30] sm:$0xff pattern:$0x75316420]  ;;  %v6264_v63 = vunpack.i.l.bf16 %v6263_v38 }
 0x616   : > { %3078 = vst [vmem:[#allocation1 + $0x21] ss:$2 sm:$0xff] %v8825_v10 }
 0x617   : > { %4658 = vmatmul.f32.gmra.mxu1 %v3461_v20  ;;  %2893 = vst [vmem:[#allocation1 + $0x30] ss:$2 sm:$0xff] %v8810_v3  ;;  %v3444_v9 = vsel %vm3441_vm11, %v8776_v29, %v6224_v60  ;;  %v6245_v29 = vunpack.i.h.bf16 %v9411_v47 }
 0x618   : > { %v3453_v35 = vsel %vm3450_vm13, %v3444_v9, %v6244_v19  ;;  %v6265_v19 = vunpack.i.h.bf16 %v6263_v38  ;;  %v6268_v38 = vpop.permute.xlu0 %6267 }
 0x619   : > { %v2979_v51 = vld.sshfl [vmem:[#allocation1] sm:$0xff pattern:$0x75316420]  ;;  %v3462_v20 = vsel %vm3459_vm15, %v3453_v35, %v6264_v63 }
 0x61a   : > { %3013 = vst [vmem:[#allocation1] ss:$2 sm:$0xff] %v8758_v12 }
 0x61b   : > { %3015 = vst [vmem:[#allocation1 + $0x1] ss:$2 sm:$0xff] %v8761_v30  ;;  %v2982_v17 = vld.sshfl [vmem:[#allocation1 + $0x10] sm:$0xff pattern:$0x75316420] }
 0x61c   : > { %3018 = vst [vmem:[#allocation1 + $0x10] ss:$2 sm:$0xff] %v8821_v45  ;;  %v6326_v31 = vpack.i.bf16 %v2982_v17, %v2979_v51  ;;  %v6225_v17 = vunpack.i.h.bf16 %v9393_v0 }
 0x61d   : > { %3020 = vst [vmem:[#allocation1 + $0x11] ss:$2 sm:$0xff] %v8825_v10  ;;  %v9488_v24 = vld.sshfl [vmem:[#allocation1 + $0x20] sm:$0xff pattern:$0x75316420] }
 0x61e   : > { %6327 = vrot.lane.b32.xlu1 %v6326_v31, %s6795_s21  ;;  %3088 = vst [vmem:[#allocation1 + $0x20] ss:$2 sm:$0xff] %v8843_v15  ;;  %v9500_v63 = vld.sshfl [vmem:[#allocation1 + $0x30] sm:$0xff pattern:$0x75316420]  ;;  %v3445_v9 = vsel %vm3441_vm11, %v8958_v22, %v6225_v17  ;;  %v2214_v22 = vpop.f32.mrf.mxu0  ;;  %v6249_v17 = vunpack.i.l.bf16 %v9457_v41 }
 0x61f   : > { %4661 = vmatmul.f32.gmra.mxu1 %v3462_v20  ;;  %3089 = vst [vmem:[#allocation1 + $0x21] ss:$2 sm:$0xff] %v8846_v25  ;;  %v3454_v0 = vsel %vm3450_vm13, %v3445_v9, %v6245_v29  ;;  %v6229_v20 = vunpack.i.l.bf16 %v9376_v49 }
 0x620   : > { %12049 = vst [vmem:[#allocation62_spill] sm:$0xff] %v9500_v63  ;;  %v3463_v47 = vsel %vm3459_vm15, %v3454_v0, %v6265_v19 }
 0x621   : > { %2903 = vst [vmem:[#allocation1 + $0x30] ss:$2 sm:$0xff] %v8823_v26 }
 0x622   : > { %v3016_v51 = vld.sshfl [vmem:[#allocation1] sm:$0xff pattern:$0x75316420] }
 0x623   : > { %3032 = vst [vmem:[#allocation1] ss:$2 sm:$0xff] %v8769_v36 }
 0x624   : > { %3033 = vst [vmem:[#allocation1 + $0x1] ss:$2 sm:$0xff] %v8774_v5  ;;  %v3021_v60 = vld.sshfl [vmem:[#allocation1 + $0x10] sm:$0xff pattern:$0x75316420] }
 0x625   : > { %3035 = vst [vmem:[#allocation1 + $0x10] ss:$2 sm:$0xff] %v8879_v37  ;;  %v6331_v31 = vpack.i.bf16 %v3021_v60, %v3016_v51  ;;  %v6269_v60 = vunpack.i.l.bf16 %v6268_v38 }
 0x626   : > { %3036 = vst [vmem:[#allocation1 + $0x11] ss:$2 sm:$0xff] %v8883_v62  ;;  %v9509_v35 = vld.sshfl [vmem:[#allocation1 + $0x20] sm:$0xff pattern:$0x75316420] }
 0x627   : > { %6332 = vrot.lane.b32.xlu0 %v6331_v31, %s6796_s22  ;;  %4664 = vmatmul.f32.gmra.mxu1 %v3463_v47  ;;  %3098 = vst [vmem:[#allocation1 + $0x20] ss:$2 sm:$0xff] %v8879_v37  ;;  %v9523_v31 = vld [vmem:[%s11666_s3] ss:$0 sm:$0xff]  ;;  %v3446_v47 = vsel %vm3441_vm11, %v8864_v55, %v6229_v20  ;;  %v6250_v55 = vunpack.i.h.bf16 %v9457_v41 }
 0x628   : > { %3099 = vst [vmem:[#allocation1 + $0x21] ss:$2 sm:$0xff] %v8883_v62  ;;  %v9517_v19 = vld.sshfl [vmem:[#allocation1 + $0x30] sm:$0xff pattern:$0x75316420]  ;;  %v2215_v9 = vadd.f32 %v9523_v31, %v2214_v22  ;;  %v3455_v63 = vsel %vm3450_vm13, %v3446_v47, %v6249_v17  ;;  %v6270_v22 = vunpack.i.h.bf16 %v6268_v38  ;;  %v6273_v38 = vpop.permute.xlu1 %6272 }
 0x629   : > { %12050 = vst [vmem:[#allocation26_spill] sm:$0xff] %v9517_v19  ;;  %v3464_v19 = vsel %vm3459_vm15, %v3455_v63, %v6269_v60 }
 0x62a   : > { %2913 = vst [vmem:[#allocation1 + $0x30] ss:$2 sm:$0xff] %v8869_v28  ;;  %v9537_v27 = vmax.f32 %v2215_v9, 0.0  ;;  %v6254_v9 = vunpack.i.l.bf16 %v9492_v2 }
 0x62b   : > { %v3034_v51 = vld.sshfl [vmem:[#allocation1] sm:$0xff pattern:$0x75316420] }
 0x62c   : > { %3068 = vst [vmem:[#allocation1] ss:$2 sm:$0xff] %v8758_v12 }
 0x62d   : > { %3070 = vst [vmem:[#allocation1 + $0x1] ss:$2 sm:$0xff] %v8761_v30  ;;  %v3037_v29 = vld.sshfl [vmem:[#allocation1 + $0x10] sm:$0xff pattern:$0x75316420] }
 0x62e   : > { %3072 = vst [vmem:[#allocation1 + $0x10] ss:$2 sm:$0xff] %v8810_v3  ;;  %v6341_v0 = vpack.i.bf16 %v3037_v29, %v3034_v51  ;;  %v6230_v51 = vunpack.i.h.bf16 %v9376_v49  ;;  %v6234_v29 = vunpack.i.l.bf16 %v9430_v18 }
 0x62f   : > { %4667 = vmatmul.f32.gmra.mxu1 %v3464_v19  ;;  %v9535_v23 = vld.sshfl [vmem:[#allocation1 + $0x20] sm:$0xff pattern:$0x75316420] }
 0x630   : > { %6342 = vrot.lane.b32.xlu2 %v6341_v0, %s6796_s22  ;;  %3108 = vst [vmem:[#allocation1 + $0x20] ss:$2 sm:$0xff] %v9533_v58  ;;  %v3447_v49 = vsel %vm3441_vm11, %v8871_v7, %v6230_v51  ;;  %v6274_v0 = vunpack.i.l.bf16 %v6273_v38  ;;  %v9568_v51 = vpop.permute.xlu2 %6277 }
 0x631   : > { %3109 = vst [vmem:[#allocation1 + $0x21] ss:$2 sm:$0xff] %v9537_v27  ;;  %v9549_v17 = vld.sshfl [vmem:[#allocation1 + $0x30] sm:$0xff pattern:$0x75316420]  ;;  %v3456_v41 = vsel %vm3450_vm13, %v3447_v49, %v6250_v55  ;;  %v3448_v55 = vsel %vm3441_vm11, %v8797_v52, %v6234_v29  ;;  %v6275_v29 = vunpack.i.h.bf16 %v6273_v38 }
 0x632   : > { %12051 = vst [vmem:[#allocation36_spill] sm:$0xff] %v9549_v17  ;;  %v3465_v60 = vsel %vm3459_vm15, %v3456_v41, %v6270_v22  ;;  %v3457_v49 = vsel %vm3450_vm13, %v3448_v55, %v6254_v9  ;;  %v6255_v17 = vunpack.i.h.bf16 %v9492_v2 }
 0x633   : > { %2923 = vst [vmem:[#allocation1 + $0x30] ss:$2 sm:$0xff] %v9329_v56  ;;  %v3466_v41 = vsel %vm3459_vm15, %v3457_v49, %v6274_v0  ;;  %v6283_v49 = vpop.permute.xlu1 %6282 }
 0x634   : > { %v9542_v20 = vld.sshfl [vmem:[#allocation1] sm:$0xff pattern:$0x75316420] }
 0x635   : > { %3083 = vst [vmem:[#allocation1] ss:$2 sm:$0xff] %v8818_v48  ;;  %v9546_v63 = vld.sshfl [vmem:[#allocation1 + $0x10] sm:$0xff pattern:$0x75316420] }
 0x636   : > { %3084 = vst [vmem:[#allocation1 + $0x1] ss:$2 sm:$0xff] %v8837_v50 }
 0x637   : > { %3085 = vst [vmem:[#allocation1 + $0x10] ss:$2 sm:$0xff] %v8823_v26  ;;  %4670 = vmatmul.f32.gmra.mxu1 %v3465_v60  ;;  %v6235_v60 = vunpack.i.h.bf16 %v9430_v18 }
 0x638   : > { %v9558_v19 = vld.sshfl [vmem:[#allocation1 + $0x20] sm:$0xff pattern:$0x75316420]  ;;  %v9588_v9 = vpop.permute.xlu2 %6292 }
 0x639   : > { %3169 = vst [vmem:[#allocation1 + $0x20] ss:$2 sm:$0xff] %v8821_v45  ;;  %v3449_v0 = vsel %vm3441_vm11, %v8980_v4, %v6235_v60  ;;  %v6285_v4 = vunpack.i.h.bf16 %v6283_v49 }
 0x63a   : > { %3171 = vst [vmem:[#allocation1 + $0x21] ss:$2 sm:$0xff] %v8825_v10  ;;  %v9566_v47 = vld.sshfl [vmem:[#allocation1 + $0x30] sm:$0xff pattern:$0x75316420]  ;;  %v3458_v18 = vsel %vm3450_vm13, %v3449_v0, %v6255_v17  ;;  %v6284_v17 = vunpack.i.l.bf16 %v6283_v49 }
 0x63b   : > { %12052 = vst [vmem:[#allocation14_spill] sm:$0xff] %v9566_v47  ;;  %v3467_v38 = vsel %vm3459_vm15, %v3458_v18, %v6275_v29 }
 0x63c   : > { %2973 = vst [vmem:[#allocation1 + $0x30] ss:$2 sm:$0xff] %v8837_v50 }
 0x63d   : > { %v9562_v7 = vld.sshfl [vmem:[#allocation1] sm:$0xff pattern:$0x75316420]  ;;  %2975 = vst [vmem:[#allocation1 + $0x31] ss:$2 sm:$0xff] %v8823_v26 }
 0x63e   : > { %3093 = vst [vmem:[#allocation1] ss:$2 sm:$0xff] %v8769_v36  ;;  %v9573_v22 = vld.sshfl [vmem:[#allocation1 + $0x10] sm:$0xff pattern:$0x75316420] }
 0x63f   : > { %3094 = vst [vmem:[#allocation1 + $0x1] ss:$2 sm:$0xff] %v8774_v5  ;;  %4673 = vmatmul.f32.gmra.mxu1 %v3466_v41 }
 0x640   : > { %3095 = vst [vmem:[#allocation1 + $0x10] ss:$2 sm:$0xff] %v8869_v28  ;;  %v6308_v29 = vpop.permute.xlu2 %6307 }
 0x641   : > { %v9582_v52 = vld.sshfl [vmem:[#allocation1 + $0x20] sm:$0xff pattern:$0x75316420]  ;;  %v6310_v18 = vunpack.i.h.bf16 %v6308_v29 }
 0x642   : > { %12053 = vst [vmem:[#allocation34_spill] sm:$0xff] %v9582_v52 }
 0x643   : > { %3181 = vst [vmem:[#allocation1 + $0x20] ss:$2 sm:$0xff] %v8843_v15 }
 0x644   : > { %3182 = vst [vmem:[#allocation1 + $0x21] ss:$2 sm:$0xff] %v8846_v25  ;;  %v2976_v2 = vld.sshfl [vmem:[#allocation1 + $0x30] sm:$0xff pattern:$0x75316420] }
 0x645   : > { %2986 = vst [vmem:[#allocation1 + $0x30] ss:$2 sm:$0xff] %v9175_v14  ;;  %v6336_v41 = vpack.i.bf16 %v2976_v2, %v9373_v8  ;;  %v6309_v8 = vunpack.i.l.bf16 %v6308_v29  ;;  %v3472_v2 = vsel %vm3441_vm11, %v9122_v44, %v6284_v17  ;;  %v2840_v17 = vrot.slane %v9274_v32, 2 }
 0x646   : > { %v9585_v47 = vld.sshfl [vmem:[#allocation1] sm:$0xff pattern:$0x75316420]  ;;  %2987 = vst [vmem:[#allocation1 + $0x31] ss:$2 sm:$0xff] %v9329_v56 }
 0x647   : > { %3103 = vst [vmem:[#allocation1] ss:$2 sm:$0xff] %v9165_v16  ;;  %v9597_v55 = vld.sshfl [vmem:[#allocation1 + $0x10] sm:$0xff pattern:$0x75316420]  ;;  %4676 = vmatmul.f32.gmra.mxu1 %v3467_v38  ;;  %6337 = vrot.lane.b32.xlu0 %v6336_v41, %s6795_s21  ;;  %v3473_v38 = vsel %vm3441_vm11, %v9126_v1, %v6285_v4  ;;  %v4550_v41 = vld [vmem:[%s11667_s4 + $0xf8] sm:$0xff] }
 0x648   : > { %3104 = vst [vmem:[#allocation1 + $0x1] ss:$2 sm:$0xff] %v9175_v14  ;;  %v9622_v29 = vsel %vm3450_vm13, %v3473_v38, %v6310_v18  ;;  %4680 = vmatpush.msra.mxu2 %v4550_v41  ;;  %v3120_v1 = vrot.slane %v9573_v22, 1  ;;  %v4549_v4 = vld [vmem:[%s11667_s4 + $0xf0] sm:$0xff]  ;;  %v3119_v18 = vrot.slane %v9562_v7, 1  ;;  %v2839_v22 = vrot.slane %v9270_v33, 2  ;;  %v6288_v7 = vpop.permute.xlu0 %6287 }
 0x649   : > { %3105 = vst [vmem:[#allocation1 + $0x10] ss:$2 sm:$0xff] %v9329_v56  ;;  %v4547_v38 = vld [vmem:[%s11667_s4 + $0xe0] sm:$0xff]  ;;  %v4546_v33 = vld [vmem:[%s11667_s4 + $0xd8] sm:$0xff] }
 0x64a   : > { %4681 = vmatpush.msra.mxu2 %v4549_v4  ;;  %v6290_v4 = vunpack.i.h.bf16 %v6288_v7 }
 0x64b   : > { %v9603_v60 = vld.sshfl [vmem:[#allocation1 + $0x20] sm:$0xff pattern:$0x75316420] }
 0x64c   : > { %12054 = vst [vmem:[#allocation17_spill] sm:$0xff] %v9603_v60  ;;  %v9619_v60 = vsel %vm3450_vm13, %v3472_v2, %v6309_v8  ;;  %v3121_v2 = vsel %vm2364_vm7, %v3119_v18, %v3120_v1  ;;  %v6289_v18 = vunpack.i.l.bf16 %v6288_v7 }
 0x64d   : > { %3191 = vst [vmem:[#allocation1 + $0x20] ss:$2 sm:$0xff] %v8879_v37  ;;  %v2988_v49 = vld.sshfl [vmem:[#allocation1 + $0x30] sm:$0xff pattern:$0x75316420] }
 0x64e   : > { %3192 = vst [vmem:[#allocation1 + $0x21] ss:$2 sm:$0xff] %v8883_v62  ;;  %v6346_v44 = vpack.i.bf16 %v2988_v49, %v9409_v61  ;;  %v4548_v61 = vld [vmem:[%s11667_s4 + $0xe8] sm:$0xff]  ;;  %v2841_v49 = vsel %vm2458_vm9, %v2839_v22, %v2840_v17  ;;  %v4545_v17 = vld [vmem:[%s11667_s4 + $0xd0] sm:$0xff] }
 0x64f   : > { %v9606_v0 = vld.sshfl [vmem:[#allocation1] sm:$0xff pattern:$0x75316420]  ;;  %3028 = vst [vmem:[#allocation1 + $0x30] ss:$2 sm:$0xff] %v8843_v15  ;;  %4682 = vmatpush.msra.mxu2 %v4548_v61 }
 0x650   : > { %3161 = vst [vmem:[#allocation1] ss:$2 sm:$0xff] %v8758_v12  ;;  %v9625_v52 = vld.sshfl [vmem:[#allocation1 + $0x10] sm:$0xff pattern:$0x75316420]  ;;  %6347 = vrot.lane.b32.xlu2 %v6346_v44, %s6795_s21  ;;  %v6356_v44 = vpack.i.bf16 %v3121_v2, %v2841_v49  ;;  %v6303_v22 = vpop.permute.xlu1 %6302  ;;  %v4544_v2 = vld [vmem:[%s11667_s4 + $0xc8] sm:$0xff] }
 0x651   : > { %3163 = vst [vmem:[#allocation1 + $0x1] ss:$2 sm:$0xff] %v8761_v30  ;;  %4683 = vmatpush.msra.mxu2 %v4547_v38  ;;  %v6305_v38 = vunpack.i.h.bf16 %v6303_v22  ;;  %v4543_v49 = vld [vmem:[%s11667_s4 + $0xc0] sm:$0xff] }
 0x652   : > { %3030 = vst [vmem:[#allocation1 + $0x31] ss:$2 sm:$0xff] %v8846_v25 }
 0x653   : > { %3165 = vst [vmem:[#allocation1 + $0x10] ss:$2 sm:$0xff] %v8810_v3  ;;  %4684 = vmatpush.msra.mxu2 %v4546_v33  ;;  %v3470_v33 = vsel %vm3441_vm11, %v9063_v11, %v6289_v18  ;;  %v4542_v11 = vld [vmem:[%s11667_s4 + $0xb8] sm:$0xff] }
 0x655   : > { %v9640_v8 = vld.sshfl [vmem:[#allocation1 + $0x20] sm:$0xff pattern:$0x75316420]  ;;  %4685 = vmatpush.msra.mxu2 %v4545_v17 }
 0x656   : > { %12055 = vst [vmem:[#allocation15_spill] sm:$0xff] %v9640_v8  ;;  %v12069_v8 = vld [vmem:[#allocation54_spill] sm:$0xff] }
 0x657   : > { %3201 = vst [vmem:[#allocation1 + $0x20] ss:$2 sm:$0xff] %v9533_v58  ;;  %4686 = vmatpush.msra.mxu2 %v4544_v2  ;;  %v4540_v2 = vld [vmem:[%s11667_s4 + $0xa8] sm:$0xff] }
 0x658   : > { %v9648_v32 = vld.sshfl [vmem:[#allocation1] sm:$0xff pattern:$0x75316420]  ;;  %3202 = vst [vmem:[#allocation1 + $0x21] ss:$2 sm:$0xff] %v9537_v27  ;;  %6357 = vrot.lane.b32.xlu2 %v6356_v44, %s6797_s23 }
 0x659   : > { %12056 = vst [vmem:[#allocation24_spill] sm:$0xff] %v9648_v32  ;;  %v3031_v41 = vld.sshfl [vmem:[#allocation1 + $0x30] sm:$0xff pattern:$0x75316420]  ;;  %4687 = vmatpush.msra.mxu2 %v4543_v49  ;;  %v4539_v49 = vld [vmem:[%s11667_s4 + $0xa0] sm:$0xff] }
 0x65a   : > { %3176 = vst [vmem:[#allocation1] ss:$2 sm:$0xff] %v8818_v48  ;;  %v9658_v1 = vld.sshfl [vmem:[#allocation1 + $0x10] sm:$0xff pattern:$0x75316420]  ;;  %v6351_v61 = vpack.i.bf16 %v3031_v41, %v9445_v59  ;;  %v6304_v59 = vunpack.i.l.bf16 %v6303_v22  ;;  %v3471_v41 = vsel %vm3441_vm11, %v9230_v6, %v6290_v4 }
 0x65b   : > { %3177 = vst [vmem:[#allocation1 + $0x1] ss:$2 sm:$0xff] %v8837_v50  ;;  %4688 = vmatpush.msra.mxu2 %v4542_v11  ;;  %v4541_v4 = vld [vmem:[%s11667_s4 + $0xb0] sm:$0xff]  ;;  %v4538_v11 = vld [vmem:[%s11667_s4 + $0x98] sm:$0xff] }
 0x65c   : > { %3041 = vst [vmem:[#allocation1 + $0x30] ss:$2 sm:$0xff] %v9533_v58  ;;  %6352 = vrot.lane.b32.xlu1 %v6351_v61, %s6796_s22  ;;  %v9682_v44 = vsel %vm3450_vm13, %v3470_v33, %v6304_v59  ;;  %v9685_v61 = vsel %vm3450_vm13, %v3471_v41, %v6305_v38  ;;  %v3126_v38 = vrot.slane %v9597_v55, 1  ;;  %v9707_v59 = vpop.permute.xlu0 %6297  ;;  %v2846_v41 = vrot.slane %v9288_v40, 2 }
 0x65d   : > { %12057 = vst [vmem:[#allocation40_spill] sm:$0xff] %v9658_v1  ;;  %4689 = vmatpush.msra.mxu2 %v4541_v4  ;;  %v2845_v55 = vrot.slane %v9284_v34, 2  ;;  %v4537_v34 = vld [vmem:[%s11667_s4 + $0x90] sm:$0xff]  ;;  %v2217_v1 = vpop.f32.mrf.mxu0 }
 0x65e   : > { %3178 = vst [vmem:[#allocation1 + $0x10] ss:$2 sm:$0xff] %v8823_v26 }
 0x65f   : > { %3042 = vst [vmem:[#allocation1 + $0x31] ss:$2 sm:$0xff] %v9537_v27  ;;  %v9671_v7 = vld.sshfl [vmem:[#allocation1 + $0x20] sm:$0xff pattern:$0x75316420]  ;;  %4690 = vmatpush.msra.mxu2 %v4540_v2  ;;  %v2847_v2 = vsel %vm2458_vm9, %v2845_v55, %v2846_v41 }
 0x660   : > { %12058 = vst [vmem:[#allocation41_spill] sm:$0xff] %v9671_v7  ;;  %v4536_v7 = vld [vmem:[%s11667_s4 + $0x88] sm:$0xff] }
 0x661   : > { %3246 = vst [vmem:[#allocation1 + $0x20] ss:$2 sm:$0xff] %v8821_v45  ;;  %4691 = vmatpush.msra.mxu2 %v4539_v49  ;;  %v3116_v49 = vrot.slane %v9488_v24, 1 }
 0x662   : > { %v9687_v17 = vld.sshfl [vmem:[#allocation1] sm:$0xff pattern:$0x75316420]  ;;  %3248 = vst [vmem:[#allocation1 + $0x21] ss:$2 sm:$0xff] %v8825_v10 }
 0x663   : > { %12059 = vst [vmem:[#allocation50_spill] sm:$0xff] %v9687_v17  ;;  %4692 = vmatpush.msra.mxu2 %v4538_v11 }
 0x664   : > { %3186 = vst [vmem:[#allocation1] ss:$2 sm:$0xff] %v8769_v36  ;;  %v9746_v55 = vpop.permute.xlu0 %6312 }
 0x665   : > { %3187 = vst [vmem:[#allocation1 + $0x1] ss:$2 sm:$0xff] %v8774_v5  ;;  %v9695_v6 = vld.sshfl [vmem:[#allocation1 + $0x10] sm:$0xff pattern:$0x75316420]  ;;  %4693 = vmatpush.msra.mxu2 %v4537_v34  ;;  %v6315_v34 = vunpack.i.h.bf16 %v9746_v55 }
 0x666   : > { %12060 = vst [vmem:[#allocation25_spill] sm:$0xff] %v9695_v6  ;;  %v3043_v18 = vld.sshfl [vmem:[#allocation1 + $0x30] sm:$0xff pattern:$0x75316420] }
 0x667   : > { %3188 = vst [vmem:[#allocation1 + $0x10] ss:$2 sm:$0xff] %v8869_v28  ;;  %v6361_v22 = vpack.i.bf16 %v3043_v18, %v9469_v53  ;;  %v3125_v53 = vrot.slane %v9585_v47, 1  ;;  %4694 = vmatpush.msra.mxu2 %v4536_v7  ;;  %v3132_v7 = vrot.slane %v9625_v52, 1  ;;  %v4565_v6 = vld [vmem:[%s11667_s4 + $0x170] sm:$0xff] }
 0x668   : > { %3080 = vst [vmem:[#allocation1 + $0x30] ss:$2 sm:$0xff] %v8990_v39 }
 0x669   : > { %6362 = vrot.lane.b32.xlu0 %v6361_v22, %s6796_s22  ;;  %v9713_v33 = vld.sshfl [vmem:[#allocation1 + $0x20] sm:$0xff pattern:$0x75316420]  ;;  %v3127_v18 = vsel %vm2364_vm7, %v3125_v53, %v3126_v38  ;;  %v3114_v22 = vrot.slane %v9546_v63, 1  ;;  %v6295_v63 = vunpack.i.h.bf16 %v9588_v9  ;;  %v3113_v53 = vrot.slane %v9542_v20, 1 }
 0x66a   : > { %12061 = vst [vmem:[#allocation28_spill] sm:$0xff] %v9713_v33  ;;  %v6366_v38 = vpack.i.bf16 %v3127_v18, %v2847_v2  ;;  %v4535_v20 = vld [vmem:[%s11667_s4 + $0x80] sm:$0xff]  ;;  %v12065_v2 = vld [vmem:[#allocation23_spill] sm:$0xff] }
 0x66b   : > { %3258 = vst [vmem:[#allocation1 + $0x20] ss:$2 sm:$0xff] %v8843_v15  ;;  %v3115_v24 = vsel %vm2364_vm7, %v3113_v53, %v3114_v22  ;;  %4695 = vmatpush.msra.mxu2 %v4535_v20  ;;  %v2852_v22 = vrot.slane %v9306_v21, 2  ;;  %v6279_v21 = vunpack.i.l.bf16 %v9568_v51 }
 0x66c   : > { %v9722_v4 = vld.sshfl [vmem:[#allocation1] sm:$0xff pattern:$0x75316420]  ;;  %3259 = vst [vmem:[#allocation1 + $0x21] ss:$2 sm:$0xff] %v8846_v25 }
 0x66d   : > { %12062 = vst [vmem:[#allocation20_spill] sm:$0xff] %v9722_v4  ;;  %v3468_v4 = vsel %vm3441_vm11, %v12069_v8, %v6279_v21  ;;  %v2849_v8 = vrot.slane %v9462_v13, 2  ;;  %v6280_v21 = vunpack.i.h.bf16 %v9568_v51  ;;  %v12072_v51 = vld [vmem:[#allocation51_spill] sm:$0xff] }
 0x66e   : > { %3196 = vst [vmem:[#allocation1] ss:$2 sm:$0xff] %v9165_v16  ;;  %v9728_v40 = vld.sshfl [vmem:[#allocation1 + $0x10] sm:$0xff pattern:$0x75316420] }
 0x66f   : > { %12063 = vst [vmem:[#allocation43_spill] sm:$0xff] %v9728_v40  ;;  %v3082_v47 = vld.sshfl [vmem:[#allocation1 + $0x30] sm:$0xff pattern:$0x75316420] }
 0x670   : > { %3197 = vst [vmem:[#allocation1 + $0x1] ss:$2 sm:$0xff] %v9175_v14  ;;  %v3117_v11 = vrot.slane %v3082_v47, 1 }
 0x671   : > { %3198 = vst [vmem:[#allocation1 + $0x10] ss:$2 sm:$0xff] %v9329_v56  ;;  %6367 = vrot.lane.b32.xlu0 %v6366_v38, %s6797_s23  ;;  %v3475_v38 = vsel %vm3441_vm11, %v12065_v2, %v6295_v63  ;;  %v2843_v63 = vrot.slane %v9428_v54, 2 }
 0x672   : > { %3090 = vst [vmem:[#allocation1 + $0x30] ss:$2 sm:$0xff] %v9015_v57  ;;  %v3118_v41 = vsel %vm2364_vm7, %v3116_v49, %v3117_v11  ;;  %v9761_v49 = vsel %vm3450_vm13, %v3475_v38, %v6315_v34  ;;  %v3131_v11 = vrot.slane %v9606_v0, 1  ;;  %v12068_v0 = vld [vmem:[#allocation52_spill] sm:$0xff] }
 0x673   : > { %v6371_v18 = vpack.i.bf16 %v3118_v41, %v3115_v24  ;;  %v9752_v47 = vld.sshfl [vmem:[#allocation1 + $0x20] sm:$0xff pattern:$0x75316420]  ;;  %v2851_v41 = vrot.slane %v9302_v43, 2  ;;  %v2842_v34 = vrot.slane %v12068_v0, 2  ;;  %v6300_v0 = vunpack.i.h.bf16 %v9707_v59 }
 0x674   : > { %12064 = vst [vmem:[#allocation39_spill] sm:$0xff] %v9752_v47  ;;  %v3133_v20 = vsel %vm2364_vm7, %v3131_v11, %v3132_v7 }
 0x675   : > { %3268 = vst [vmem:[#allocation1 + $0x20] ss:$2 sm:$0xff] %v8879_v37  ;;  %6372 = vrot.lane.b32.xlu1 %v6371_v18, %s6797_s23  ;;  %v6299_v18 = vunpack.i.l.bf16 %v9707_v59  ;;  %v2853_v54 = vsel %vm2458_vm9, %v2851_v41, %v2852_v22  ;;  %v12071_v22 = vld [vmem:[#allocation46_spill] sm:$0xff] }
 0x676   : > { %3269 = vst [vmem:[#allocation1 + $0x21] ss:$2 sm:$0xff] %v8883_v62  ;;  %v6376_v38 = vpack.i.bf16 %v3133_v20, %v2853_v54  ;;  %v3128_v20 = vrot.slane %v9535_v23, 1  ;;  %v3469_v23 = vsel %vm3441_vm11, %v12072_v51, %v6280_v21 }
 0x677   : > { %v9763_v53 = vld.sshfl [vmem:[#allocation1] sm:$0xff pattern:$0x75316420] }
 0x678   : > { %12066 = vst [vmem:[#allocation18_spill] sm:$0xff] %v9763_v53  ;;  %v9768_v52 = vld.sshfl [vmem:[#allocation1 + $0x10] sm:$0xff pattern:$0x75316420]  ;;  %v2844_v53 = vsel %vm2458_vm9, %v2842_v34, %v2843_v63  ;;  %v2848_v63 = vrot.slane %v12071_v22, 2 }
 0x679   : > { %3238 = vst [vmem:[#allocation1] ss:$2 sm:$0xff] %v8758_v12  ;;  %v3092_v24 = vld.sshfl [vmem:[#allocation1 + $0x30] sm:$0xff pattern:$0x75316420]  ;;  %v3122_v12 = vrot.slane %v9509_v35, 1  ;;  %v3476_v35 = vsel %vm3450_vm13, %v3468_v4, %v6299_v18 }
 0x67a   : > { %12067 = vst [vmem:[#allocation35_spill] sm:$0xff] %v9768_v52  ;;  %v3123_v2 = vrot.slane %v3092_v24, 1  ;;  %v6318_v52 = vpop.permute.xlu1 %6317  ;;  %v9790_v24 = vrot.slane %v9537_v27, 4  ;;  %v2850_v13 = vsel %vm2458_vm9, %v2848_v63, %v2849_v8  ;;  %v3134_v63 = vrot.slane %v9558_v19, 1 }
 0x67b   : > { %3240 = vst [vmem:[#allocation1 + $0x1] ss:$2 sm:$0xff] %v8761_v30  ;;  %v6319_v11 = vunpack.i.l.bf16 %v6318_v52 }
 0x67c   : > { %3100 = vst [vmem:[#allocation1 + $0x30] ss:$2 sm:$0xff] %v9037_v42  ;;  %v3124_v43 = vsel %vm2364_vm7, %v3122_v12, %v3123_v2  ;;  %v6320_v12 = vunpack.i.h.bf16 %v6318_v52  ;;  %v12074_v52 = vld [vmem:[#allocation45_spill] sm:$0xff] }
 0x67d   : > { %3242 = vst [vmem:[#allocation1 + $0x10] ss:$2 sm:$0xff] %v8810_v3  ;;  %v6381_v7 = vpack.i.bf16 %v3124_v43, %v2844_v53  ;;  %v9785_v40 = vld.sshfl [vmem:[#allocation1 + $0x20] sm:$0xff pattern:$0x75316420]  ;;  %6377 = vrot.lane.b32.xlu1 %v6376_v38, %s6797_s23  ;;  %v3484_v53 = vsel %vm3459_vm15, %v3476_v35, %v6319_v11  ;;  %v3477_v38 = vsel %vm3450_vm13, %v3469_v23, %v6300_v0  ;;  %v2855_v35 = vrot.slane %v9480_v46, 2 }
 0x67e   : > { %12070 = vst [vmem:[#allocation37_spill] sm:$0xff] %v9785_v40  ;;  %4696 = vmatmul.f32.vlgmr.msra.gmra.mxu2 %v3484_v53  ;;  %v3485_v59 = vsel %vm3459_vm15, %v3477_v38, %v6320_v12 }
 0x67f   : > { %3278 = vst [vmem:[#allocation1 + $0x20] ss:$2 sm:$0xff] %v9533_v58  ;;  %6382 = vrot.lane.b32.xlu2 %v6381_v7, %s6797_s23  ;;  %v2854_v7 = vrot.slane %v12074_v52, 2 }
 0x680   : > { %3279 = vst [vmem:[#allocation1 + $0x21] ss:$2 sm:$0xff] %v9537_v27 }
 0x682   : > { %v9796_v41 = vld.sshfl [vmem:[#allocation1] sm:$0xff pattern:$0x75316420] }
 0x683   : > { %3253 = vst [vmem:[#allocation1] ss:$2 sm:$0xff] %v8818_v48  ;;  %v3102_v4 = vld.sshfl [vmem:[#allocation1 + $0x30] sm:$0xff pattern:$0x75316420] }
 0x684   : > { %3254 = vst [vmem:[#allocation1 + $0x1] ss:$2 sm:$0xff] %v8837_v50  ;;  %v9804_v18 = vld.sshfl [vmem:[#allocation1 + $0x10] sm:$0xff pattern:$0x75316420]  ;;  %v3129_v34 = vrot.slane %v3102_v4, 1  ;;  %v2856_v4 = vsel %vm2458_vm9, %v2854_v7, %v2855_v35 }
 0x685   : > { %3110 = vst [vmem:[#allocation1 + $0x30] ss:$2 sm:$0xff] %v9790_v24 }
 0x686   : > { %3255 = vst [vmem:[#allocation1 + $0x10] ss:$2 sm:$0xff] %v8823_v26  ;;  %v3130_v2 = vsel %vm2364_vm7, %v3128_v20, %v3129_v34  ;;  %4699 = vmatmul.f32.gmra.mxu2 %v3485_v59  ;;  %v9869_v59 = vpop.permute.xlu2 %6322 }
 0x687   : > { %v6386_v54 = vpack.i.bf16 %v3130_v2, %v2850_v13  ;;  %v9814_v43 = vld.sshfl [vmem:[#allocation1 + $0x20] sm:$0xff pattern:$0x75316420] }
 0x688   : > { %12073 = vst [vmem:[#allocation33_spill] sm:$0xff] %v9814_v43 }
 0x689   : > { %6387 = vrot.lane.b32.xlu0 %v6386_v54, %s6797_s23  ;;  %3341 = vst [vmem:[#allocation1 + $0x20] ss:$2 sm:$0xff] %v8837_v50 }
 0x68a   : > { %3343 = vst [vmem:[#allocation1 + $0x21] ss:$2 sm:$0xff] %v8823_v26 }
 0x68b   : > { %v9820_v11 = vld.sshfl [vmem:[#allocation1] sm:$0xff pattern:$0x75316420] }
 0x68c   : > { %3263 = vst [vmem:[#allocation1] ss:$2 sm:$0xff] %v8769_v36  ;;  %v3112_v22 = vld.sshfl [vmem:[#allocation1 + $0x30] sm:$0xff pattern:$0x75316420]  ;;  %v9840_v0 = vpop.f32.mrf.mxu1 }
 0x68d   : > { %3264 = vst [vmem:[#allocation1 + $0x1] ss:$2 sm:$0xff] %v8774_v5  ;;  %v9827_v53 = vld.sshfl [vmem:[#allocation1 + $0x10] sm:$0xff pattern:$0x75316420]  ;;  %v3135_v8 = vrot.slane %v3112_v22, 1 }
 0x68e   : > { %3173 = vst [vmem:[#allocation1 + $0x30] ss:$2 sm:$0xff] %v8990_v39  ;;  %v9886_v35 = vpop.permute.xlu2 %6342 }
 0x68f   : > { %3265 = vst [vmem:[#allocation1 + $0x10] ss:$2 sm:$0xff] %v8869_v28  ;;  %v3136_v21 = vsel %vm2364_vm7, %v3134_v63, %v3135_v8 }
 0x690   : > { %v6391_v20 = vpack.i.bf16 %v3136_v21, %v2856_v4  ;;  %12077 = vst [vmem:[#allocation30_spill] sm:$0xff] %v9840_v0 }
 0x691   : > { %v9833_v46 = vld.sshfl [vmem:[#allocation1 + $0x20] sm:$0xff pattern:$0x75316420] }
 0x692   : > { %12075 = vst [vmem:[#allocation48_spill] sm:$0xff] %v9833_v46  ;;  %6392 = vrot.lane.b32.xlu1 %v6391_v20, %s6797_s23  ;;  %v12122_v46 = vld [vmem:[#allocation62_spill] sm:$0xff] }
 0x693   : > { %3356 = vst [vmem:[#allocation1 + $0x20] ss:$2 sm:$0xff] %v9175_v14 }
 0x694   : > { %v9837_v19 = vld.sshfl [vmem:[#allocation1] sm:$0xff pattern:$0x75316420]  ;;  %3357 = vst [vmem:[#allocation1 + $0x21] ss:$2 sm:$0xff] %v9329_v56  ;;  %v9853_v2 = vpop.f32.mrf.mxu1 }
 0x695   : > { %12076 = vst [vmem:[#allocation22_spill] sm:$0xff] %v9837_v19  ;;  %v9843_v34 = vld.sshfl [vmem:[#allocation1 + $0x30] sm:$0xff pattern:$0x75316420] }
 0x696   : > { %3273 = vst [vmem:[#allocation1] ss:$2 sm:$0xff] %v9165_v16  ;;  %v9846_v12 = vld.sshfl [vmem:[#allocation1 + $0x10] sm:$0xff pattern:$0x75316420] }
 0x697   : > { %12078 = vst [vmem:[#allocation29_spill] sm:$0xff] %v9843_v34 }
 0x698   : > { %3274 = vst [vmem:[#allocation1 + $0x1] ss:$2 sm:$0xff] %v9175_v14 }
 0x699   : > { %12079 = vst [vmem:[#allocation44_spill] sm:$0xff] %v9846_v12 }
 0x69a   : > { %3183 = vst [vmem:[#allocation1 + $0x30] ss:$2 sm:$0xff] %v9015_v57 }
 0x69b   : > { %3275 = vst [vmem:[#allocation1 + $0x10] ss:$2 sm:$0xff] %v9329_v56  ;;  %v9850_v13 = vld.sshfl [vmem:[#allocation1 + $0x20] sm:$0xff pattern:$0x75316420] }
 0x69c   : > { %12080 = vst [vmem:[#allocation47_spill] sm:$0xff] %v9850_v13  ;;  %v9871_v52 = vpop.f32.mrf.mxu1 }
 0x69d   : > { %3396 = vst [vmem:[#allocation1 + $0x20] ss:$2 sm:$0xff] %v8843_v15 }
 0x69e   : > { %3398 = vst [vmem:[#allocation1 + $0x21] ss:$2 sm:$0xff] %v8846_v25 }
 0x69f   : > { %v9855_v54 = vld.sshfl [vmem:[#allocation1] sm:$0xff pattern:$0x75316420] }
 0x6a0   : > { %12081 = vst [vmem:[#allocation21_spill] sm:$0xff] %v9855_v54 }
 0x6a1   : > { %3331 = vst [vmem:[#allocation1] ss:$2 sm:$0xff] %v8761_v30  ;;  %v9859_v51 = vld.sshfl [vmem:[#allocation1 + $0x30] sm:$0xff pattern:$0x75316420] }
 0x6a2   : > { %12082 = vst [vmem:[#allocation56_spill] sm:$0xff] %v9859_v51  ;;  %v9862_v23 = vld.sshfl [vmem:[#allocation1 + $0x10] sm:$0xff pattern:$0x75316420] }
 0x6a3   : > { %3333 = vst [vmem:[#allocation1 + $0x1] ss:$2 sm:$0xff] %v8810_v3 }
 0x6a4   : > { %12083 = vst [vmem:[#allocation53_spill] sm:$0xff] %v9862_v23  ;;  %v9888_v22 = vpop.f32.mrf.mxu1 }
 0x6a5   : > { %3193 = vst [vmem:[#allocation1 + $0x30] ss:$2 sm:$0xff] %v9037_v42  ;;  %v9867_v38 = vld.sshfl [vmem:[#allocation1 + $0x20] sm:$0xff pattern:$0x75316420] }
 0x6a6   : > { %3336 = vst [vmem:[#allocation1 + $0x10] ss:$2 sm:$0xff] %v8825_v10 }
 0x6a7   : > { %3338 = vst [vmem:[#allocation1 + $0x11] ss:$2 sm:$0xff] %v8990_v39 }
 0x6a8   : > { %12084 = vst [vmem:[#allocation49_spill] sm:$0xff] %v9867_v38 }
 0x6a9   : > { %3411 = vst [vmem:[#allocation1 + $0x20] ss:$2 sm:$0xff] %v9533_v58 }
 0x6aa   : > { %v9874_v30 = vld.sshfl [vmem:[#allocation1] sm:$0xff pattern:$0x75316420]  ;;  %3412 = vst [vmem:[#allocation1 + $0x21] ss:$2 sm:$0xff] %v9537_v27  ;;  %v9904_v20 = vpop.permute.xlu2 %6347 }
 0x6ab   : > { %12085 = vst [vmem:[#allocation42_spill] sm:$0xff] %v9874_v30  ;;  %v2930_v30 = vrot.slane %v12122_v46, 3 }
 0x6ac   : > { %3350 = vst [vmem:[#allocation1] ss:$2 sm:$0xff] %v8774_v5  ;;  %v9878_v3 = vld.sshfl [vmem:[#allocation1 + $0x30] sm:$0xff pattern:$0x75316420]  ;;  %v9906_v0 = vpop.f32.mrf.mxu1 }
 0x6ad   : > { %12086 = vst [vmem:[#allocation57_spill] sm:$0xff] %v9878_v3 }
 0x6ae   : > { %3351 = vst [vmem:[#allocation1 + $0x1] ss:$2 sm:$0xff] %v8869_v28  ;;  %v9882_v7 = vld.sshfl [vmem:[#allocation1 + $0x10] sm:$0xff pattern:$0x75316420] }
 0x6af   : > { %3203 = vst [vmem:[#allocation1 + $0x30] ss:$2 sm:$0xff] %v9790_v24 }
 0x6b0   : > { %12087 = vst [vmem:[#allocation32_spill] sm:$0xff] %v9882_v7 }
 0x6b1   : > { %3353 = vst [vmem:[#allocation1 + $0x10] ss:$2 sm:$0xff] %v8883_v62  ;;  %v9890_v63 = vld.sshfl [vmem:[#allocation1 + $0x20] sm:$0xff pattern:$0x75316420] }
 0x6b2   : > { %3354 = vst [vmem:[#allocation1 + $0x11] ss:$2 sm:$0xff] %v9037_v42  ;;  %v9936_v13 = vpop.permute.xlu2 %6357 }
 0x6b3   : > { %12088 = vst [vmem:[#allocation23_spill] sm:$0xff] %v9888_v22  ;;  %v6359_v54 = vunpack.i.l.bf16 %v9936_v13 }
 0x6b4   : > { %12089 = vst [vmem:[#allocation52_spill] sm:$0xff] %v9890_v63  ;;  %v4671_v32 = vpop.f32.mrf.mxu1  ;;  %v4562_v63 = vld [vmem:[%s11667_s4 + $0x158] sm:$0xff] }
 0x6b5   : > { %3548 = vst [vmem:[#allocation1 + $0x20] ss:$2 sm:$0xff] %v8818_v48  ;;  %v9893_v8 = vld.sshfl [vmem:[#allocation1] sm:$0xff pattern:$0x75316420] }
 0x6b6   : > { %12090 = vst [vmem:[#allocation54_spill] sm:$0xff] %v9893_v8  ;;  %v9897_v4 = vld.sshfl [vmem:[#allocation1 + $0x30] sm:$0xff pattern:$0x75316420] }
 0x6b7   : > { %3550 = vst [vmem:[#allocation1 + $0x21] ss:$2 sm:$0xff] %v8837_v50 }
 0x6b8   : > { %3386 = vst [vmem:[#allocation1] ss:$2 sm:$0xff] %v8821_v45 }
 0x6b9   : > { %12091 = vst [vmem:[#allocation46_spill] sm:$0xff] %v9897_v4  ;;  %v9901_v21 = vld.sshfl [vmem:[#allocation1 + $0x10] sm:$0xff pattern:$0x75316420]  ;;  %v4566_v4 = vld [vmem:[%s11667_s4 + $0x178] sm:$0xff] }
 0x6ba   : > { %3388 = vst [vmem:[#allocation1 + $0x1] ss:$2 sm:$0xff] %v8825_v10  ;;  %4721 = vmatpush.msra.mxu3 %v4566_v4  ;;  %v4564_v4 = vld [vmem:[%s11667_s4 + $0x168] sm:$0xff] }
 0x6bb   : > { %3250 = vst [vmem:[#allocation1 + $0x30] ss:$2 sm:$0xff] %v8990_v39 }
 0x6bc   : > { %12092 = vst [vmem:[#allocation51_spill] sm:$0xff] %v9901_v21  ;;  %4722 = vmatpush.msra.mxu3 %v4565_v6  ;;  %v4563_v6 = vld [vmem:[%s11667_s4 + $0x160] sm:$0xff]  ;;  %v2218_v21 = vadd.f32 %v9523_v31, %v2217_v1  ;;  %v4560_v31 = vld [vmem:[%s11667_s4 + $0x148] sm:$0xff] }
 0x6bd   : > { %3391 = vst [vmem:[#allocation1 + $0x10] ss:$2 sm:$0xff] %v8818_v48 }
 0x6be   : > { %12093 = vst [vmem:[#allocation45_spill] sm:$0xff] %v9906_v0  ;;  %v9909_v3 = vld.sshfl [vmem:[#allocation1 + $0x20] sm:$0xff pattern:$0x75316420]  ;;  %4723 = vmatpush.msra.mxu3 %v4564_v4  ;;  %v3486_v4 = vsel %vm3459_vm15, %v9682_v44, %v6359_v54  ;;  %v9970_v1 = vmax.f32 %v2218_v21, 0.0  ;;  %v4674_v44 = vpop.f32.mrf.mxu1 }
 0x6bf   : > { %3393 = vst [vmem:[#allocation1 + $0x11] ss:$2 sm:$0xff] %v8837_v50  ;;  %4702 = vmatmul.f32.gmra.mxu2 %v3486_v4  ;;  %v4559_v4 = vld [vmem:[%s11667_s4 + $0x140] sm:$0xff] }
 0x6c0   : > { %12094 = vst [vmem:[#allocation63_spill] sm:$0xff] %v9909_v3  ;;  %v9928_v3 = vld [vmem:[%s11668_s5] ss:$0 sm:$0xff]  ;;  %4724 = vmatpush.msra.mxu3 %v4563_v6  ;;  %v4561_v6 = vld [vmem:[%s11667_s4 + $0x150] sm:$0xff]  ;;  %v9985_v21 = vrot.slane %v9970_v1, 4 }
 0x6c1   : > { %3560 = vst [vmem:[#allocation1 + $0x20] ss:$2 sm:$0xff] %v8769_v36  ;;  %v9915_v17 = vld.sshfl [vmem:[#allocation1] sm:$0xff pattern:$0x75316420]  ;;  %v9941_v43 = vadd.f32 %v9928_v3, %v4671_v32 }
 0x6c2   : > { %12095 = vst [vmem:[#allocation64_spill] sm:$0xff] %v9915_v17  ;;  %v9919_v51 = vld.sshfl [vmem:[#allocation1 + $0x30] sm:$0xff pattern:$0x75316420]  ;;  %4725 = vmatpush.msra.mxu3 %v4562_v63  ;;  %v9975_v63 = vadd.f32 %v9928_v3, %v4674_v44 }
 0x6c3   : > { %3561 = vst [vmem:[#allocation1 + $0x21] ss:$2 sm:$0xff] %v8774_v5  ;;  %v4557_v44 = vld [vmem:[%s11667_s4 + $0x130] sm:$0xff] }
 0x6c4   : > { %3406 = vst [vmem:[#allocation1 + $0x1] ss:$2 sm:$0xff] %v8883_v62  ;;  %4726 = vmatpush.msra.mxu3 %v4561_v6  ;;  %v4558_v6 = vld [vmem:[%s11667_s4 + $0x138] sm:$0xff] }
 0x6c5   : > { %12096 = vst [vmem:[#allocation65_spill] sm:$0xff] %v9919_v51 }
 0x6c6   : > { %3405 = vst [vmem:[#allocation1] ss:$2 sm:$0xff] %v8879_v37  ;;  %v9934_v34 = vld.sshfl [vmem:[#allocation1 + $0x10] sm:$0xff pattern:$0x75316420]  ;;  %4727 = vmatpush.msra.mxu3 %v4560_v31 }
 0x6c7   : > { %3260 = vst [vmem:[#allocation1 + $0x30] ss:$2 sm:$0xff] %v9015_v57 }
 0x6c8   : > { %12097 = vst [vmem:[#allocation66_spill] sm:$0xff] %v9934_v34  ;;  %4728 = vmatpush.msra.mxu3 %v4559_v4  ;;  %v4556_v4 = vld [vmem:[%s11667_s4 + $0x128] sm:$0xff]  ;;  %v12113_v34 = vld [vmem:[#allocation14_spill] sm:$0xff] }
 0x6c9   : > { %3408 = vst [vmem:[#allocation1 + $0x10] ss:$2 sm:$0xff] %v9165_v16  ;;  %v2948_v7 = vrot.slane %v12113_v34, 3 }
 0x6ca   : > { %12098 = vst [vmem:[#allocation67_spill] sm:$0xff] %v9941_v43  ;;  %v9947_v23 = vld.sshfl [vmem:[#allocation1 + $0x20] sm:$0xff pattern:$0x75316420]  ;;  %4729 = vmatpush.msra.mxu3 %v4558_v6 }
 0x6cb   : > { %3409 = vst [vmem:[#allocation1 + $0x11] ss:$2 sm:$0xff] %v9175_v14  ;;  %v4555_v6 = vld [vmem:[%s11667_s4 + $0x120] sm:$0xff] }
 0x6cc   : > { %12099 = vst [vmem:[#allocation68_spill] sm:$0xff] %v9947_v23  ;;  %4730 = vmatpush.msra.mxu3 %v4557_v44  ;;  %v10013_v44 = vpop.permute.xlu0 %6332 }
 0x6cd   : > { %3570 = vst [vmem:[#allocation1 + $0x20] ss:$2 sm:$0xff] %v9165_v16  ;;  %v9956_v32 = vld.sshfl [vmem:[#allocation1] sm:$0xff pattern:$0x75316420] }
 0x6ce   : > { %12100 = vst [vmem:[#allocation69_spill] sm:$0xff] %v9956_v32  ;;  %v9962_v40 = vld.sshfl [vmem:[#allocation1 + $0x30] sm:$0xff pattern:$0x75316420]  ;;  %4731 = vmatpush.msra.mxu3 %v4556_v4  ;;  %v4552_v4 = vld [vmem:[%s11667_s4 + $0x108] sm:$0xff] }
 0x6cf   : > { %3571 = vst [vmem:[#allocation1 + $0x21] ss:$2 sm:$0xff] %v9175_v14 }
 0x6d0   : > { %12101 = vst [vmem:[#allocation70_spill] sm:$0xff] %v9962_v40  ;;  %4732 = vmatpush.msra.mxu3 %v4555_v6  ;;  %v4551_v6 = vld [vmem:[%s11667_s4 + $0x100] sm:$0xff] }
 0x6d1   : > { %3540 = vst [vmem:[#allocation1] ss:$2 sm:$0xff] %v8821_v45 }
 0x6d2   : > { %3270 = vst [vmem:[#allocation1 + $0x30] ss:$2 sm:$0xff] %v9037_v42  ;;  %v9972_v54 = vld.sshfl [vmem:[#allocation1 + $0x10] sm:$0xff pattern:$0x75316420] }
 0x6d3   : > { %3542 = vst [vmem:[#allocation1 + $0x1] ss:$2 sm:$0xff] %v8825_v10 }
 0x6d4   : > { %12102 = vst [vmem:[#allocation71_spill] sm:$0xff] %v9972_v54 }
 0x6d5   : > { %12103 = vst [vmem:[#allocation72_spill] sm:$0xff] %v9975_v63 }
 0x6d6   : > { %3544 = vst [vmem:[#allocation1 + $0x10] ss:$2 sm:$0xff] %v8990_v39  ;;  %v9987_v31 = vld.sshfl [vmem:[#allocation1 + $0x20] sm:$0xff pattern:$0x75316420] }
 0x6d7   : > { %12104 = vst [vmem:[#allocation73_spill] sm:$0xff] %v9987_v31 }
 0x6d8   : > { %3580 = vst [vmem:[#allocation1 + $0x20] ss:$2 sm:$0xff] %v9970_v1 }
 0x6d9   : > { %v9996_v54 = vld.sshfl [vmem:[#allocation1 + $0x30] sm:$0xff pattern:$0x75316420]  ;;  %3581 = vst [vmem:[#allocation1 + $0x21] ss:$2 sm:$0xff] %v9985_v21 }
 0x6da   : > { %12105 = vst [vmem:[#allocation74_spill] sm:$0xff] %v9996_v54  ;;  %v10000_v19 = vld.sshfl [vmem:[#allocation1] sm:$0xff pattern:$0x75316420]  ;;  %v4554_v54 = vld [vmem:[%s11667_s4 + $0x118] sm:$0xff] }
 0x6db   : > { %3280 = vst [vmem:[#allocation1 + $0x30] ss:$2 sm:$0xff] %v9790_v24  ;;  %4733 = vmatpush.msra.mxu3 %v4554_v54 }
 0x6dc   : > { %12106 = vst [vmem:[#allocation75_spill] sm:$0xff] %v10000_v19  ;;  %v4553_v19 = vld [vmem:[%s11667_s4 + $0x110] sm:$0xff] }
 0x6dd   : > { %3555 = vst [vmem:[#allocation1] ss:$2 sm:$0xff] %v8843_v15  ;;  %v10006_v31 = vld.sshfl [vmem:[#allocation1 + $0x10] sm:$0xff pattern:$0x75316420]  ;;  %4734 = vmatpush.msra.mxu3 %v4553_v19  ;;  %v10037_v19 = vpop.permute.xlu0 %6337 }
 0x6de   : > { %12107 = vst [vmem:[#allocation76_spill] sm:$0xff] %v10006_v31 }
 0x6df   : > { %3556 = vst [vmem:[#allocation1 + $0x1] ss:$2 sm:$0xff] %v8846_v25  ;;  %4735 = vmatpush.msra.mxu3 %v4552_v4 }
 0x6e0   : > { %3557 = vst [vmem:[#allocation1 + $0x10] ss:$2 sm:$0xff] %v9015_v57  ;;  %v10021_v31 = vld.sshfl [vmem:[#allocation1 + $0x20] sm:$0xff pattern:$0x75316420] }
 0x6e1   : > { %12108 = vst [vmem:[#allocation77_spill] sm:$0xff] %v10021_v31  ;;  %4736 = vmatpush.msra.mxu3 %v4551_v6  ;;  %v10041_v31 = vpop.permute.xlu1 %6327  ;;  %v6350_v6 = vunpack.i.h.bf16 %v9904_v20 }
 0x6e2   : > { %v10023_v12 = vld.sshfl [vmem:[#allocation1 + $0x30] sm:$0xff pattern:$0x75316420]  ;;  %3609 = vst [vmem:[#allocation1 + $0x20] ss:$2 sm:$0xff] %v8818_v48 }
 0x6e3   : > { %12109 = vst [vmem:[#allocation78_spill] sm:$0xff] %v10023_v12  ;;  %v10043_v12 = vpop.permute.xlu2 %6382 }
 0x6e4   : > { %3346 = vst [vmem:[#allocation1 + $0x30] ss:$2 sm:$0xff] %v8846_v25  ;;  %v6384_v4 = vunpack.i.l.bf16 %v10043_v12 }
 0x6e5   : > { %3348 = vst [vmem:[#allocation1 + $0x31] ss:$2 sm:$0xff] %v9015_v57  ;;  %v10061_v47 = vpop.permute.xlu0 %6362 }
 0x6e6   : > { %v10030_v32 = vld.sshfl [vmem:[#allocation1] sm:$0xff pattern:$0x75316420]  ;;  %3611 = vst [vmem:[#allocation1 + $0x21] ss:$2 sm:$0xff] %v8837_v50  ;;  %v3487_v38 = vsel %vm3459_vm15, %v9685_v61, %v6384_v4 }
 0x6e7   : > { %12110 = vst [vmem:[#allocation79_spill] sm:$0xff] %v10030_v32  ;;  %v10034_v54 = vld.sshfl [vmem:[#allocation1 + $0x10] sm:$0xff pattern:$0x75316420]  ;;  %4705 = vmatmul.f32.gmra.mxu2 %v3487_v38 }
 0x6e8   : > { %3565 = vst [vmem:[#allocation1] ss:$2 sm:$0xff] %v8879_v37  ;;  %v12119_v32 = vld [vmem:[#allocation60_spill] sm:$0xff] }
 0x6e9   : > { %12111 = vst [vmem:[#allocation80_spill] sm:$0xff] %v10034_v54  ;;  %v10070_v4 = vpop.permute.xlu1 %6352  ;;  %v2927_v54 = vrot.slane %v12119_v32, 3 }
 0x6ea   : > { %3566 = vst [vmem:[#allocation1 + $0x1] ss:$2 sm:$0xff] %v8883_v62 }
 0x6eb   : > { %3567 = vst [vmem:[#allocation1 + $0x10] ss:$2 sm:$0xff] %v9037_v42 }
 0x6ec   : > { %v10045_v8 = vld.sshfl [vmem:[#allocation1 + $0x30] sm:$0xff pattern:$0x75316420] }
 0x6ed   : > { %12112 = vst [vmem:[#allocation81_spill] sm:$0xff] %v10045_v8  ;;  %v12116_v8 = vld [vmem:[#allocation27_spill] sm:$0xff]  ;;  %v10063_v34 = vld.sshfl [vmem:[#allocation1 + $0x20] sm:$0xff pattern:$0x75316420] }
 0x6ee   : > { %3359 = vst [vmem:[#allocation1 + $0x30] ss:$2 sm:$0xff] %v9537_v27  ;;  %v2947_v63 = vrot.slane %v12116_v8, 3 }
 0x6ef   : > { %3360 = vst [vmem:[#allocation1 + $0x31] ss:$2 sm:$0xff] %v9790_v24 }
 0x6f0   : > { %v2949_v40 = vsel %vm2552_vm10, %v2947_v63, %v2948_v7  ;;  %3621 = vst [vmem:[#allocation1 + $0x20] ss:$2 sm:$0xff] %v8769_v36  ;;  %v10085_v7 = vpop.permute.xlu0 %6367 }
 0x6f1   : > { %v10050_v23 = vld.sshfl [vmem:[#allocation1] sm:$0xff pattern:$0x75316420]  ;;  %v3499_v61 = vsel %vm3441_vm11, %v2949_v40, %v6350_v6  ;;  %3622 = vst [vmem:[#allocation1 + $0x21] ss:$2 sm:$0xff] %v8774_v5  ;;  %v6324_v40 = vunpack.i.l.bf16 %v9869_v59  ;;  %v6369_v6 = vunpack.i.l.bf16 %v10085_v7 }
 0x6f2   : > { %12114 = vst [vmem:[#allocation14_spill] sm:$0xff] %v10050_v23  ;;  %v10057_v17 = vld.sshfl [vmem:[#allocation1 + $0x10] sm:$0xff pattern:$0x75316420]  ;;  %v6365_v23 = vunpack.i.h.bf16 %v10061_v47 }
 0x6f3   : > { %3575 = vst [vmem:[#allocation1] ss:$2 sm:$0xff] %v9533_v58  ;;  %v3488_v43 = vsel %vm3459_vm15, %v9619_v60, %v6369_v6  ;;  %v6325_v60 = vunpack.i.h.bf16 %v9869_v59 }
 0x6f4   : > { %12115 = vst [vmem:[#allocation82_spill] sm:$0xff] %v10057_v17  ;;  %v10074_v38 = vsel %vm3450_vm13, %v3499_v61, %v6365_v23  ;;  %v6334_v23 = vunpack.i.l.bf16 %v10013_v44  ;;  %v12121_v61 = vld [vmem:[#allocation59_spill] sm:$0xff]  ;;  %4708 = vmatmul.f32.gmra.mxu2 %v3488_v43 }
 0x6f5   : > { %3576 = vst [vmem:[#allocation1 + $0x1] ss:$2 sm:$0xff] %v9537_v27 }
 0x6f6   : > { %3577 = vst [vmem:[#allocation1 + $0x10] ss:$2 sm:$0xff] %v9790_v24  ;;  %v10076_v8 = vld.sshfl [vmem:[#allocation1 + $0x30] sm:$0xff pattern:$0x75316420] }
 0x6f7   : > { %12117 = vst [vmem:[#allocation27_spill] sm:$0xff] %v10076_v8  ;;  %v6373_v8 = vpop.permute.xlu1 %6372 }
 0x6f8   : > { %3401 = vst [vmem:[#allocation1 + $0x30] ss:$2 sm:$0xff] %v8769_v36  ;;  %v10094_v32 = vld.sshfl [vmem:[#allocation1 + $0x20] sm:$0xff pattern:$0x75316420] }
 0x6f9   : > { %3403 = vst [vmem:[#allocation1 + $0x31] ss:$2 sm:$0xff] %v8774_v5 }
 0x6fa   : > { %3631 = vst [vmem:[#allocation1 + $0x20] ss:$2 sm:$0xff] %v9165_v16 }
 0x6fb   : > { %3632 = vst [vmem:[#allocation1 + $0x21] ss:$2 sm:$0xff] %v9175_v14 }
 0x6fc   : > { %v10079_v17 = vld.sshfl [vmem:[#allocation1] sm:$0xff pattern:$0x75316420] }
 0x6fd   : > { %12118 = vst [vmem:[#allocation83_spill] sm:$0xff] %v10079_v17  ;;  %v10087_v63 = vld.sshfl [vmem:[#allocation1 + $0x10] sm:$0xff pattern:$0x75316420]  ;;  %v2926_v17 = vrot.slane %v12121_v61, 3 }
 0x6fe   : > { %3601 = vst [vmem:[#allocation1] ss:$2 sm:$0xff] %v8821_v45 }
 0x6ff   : > { %12120 = vst [vmem:[#allocation60_spill] sm:$0xff] %v10087_v63  ;;  %v2928_v33 = vsel %vm2552_vm10, %v2926_v17, %v2927_v54  ;;  %v6374_v63 = vunpack.i.l.bf16 %v6373_v8 }
 0x700   : > { %3603 = vst [vmem:[#allocation1 + $0x1] ss:$2 sm:$0xff] %v8825_v10  ;;  %v3492_v51 = vsel %vm3441_vm11, %v2928_v33, %v6324_v40  ;;  %v10104_v22 = vld.sshfl [vmem:[#allocation1 + $0x30] sm:$0xff pattern:$0x75316420]  ;;  %v6335_v33 = vunpack.i.h.bf16 %v10013_v44  ;;  %v6375_v40 = vunpack.i.h.bf16 %v6373_v8 }
 0x701   : > { %3605 = vst [vmem:[#allocation1 + $0x10] ss:$2 sm:$0xff] %v8990_v39  ;;  %v3500_v61 = vsel %vm3450_vm13, %v3492_v51, %v6334_v23  ;;  %v12123_v51 = vld [vmem:[#allocation13_spill] sm:$0xff]  ;;  %v12125_v8 = vld [vmem:[#allocation16_spill] sm:$0xff] }
 0x702   : > { %v3508_v0 = vsel %vm3459_vm15, %v3500_v61, %v6374_v63  ;;  %3414 = vst [vmem:[#allocation1 + $0x30] ss:$2 sm:$0xff] %v9970_v1  ;;  %v2929_v54 = vrot.slane %v12123_v51, 3 }
 0x703   : > { %4737 = vmatmul.f32.vlgmr.msra.gmra.mxu3 %v3508_v0  ;;  %3415 = vst [vmem:[#allocation1 + $0x31] ss:$2 sm:$0xff] %v9985_v21  ;;  %v10116_v0 = vld.sshfl [vmem:[#allocation1 + $0x20] sm:$0xff pattern:$0x75316420] }
 0x704   : > { %v2931_v46 = vsel %vm2552_vm10, %v2929_v54, %v2930_v30  ;;  %12124 = vst [vmem:[#allocation59_spill] sm:$0xff] %v10116_v0  ;;  %v6354_v30 = vunpack.i.l.bf16 %v10070_v4  ;;  %v12126_v54 = vld [vmem:[#allocation11_spill] sm:$0xff] }
 0x705   : > { %v3493_v44 = vsel %vm3441_vm11, %v2931_v46, %v6325_v60  ;;  %3641 = vst [vmem:[#allocation1 + $0x20] ss:$2 sm:$0xff] %v9970_v1  ;;  %v2932_v60 = vrot.slane %v12126_v54, 3 }
 0x706   : > { %v3501_v61 = vsel %vm3450_vm13, %v3493_v44, %v6335_v33  ;;  %3642 = vst [vmem:[#allocation1 + $0x21] ss:$2 sm:$0xff] %v9985_v21 }
 0x707   : > { %v3606_v17 = vld.sshfl [vmem:[#allocation1] sm:$0xff pattern:$0x75316420]  ;;  %v3509_v51 = vsel %vm3459_vm15, %v3501_v61, %v6375_v40  ;;  %v6360_v61 = vunpack.i.h.bf16 %v9936_v13 }
 0x708   : > { %v3607_v43 = vld.sshfl [vmem:[#allocation1 + $0x10] sm:$0xff pattern:$0x75316420]  ;;  %3616 = vst [vmem:[#allocation1] ss:$2 sm:$0xff] %v8843_v15  ;;  %v3646_v63 = vrot.slane %v3606_v17, 1 }
 0x709   : > { %v3647_v23 = vrot.slane %v3607_v43, 1  ;;  %3617 = vst [vmem:[#allocation1 + $0x1] ss:$2 sm:$0xff] %v8846_v25  ;;  %v2933_v17 = vrot.slane %v12125_v8, 3  ;;  %v6339_v43 = vunpack.i.l.bf16 %v10037_v19  ;;  %v10138_v8 = vpop.permute.xlu0 %6387 }
 0x70a   : > { %3618 = vst [vmem:[#allocation1 + $0x10] ss:$2 sm:$0xff] %v9015_v57 }
 0x70b   : > { %v3648_v59 = vsel %vm2364_vm7, %v3646_v63, %v3647_v23  ;;  %4740 = vmatmul.f32.gmra.mxu3 %v3509_v51  ;;  %v10129_v63 = vld.sshfl [vmem:[#allocation1 + $0x30] sm:$0xff pattern:$0x75316420] }
 0x70c   : > { %v6396_v6 = vpack.i.bf16 %v3647_v23, %v3648_v59  ;;  %12127 = vst [vmem:[#allocation62_spill] sm:$0xff] %v10129_v63  ;;  %v2934_v23 = vsel %vm2552_vm10, %v2932_v60, %v2933_v17  ;;  %v6389_v17 = vunpack.i.l.bf16 %v10138_v8 }
 0x70d   : > { %3552 = vst [vmem:[#allocation1 + $0x30] ss:$2 sm:$0xff] %v8823_v26  ;;  %v3494_v59 = vsel %vm3441_vm11, %v2934_v23, %v6339_v43  ;;  %v10141_v51 = vld.sshfl [vmem:[#allocation1 + $0x20] sm:$0xff pattern:$0x75316420] }
 0x70e   : > { %6397 = vrot.lane.b32.xlu2 %v6396_v6, %s6795_s21  ;;  %v3502_v6 = vsel %vm3450_vm13, %v3494_v59, %v6354_v30  ;;  %12128 = vst [vmem:[#allocation13_spill] sm:$0xff] %v10141_v51  ;;  %v3489_v13 = vsel %vm3459_vm15, %v9622_v29, %v6389_v17  ;;  %v12129_v30 = vld [vmem:[#allocation26_spill] sm:$0xff]  ;;  %v10154_v59 = vpop.permute.xlu1 %6377  ;;  %v6385_v17 = vunpack.i.h.bf16 %v10043_v12  ;;  %v12133_v12 = vld [vmem:[#allocation31_spill] sm:$0xff] }
 0x70f   : > { %3726 = vst [vmem:[#allocation1 + $0x20] ss:$2 sm:$0xff] %v8818_v48  ;;  %v3510_v60 = vsel %vm3459_vm15, %v3502_v6, %v6360_v61  ;;  %4711 = vmatmul.f32.gmra.mxu2 %v3489_v13  ;;  %v12131_v6 = vld [vmem:[#allocation58_spill] sm:$0xff]  ;;  %v6314_v61 = vunpack.i.l.bf16 %v9746_v55 }
 0x710   : > { %v3619_v33 = vld.sshfl [vmem:[#allocation1] sm:$0xff pattern:$0x75316420]  ;;  %3728 = vst [vmem:[#allocation1 + $0x21] ss:$2 sm:$0xff] %v8837_v50  ;;  %v2935_v29 = vrot.slane %v12131_v6, 3 }
 0x711   : > { %v3620_v46 = vld.sshfl [vmem:[#allocation1 + $0x10] sm:$0xff pattern:$0x75316420]  ;;  %3626 = vst [vmem:[#allocation1] ss:$2 sm:$0xff] %v8879_v37  ;;  %v3652_v40 = vrot.slane %v3619_v33, 1 }
 0x712   : > { %v3653_v44 = vrot.slane %v3620_v46, 1  ;;  %3628 = vst [vmem:[#allocation1 + $0x10] ss:$2 sm:$0xff] %v9037_v42  ;;  %v2936_v33 = vrot.slane %v12129_v30, 3  ;;  %v6340_v46 = vunpack.i.h.bf16 %v10037_v19  ;;  %v6379_v19 = vunpack.i.l.bf16 %v10154_v59 }
 0x713   : > { %3627 = vst [vmem:[#allocation1 + $0x1] ss:$2 sm:$0xff] %v8883_v62  ;;  %4743 = vmatmul.f32.gmra.mxu3 %v3510_v60  ;;  %v2939_v30 = vrot.slane %v12133_v12, 3 }
 0x714   : > { %v3654_v54 = vsel %vm2364_vm7, %v3652_v40, %v3653_v44  ;;  %v10151_v23 = vld.sshfl [vmem:[#allocation1 + $0x30] sm:$0xff pattern:$0x75316420]  ;;  %v6294_v40 = vunpack.i.l.bf16 %v9588_v9  ;;  %v2937_v60 = vsel %vm2552_vm10, %v2935_v29, %v2936_v33  ;;  %v6329_v33 = vunpack.i.l.bf16 %v10041_v31 }
 0x715   : > { %v6401_v43 = vpack.i.bf16 %v3653_v44, %v3654_v54  ;;  %12130 = vst [vmem:[#allocation16_spill] sm:$0xff] %v10151_v23  ;;  %v6355_v44 = vunpack.i.h.bf16 %v10070_v4  ;;  %v3495_v9 = vsel %vm3441_vm11, %v2937_v60, %v6340_v46  ;;  %v12132_v4 = vld [vmem:[#allocation38_spill] sm:$0xff]  ;;  %v10182_v46 = vpop.f32.mrf.mxu2  ;;  %v2220_v60 = vpop.f32.mrf.mxu0 }
 0x716   : > { %3562 = vst [vmem:[#allocation1 + $0x30] ss:$2 sm:$0xff] %v8869_v28  ;;  %v3474_v13 = vsel %vm3441_vm11, %v12132_v4, %v6294_v40  ;;  %v10190_v12 = vpop.permute.xlu1 %6392 }
 0x717   : > { %6402 = vrot.lane.b32.xlu1 %v6401_v43, %s6795_s21  ;;  %v3503_v55 = vsel %vm3450_vm13, %v3495_v9, %v6355_v44  ;;  %v10177_v6 = vld.sshfl [vmem:[#allocation1 + $0x20] sm:$0xff pattern:$0x75316420]  ;;  %v3482_v29 = vsel %vm3450_vm13, %v3474_v13, %v6314_v61  ;;  %12134 = vst [vmem:[#allocation11_spill] sm:$0xff] %v10182_v46  ;;  %v12135_v44 = vld [vmem:[#allocation12_spill] sm:$0xff] }
 0x718   : > { %v3511_v23 = vsel %vm3459_vm15, %v3503_v55, %v6385_v17  ;;  %3738 = vst [vmem:[#allocation1 + $0x20] ss:$2 sm:$0xff] %v8769_v36  ;;  %v3490_v40 = vsel %vm3459_vm15, %v3482_v29, %v6379_v19  ;;  %v2938_v9 = vrot.slane %v12135_v44, 3  ;;  %v10197_v17 = vld [vmem:[%s11666_s3] ss:$0 sm:$0xff]  ;;  %v6370_v19 = vunpack.i.h.bf16 %v10085_v7  ;;  %v12139_v7 = vld [vmem:[#allocation36_spill] sm:$0xff] }
 0x719   : > { %v10163_v54 = vld.sshfl [vmem:[#allocation1 + $0x10] sm:$0xff pattern:$0x75316420]  ;;  %3739 = vst [vmem:[#allocation1 + $0x21] ss:$2 sm:$0xff] %v8774_v5  ;;  %4714 = vmatmul.f32.gmra.mxu2 %v3490_v40  ;;  %v6344_v29 = vunpack.i.l.bf16 %v9886_v35  ;;  %v6394_v40 = vunpack.i.l.bf16 %v10190_v12  ;;  %v4660_v44 = vadd.f32 %v9928_v3, %v9853_v2 }
 0x71a   : > { %v10167_v43 = vld.sshfl [vmem:[#allocation1] sm:$0xff pattern:$0x75316420]  ;;  %3638 = vst [vmem:[#allocation1 + $0x10] ss:$2 sm:$0xff] %v9790_v24  ;;  %v2940_v61 = vsel %vm2552_vm10, %v2938_v9, %v2939_v30 }
 0x71b   : > { %3636 = vst [vmem:[#allocation1] ss:$2 sm:$0xff] %v9533_v58  ;;  %4746 = vmatmul.f32.gmra.mxu3 %v3511_v23  ;;  %v2221_v23 = vadd.f32 %v10197_v17, %v2220_v60  ;;  %v3496_v13 = vsel %vm3441_vm11, %v2940_v61, %v6329_v33  ;;  %v2942_v60 = vrot.slane %v12139_v7, 3  ;;  %v6330_v61 = vunpack.i.h.bf16 %v10041_v31 }
 0x71c   : > { %3637 = vst [vmem:[#allocation1 + $0x1] ss:$2 sm:$0xff] %v9537_v27  ;;  %v3504_v9 = vsel %vm3450_vm13, %v3496_v13, %v6344_v29  ;;  %v3491_v2 = vsel %vm3459_vm15, %v9761_v49, %v6394_v40  ;;  %v12140_v13 = vld [vmem:[#allocation19_spill] sm:$0xff] }
 0x71d   : > { %v10187_v4 = vld.sshfl [vmem:[#allocation1 + $0x30] sm:$0xff pattern:$0x75316420]  ;;  %v10214_v33 = vmax.f32 %v2221_v23, 0.0  ;;  %v3512_v46 = vsel %vm3459_vm15, %v3504_v9, %v6370_v19  ;;  %v2941_v29 = vrot.slane %v12140_v13, 3  ;;  %v6390_v23 = vunpack.i.h.bf16 %v10138_v8 }
 0x71e   : > { %12136 = vst [vmem:[#allocation26_spill] sm:$0xff] %v10187_v4  ;;  %v4700_v4 = vpop.f32.mrf.mxu2 }
 0x71f   : > { %3572 = vst [vmem:[#allocation1 + $0x30] ss:$2 sm:$0xff] %v9329_v56  ;;  %v10226_v7 = vadd.f32 %v4700_v4, %v4660_v44  ;;  %v2943_v31 = vsel %vm2552_vm10, %v2941_v29, %v2942_v60 }
 0x720   : > { %v10219_v63 = vld.sshfl [vmem:[#allocation1 + $0x20] sm:$0xff pattern:$0x75316420]  ;;  %v3497_v49 = vsel %vm3441_vm11, %v2943_v31, %v6330_v61  ;;  %v6364_v31 = vunpack.i.l.bf16 %v10061_v47 }
 0x721   : > { %v10202_v55 = vld.sshfl [vmem:[#allocation1 + $0x10] sm:$0xff pattern:$0x75316420]  ;;  %3748 = vst [vmem:[#allocation1 + $0x20] ss:$2 sm:$0xff] %v9165_v16  ;;  %4717 = vmatmul.f32.gmra.mxu2 %v3491_v2  ;;  %v12143_v2 = vld [vmem:[#allocation61_spill] sm:$0xff] }
 0x722   : > { %12137 = vst [vmem:[#allocation58_spill] sm:$0xff] %v10202_v55  ;;  %v2945_v61 = vrot.slane %v12143_v2, 3 }
 0x723   : > { %3722 = vst [vmem:[#allocation1 + $0x10] ss:$2 sm:$0xff] %v8990_v39  ;;  %v10207_v30 = vld.sshfl [vmem:[#allocation1] sm:$0xff pattern:$0x75316420]  ;;  %4749 = vmatmul.f32.gmra.mxu3 %v3512_v46  ;;  %v6345_v46 = vunpack.i.h.bf16 %v9886_v35  ;;  %v6349_v35 = vunpack.i.l.bf16 %v9904_v20 }
 0x724   : > { %12138 = vst [vmem:[#allocation38_spill] sm:$0xff] %v10207_v30 }
 0x725   : > { %3718 = vst [vmem:[#allocation1] ss:$2 sm:$0xff] %v8821_v45  ;;  %v3505_v44 = vsel %vm3450_vm13, %v3497_v49, %v6345_v46  ;;  %v12144_v49 = vld [vmem:[#allocation55_spill] sm:$0xff]  ;;  %v6380_v46 = vunpack.i.h.bf16 %v10154_v59  ;;  %v3283_v59 = vrot.slane %v9796_v41, 3 }
 0x726   : > { %3720 = vst [vmem:[#allocation1 + $0x1] ss:$2 sm:$0xff] %v8825_v10  ;;  %v10224_v45 = vld.sshfl [vmem:[#allocation1 + $0x30] sm:$0xff pattern:$0x75316420]  ;;  %v3513_v60 = vsel %vm3459_vm15, %v3505_v44, %v6390_v23  ;;  %v2944_v23 = vrot.slane %v12144_v49, 3 }
 0x727   : > { %12141 = vst [vmem:[#allocation31_spill] sm:$0xff] %v10224_v45 }
 0x728   : > { %3582 = vst [vmem:[#allocation1 + $0x30] ss:$2 sm:$0xff] %v10214_v33  ;;  %v2946_v20 = vsel %vm2552_vm10, %v2944_v23, %v2945_v61  ;;  %v3649_v61 = vrot.slane %v10063_v34, 1 }
 0x729   : > { %3749 = vst [vmem:[#allocation1 + $0x21] ss:$2 sm:$0xff] %v9175_v14  ;;  %v3498_v44 = vsel %vm3441_vm11, %v2946_v20, %v6349_v35  ;;  %v3289_v20 = vrot.slane %v9820_v11, 3 }
 0x72a   : > { %v3724_v19 = vld.sshfl [vmem:[#allocation1 + $0x10] sm:$0xff pattern:$0x75316420]  ;;  %v3506_v47 = vsel %vm3450_vm13, %v3498_v44, %v6364_v31 }
 0x72b   : > { %3735 = vst [vmem:[#allocation1 + $0x10] ss:$2 sm:$0xff] %v9015_v57  ;;  %v3764_v4 = vrot.slane %v3724_v19, 2  ;;  %4752 = vmatmul.f32.gmra.mxu3 %v3513_v60 }
 0x72d   : > { %v3723_v40 = vld.sshfl [vmem:[#allocation1] sm:$0xff pattern:$0x75316420] }
 0x72e   : > { %v3763_v9 = vrot.slane %v3723_v40, 2  ;;  %3733 = vst [vmem:[#allocation1] ss:$2 sm:$0xff] %v8843_v15 }
 0x72f   : > { %3734 = vst [vmem:[#allocation1 + $0x1] ss:$2 sm:$0xff] %v8846_v25  ;;  %v10240_v8 = vld.sshfl [vmem:[#allocation1 + $0x30] sm:$0xff pattern:$0x75316420] }
 0x730   : > { %12142 = vst [vmem:[#allocation12_spill] sm:$0xff] %v10240_v8  ;;  %v3765_v13 = vsel %vm2458_vm9, %v3763_v9, %v3764_v4  ;;  %v10246_v29 = vld.sshfl [vmem:[#allocation1 + $0x20] sm:$0xff pattern:$0x75316420]  ;;  %v3514_v9 = vsel %vm3459_vm15, %v3506_v47, %v6380_v46  ;;  %v3655_v47 = vrot.slane %v10094_v32, 1 }
 0x731   : > { %3613 = vst [vmem:[#allocation1 + $0x30] ss:$2 sm:$0xff] %v8823_v26  ;;  %v6411_v19 = vpack.i.bf16 %v3764_v4, %v3765_v13  ;;  %v3284_v4 = vrot.slane %v9804_v18, 3  ;;  %v6395_v18 = vunpack.i.h.bf16 %v10190_v12  ;;  %v3290_v12 = vrot.slane %v9827_v53, 3 }
 0x732   : > { %3758 = vst [vmem:[#allocation1 + $0x20] ss:$2 sm:$0xff] %v9970_v1  ;;  %v3737_v40 = vld.sshfl [vmem:[#allocation1 + $0x10] sm:$0xff pattern:$0x75316420] }
 0x733   : > { %3759 = vst [vmem:[#allocation1 + $0x21] ss:$2 sm:$0xff] %v9985_v21  ;;  %6412 = vrot.lane.b32.xlu0 %v6411_v19, %s6796_s22  ;;  %4755 = vmatmul.f32.gmra.mxu3 %v3514_v9  ;;  %v3285_v31 = vsel %vm2552_vm10, %v3283_v59, %v3284_v4  ;;  %v3770_v49 = vrot.slane %v3737_v40, 2  ;;  %v3515_v46 = vsel %vm3459_vm15, %v10074_v38, %v6395_v18 }
 0x734   : > { %3745 = vst [vmem:[#allocation1 + $0x10] ss:$2 sm:$0xff] %v9037_v42  ;;  %v3291_v53 = vsel %vm2552_vm10, %v3289_v20, %v3290_v12  ;;  %v3766_v12 = vrot.slane %v10177_v6, 2 }
 0x736   : > { %v3736_v60 = vld.sshfl [vmem:[#allocation1] sm:$0xff pattern:$0x75316420] }
 0x737   : > { %3743 = vst [vmem:[#allocation1] ss:$2 sm:$0xff] %v8879_v37  ;;  %v3769_v23 = vrot.slane %v3736_v60, 2 }
 0x738   : > { %v10260_v2 = vld.sshfl [vmem:[#allocation1 + $0x30] sm:$0xff pattern:$0x75316420]  ;;  %3744 = vst [vmem:[#allocation1 + $0x1] ss:$2 sm:$0xff] %v8883_v62 }
 0x739   : > { %v11798_v13 = vrot.slane %v10260_v2, 1  ;;  %3623 = vst [vmem:[#allocation1 + $0x30] ss:$2 sm:$0xff] %v8869_v28  ;;  %v3771_v4 = vsel %vm2458_vm9, %v3769_v23, %v3770_v49 }
 0x73a   : > { %v10268_v35 = vld.sshfl [vmem:[#allocation1 + $0x20] sm:$0xff pattern:$0x75316420]  ;;  %v6421_v32 = vpack.i.bf16 %v3770_v49, %v3771_v4 }
 0x73b   : > { %12145 = vst [vmem:[#allocation36_spill] sm:$0xff] %v10268_v35  ;;  %v3651_v19 = vsel %vm2364_vm7, %v3649_v61, %v11798_v13  ;;  %v10276_v41 = vld.sshfl [vmem:[#allocation1 + $0x10] sm:$0xff pattern:$0x75316420]  ;;  %4758 = vmatmul.f32.gmra.mxu3 %v3515_v46  ;;  %v12152_v4 = vld [vmem:[#allocation42_spill] sm:$0xff] }
 0x73c   : > { %3845 = vst [vmem:[#allocation1 + $0x20] ss:$2 sm:$0xff] %v8846_v25  ;;  %v6406_v34 = vpack.i.bf16 %v3651_v19, %v3285_v31 }
 0x73d   : > { %3847 = vst [vmem:[#allocation1 + $0x21] ss:$2 sm:$0xff] %v9015_v57 }
 0x73e   : > { %3755 = vst [vmem:[#allocation1 + $0x10] ss:$2 sm:$0xff] %v9790_v24  ;;  %6407 = vrot.lane.b32.xlu2 %v6406_v34, %s6795_s21 }
 0x73f   : > { %v10291_v9 = vld.sshfl [vmem:[#allocation1] sm:$0xff pattern:$0x75316420] }
 0x740   : > { %v10285_v44 = vld.sshfl [vmem:[#allocation1 + $0x30] sm:$0xff pattern:$0x75316420]  ;;  %3753 = vst [vmem:[#allocation1] ss:$2 sm:$0xff] %v9533_v58 }
 0x741   : > { %v3656_v40 = vrot.slane %v10285_v44, 1  ;;  %3633 = vst [vmem:[#allocation1 + $0x30] ss:$2 sm:$0xff] %v9329_v56  ;;  %v10403_v44 = vrot.slane %v10214_v33, 4 }
 0x742   : > { %3754 = vst [vmem:[#allocation1 + $0x1] ss:$2 sm:$0xff] %v9537_v27 }
 0x743   : > { %v3657_v11 = vsel %vm2364_vm7, %v3655_v47, %v3656_v40  ;;  %v4663_v47 = vadd.f32 %v9928_v3, %v9871_v52  ;;  %v3772_v52 = vrot.slane %v10219_v63, 2 }
 0x744   : > { %v10298_v38 = vld.sshfl [vmem:[#allocation1 + $0x20] sm:$0xff pattern:$0x75316420]  ;;  %v6416_v60 = vpack.i.bf16 %v3657_v11, %v3291_v53 }
 0x745   : > { %3860 = vst [vmem:[#allocation1 + $0x20] ss:$2 sm:$0xff] %v9537_v27  ;;  %v10302_v59 = vld.sshfl [vmem:[#allocation1 + $0x10] sm:$0xff pattern:$0x75316420] }
 0x746   : > { %12146 = vst [vmem:[#allocation19_spill] sm:$0xff] %v10302_v59  ;;  %6422 = vrot.lane.b32.xlu2 %v6421_v32, %s6796_s22  ;;  %6417 = vrot.lane.b32.xlu1 %v6416_v60, %s6795_s21  ;;  %v4703_v32 = vpop.f32.mrf.mxu2  ;;  %v12179_v59 = vld [vmem:[#allocation67_spill] sm:$0xff] }
 0x747   : > { %3861 = vst [vmem:[#allocation1 + $0x21] ss:$2 sm:$0xff] %v9790_v24  ;;  %v10354_v6 = vadd.f32 %v4703_v32, %v4663_v47 }
 0x748   : > { %3840 = vst [vmem:[#allocation1 + $0x10] ss:$2 sm:$0xff] %v8837_v50  ;;  %v10309_v61 = vld.sshfl [vmem:[#allocation1 + $0x30] sm:$0xff pattern:$0x75316420] }
 0x749   : > { %3842 = vst [vmem:[#allocation1 + $0x11] ss:$2 sm:$0xff] %v8823_v26  ;;  %v10312_v18 = vld.sshfl [vmem:[#allocation1] sm:$0xff pattern:$0x75316420] }
 0x74a   : > { %12147 = vst [vmem:[#allocation61_spill] sm:$0xff] %v10309_v61 }
 0x74b   : > { %3643 = vst [vmem:[#allocation1 + $0x30] ss:$2 sm:$0xff] %v10214_v33 }
 0x74c   : > { %12148 = vst [vmem:[#allocation55_spill] sm:$0xff] %v10312_v18  ;;  %v12178_v18 = vld [vmem:[#allocation28_spill] sm:$0xff] }
 0x74d   : > { %3835 = vst [vmem:[#allocation1] ss:$2 sm:$0xff] %v8825_v10 }
 0x74e   : > { %v10315_v31 = vld.sshfl [vmem:[#allocation1 + $0x20] sm:$0xff pattern:$0x75316420]  ;;  %3837 = vst [vmem:[#allocation1 + $0x1] ss:$2 sm:$0xff] %v8990_v39 }
 0x74f   : > { %12149 = vst [vmem:[#allocation84_spill] sm:$0xff] %v10315_v31 }
 0x750   : > { %3908 = vst [vmem:[#allocation1 + $0x20] ss:$2 sm:$0xff] %v8769_v36  ;;  %v10320_v19 = vld.sshfl [vmem:[#allocation1 + $0x10] sm:$0xff pattern:$0x75316420] }
 0x751   : > { %3910 = vst [vmem:[#allocation1 + $0x21] ss:$2 sm:$0xff] %v8774_v5 }
 0x752   : > { %3857 = vst [vmem:[#allocation1 + $0x10] ss:$2 sm:$0xff] %v9175_v14  ;;  %v10323_v34 = vld.sshfl [vmem:[#allocation1 + $0x30] sm:$0xff pattern:$0x75316420] }
 0x753   : > { %12150 = vst [vmem:[#allocation85_spill] sm:$0xff] %v10323_v34 }
 0x754   : > { %3858 = vst [vmem:[#allocation1 + $0x11] ss:$2 sm:$0xff] %v9329_v56 }
 0x755   : > { %3730 = vst [vmem:[#allocation1 + $0x30] ss:$2 sm:$0xff] %v8823_v26  ;;  %v10327_v49 = vld.sshfl [vmem:[#allocation1] sm:$0xff pattern:$0x75316420] }
 0x756   : > { %3854 = vst [vmem:[#allocation1] ss:$2 sm:$0xff] %v8883_v62 }
 0x757   : > { %3855 = vst [vmem:[#allocation1 + $0x1] ss:$2 sm:$0xff] %v9037_v42 }
 0x758   : > { %v10330_v10 = vld.sshfl [vmem:[#allocation1 + $0x20] sm:$0xff pattern:$0x75316420] }
 0x759   : > { %12151 = vst [vmem:[#allocation86_spill] sm:$0xff] %v10330_v10 }
 0x75a   : > { %3923 = vst [vmem:[#allocation1 + $0x20] ss:$2 sm:$0xff] %v9970_v1 }
 0x75b   : > { %3924 = vst [vmem:[#allocation1 + $0x21] ss:$2 sm:$0xff] %v9985_v21  ;;  %v10335_v39 = vld.sshfl [vmem:[#allocation1 + $0x10] sm:$0xff pattern:$0x75316420] }
 0x75c   : > { %v10337_v23 = vld.sshfl [vmem:[#allocation1 + $0x30] sm:$0xff pattern:$0x75316420]  ;;  %3903 = vst [vmem:[#allocation1 + $0x10] ss:$2 sm:$0xff] %v8843_v15 }
 0x75d   : > { %v11797_v46 = vrot.slane %v10337_v23, 2  ;;  %3740 = vst [vmem:[#allocation1 + $0x30] ss:$2 sm:$0xff] %v8869_v28 }
 0x75e   : > { %3905 = vst [vmem:[#allocation1 + $0x11] ss:$2 sm:$0xff] %v8846_v25  ;;  %v10350_v11 = vld.sshfl [vmem:[#allocation1] sm:$0xff pattern:$0x75316420] }
 0x75f   : > { %v3768_v20 = vsel %vm2458_vm9, %v3766_v12, %v11797_v46  ;;  %3898 = vst [vmem:[#allocation1] ss:$2 sm:$0xff] %v8818_v48 }
 0x760   : > { %v6426_v53 = vpack.i.bf16 %v3768_v20, %v12152_v4  ;;  %3900 = vst [vmem:[#allocation1 + $0x1] ss:$2 sm:$0xff] %v8837_v50 }
 0x762   : > { %6427 = vrot.lane.b32.xlu0 %v6426_v53, %s6796_s22  ;;  %v10356_v60 = vld.sshfl [vmem:[#allocation1 + $0x20] sm:$0xff pattern:$0x75316420]  ;;  %v12155_v53 = vld [vmem:[#allocation48_spill] sm:$0xff] }
 0x763   : > { %12153 = vst [vmem:[#allocation42_spill] sm:$0xff] %v10356_v60  ;;  %v2223_v60 = vpop.f32.mrf.mxu0 }
 0x764   : > { %3953 = vst [vmem:[#allocation1 + $0x20] ss:$2 sm:$0xff] %v8843_v15  ;;  %v10360_v12 = vld.sshfl [vmem:[#allocation1 + $0x30] sm:$0xff pattern:$0x75316420] }
 0x765   : > { %3955 = vst [vmem:[#allocation1 + $0x21] ss:$2 sm:$0xff] %v8846_v25  ;;  %v11799_v20 = vrot.slane %v10360_v12, 2  ;;  %v10366_v4 = vld.sshfl [vmem:[#allocation1 + $0x10] sm:$0xff pattern:$0x75316420] }
 0x766   : > { %3750 = vst [vmem:[#allocation1 + $0x30] ss:$2 sm:$0xff] %v9329_v56 }
 0x767   : > { %12154 = vst [vmem:[#allocation87_spill] sm:$0xff] %v10366_v4  ;;  %v3774_v47 = vsel %vm2458_vm9, %v3772_v52, %v11799_v20  ;;  %v10374_v46 = vld.sshfl [vmem:[#allocation1] sm:$0xff pattern:$0x75316420]  ;;  %v12161_v4 = vld [vmem:[#allocation23_spill] sm:$0xff] }
 0x768   : > { %3920 = vst [vmem:[#allocation1 + $0x10] ss:$2 sm:$0xff] %v9533_v58  ;;  %v6431_v32 = vpack.i.bf16 %v3774_v47, %v12155_v53 }
 0x769   : > { %3921 = vst [vmem:[#allocation1 + $0x11] ss:$2 sm:$0xff] %v9537_v27 }
 0x76a   : > { %12156 = vst [vmem:[#allocation48_spill] sm:$0xff] %v10374_v46  ;;  %6432 = vrot.lane.b32.xlu2 %v6431_v32, %s6796_s22  ;;  %v12166_v46 = vrot.slane %v10260_v2, 1 }
 0x76b   : > { %3917 = vst [vmem:[#allocation1] ss:$2 sm:$0xff] %v9165_v16 }
 0x76c   : > { %v3958_v63 = vld.sshfl [vmem:[#allocation1 + $0x20] sm:$0xff pattern:$0x75316420]  ;;  %3918 = vst [vmem:[#allocation1 + $0x1] ss:$2 sm:$0xff] %v9175_v14 }
 0x76d   : > { %3965 = vst [vmem:[#allocation1 + $0x20] ss:$2 sm:$0xff] %v8879_v37  ;;  %v10380_v13 = vld.sshfl [vmem:[#allocation1 + $0x30] sm:$0xff pattern:$0x75316420]  ;;  %v6446_v35 = vpack.i.bf16 %v3958_v63, %v12166_v46  ;;  %v10460_v46 = vpop.permute.xlu2 %6397 }
 0x76e   : > { %3966 = vst [vmem:[#allocation1 + $0x21] ss:$2 sm:$0xff] %v8883_v62 }
 0x76f   : > { %3760 = vst [vmem:[#allocation1 + $0x30] ss:$2 sm:$0xff] %v10214_v33 }
 0x770   : > { %v10383_v52 = vld.sshfl [vmem:[#allocation1 + $0x10] sm:$0xff pattern:$0x75316420]  ;;  %12171 = vst [vmem:[#allocation97_spill] sm:$0xff] %v10460_v46 }
 0x771   : > { %12157 = vst [vmem:[#allocation88_spill] sm:$0xff] %v10383_v52  ;;  %v2224_v52 = vadd.f32 %v10197_v17, %v2223_v60  ;;  %v4666_v17 = vadd.f32 %v9928_v3, %v12161_v4  ;;  %v4706_v60 = vpop.f32.mrf.mxu2 }
 0x772   : > { %3949 = vst [vmem:[#allocation1 + $0x10] ss:$2 sm:$0xff] %v8823_v26 }
 0x773   : > { %v10387_v47 = vld.sshfl [vmem:[#allocation1] sm:$0xff pattern:$0x75316420] }
 0x774   : > { %12158 = vst [vmem:[#allocation89_spill] sm:$0xff] %v10387_v47 }
 0x775   : > { %3945 = vst [vmem:[#allocation1] ss:$2 sm:$0xff] %v8818_v48  ;;  %v3968_v53 = vld.sshfl [vmem:[#allocation1 + $0x20] sm:$0xff pattern:$0x75316420] }
 0x776   : > { %3947 = vst [vmem:[#allocation1 + $0x1] ss:$2 sm:$0xff] %v8837_v50  ;;  %v6451_v32 = vpack.i.bf16 %v3968_v53, %v3656_v40  ;;  %v10394_v20 = vld.sshfl [vmem:[#allocation1 + $0x30] sm:$0xff pattern:$0x75316420] }
 0x777   : > { %3975 = vst [vmem:[#allocation1 + $0x20] ss:$2 sm:$0xff] %v9533_v58 }
 0x778   : > { %12159 = vst [vmem:[#allocation90_spill] sm:$0xff] %v10394_v20  ;;  %6452 = vrot.lane.b32.xlu0 %v6451_v32, %s6795_s21  ;;  %v10409_v32 = vmax.f32 %v2224_v52, 0.0 }
 0x779   : > { %3976 = vst [vmem:[#allocation1 + $0x21] ss:$2 sm:$0xff] %v9537_v27  ;;  %v3951_v8 = vld.sshfl [vmem:[#allocation1 + $0x10] sm:$0xff pattern:$0x75316420] }
 0x77a   : > { %3962 = vst [vmem:[#allocation1 + $0x10] ss:$2 sm:$0xff] %v8869_v28 }
 0x77b   : > { %3850 = vst [vmem:[#allocation1 + $0x30] ss:$2 sm:$0xff] %v8774_v5 }
 0x77c   : > { %3852 = vst [vmem:[#allocation1 + $0x31] ss:$2 sm:$0xff] %v8869_v28 }
 0x77d   : > { %v3950_v45 = vld.sshfl [vmem:[#allocation1] sm:$0xff pattern:$0x75316420] }
 0x77e   : > { %v6436_v40 = vpack.i.bf16 %v3951_v8, %v3950_v45  ;;  %3960 = vst [vmem:[#allocation1] ss:$2 sm:$0xff] %v8769_v36  ;;  %v10419_v8 = vadd.f32 %v4706_v60, %v4666_v17  ;;  %v12165_v60 = vld [vmem:[#allocation45_spill] sm:$0xff] }
 0x77f   : > { %3961 = vst [vmem:[#allocation1 + $0x1] ss:$2 sm:$0xff] %v8774_v5 }
 0x780   : > { %v10407_v53 = vld.sshfl [vmem:[#allocation1 + $0x20] sm:$0xff pattern:$0x75316420]  ;;  %6437 = vrot.lane.b32.xlu2 %v6436_v40, %s6795_s21 }
 0x781   : > { %12160 = vst [vmem:[#allocation91_spill] sm:$0xff] %v10407_v53  ;;  %v3964_v47 = vld.sshfl [vmem:[#allocation1 + $0x10] sm:$0xff pattern:$0x75316420] }
 0x782   : > { %3985 = vst [vmem:[#allocation1 + $0x20] ss:$2 sm:$0xff] %v10403_v44 }
 0x783   : > { %3972 = vst [vmem:[#allocation1 + $0x10] ss:$2 sm:$0xff] %v9329_v56  ;;  %v10416_v45 = vld.sshfl [vmem:[#allocation1 + $0x30] sm:$0xff pattern:$0x75316420] }
 0x784   : > { %3986 = vst [vmem:[#allocation1 + $0x21] ss:$2 sm:$0xff] %v10409_v32 }
 0x785   : > { %3863 = vst [vmem:[#allocation1 + $0x30] ss:$2 sm:$0xff] %v9985_v21 }
 0x786   : > { %3864 = vst [vmem:[#allocation1 + $0x31] ss:$2 sm:$0xff] %v10214_v33  ;;  %v3963_v52 = vld.sshfl [vmem:[#allocation1] sm:$0xff pattern:$0x75316420] }
 0x787   : > { %3970 = vst [vmem:[#allocation1] ss:$2 sm:$0xff] %v9165_v16  ;;  %v6441_v40 = vpack.i.bf16 %v3964_v47, %v3963_v52  ;;  %v4669_v47 = vadd.f32 %v9928_v3, %v12165_v60  ;;  %v4709_v52 = vpop.f32.mrf.mxu2 }
 0x788   : > { %3971 = vst [vmem:[#allocation1 + $0x1] ss:$2 sm:$0xff] %v9175_v14 }
 0x789   : > { %6442 = vrot.lane.b32.xlu1 %v6441_v40, %s6795_s21  ;;  %v10441_v40 = vadd.f32 %v4709_v52, %v4669_v47 }
 0x78a   : > { %v10425_v4 = vld.sshfl [vmem:[#allocation1 + $0x10] sm:$0xff pattern:$0x75316420] }
 0x78b   : > { %12162 = vst [vmem:[#allocation23_spill] sm:$0xff] %v10425_v4  ;;  %v10429_v10 = vld.sshfl [vmem:[#allocation1 + $0x20] sm:$0xff pattern:$0x75316420]  ;;  %v12186_v4 = vld [vmem:[#allocation72_spill] sm:$0xff] }
 0x78c   : > { %3982 = vst [vmem:[#allocation1 + $0x10] ss:$2 sm:$0xff] %v10214_v33 }
 0x78d   : > { %12163 = vst [vmem:[#allocation92_spill] sm:$0xff] %v10429_v10  ;;  %v10432_v17 = vld.sshfl [vmem:[#allocation1 + $0x30] sm:$0xff pattern:$0x75316420] }
 0x78e   : > { %4046 = vst [vmem:[#allocation1 + $0x20] ss:$2 sm:$0xff] %v8843_v15 }
 0x78f   : > { %12164 = vst [vmem:[#allocation93_spill] sm:$0xff] %v10432_v17  ;;  %v10443_v20 = vld.sshfl [vmem:[#allocation1] sm:$0xff pattern:$0x75316420]  ;;  %v10450_v17 = vpop.f32.mrf.mxu3 }
 0x790   : > { %4048 = vst [vmem:[#allocation1 + $0x21] ss:$2 sm:$0xff] %v8846_v25 }
 0x791   : > { %3913 = vst [vmem:[#allocation1 + $0x30] ss:$2 sm:$0xff] %v8879_v37  ;;  %6447 = vrot.lane.b32.xlu1 %v6446_v35, %s6795_s21 }
 0x792   : > { %3915 = vst [vmem:[#allocation1 + $0x31] ss:$2 sm:$0xff] %v8883_v62  ;;  %v4712_v10 = vpop.f32.mrf.mxu2 }
 0x793   : > { %12167 = vst [vmem:[#allocation45_spill] sm:$0xff] %v10443_v20  ;;  %v10445_v51 = vld.sshfl [vmem:[#allocation1 + $0x10] sm:$0xff pattern:$0x75316420] }
 0x794   : > { %12168 = vst [vmem:[#allocation94_spill] sm:$0xff] %v10445_v51  ;;  %v6403_v51 = vpop.permute.xlu1 %6402 }
 0x795   : > { %3980 = vst [vmem:[#allocation1] ss:$2 sm:$0xff] %v9970_v1  ;;  %v6405_v30 = vunpack.i.h.bf16 %v6403_v51  ;;  %v6404_v55 = vunpack.i.l.bf16 %v6403_v51 }
 0x796   : > { %4042 = vst [vmem:[#allocation1 + $0x10] ss:$2 sm:$0xff] %v8823_v26 }
 0x797   : > { %12169 = vst [vmem:[#allocation95_spill] sm:$0xff] %v10450_v17  ;;  %v10453_v3 = vld.sshfl [vmem:[#allocation1 + $0x20] sm:$0xff pattern:$0x75316420]  ;;  %v4741_v35 = vpop.f32.mrf.mxu3 }
 0x798   : > { %3981 = vst [vmem:[#allocation1 + $0x1] ss:$2 sm:$0xff] %v9985_v21  ;;  %v10469_v47 = vadd.f32 %v4741_v35, %v10226_v7  ;;  %v12176_v7 = vld [vmem:[#allocation65_spill] sm:$0xff] }
 0x799   : > { %4058 = vst [vmem:[#allocation1 + $0x20] ss:$2 sm:$0xff] %v8879_v37  ;;  %v10456_v2 = vld.sshfl [vmem:[#allocation1 + $0x30] sm:$0xff pattern:$0x75316420]  ;;  %v3287_v35 = vrot.slane %v12176_v7, 3 }
 0x79a   : > { %12170 = vst [vmem:[#allocation96_spill] sm:$0xff] %v10456_v2  ;;  %v10479_v2 = vpop.permute.xlu2 %6407 }
 0x79b   : > { %4059 = vst [vmem:[#allocation1 + $0x21] ss:$2 sm:$0xff] %v8883_v62 }
 0x79c   : > { %3926 = vst [vmem:[#allocation1 + $0x30] ss:$2 sm:$0xff] %v10403_v44 }
 0x79d   : > { %3927 = vst [vmem:[#allocation1 + $0x31] ss:$2 sm:$0xff] %v10409_v32  ;;  %v10463_v63 = vld.sshfl [vmem:[#allocation1 + $0x10] sm:$0xff pattern:$0x75316420] }
 0x79e   : > { %4055 = vst [vmem:[#allocation1 + $0x10] ss:$2 sm:$0xff] %v8869_v28 }
 0x79f   : > { %v10465_v60 = vld.sshfl [vmem:[#allocation1] sm:$0xff pattern:$0x75316420]  ;;  %12173 = vst [vmem:[#allocation99_spill] sm:$0xff] %v10469_v47  ;;  %v4744_v47 = vpop.f32.mrf.mxu3 }
 0x7a0   : > { %12172 = vst [vmem:[#allocation98_spill] sm:$0xff] %v10465_v60  ;;  %v10485_v34 = vadd.f32 %v4744_v47, %v10354_v6 }
 0x7a1   : > { %4038 = vst [vmem:[#allocation1] ss:$2 sm:$0xff] %v8818_v48 }
 0x7a2   : > { %4040 = vst [vmem:[#allocation1 + $0x1] ss:$2 sm:$0xff] %v8837_v50  ;;  %v10473_v52 = vld.sshfl [vmem:[#allocation1 + $0x20] sm:$0xff pattern:$0x75316420] }
 0x7a3   : > { %4068 = vst [vmem:[#allocation1 + $0x20] ss:$2 sm:$0xff] %v9533_v58 }
 0x7a4   : > { %v10476_v17 = vld.sshfl [vmem:[#allocation1 + $0x30] sm:$0xff pattern:$0x75316420]  ;;  %4069 = vst [vmem:[#allocation1 + $0x21] ss:$2 sm:$0xff] %v9537_v27 }
 0x7a5   : > { %12174 = vst [vmem:[#allocation100_spill] sm:$0xff] %v10476_v17  ;;  %v4057_v46 = vld.sshfl [vmem:[#allocation1 + $0x10] sm:$0xff pattern:$0x75316420]  ;;  %v3286_v17 = vrot.slane %v12178_v18, 3  ;;  %v6423_v18 = vpop.permute.xlu2 %6422 }
 0x7a6   : > { %12175 = vst [vmem:[#allocation101_spill] sm:$0xff] %v10479_v2  ;;  %v10490_v2 = vadd.f32 %v4712_v10, %v12179_v59  ;;  %v6425_v47 = vunpack.i.h.bf16 %v6423_v18  ;;  %v12181_v59 = vld [vmem:[#allocation80_spill] sm:$0xff]  ;;  %v12182_v10 = vld [vmem:[#allocation79_spill] sm:$0xff]  ;;  %v4090_v61 = vrot.slane %v4057_v46, 1 }
 0x7a7   : > { %3957 = vst [vmem:[#allocation1 + $0x30] ss:$2 sm:$0xff] %v9015_v57  ;;  %v3288_v31 = vsel %vm2552_vm10, %v3286_v17, %v3287_v35  ;;  %v4316_v51 = vsel %vm3441_vm11, %v12181_v59, %v6405_v30  ;;  %v4315_v0 = vsel %vm3441_vm11, %v12182_v10, %v6404_v55  ;;  %v4715_v30 = vpop.f32.mrf.mxu2 }
 0x7a8   : > { %4065 = vst [vmem:[#allocation1 + $0x10] ss:$2 sm:$0xff] %v9329_v56  ;;  %v10507_v35 = vsel %vm3450_vm13, %v4316_v51, %v6425_v47  ;;  %v4716_v20 = vadd.f32 %v4715_v30, %v12186_v4 }
 0x7a9   : > { %v4043_v60 = vld.sshfl [vmem:[#allocation1] sm:$0xff pattern:$0x75316420]  ;;  %12177 = vst [vmem:[#allocation65_spill] sm:$0xff] %v10485_v34  ;;  %v6424_v34 = vunpack.i.l.bf16 %v6423_v18 }
 0x7aa   : > { %4053 = vst [vmem:[#allocation1] ss:$2 sm:$0xff] %v8769_v36 }
 0x7ab   : > { %4054 = vst [vmem:[#allocation1 + $0x1] ss:$2 sm:$0xff] %v8774_v5  ;;  %v10493_v7 = vld.sshfl [vmem:[#allocation1 + $0x20] sm:$0xff pattern:$0x75316420] }
 0x7ac   : > { %12180 = vst [vmem:[#allocation28_spill] sm:$0xff] %v10493_v7  ;;  %v4747_v7 = vpop.f32.mrf.mxu3 }
 0x7ad   : > { %4078 = vst [vmem:[#allocation1 + $0x20] ss:$2 sm:$0xff] %v10403_v44  ;;  %v10515_v59 = vadd.f32 %v4747_v7, %v10419_v8 }
 0x7ae   : > { %v3959_v53 = vld.sshfl [vmem:[#allocation1 + $0x30] sm:$0xff pattern:$0x75316420]  ;;  %4079 = vst [vmem:[#allocation1 + $0x21] ss:$2 sm:$0xff] %v10409_v32 }
 0x7af   : > { %v6456_v6 = vpack.i.bf16 %v3288_v31, %v3959_v53  ;;  %3967 = vst [vmem:[#allocation1 + $0x30] ss:$2 sm:$0xff] %v9037_v42  ;;  %v10504_v17 = vld.sshfl [vmem:[#allocation1 + $0x10] sm:$0xff pattern:$0x75316420]  ;;  %v10510_v31 = vsel %vm3450_vm13, %v4315_v0, %v6424_v34  ;;  %v12183_v53 = vld [vmem:[#allocation70_spill] sm:$0xff] }
 0x7b0   : > { %4075 = vst [vmem:[#allocation1 + $0x10] ss:$2 sm:$0xff] %v10214_v33  ;;  %v3293_v18 = vrot.slane %v12183_v53, 3  ;;  %v4084_v53 = vrot.slane %v10463_v63, 1 }
 0x7b1   : > { %6457 = vrot.lane.b32.xlu1 %v6456_v6, %s6795_s21  ;;  %12184 = vst [vmem:[#allocation67_spill] sm:$0xff] %v10515_v59  ;;  %v12185_v6 = vld [vmem:[#allocation39_spill] sm:$0xff] }
 0x7b2   : > { %v4056_v55 = vld.sshfl [vmem:[#allocation1] sm:$0xff pattern:$0x75316420]  ;;  %v3292_v10 = vrot.slane %v12185_v6, 3 }
 0x7b3   : > { %v4089_v47 = vrot.slane %v4056_v55, 1  ;;  %4063 = vst [vmem:[#allocation1] ss:$2 sm:$0xff] %v9165_v16 }
 0x7b4   : > { %4064 = vst [vmem:[#allocation1 + $0x1] ss:$2 sm:$0xff] %v9175_v14  ;;  %v3294_v0 = vsel %vm2552_vm10, %v3292_v10, %v3293_v18  ;;  %v4083_v18 = vrot.slane %v4043_v60, 1  ;;  %v4750_v30 = vpop.f32.mrf.mxu3 }
 0x7b5   : > { %v4091_v51 = vsel %vm2364_vm7, %v4089_v47, %v4090_v61  ;;  %v10524_v8 = vld.sshfl [vmem:[#allocation1 + $0x20] sm:$0xff pattern:$0x75316420]  ;;  %v10535_v55 = vadd.f32 %v4750_v30, %v10441_v40 }
 0x7b6   : > { %v3969_v34 = vld.sshfl [vmem:[#allocation1 + $0x30] sm:$0xff pattern:$0x75316420]  ;;  %v6471_v7 = vpack.i.bf16 %v4090_v61, %v4091_v51  ;;  %4163 = vst [vmem:[#allocation1 + $0x20] ss:$2 sm:$0xff] %v8843_v15  ;;  %v4085_v61 = vsel %vm2364_vm7, %v4083_v18, %v4084_v53  ;;  %v10541_v15 = vrot.slane %v10409_v32, 4 }
 0x7b7   : > { %v6461_v46 = vpack.i.bf16 %v3294_v0, %v3969_v34  ;;  %3977 = vst [vmem:[#allocation1 + $0x30] ss:$2 sm:$0xff] %v9790_v24  ;;  %v10528_v4 = vld.sshfl [vmem:[#allocation1 + $0x10] sm:$0xff pattern:$0x75316420]  ;;  %v6466_v10 = vpack.i.bf16 %v4084_v53, %v4085_v61 }
 0x7b8   : > { %4165 = vst [vmem:[#allocation1 + $0x21] ss:$2 sm:$0xff] %v8846_v25  ;;  %6472 = vrot.lane.b32.xlu2 %v6471_v7, %s6796_s22  ;;  %v12189_v51 = vld [vmem:[#allocation64_spill] sm:$0xff]  ;;  %v10574_v18 = vpop.permute.xlu1 %6417 }
 0x7b9   : > { %6462 = vrot.lane.b32.xlu0 %v6461_v46, %s6795_s21  ;;  %4159 = vst [vmem:[#allocation1 + $0x10] ss:$2 sm:$0xff] %v8823_v26 }
 0x7ba   : > { %12187 = vst [vmem:[#allocation80_spill] sm:$0xff] %v10535_v55 }
 0x7bb   : > { %v10538_v63 = vld.sshfl [vmem:[#allocation1] sm:$0xff pattern:$0x75316420]  ;;  %12190 = vst [vmem:[#allocation70_spill] sm:$0xff] %v10574_v18 }
 0x7bc   : > { %4073 = vst [vmem:[#allocation1] ss:$2 sm:$0xff] %v9970_v1  ;;  %v4753_v0 = vpop.f32.mrf.mxu3 }
 0x7bd   : > { %4074 = vst [vmem:[#allocation1 + $0x1] ss:$2 sm:$0xff] %v9985_v21  ;;  %v10557_v34 = vadd.f32 %v4753_v0, %v10490_v2 }
 0x7be   : > { %v10544_v6 = vld.sshfl [vmem:[#allocation1 + $0x30] sm:$0xff pattern:$0x75316420] }
 0x7bf   : > { %3987 = vst [vmem:[#allocation1 + $0x30] ss:$2 sm:$0xff] %v10541_v15  ;;  %v10548_v60 = vld.sshfl [vmem:[#allocation1 + $0x20] sm:$0xff pattern:$0x75316420] }
 0x7c0   : > { %v10551_v40 = vld.sshfl [vmem:[#allocation1 + $0x10] sm:$0xff pattern:$0x75316420]  ;;  %4175 = vst [vmem:[#allocation1 + $0x20] ss:$2 sm:$0xff] %v8879_v37  ;;  %v4618_v37 = vld [vmem:[%s11667_s4 + $0x318] sm:$0xff] }
 0x7c1   : > { %6467 = vrot.lane.b32.xlu0 %v6466_v10, %s6796_s22  ;;  %v11802_v47 = vrot.slane %v10551_v40, 2  ;;  %4172 = vst [vmem:[#allocation1 + $0x10] ss:$2 sm:$0xff] %v8869_v28  ;;  %4897 = vmatpush.msrb.mxu0 %v4618_v37  ;;  %v4617_v37 = vld [vmem:[%s11667_s4 + $0x310] sm:$0xff] }
 0x7c2   : > { %12188 = vst [vmem:[#allocation79_spill] sm:$0xff] %v10557_v34  ;;  %v12194_v34 = vld [vmem:[#allocation68_spill] sm:$0xff] }
 0x7c3   : > { %4176 = vst [vmem:[#allocation1 + $0x21] ss:$2 sm:$0xff] %v8883_v62  ;;  %v6486_v46 = vpack.i.bf16 %v12189_v51, %v11802_v47  ;;  %4898 = vmatpush.msrb.mxu0 %v4617_v37  ;;  %v12195_v37 = vld [vmem:[#allocation32_spill] sm:$0xff] }
 0x7c4   : > { %v10564_v7 = vld.sshfl [vmem:[#allocation1] sm:$0xff pattern:$0x75316420]  ;;  %v4756_v61 = vpop.f32.mrf.mxu3 }
 0x7c5   : > { %6487 = vrot.lane.b32.xlu1 %v6486_v46, %s6797_s23  ;;  %4155 = vst [vmem:[#allocation1] ss:$2 sm:$0xff] %v8818_v48  ;;  %v10579_v0 = vadd.f32 %v4756_v61, %v4716_v20  ;;  %v12192_v48 = vld [vmem:[#allocation49_spill] sm:$0xff]  ;;  %v6420_v46 = vunpack.i.h.bf16 %v10574_v18  ;;  %v10592_v61 = vpop.permute.xlu2 %6432 }
 0x7c6   : > { %v10566_v53 = vld.sshfl [vmem:[#allocation1 + $0x30] sm:$0xff pattern:$0x75316420]  ;;  %4157 = vst [vmem:[#allocation1 + $0x1] ss:$2 sm:$0xff] %v8837_v50  ;;  %v6435_v47 = vunpack.i.h.bf16 %v10592_v61 }
 0x7c7   : > { %4050 = vst [vmem:[#allocation1 + $0x30] ss:$2 sm:$0xff] %v9015_v57  ;;  %v4317_v55 = vsel %vm3441_vm11, %v12194_v34, %v6420_v46 }
 0x7c8   : > { %v4174_v2 = vld.sshfl [vmem:[#allocation1 + $0x10] sm:$0xff pattern:$0x75316420]  ;;  %12191 = vst [vmem:[#allocation39_spill] sm:$0xff] %v10579_v0  ;;  %v10606_v18 = vsel %vm3450_vm13, %v4317_v55, %v6435_v47 }
 0x7c9   : > { %v4207_v30 = vrot.slane %v4174_v2, 2  ;;  %4182 = vst [vmem:[#allocation1 + $0x10] ss:$2 sm:$0xff] %v9329_v56  ;;  %v4616_v2 = vld [vmem:[%s11667_s4 + $0x308] sm:$0xff] }
 0x7ca   : > { %v10577_v10 = vld.sshfl [vmem:[#allocation1 + $0x20] sm:$0xff pattern:$0x75316420]  ;;  %12193 = vst [vmem:[#allocation72_spill] sm:$0xff] %v10592_v61  ;;  %4899 = vmatpush.msrb.mxu0 %v4616_v2  ;;  %v12197_v2 = vrot.slane %v10337_v23, 2 }
 0x7cb   : > { %4185 = vst [vmem:[#allocation1 + $0x20] ss:$2 sm:$0xff] %v9533_v58  ;;  %v6506_v51 = vpack.i.bf16 %v12192_v48, %v4207_v30  ;;  %v4615_v58 = vld [vmem:[%s11667_s4 + $0x300] sm:$0xff] }
 0x7cc   : > { %4186 = vst [vmem:[#allocation1 + $0x21] ss:$2 sm:$0xff] %v9537_v27  ;;  %4900 = vmatpush.msrb.mxu0 %v4615_v58 }
 0x7cd   : > { %6507 = vrot.lane.b32.xlu0 %v6506_v51, %s6797_s23  ;;  %v4160_v0 = vld.sshfl [vmem:[#allocation1] sm:$0xff pattern:$0x75316420]  ;;  %12196 = vst [vmem:[#allocation64_spill] sm:$0xff] %v10606_v18 }
 0x7ce   : > { %v4052_v20 = vld.sshfl [vmem:[#allocation1 + $0x30] sm:$0xff pattern:$0x75316420]  ;;  %4170 = vst [vmem:[#allocation1] ss:$2 sm:$0xff] %v8769_v36  ;;  %v4086_v36 = vrot.slane %v10453_v3, 1 }
 0x7cf   : > { %v4087_v48 = vrot.slane %v4052_v20, 1  ;;  %4060 = vst [vmem:[#allocation1 + $0x30] ss:$2 sm:$0xff] %v9037_v42  ;;  %v3868_v3 = vrot.slane %v10298_v38, 7  ;;  %v12199_v38 = vrot.slane %v10551_v40, 2 }
 0x7d0   : > { %v10602_v51 = vld.sshfl [vmem:[#allocation1 + $0x10] sm:$0xff pattern:$0x75316420]  ;;  %4171 = vst [vmem:[#allocation1 + $0x1] ss:$2 sm:$0xff] %v8774_v5 }
 0x7d1   : > { %v6476_v59 = vpack.i.bf16 %v12195_v37, %v4087_v48  ;;  %4192 = vst [vmem:[#allocation1 + $0x10] ss:$2 sm:$0xff] %v10214_v33  ;;  %v4088_v34 = vsel %vm2364_vm7, %v4086_v36, %v4087_v48  ;;  %v12198_v37 = vld [vmem:[#allocation81_spill] sm:$0xff] }
 0x7d2   : > { %v6481_v58 = vpack.i.bf16 %v4088_v34, %v12197_v2 }
 0x7d3   : > { %v10610_v20 = vld.sshfl [vmem:[#allocation1 + $0x20] sm:$0xff pattern:$0x75316420]  ;;  %6477 = vrot.lane.b32.xlu2 %v6476_v59, %s6796_s22 }
 0x7d4   : > { %4195 = vst [vmem:[#allocation1 + $0x20] ss:$2 sm:$0xff] %v10403_v44 }
 0x7d5   : > { %4196 = vst [vmem:[#allocation1 + $0x21] ss:$2 sm:$0xff] %v10409_v32 }
 0x7d6   : > { %v4062_v46 = vld.sshfl [vmem:[#allocation1 + $0x30] sm:$0xff pattern:$0x75316420] }
 0x7d7   : > { %v4093_v55 = vrot.slane %v4062_v46, 1  ;;  %4070 = vst [vmem:[#allocation1 + $0x30] ss:$2 sm:$0xff] %v9790_v24  ;;  %v4173_v47 = vld.sshfl [vmem:[#allocation1] sm:$0xff pattern:$0x75316420] }
 0x7d8   : > { %v4206_v61 = vrot.slane %v4173_v47, 2  ;;  %4180 = vst [vmem:[#allocation1] ss:$2 sm:$0xff] %v9165_v16  ;;  %v10622_v44 = vld.sshfl [vmem:[#allocation1 + $0x10] sm:$0xff pattern:$0x75316420] }
 0x7d9   : > { %v6491_v18 = vpack.i.bf16 %v12198_v37, %v4093_v55  ;;  %4181 = vst [vmem:[#allocation1 + $0x1] ss:$2 sm:$0xff] %v9175_v14  ;;  %v4200_v16 = vrot.slane %v4160_v0, 2 }
 0x7da   : > { %v4208_v59 = vsel %vm2458_vm9, %v4206_v61, %v4207_v30  ;;  %4277 = vst [vmem:[#allocation1 + $0x10] ss:$2 sm:$0xff] %v8846_v25  ;;  %v3866_v25 = vrot.slane %v10327_v49, 7  ;;  %v4213_v30 = vrot.slane %v10602_v51, 2  ;;  %v4092_v49 = vrot.slane %v10473_v52, 1  ;;  %v4579_v51 = vld [vmem:[%s11667_s4 + $0x1e0] sm:$0xff] }
 0x7db   : > { %6482 = vrot.lane.b32.xlu2 %v6481_v58, %s6796_s22  ;;  %6492 = vrot.lane.b32.xlu1 %v6491_v18, %s6796_s22  ;;  %v6511_v48 = vpack.i.bf16 %v4208_v59, %v3868_v3  ;;  %4279 = vst [vmem:[#allocation1 + $0x11] ss:$2 sm:$0xff] %v9015_v57  ;;  %v4202_v18 = vsel %vm2458_vm9, %v4200_v16, %v12199_v38  ;;  %v12200_v52 = vrot.slane %v10360_v12, 2  ;;  %v3776_v58 = vrot.slane %v10276_v41, 2  ;;  %v12201_v12 = vld [vmem:[#allocation66_spill] sm:$0xff] }
 0x7dc   : > { %v10630_v23 = vld.sshfl [vmem:[#allocation1 + $0x20] sm:$0xff pattern:$0x75316420]  ;;  %v6496_v0 = vpack.i.bf16 %v4202_v18, %v3866_v25  ;;  %v4096_v59 = vrot.slane %v10504_v17, 1  ;;  %v3867_v16 = vrot.slane %v10320_v19, 7  ;;  %v4209_v19 = vrot.slane %v10577_v10, 2 }
 0x7dd   : > { %4282 = vst [vmem:[#allocation1 + $0x20] ss:$2 sm:$0xff] %v8774_v5  ;;  %6512 = vrot.lane.b32.xlu0 %v6511_v48, %s6797_s23  ;;  %v3870_v5 = vrot.slane %v10350_v11, 7  ;;  %v4094_v11 = vsel %vm2364_vm7, %v4092_v49, %v4093_v55  ;;  %v4215_v10 = vrot.slane %v10610_v20, 2  ;;  %v4582_v49 = vld [vmem:[%s11667_s4 + $0x1f8] sm:$0xff] }
 0x7de   : > { %v10634_v36 = vld.sshfl [vmem:[#allocation1 + $0x30] sm:$0xff pattern:$0x75316420]  ;;  %4284 = vst [vmem:[#allocation1 + $0x21] ss:$2 sm:$0xff] %v8869_v28  ;;  %v6501_v2 = vpack.i.bf16 %v4094_v11, %v12200_v52  ;;  %4762 = vmatpush.msrb.mxu1 %v4582_v49  ;;  %v3871_v11 = vrot.slane %v10335_v39, 7 }
 0x7df   : > { %4080 = vst [vmem:[#allocation1 + $0x30] ss:$2 sm:$0xff] %v10541_v15  ;;  %v12203_v20 = vld [vmem:[#allocation45_spill] sm:$0xff]  ;;  %v12204_v52 = vld [vmem:[#allocation23_spill] sm:$0xff] }
 0x7e0   : > { %v4183_v61 = vld.sshfl [vmem:[#allocation1] sm:$0xff pattern:$0x75316420]  ;;  %v12205_v39 = vld [vmem:[#allocation69_spill] sm:$0xff] }
 0x7e1   : > { %v4212_v34 = vrot.slane %v4183_v61, 2  ;;  %4190 = vst [vmem:[#allocation1] ss:$2 sm:$0xff] %v9970_v1  ;;  %v4574_v49 = vld [vmem:[%s11667_s4 + $0x1b8] sm:$0xff] }
 0x7e2   : > { %4191 = vst [vmem:[#allocation1 + $0x1] ss:$2 sm:$0xff] %v9985_v21  ;;  %v4280_v40 = vld.sshfl [vmem:[#allocation1 + $0x10] sm:$0xff pattern:$0x75316420] }
 0x7e3   : > { %6497 = vrot.lane.b32.xlu1 %v6496_v0, %s6797_s23  ;;  %v4214_v28 = vsel %vm2458_vm9, %v4212_v34, %v4213_v30  ;;  %4294 = vst [vmem:[#allocation1 + $0x10] ss:$2 sm:$0xff] %v9537_v27  ;;  %v3869_v34 = vrot.slane %v10416_v45, 7 }
 0x7e4   : > { %v6536_v46 = vpack.i.bf16 %v4214_v28, %v3870_v5  ;;  %4295 = vst [vmem:[#allocation1 + $0x11] ss:$2 sm:$0xff] %v9790_v24  ;;  %v12202_v5 = vld [vmem:[#allocation54_spill] sm:$0xff] }
 0x7e5   : > { %v4285_v47 = vld.sshfl [vmem:[#allocation1 + $0x20] sm:$0xff pattern:$0x75316420] }
 0x7e6   : > { %v10654_v1 = vld.sshfl [vmem:[#allocation1 + $0x30] sm:$0xff pattern:$0x75316420]  ;;  %4297 = vst [vmem:[#allocation1 + $0x20] ss:$2 sm:$0xff] %v9985_v21  ;;  %6537 = vrot.lane.b32.xlu2 %v6536_v46, %s6797_s23  ;;  %v3775_v21 = vrot.slane %v10291_v9, 2 }
 0x7e7   : > { %4167 = vst [vmem:[#allocation1 + $0x30] ss:$2 sm:$0xff] %v9015_v57 }
 0x7e8   : > { %4298 = vst [vmem:[#allocation1 + $0x21] ss:$2 sm:$0xff] %v10214_v33  ;;  %v3777_v57 = vsel %vm2458_vm9, %v3775_v21, %v3776_v58  ;;  %v4580_v21 = vld [vmem:[%s11667_s4 + $0x1e8] sm:$0xff] }
 0x7e9   : > { %v10663_v27 = vld.sshfl [vmem:[#allocation1] sm:$0xff pattern:$0x75316420]  ;;  %v6531_v33 = vpack.i.bf16 %v3776_v58, %v3777_v57  ;;  %v6561_v57 = vpack.i.bf16 %v12205_v39, %v4213_v30  ;;  %v10810_v39 = vpop.permute.xlu0 %6412 }
 0x7ea   : > { %4272 = vst [vmem:[#allocation1] ss:$2 sm:$0xff] %v8837_v50  ;;  %v4203_v50 = vrot.slane %v10548_v60, 2  ;;  %v3659_v60 = vrot.slane %v10163_v54, 1  ;;  %v12209_v30 = vld [vmem:[#allocation22_spill] sm:$0xff] }
 0x7eb   : > { %6502 = vrot.lane.b32.xlu1 %v6501_v2, %s6796_s22  ;;  %4274 = vst [vmem:[#allocation1 + $0x1] ss:$2 sm:$0xff] %v8823_v26  ;;  %v4095_v26 = vrot.slane %v10538_v63, 1  ;;  %v3779_v63 = vrot.slane %v10380_v13, 2  ;;  %v6541_v2 = vpack.i.bf16 %v12204_v52, %v12203_v20  ;;  %v4595_v20 = vld [vmem:[%s11667_s4 + $0x260] sm:$0xff]  ;;  %v4573_v52 = vld [vmem:[%s11667_s4 + $0x1b0] sm:$0xff] }
 0x7ec   : > { %v4611_v13 = vld [vmem:[%s11667_s4 + $0x2e0] sm:$0xff] }
 0x7ed   : > { %v4097_v9 = vsel %vm2364_vm7, %v4095_v26, %v4096_v59 }
 0x7ee   : > { %v4169_v55 = vld.sshfl [vmem:[#allocation1 + $0x30] sm:$0xff pattern:$0x75316420]  ;;  %v6546_v18 = vpack.i.bf16 %v4096_v59, %v4097_v9  ;;  %v3295_v59 = vrot.slane %v12209_v30, 3  ;;  %v4614_v9 = vld [vmem:[%s11667_s4 + $0x2f8] sm:$0xff] }
 0x7ef   : > { %v4204_v37 = vrot.slane %v4169_v55, 2  ;;  %4177 = vst [vmem:[#allocation1 + $0x30] ss:$2 sm:$0xff] %v9037_v42  ;;  %4844 = vmatpush.msrb.mxu3 %v4614_v9  ;;  %v4570_v9 = vld [vmem:[%s11667_s4 + $0x198] sm:$0xff] }
 0x7f1   : > { %v6516_v3 = vpack.i.bf16 %v12201_v12, %v4204_v37  ;;  %v4205_v48 = vsel %vm2458_vm9, %v4203_v50, %v4204_v37 }
 0x7f2   : > { %v4275_v41 = vld.sshfl [vmem:[#allocation1] sm:$0xff pattern:$0x75316420]  ;;  %v6521_v25 = vpack.i.bf16 %v4205_v48, %v3867_v16  ;;  %v4578_v48 = vld [vmem:[%s11667_s4 + $0x1d8] sm:$0xff] }
 0x7f3   : > { %6532 = vrot.lane.b32.xlu1 %v6531_v33, %s6796_s22  ;;  %6517 = vrot.lane.b32.xlu0 %v6516_v3, %s6797_s23  ;;  %4291 = vst [vmem:[#allocation1] ss:$2 sm:$0xff] %v9175_v14  ;;  %v12208_v33 = vld [vmem:[#allocation59_spill] sm:$0xff]  ;;  %v4598_v3 = vld [vmem:[%s11667_s4 + $0x278] sm:$0xff] }
 0x7f4   : > { %5984 = vmatmul.msk.f32.vlgmr.msrb.gmra.mxu0 %vm3441_vm11, %v4275_v41  ;;  %4292 = vst [vmem:[#allocation1 + $0x1] ss:$2 sm:$0xff] %v9329_v56  ;;  %v3778_v56 = vrot.slane %v10246_v29, 2  ;;  %v3661_v12 = vrot.slane %v12208_v33, 1  ;;  %4803 = vmatpush.msrb.mxu2 %v4598_v3 }
 0x7f6   : > { %v4179_v17 = vld.sshfl [vmem:[#allocation1 + $0x30] sm:$0xff pattern:$0x75316420] }
 0x7f7   : > { %v4210_v38 = vrot.slane %v4179_v17, 2  ;;  %4187 = vst [vmem:[#allocation1 + $0x30] ss:$2 sm:$0xff] %v9790_v24  ;;  %v3658_v24 = vrot.slane %v10167_v43, 1  ;;  %v4597_v17 = vld [vmem:[%s11667_s4 + $0x270] sm:$0xff] }
 0x7f8   : > { %4804 = vmatpush.msrb.mxu2 %v4597_v17  ;;  %v4609_v17 = vld [vmem:[%s11667_s4 + $0x2d0] sm:$0xff] }
 0x7f9   : > { %v6551_v14 = vpack.i.bf16 %v10104_v22, %v4210_v38  ;;  %v3780_v22 = vsel %vm2458_vm9, %v3778_v56, %v3779_v63  ;;  %v3660_v54 = vsel %vm2364_vm7, %v3658_v24, %v3659_v60  ;;  %v4211_v0 = vsel %vm2458_vm9, %v4209_v19, %v4210_v38  ;;  %v12210_v38 = vld [vmem:[#allocation71_spill] sm:$0xff]  ;;  %v12212_v19 = vld [vmem:[#allocation28_spill] sm:$0xff] }
 0x7fa   : > { %v6526_v29 = vpack.i.bf16 %v3659_v60, %v3660_v54  ;;  %v6556_v28 = vpack.i.bf16 %v4211_v0, %v3869_v34  ;;  %v4099_v60 = vrot.slane %v10634_v36, 1  ;;  %v4219_v56 = vrot.slane %v10622_v44, 2  ;;  %v4576_v24 = vld [vmem:[%s11667_s4 + $0x1c8] sm:$0xff]  ;;  %v12213_v44 = vld [vmem:[#allocation74_spill] sm:$0xff] }
 0x7fb   : > { %6547 = vrot.lane.b32.xlu1 %v6546_v18, %s6796_s22  ;;  %6522 = vrot.lane.b32.xlu0 %v6521_v25, %s6797_s23  ;;  %v12211_v25 = vld [vmem:[#allocation91_spill] sm:$0xff]  ;;  %v4218_v36 = vrot.slane %v10663_v27, 2  ;;  %v3299_v54 = vrot.slane %v12213_v44, 3  ;;  %v4575_v0 = vld [vmem:[%s11667_s4 + $0x1c0] sm:$0xff]  ;;  %v12214_v27 = vld [vmem:[#allocation37_spill] sm:$0xff] }
 0x7fc   : > { %5985 = vmatmul.msk.f32.gmra.mxu0 %vm3441_vm11, %v4280_v40  ;;  %6552 = vrot.lane.b32.xlu2 %v6551_v14, %s6797_s23  ;;  %v6571_v40 = vpack.i.bf16 %v3780_v22, %v12202_v5  ;;  %v4098_v22 = vrot.slane %v12212_v19, 1  ;;  %v4299_v19 = vld.sshfl [vmem:[#allocation1 + $0x20] sm:$0xff pattern:$0x75316420] }
 0x7fd   : > { %v4220_v5 = vsel %vm2458_vm9, %v4218_v36, %v4219_v56  ;;  %v4607_v44 = vld [vmem:[%s11667_s4 + $0x2c0] sm:$0xff] }
 0x7fe   : > { %v4189_v61 = vld.sshfl [vmem:[#allocation1 + $0x30] sm:$0xff pattern:$0x75316420]  ;;  %v4100_v34 = vsel %vm2364_vm7, %v4098_v22, %v4099_v60  ;;  %v12222_v22 = vld [vmem:[#allocation85_spill] sm:$0xff] }
 0x7ff   : > { %4197 = vst [vmem:[#allocation1 + $0x30] ss:$2 sm:$0xff] %v10541_v15  ;;  %v4216_v43 = vrot.slane %v4189_v61, 2  ;;  %v4596_v61 = vld [vmem:[%s11667_s4 + $0x268] sm:$0xff]  ;;  %v3668_v36 = vrot.slane %v12222_v22, 1 }
 0x800   : > { %4805 = vmatpush.msrb.mxu2 %v4596_v61  ;;  %v12223_v61 = vld [vmem:[#allocation92_spill] sm:$0xff] }
 0x801   : > { %v4217_v45 = vsel %vm2458_vm9, %v4215_v10, %v4216_v43  ;;  %v6601_v18 = vpack.i.bf16 %v12210_v38, %v4216_v43  ;;  %v4612_v10 = vld [vmem:[%s11667_s4 + $0x2e8] sm:$0xff] }
 0x802   : > { %v6596_v58 = vpack.i.bf16 %v4217_v45, %v3871_v11  ;;  %v6581_v45 = vpack.i.bf16 %v4100_v34, %v3779_v63  ;;  %4806 = vmatpush.msrb.mxu2 %v4595_v20  ;;  %v12216_v63 = vld [vmem:[#allocation58_spill] sm:$0xff]  ;;  %v12221_v38 = vld [vmem:[#allocation55_spill] sm:$0xff] }
 0x803   : > { %6572 = vrot.lane.b32.xlu1 %v6571_v40, %s6796_s22  ;;  %6527 = vrot.lane.b32.xlu0 %v6526_v29, %s6795_s21  ;;  %v4293_v40 = vld.sshfl [vmem:[#allocation1] sm:$0xff pattern:$0x75316420]  ;;  %v3298_v29 = vrot.slane %v12214_v27, 3 }
 0x804   : > { %5986 = vmatmul.msk.f32.gmra.mxu0 %vm3441_vm11, %v4285_v47  ;;  %6557 = vrot.lane.b32.xlu2 %v6556_v28, %s6797_s23  ;;  %v4581_v47 = vld [vmem:[%s11667_s4 + $0x1f0] sm:$0xff]  ;;  %v4567_v34 = vld [vmem:[%s11667_s4 + $0x180] sm:$0xff] }
 0x805   : > { %4763 = vmatpush.msrb.mxu1 %v4581_v47  ;;  %v12215_v28 = vld [vmem:[#allocation84_spill] sm:$0xff]  ;;  %v3300_v11 = vsel %vm2552_vm10, %v3298_v29, %v3299_v54  ;;  %v12225_v27 = vld [vmem:[#allocation94_spill] sm:$0xff] }
 0x806   : > { %v10712_v46 = vld.sshfl [vmem:[#allocation1 + $0x30] sm:$0xff pattern:$0x75316420]  ;;  %v3872_v43 = vrot.slane %v12215_v28, 7  ;;  %v4102_v28 = vrot.slane %v10528_v4, 1  ;;  %v4606_v4 = vld [vmem:[%s11667_s4 + $0x2b8] sm:$0xff] }
 0x807   : > { %4287 = vst [vmem:[#allocation1 + $0x30] ss:$2 sm:$0xff] %v8883_v62  ;;  %v12206_v62 = vld [vmem:[#allocation61_spill] sm:$0xff]  ;;  %4764 = vmatpush.msrb.mxu1 %v4580_v21  ;;  %v4572_v21 = vld [vmem:[%s11667_s4 + $0x1a8] sm:$0xff] }
 0x808   : > { %4289 = vst [vmem:[#allocation1 + $0x31] ss:$2 sm:$0xff] %v9037_v42  ;;  %v3662_v55 = vrot.slane %v12206_v62, 1  ;;  %v12207_v42 = vld [vmem:[#allocation44_spill] sm:$0xff]  ;;  %v6616_v47 = vpack.i.bf16 %v4220_v5, %v3872_v43  ;;  %v12217_v62 = vld [vmem:[#allocation38_spill] sm:$0xff]  ;;  %v10872_v5 = vpop.permute.xlu2 %6437 }
 0x809   : > { %v3296_v37 = vrot.slane %v12207_v42, 3  ;;  %4765 = vmatpush.msrb.mxu1 %v4579_v51  ;;  %v4571_v42 = vld [vmem:[%s11667_s4 + $0x1a0] sm:$0xff]  ;;  %v12219_v51 = vld [vmem:[#allocation52_spill] sm:$0xff] }
 0x80a   : > { %v3663_v41 = vsel %vm2364_vm7, %v3661_v12, %v3662_v55  ;;  %v6576_v14 = vpack.i.bf16 %v12211_v25, %v3662_v55  ;;  %v3664_v55 = vrot.slane %v12217_v62, 1  ;;  %v12218_v12 = vld [vmem:[#allocation51_spill] sm:$0xff]  ;;  %v6631_v30 = vpack.i.bf16 %v12219_v51, %v4219_v56 }
 0x80b   : > { %6542 = vrot.lane.b32.xlu0 %v6541_v2, %s6795_s21  ;;  %6597 = vrot.lane.b32.xlu1 %v6596_v58, %s6797_s23  ;;  %v3297_v50 = vsel %vm2552_vm10, %v3295_v59, %v3296_v37  ;;  %v6586_v2 = vpack.i.bf16 %v3300_v11, %v10544_v6  ;;  %v3665_v58 = vrot.slane %v12216_v63, 1  ;;  %v4594_v6 = vld [vmem:[%s11667_s4 + $0x258] sm:$0xff]  ;;  %v4296_v37 = vld.sshfl [vmem:[#allocation1 + $0x10] sm:$0xff pattern:$0x75316420]  ;;  %v6591_v3 = vpack.i.bf16 %v12218_v12, %v4099_v60  ;;  %v4592_v25 = vld [vmem:[%s11667_s4 + $0x248] sm:$0xff] }
 0x80c   : > { %6562 = vrot.lane.b32.xlu2 %v6561_v57, %s6797_s23  ;;  %v6566_v16 = vpack.i.bf16 %v3663_v41, %v3297_v50  ;;  %4766 = vmatpush.msrb.mxu1 %v4578_v48  ;;  %v10816_v57 = vpop.permute.xlu1 %6442  ;;  %v12220_v41 = vld [vmem:[#allocation19_spill] sm:$0xff]  ;;  %v4610_v50 = vld [vmem:[%s11667_s4 + $0x2d8] sm:$0xff]  ;;  %v4593_v48 = vld [vmem:[%s11667_s4 + $0x250] sm:$0xff] }
 0x80d   : > { %4807 = vmatpush.msrb.mxu2 %v4594_v6  ;;  %v3666_v33 = vsel %vm2364_vm7, %v3664_v55, %v3665_v58  ;;  %v4568_v56 = vld [vmem:[%s11667_s4 + $0x188] sm:$0xff]  ;;  %v4590_v11 = vld [vmem:[%s11667_s4 + $0x238] sm:$0xff] }
 0x80e   : > { %v6606_v59 = vpack.i.bf16 %v3665_v58, %v3666_v33  ;;  %v12230_v6 = vld [vmem:[#allocation21_spill] sm:$0xff]  ;;  %v4605_v33 = vld [vmem:[%s11667_s4 + $0x2b0] sm:$0xff] }
 0x80f   : > { %v4290_v26 = vld.sshfl [vmem:[#allocation1 + $0x30] sm:$0xff pattern:$0x75316420]  ;;  %4808 = vmatpush.msrb.mxu2 %v4593_v48  ;;  %v3301_v62 = vrot.slane %v12230_v6, 3  ;;  %v12238_v6 = vld [vmem:[#allocation93_spill] sm:$0xff] }
 0x810   : > { %5987 = vmatmul.msk.f32.gmra.mxu0 %vm3441_vm11, %v4290_v26  ;;  %4300 = vst [vmem:[#allocation1 + $0x30] ss:$2 sm:$0xff] %v10409_v32  ;;  %v4577_v32 = vld [vmem:[%s11667_s4 + $0x1d0] sm:$0xff]  ;;  %v3782_v26 = vrot.slane %v12220_v41, 2 }
 0x811   : > { %4301 = vst [vmem:[#allocation1 + $0x31] ss:$2 sm:$0xff] %v10541_v15  ;;  %v4613_v15 = vld [vmem:[%s11667_s4 + $0x2f0] sm:$0xff]  ;;  %4767 = vmatpush.msrb.mxu1 %v4577_v32  ;;  %4809 = vmatpush.msrb.mxu2 %v4592_v25 }
 0x812   : > { %4845 = vmatpush.msrb.mxu3 %v4613_v15  ;;  %v4569_v32 = vld [vmem:[%s11667_s4 + $0x190] sm:$0xff]  ;;  %v4591_v15 = vld [vmem:[%s11667_s4 + $0x240] sm:$0xff] }
 0x813   : > { %6567 = vrot.lane.b32.xlu0 %v6566_v16, %s6795_s21  ;;  %6602 = vrot.lane.b32.xlu1 %v6601_v18, %s6797_s23  ;;  %v10841_v16 = vpop.permute.xlu0 %6427  ;;  %v3781_v18 = vrot.slane %v12221_v38, 2  ;;  %v12232_v48 = vld [vmem:[#allocation40_spill] sm:$0xff]  ;;  %v4587_v38 = vld [vmem:[%s11667_s4 + $0x220] sm:$0xff] }
 0x814   : > { %6577 = vrot.lane.b32.xlu2 %v6576_v14, %s6795_s21  ;;  %4768 = vmatpush.msrb.mxu1 %v4576_v24  ;;  %v4608_v14 = vld [vmem:[%s11667_s4 + $0x2c8] sm:$0xff]  ;;  %v10861_v24 = vpop.permute.xlu1 %6447 }
 0x815   : > { %4846 = vmatpush.msrb.mxu3 %v4612_v10  ;;  %v3783_v60 = vsel %vm2458_vm9, %v3781_v18, %v3782_v26  ;;  %4810 = vmatpush.msrb.mxu2 %v4591_v15  ;;  %v4101_v10 = vrot.slane %v10564_v7, 1  ;;  %v12229_v7 = vld [vmem:[#allocation33_spill] sm:$0xff]  ;;  %v4104_v15 = vrot.slane %v10524_v8, 1 }
 0x816   : > { %4769 = vmatpush.msrb.mxu1 %v4575_v0  ;;  %v6611_v54 = vpack.i.bf16 %v3782_v26, %v3783_v60  ;;  %v6646_v0 = vpack.i.bf16 %v12223_v61, %v3668_v36  ;;  %v3304_v63 = vrot.slane %v12229_v7, 3  ;;  %v12231_v26 = vld [vmem:[#allocation90_spill] sm:$0xff]  ;;  %v12233_v18 = vld [vmem:[#allocation101_spill] sm:$0xff] }
 0x817   : > { %4847 = vmatpush.msrb.mxu3 %v4611_v13  ;;  %4811 = vmatpush.msrb.mxu2 %v4590_v11  ;;  %v4103_v13 = vsel %vm2364_vm7, %v4101_v10, %v4102_v28  ;;  %v4222_v11 = vrot.slane %v10712_v46, 2  ;;  %v4221_v46 = vrot.slane %v10630_v23, 2  ;;  %v3873_v23 = vrot.slane %v12238_v6, 7 }
 0x818   : > { %5988 = vmatmul.msk.f32.gmra.mxu0 %vm3441_vm11, %v4293_v40  ;;  %4770 = vmatpush.msrb.mxu1 %v4574_v49  ;;  %v12224_v40 = vld [vmem:[#allocation98_spill] sm:$0xff]  ;;  %v6626_v12 = vpack.i.bf16 %v4102_v28, %v4103_v13 }
 0x819   : > { %4848 = vmatpush.msrb.mxu3 %v4610_v50  ;;  %v6621_v29 = vpack.i.bf16 %v12225_v27, %v12224_v40  ;;  %v12226_v49 = vld [vmem:[#allocation78_spill] sm:$0xff]  ;;  %v3785_v50 = vrot.slane %v12231_v26, 2  ;;  %v4585_v27 = vld [vmem:[%s11667_s4 + $0x210] sm:$0xff] }
 0x81a   : > { %4771 = vmatpush.msrb.mxu1 %v4573_v52  ;;  %v12228_v52 = vld [vmem:[#allocation13_spill] sm:$0xff]  ;;  %v4583_v13 = vld [vmem:[%s11667_s4 + $0x200] sm:$0xff] }
 0x81b   : > { %6582 = vrot.lane.b32.xlu0 %v6581_v45, %s6796_s22  ;;  %6617 = vrot.lane.b32.xlu1 %v6616_v47, %s6797_s23  ;;  %v10879_v43 = vpop.permute.xlu0 %6452  ;;  %v3305_v45 = vrot.slane %v12226_v49, 3  ;;  %v12227_v47 = vld [vmem:[#allocation53_spill] sm:$0xff] }
 0x81c   : > { %6587 = vrot.lane.b32.xlu2 %v6586_v2, %s6795_s21  ;;  %4772 = vmatpush.msrb.mxu1 %v4572_v21  ;;  %v3302_v20 = vrot.slane %v12227_v47, 3  ;;  %v3667_v2 = vrot.slane %v12228_v52, 1  ;;  %v4302_v21 = vld.sshfl [vmem:[#allocation1 + $0x30] sm:$0xff pattern:$0x75316420]  ;;  %v12237_v52 = vld [vmem:[#allocation27_spill] sm:$0xff] }
 0x81d   : > { %4849 = vmatpush.msrb.mxu3 %v4609_v17  ;;  %v3207_v17 = vrot.slane %v12232_v48, 2  ;;  %v4601_v47 = vld [vmem:[%s11667_s4 + $0x290] sm:$0xff]  ;;  %v6415_v48 = vunpack.i.h.bf16 %v10810_v39 }
 0x81e   : > { %4773 = vmatpush.msrb.mxu1 %v4571_v42  ;;  %v3669_v55 = vsel %vm2364_vm7, %v3667_v2, %v3668_v36  ;;  %v3306_v42 = vsel %vm2552_vm10, %v3304_v63, %v3305_v45  ;;  %v3303_v51 = vsel %vm2552_vm10, %v3301_v62, %v3302_v20  ;;  %v4586_v36 = vld [vmem:[%s11667_s4 + $0x218] sm:$0xff]  ;;  %v4584_v20 = vld [vmem:[%s11667_s4 + $0x208] sm:$0xff]  ;;  %v4223_v63 = vsel %vm2458_vm9, %v4221_v46, %v4222_v11 }
 0x81f   : > { %4850 = vmatpush.msrb.mxu3 %v4608_v14  ;;  %v6636_v41 = vpack.i.bf16 %v3669_v55, %v3303_v51  ;;  %v12234_v14 = vld [vmem:[#allocation36_spill] sm:$0xff]  ;;  %v4600_v2 = vld [vmem:[%s11667_s4 + $0x288] sm:$0xff]  ;;  %v6661_v62 = vpack.i.bf16 %v4223_v63, %v3873_v23  ;;  %v12244_v63 = vld [vmem:[#allocation29_spill] sm:$0xff] }
 0x820   : > { %5989 = vmatmul.msk.f32.gmra.mxu0 %vm3441_vm11, %v4296_v37  ;;  %4774 = vmatpush.msrb.mxu1 %v4570_v9  ;;  %v4589_v37 = vld [vmem:[%s11667_s4 + $0x230] sm:$0xff]  ;;  %v4604_v9 = vld [vmem:[%s11667_s4 + $0x2a8] sm:$0xff]  ;;  %v3784_v60 = vrot.slane %v12234_v14, 2  ;;  %v6414_v14 = vunpack.i.l.bf16 %v10810_v39 }
 0x821   : > { %4851 = vmatpush.msrb.mxu3 %v4607_v44  ;;  %4812 = vmatpush.msrb.mxu2 %v4589_v37  ;;  %v12239_v37 = vld [vmem:[#allocation62_spill] sm:$0xff] }
 0x822   : > { %4775 = vmatpush.msrb.mxu1 %v4569_v32  ;;  %v6409_v32 = vunpack.i.l.bf16 %v12233_v18  ;;  %v3786_v44 = vsel %vm2458_vm9, %v3784_v60, %v3785_v50 }
 0x823   : > { %6592 = vrot.lane.b32.xlu0 %v6591_v3, %s6796_s22  ;;  %6632 = vrot.lane.b32.xlu1 %v6631_v30, %s6797_s23  ;;  %v10894_v58 = vpop.permute.xlu1 %6457  ;;  %v6656_v3 = vpack.i.bf16 %v3306_v42, %v10566_v53  ;;  %v4588_v30 = vld [vmem:[%s11667_s4 + $0x228] sm:$0xff]  ;;  %v4105_v53 = vrot.slane %v10654_v1, 1  ;;  %v6429_v1 = vunpack.i.l.bf16 %v10841_v16 }
 0x824   : > { %6607 = vrot.lane.b32.xlu2 %v6606_v59, %s6795_s21  ;;  %4776 = vmatpush.msrb.mxu1 %v4568_v56  ;;  %v10911_v59 = vpop.permute.xlu2 %6472  ;;  %v4603_v56 = vld [vmem:[%s11667_s4 + $0x2a0] sm:$0xff]  ;;  %v6460_v6 = vunpack.i.h.bf16 %v10894_v58 }
 0x825   : > { %4852 = vmatpush.msrb.mxu3 %v4606_v4  ;;  %4813 = vmatpush.msrb.mxu2 %v4588_v30  ;;  %v4106_v61 = vsel %vm2364_vm7, %v4104_v15, %v4105_v53  ;;  %v6440_v30 = vunpack.i.h.bf16 %v10872_v5 }
 0x826   : > { %4777 = vmatpush.msrb.mxu1 %v4567_v34  ;;  %v6651_v45 = vpack.i.bf16 %v4106_v61, %v3785_v50  ;;  %v6439_v50 = vunpack.i.l.bf16 %v10872_v5 }
 0x827   : > { %4853 = vmatpush.msrb.mxu3 %v4605_v33  ;;  %4814 = vmatpush.msrb.mxu2 %v4587_v38 }
 0x828   : > { %5990 = vmatmul.msk.f32.gmra.mxu0 %vm3441_vm11, %v4299_v19  ;;  %v12235_v19 = vld [vmem:[#allocation24_spill] sm:$0xff] }
 0x829   : > { %v3206_v22 = vrot.slane %v12235_v19, 2  ;;  %4854 = vmatpush.msrb.mxu3 %v4604_v9  ;;  %4815 = vmatpush.msrb.mxu2 %v4586_v36 }
 0x82b   : > { %6612 = vrot.lane.b32.xlu0 %v6611_v54, %s6796_s22  ;;  %6647 = vrot.lane.b32.xlu1 %v6646_v0, %s6795_s21  ;;  %v10925_v25 = vpop.permute.xlu0 %6462  ;;  %v4602_v54 = vld [vmem:[%s11667_s4 + $0x298] sm:$0xff]  ;;  %v3208_v8 = vsel %vm2458_vm9, %v3206_v22, %v3207_v17  ;;  %v12241_v17 = vld [vmem:[#allocation48_spill] sm:$0xff] }
 0x82c   : > { %6622 = vrot.lane.b32.xlu2 %v6621_v29, %s6795_s21  ;;  %4855 = vmatpush.msrb.mxu3 %v4603_v56  ;;  %v3516_v40 = vsel %vm3441_vm11, %v3208_v8, %v6409_v32  ;;  %v12236_v29 = vld [vmem:[#allocation47_spill] sm:$0xff]  ;;  %v3929_v38 = vrot.slane %v12241_v17, 7  ;;  %v12242_v22 = vld [vmem:[#allocation76_spill] sm:$0xff] }
 0x82d   : > { %v6641_v28 = vpack.i.bf16 %v3786_v44, %v12236_v29  ;;  %v3524_v10 = vsel %vm3450_vm13, %v3516_v40, %v6429_v1  ;;  %v10953_v49 = vpop.permute.xlu2 %6477  ;;  %4816 = vmatpush.msrb.mxu2 %v4585_v27  ;;  %v12243_v44 = vld [vmem:[#allocation75_spill] sm:$0xff] }
 0x82e   : > { %4856 = vmatpush.msrb.mxu3 %v4602_v54  ;;  %v4360_v5 = vsel %vm3441_vm11, %v3929_v38, %v6440_v30  ;;  %v4359_v61 = vsel %vm3441_vm11, %v3929_v38, %v6439_v50  ;;  %v6480_v23 = vunpack.i.h.bf16 %v10953_v49 }
 0x82f   : > { %4817 = vmatpush.msrb.mxu2 %v4584_v20 }
 0x830   : > { %5991 = vmatmul.msk.f32.gmra.mxu0 %vm3441_vm11, %v4302_v21  ;;  %4857 = vmatpush.msrb.mxu3 %v4601_v47  ;;  %v4599_v21 = vld [vmem:[%s11667_s4 + $0x280] sm:$0xff] }
 0x831   : > { %4818 = vmatpush.msrb.mxu2 %v4583_v13 }
 0x832   : > { %4858 = vmatpush.msrb.mxu3 %v4600_v2 }
 0x833   : > { %6627 = vrot.lane.b32.xlu0 %v6626_v12, %s6796_s22  ;;  %6657 = vrot.lane.b32.xlu1 %v6656_v3, %s6795_s21  ;;  %v6468_v7 = vpop.permute.xlu0 %6467  ;;  %v12240_v3 = vld [vmem:[#allocation97_spill] sm:$0xff] }
 0x834   : > { %6637 = vrot.lane.b32.xlu2 %v6636_v41, %s6795_s21  ;;  %4859 = vmatpush.msrb.mxu3 %v4599_v21  ;;  %v6400_v51 = vunpack.i.h.bf16 %v12240_v3  ;;  %v6399_v26 = vunpack.i.l.bf16 %v12240_v3  ;;  %v6470_v9 = vunpack.i.h.bf16 %v6468_v7  ;;  %v6469_v60 = vunpack.i.l.bf16 %v6468_v7  ;;  %v12246_v3 = vld [vmem:[#allocation25_spill] sm:$0xff] }
 0x835   : > { %v10980_v55 = vpop.permute.xlu2 %6482  ;;  %v3210_v21 = vrot.slane %v12244_v63, 2 }
 0x836   : > { %v4312_v36 = vsel %vm3441_vm11, %v12242_v22, %v6400_v51  ;;  %v4311_v54 = vsel %vm3441_vm11, %v12243_v44, %v6399_v26  ;;  %v4376_v39 = vsel %vm3450_vm13, %v4360_v5, %v6470_v9  ;;  %v3213_v51 = vrot.slane %v12246_v3, 2  ;;  %v12247_v9 = vld [vmem:[#allocation56_spill] sm:$0xff]  ;;  %v12250_v5 = vld [vmem:[#allocation17_spill] sm:$0xff] }
 0x837   : > { %v10943_v0 = vpop.permute.xlu1 %6487  ;;  %v4327_v27 = vsel %vm3450_vm13, %v4311_v54, %v6414_v14  ;;  %v4328_v29 = vsel %vm3450_vm13, %v4312_v36, %v6415_v48  ;;  %v6410_v48 = vunpack.i.h.bf16 %v12233_v18  ;;  %v6430_v36 = vunpack.i.h.bf16 %v10841_v16 }
 0x838   : > { %v6490_v34 = vunpack.i.h.bf16 %v10943_v0  ;;  %v6489_v32 = vunpack.i.l.bf16 %v10943_v0 }
 0x83a   : > { %v3532_v4 = vsel %vm3459_vm15, %v3524_v10, %v6490_v34 }
 0x83b   : > { %6642 = vrot.lane.b32.xlu0 %v6641_v28, %s6796_s22  ;;  %3376 = vrot.lane.b32.xlu1 %v12237_v52, %s6796_s22  ;;  %v4375_v28 = vsel %vm3450_vm13, %v4359_v61, %v6469_v60  ;;  %v12249_v60 = vld [vmem:[#allocation70_spill] sm:$0xff] }
 0x83c   : > { %6652 = vrot.lane.b32.xlu2 %v6651_v45, %s6796_s22  ;;  %4778 = vmatmul.f32.vlgmr.msrb.gmra.mxu1 %v3532_v4  ;;  %v12252_v61 = vld [vmem:[#allocation86_spill] sm:$0xff] }
 0x83f   : > { %v10983_v42 = vpop.permute.xlu0 %6507 }
 0x840   : > { %v10990_v12 = vpop.permute.xlu2 %6537 }
 0x843   : > { %6662 = vrot.lane.b32.xlu0 %v6661_v62, %s6797_s23  ;;  %v12245_v62 = vld [vmem:[#allocation34_spill] sm:$0xff] }
 0x844   : > { %4137 = vrot.lane.b32.xlu2 %v4105_v53, %s6796_s22 }
 0x84b   : > { %4254 = vrot.lane.b32.xlu0 %v4222_v11, %s6797_s23 }
 0x84c   : > { %3431 = vrot.lane.b32.xlu2 %v12239_v37, %s6797_s23  ;;  %v3209_v37 = vrot.slane %v12245_v62, 2  ;;  %s5858_s23 = sshll.u32 %s5855_s26, 4  ;;  %s5859_s23 = int_to_ptr.hbm [resolvable:$true] %s5858_s23 }
 0x84d   : > { %v10988_v33 = vpop.permute.xlu1 %6492  ;;  %s6732_s12 = sshra.s32 %s5859_s23, 4  ;;  %s6733_s12 = int_to_ptr.hbm [resolvable:$true] %s6732_s12 }
 0x84e   : > { %v3211_v50 = vsel %vm2458_vm9, %v3209_v37, %v3210_v21  ;;  %s6734_s13 = scalar_lea.hbm %s6733_s12, 16  ;;  %p6739_p3 = scmp.lt.s32.totalorder %s6733_s12, %s11671_s8 }
 0x84f   : > { %v10994_v41 = vpop.permute.xlu0 %6512  ;;  %v3517_v38 = vsel %vm3441_vm11, %v3211_v50, %v6460_v6  ;;  %v12255_v6 = vld [vmem:[#allocation16_spill] sm:$0xff]  ;;  %p6735_p0 = scmp.ne.s32.totalorder %s6733_s12, %s6734_s13  ;;  %p6740_p4 = scmp.lt.s32.totalorder %s6738_s20, %s6734_s13 }
 0x850   : > { %v6514_v53 = vunpack.i.l.bf16 %v10994_v41 }
 0x851   : > { %p6736_p1 = pnand %p6735_p0, %p6882_p5  ;;  %p6741_p7 = por %p6740_p4, %p6739_p3 }
 0x852   : > { %v4347_v56 = vsel %vm3459_vm15, %v10510_v31, %v6514_v53  ;;  %v4348_v1 = vsel %vm3459_vm15, %v10507_v35, %v6514_v53  ;;  %v4392_v31 = vsel %vm3459_vm15, %v4376_v39, %v6489_v32  ;;  %v3216_v53 = vrot.slane %v12247_v9, 2  ;;  %v12248_v32 = vld [vmem:[#allocation50_spill] sm:$0xff] }
 0x853   : > { %v4455_v15 = vrot.slane %v4347_v56, 1  ;;  %v4456_v19 = vrot.slane %v4348_v1, 1  ;;  %v4443_v52 = vrot.slane %v4392_v31, 1  ;;  %v3212_v14 = vrot.slane %v12248_v32, 2  ;;  %p6737_p2 = pneg %p6736_p1 }
 0x854   : > { %v6419_v56 = vunpack.i.l.bf16 %v12249_v60  ;;  %v3525_v1 = vsel %vm3450_vm13, %v3517_v38, %v6480_v23  ;;  %v3931_v39 = vrot.slane %v12252_v61, 7  ;;  %v6459_v31 = vunpack.i.l.bf16 %v10894_v58 }
 0x855   : > { %v6498_v0 = vpop.permute.xlu1 %6497  ;;  %v11018_v40 = vsel %vm2364_vm7, %v4455_v15, %v4456_v19  ;;  %v3215_v15 = vrot.slane %v12250_v5, 2  ;;  %v12251_v19 = vld [vmem:[#allocation72_spill] sm:$0xff]  ;;  %v3214_v18 = vsel %vm2458_vm9, %v3212_v14, %v3213_v51  ;;  %v6474_v51 = vunpack.i.l.bf16 %v10911_v59  ;;  %p6742_p8 = pnand %p6741_p7, %p6737_p2 }
 0x856   : > { %v6500_v8 = vunpack.i.h.bf16 %v6498_v0  ;;  %v6499_v34 = vunpack.i.l.bf16 %v6498_v0  ;;  %v11015_v35 = vpop.permute.xlu2 %6552  ;;  %v6434_v22 = vunpack.i.l.bf16 %v12251_v19  ;;  %v6450_v0 = vunpack.i.h.bf16 %v10861_v24 }
 0x857   : > { %v6445_v38 = vunpack.i.h.bf16 %v10816_v57  ;;  %v6515_v32 = vunpack.i.h.bf16 %v10994_v41  ;;  %v12256_v41 = vld [vmem:[#allocation96_spill] sm:$0xff] }
 0x858   : > { %v4391_v10 = vsel %vm3459_vm15, %v4375_v28, %v6500_v8  ;;  %v4343_v45 = vsel %vm3459_vm15, %v4327_v27, %v6499_v34  ;;  %v4344_v11 = vsel %vm3459_vm15, %v4328_v29, %v6499_v34  ;;  %v3217_v8 = vsel %vm2458_vm9, %v3215_v15, %v3216_v53  ;;  %v12253_v34 = vld [vmem:[#allocation63_spill] sm:$0xff] }
 0x859   : > { %v4439_v4 = vrot.slane %v4343_v45, 1  ;;  %v4440_v47 = vrot.slane %v4344_v11, 1  ;;  %v4442_v20 = vrot.slane %v4391_v10, 1  ;;  %v4313_v27 = vsel %vm3441_vm11, %v12253_v34, %v6410_v48  ;;  %v12254_v29 = vld [vmem:[#allocation87_spill] sm:$0xff] }
 0x85a   : > { %v3930_v16 = vrot.slane %v12254_v29, 7  ;;  %v6449_v28 = vunpack.i.l.bf16 %v10861_v24  ;;  %v6479_v10 = vunpack.i.l.bf16 %v10953_v49  ;;  %v6485_v45 = vunpack.i.h.bf16 %v10980_v55 }
 0x85b   : > { %v4441_v46 = vsel %vm2364_vm7, %v4439_v4, %v4440_v47  ;;  %v4444_v2 = vsel %vm2364_vm7, %v4442_v20, %v4443_v52  ;;  %v6484_v11 = vunpack.i.l.bf16 %v10980_v55  ;;  %v3518_v47 = vsel %vm3441_vm11, %v3214_v18, %v6419_v56 }
 0x85c   : > { %4819 = vmatmul.f32.vlgmr.msrb.gmra.mxu2 %v4441_v46  ;;  %4860 = vmatmul.f32.vlgmr.msrb.gmra.mxu3 %v4444_v2  ;;  %v4329_v58 = vsel %vm3450_vm13, %v4313_v27, %v6430_v36  ;;  %v6455_v20 = vunpack.i.h.bf16 %v10879_v43  ;;  %v6510_v52 = vunpack.i.h.bf16 %v10983_v42  ;;  %v3526_v46 = vsel %vm3450_vm13, %v3518_v47, %v6434_v22 }
 0x85d   : > { %v11028_v13 = vpop.permute.xlu1 %6502  ;;  %v6454_v2 = vunpack.i.l.bf16 %v10879_v43  ;;  %v6444_v24 = vunpack.i.l.bf16 %v10816_v57  ;;  %v4361_v49 = vsel %vm3441_vm11, %v3930_v16, %v6450_v0  ;;  %v4362_v63 = vsel %vm3441_vm11, %v3930_v16, %v6459_v31 }
 0x85e   : > { %v11030_v7 = vpop.permute.xlu2 %6557  ;;  %v4314_v23 = vsel %vm3441_vm11, %v12255_v6, %v6449_v28  ;;  %v4378_v62 = vsel %vm3450_vm13, %v4362_v63, %v6479_v10  ;;  %v4377_v43 = vsel %vm3450_vm13, %v4361_v49, %v6485_v45  ;;  %v3534_v9 = vsel %vm3459_vm15, %v3526_v46, %v6510_v52  ;;  %v12257_v28 = vld [vmem:[#allocation26_spill] sm:$0xff]  ;;  %v12258_v6 = vld [vmem:[#allocation64_spill] sm:$0xff] }
 0x85f   : > { %v6475_v56 = vunpack.i.h.bf16 %v10911_v59  ;;  %v4363_v22 = vsel %vm3441_vm11, %v3931_v39, %v6444_v24  ;;  %v6509_v36 = vunpack.i.l.bf16 %v10983_v42  ;;  %v3932_v18 = vrot.slane %v12256_v41, 7 }
 0x860   : > { %v4379_v61 = vsel %vm3450_vm13, %v4363_v22, %v6474_v51  ;;  %v6555_v59 = vunpack.i.h.bf16 %v11015_v35  ;;  %v4364_v31 = vsel %vm3441_vm11, %v3931_v39, %v6445_v38  ;;  %v6505_v34 = vunpack.i.h.bf16 %v11028_v13  ;;  %v12259_v51 = vld [vmem:[#allocation89_spill] sm:$0xff]  ;;  %v12261_v38 = vld [vmem:[#allocation14_spill] sm:$0xff] }
 0x861   : > { %v6504_v27 = vunpack.i.l.bf16 %v11028_v13  ;;  %v4395_v16 = vsel %vm3459_vm15, %v4379_v61, %v6515_v32  ;;  %v4318_v10 = vsel %vm3441_vm11, %v12257_v28, %v6454_v2  ;;  %v4380_v45 = vsel %vm3450_vm13, %v4364_v31, %v6475_v56 }
 0x862   : > { %v4365_v39 = vsel %vm3441_vm11, %v3932_v18, %v6455_v20  ;;  %v6464_v47 = vunpack.i.l.bf16 %v10925_v25  ;;  %v6494_v52 = vunpack.i.l.bf16 %v10988_v33  ;;  %v6560_v46 = vunpack.i.h.bf16 %v11030_v7 }
 0x863   : > { %v4458_v24 = vrot.slane %v4395_v16, 1  ;;  %v6554_v49 = vunpack.i.l.bf16 %v11015_v35  ;;  %v4381_v63 = vsel %vm3450_vm13, %v4365_v39, %v6505_v34  ;;  %v12262_v34 = vld [vmem:[#allocation43_spill] sm:$0xff] }
 0x865   : > { %v11037_v30 = vpop.permute.xlu1 %6532  ;;  %v6518_v26 = vpop.permute.xlu0 %6517 }
 0x866   : > { %v6520_v17 = vunpack.i.h.bf16 %v6518_v26  ;;  %v11049_v44 = vpop.permute.xlu2 %6562  ;;  %v6519_v4 = vunpack.i.l.bf16 %v6518_v26  ;;  %v4330_v26 = vsel %vm3450_vm13, %v4314_v23, %v6484_v11  ;;  %v6559_v11 = vunpack.i.l.bf16 %v11030_v7 }
 0x867   : > { %v6534_v56 = vunpack.i.l.bf16 %v11037_v30  ;;  %v6564_v31 = vunpack.i.l.bf16 %v11049_v44 }
 0x868   : > { %v3533_v54 = vsel %vm3459_vm15, %v3525_v1, %v6520_v17  ;;  %v4394_v50 = vsel %vm3459_vm15, %v4378_v62, %v6519_v4  ;;  %v6465_v1 = vunpack.i.h.bf16 %v10925_v25  ;;  %v4349_v23 = vsel %vm3459_vm15, %v12258_v6, %v6559_v11 }
 0x869   : > { %4781 = vmatmul.f32.gmra.mxu1 %v3533_v54  ;;  %v4451_v19 = vrot.slane %v4394_v50, 1  ;;  %v6495_v54 = vunpack.i.h.bf16 %v10988_v33  ;;  %v4366_v33 = vsel %vm3441_vm11, %v3932_v18, %v6464_v47  ;;  %v6539_v18 = vunpack.i.l.bf16 %v10990_v12 }
 0x86a   : > { %v3519_v4 = vsel %vm3441_vm11, %v3217_v8, %v6465_v1  ;;  %v4334_v8 = vsel %vm3450_vm13, %v4318_v10, %v6504_v27  ;;  %v4382_v7 = vsel %vm3450_vm13, %v4366_v33, %v6494_v52  ;;  %v3219_v27 = vrot.slane %v12262_v34, 2 }
 0x86b   : > { %v3527_v13 = vsel %vm3450_vm13, %v3519_v4, %v6495_v54 }
 0x86c   : > { %v3535_v2 = vsel %vm3459_vm15, %v3527_v13, %v6555_v59 }
 0x86d   : > { %v11073_v55 = vpop.permute.xlu1 %6547  ;;  %v6523_v21 = vpop.permute.xlu0 %6522 }
 0x86e   : > { %v6525_v37 = vunpack.i.h.bf16 %v6523_v21  ;;  %v6524_v3 = vunpack.i.l.bf16 %v6523_v21  ;;  %v11090_v5 = vpop.permute.xlu2 %6577  ;;  %v6549_v22 = vunpack.i.l.bf16 %v11073_v55 }
 0x870   : > { %v4345_v53 = vsel %vm3459_vm15, %v4329_v58, %v6524_v3  ;;  %v4346_v48 = vsel %vm3459_vm15, %v4330_v26, %v6524_v3  ;;  %v4393_v17 = vsel %vm3459_vm15, %v4377_v43, %v6525_v37  ;;  %v4396_v58 = vsel %vm3459_vm15, %v4380_v45, %v6509_v36 }
 0x871   : > { %4784 = vmatmul.f32.gmra.mxu1 %v3534_v9  ;;  %v4447_v14 = vrot.slane %v4345_v53, 1  ;;  %v4448_v60 = vrot.slane %v4346_v48, 1  ;;  %v4450_v15 = vrot.slane %v4393_v17, 1  ;;  %v4459_v21 = vrot.slane %v4396_v58, 1  ;;  %v12260_v48 = vld [vmem:[#allocation82_spill] sm:$0xff] }
 0x872   : > { %v4350_v37 = vsel %vm3459_vm15, %v4334_v8, %v6559_v11  ;;  %v4397_v3 = vsel %vm3459_vm15, %v4381_v63, %v6560_v46  ;;  %v3933_v43 = vrot.slane %v12259_v51, 7  ;;  %v4463_v9 = vrot.slane %v4349_v23, 1  ;;  %v12263_v11 = vld [vmem:[#allocation20_spill] sm:$0xff] }
 0x873   : > { %v4449_v57 = vsel %vm2364_vm7, %v4447_v14, %v4448_v60  ;;  %v4452_v0 = vsel %vm2364_vm7, %v4450_v15, %v4451_v19  ;;  %v4460_v35 = vsel %vm2364_vm7, %v4458_v24, %v4459_v21  ;;  %v4398_v53 = vsel %vm3459_vm15, %v4382_v7, %v6554_v49 }
 0x874   : > { %4822 = vmatmul.f32.gmra.mxu2 %v4449_v57  ;;  %4863 = vmatmul.f32.gmra.mxu3 %v4452_v0  ;;  %v6535_v60 = vunpack.i.h.bf16 %v11037_v30  ;;  %v4464_v1 = vrot.slane %v4350_v37, 1  ;;  %v4466_v15 = vrot.slane %v4397_v3, 1  ;;  %v6550_v19 = vunpack.i.h.bf16 %v11073_v55 }
 0x875   : > { %v11103_v42 = vpop.permute.xlu1 %6572  ;;  %v6528_v29 = vpop.permute.xlu0 %6527  ;;  %v4467_v61 = vrot.slane %v4398_v53, 1  ;;  %v6540_v0 = vunpack.i.h.bf16 %v10990_v12  ;;  %v3218_v4 = vrot.slane %v12263_v11, 2  ;;  %v6565_v49 = vunpack.i.h.bf16 %v11049_v44 }
 0x876   : > { %v6530_v20 = vunpack.i.h.bf16 %v6528_v29  ;;  %v6529_v25 = vunpack.i.l.bf16 %v6528_v29  ;;  %v11125_v62 = vpop.permute.xlu2 %6587  ;;  %v4465_v55 = vsel %vm2364_vm7, %v4463_v9, %v4464_v1  ;;  %v6574_v52 = vunpack.i.l.bf16 %v11103_v42  ;;  %v12265_v9 = vld [vmem:[#allocation31_spill] sm:$0xff] }
 0x877   : > { %v4468_v29 = vsel %vm2364_vm7, %v4466_v15, %v4467_v61  ;;  %v3220_v46 = vsel %vm2458_vm9, %v3218_v4, %v3219_v27  ;;  %v6575_v23 = vunpack.i.h.bf16 %v11103_v42  ;;  %v6579_v7 = vunpack.i.l.bf16 %v11090_v5 }
 0x878   : > { %v4320_v17 = vsel %vm3441_vm11, %v12260_v48, %v6530_v20  ;;  %v6580_v42 = vunpack.i.h.bf16 %v11090_v5 }
 0x879   : > { %4787 = vmatmul.f32.gmra.mxu1 %v3535_v2  ;;  %v4336_v41 = vsel %vm3450_vm13, %v4320_v17, %v6535_v60  ;;  %v4322_v53 = vsel %vm3441_vm11, %v12265_v9, %v6579_v7 }
 0x87a   : > { %v4352_v28 = vsel %vm3459_vm15, %v4336_v41, %v6539_v18  ;;  %v12268_v41 = vld [vmem:[#allocation15_spill] sm:$0xff] }
 0x87b   : > { %v4472_v24 = vrot.slane %v4352_v28, 1 }
 0x87c   : > { %4825 = vmatmul.f32.gmra.mxu2 %v11018_v40  ;;  %4866 = vmatmul.f32.gmra.mxu3 %v4460_v35  ;;  %v4319_v40 = vsel %vm3441_vm11, %v12261_v38, %v6529_v25  ;;  %v12264_v25 = vld [vmem:[#allocation73_spill] sm:$0xff] }
 0x87d   : > { %v6543_v26 = vpop.permute.xlu0 %6542  ;;  %v11132_v50 = vpop.permute.xlu1 %6597  ;;  %v4335_v57 = vsel %vm3450_vm13, %v4319_v40, %v6534_v56  ;;  %v6589_v56 = vunpack.i.l.bf16 %v11125_v62 }
 0x87e   : > { %v6545_v32 = vunpack.i.h.bf16 %v6543_v26  ;;  %v6544_v14 = vunpack.i.l.bf16 %v6543_v26  ;;  %v4351_v16 = vsel %vm3459_vm15, %v4335_v57, %v6539_v18  ;;  %v11162_v47 = vpop.permute.xlu2 %6607  ;;  %v6599_v3 = vunpack.i.l.bf16 %v11132_v50 }
 0x87f   : > { %v4471_v2 = vrot.slane %v4351_v16, 1  ;;  %v3221_v18 = vrot.slane %v12268_v41, 2  ;;  %v6600_v61 = vunpack.i.h.bf16 %v11132_v50 }
 0x880   : > { %v4368_v36 = vsel %vm3441_vm11, %v3933_v43, %v6545_v32  ;;  %v4367_v54 = vsel %vm3441_vm11, %v3933_v43, %v6544_v14  ;;  %v12266_v32 = vld [vmem:[#allocation88_spill] sm:$0xff] }
 0x881   : > { %v4383_v59 = vsel %vm3450_vm13, %v4367_v54, %v6549_v22  ;;  %v4384_v30 = vsel %vm3450_vm13, %v4368_v36, %v6550_v19  ;;  %v4473_v35 = vsel %vm2364_vm7, %v4471_v2, %v4472_v24  ;;  %v3934_v14 = vrot.slane %v12266_v32, 7  ;;  %v12267_v19 = vld [vmem:[#allocation57_spill] sm:$0xff]  ;;  %v12269_v24 = vld [vmem:[#allocation60_spill] sm:$0xff] }
 0x882   : > { %v4399_v12 = vsel %vm3459_vm15, %v4383_v59, %v6540_v0  ;;  %v4400_v39 = vsel %vm3459_vm15, %v4384_v30, %v6564_v31  ;;  %v3222_v5 = vrot.slane %v12267_v19, 2  ;;  %v6590_v36 = vunpack.i.h.bf16 %v11125_v62 }
 0x883   : > { %v4474_v8 = vrot.slane %v4399_v12, 1  ;;  %v4475_v20 = vrot.slane %v4400_v39, 1  ;;  %v4369_v22 = vsel %vm3441_vm11, %v3934_v14, %v6580_v42  ;;  %v4370_v30 = vsel %vm3441_vm11, %v3934_v14, %v6589_v56 }
 0x884   : > { %4828 = vmatmul.f32.gmra.mxu2 %v4465_v55  ;;  %4869 = vmatmul.f32.gmra.mxu3 %v4468_v29  ;;  %v3223_v34 = vsel %vm2458_vm9, %v3221_v18, %v3222_v5  ;;  %v12272_v5 = vld [vmem:[#allocation35_spill] sm:$0xff] }
 0x885   : > { %v6568_v10 = vpop.permute.xlu0 %6567  ;;  %v11157_v45 = vpop.permute.xlu1 %6602  ;;  %v4476_v44 = vsel %vm2364_vm7, %v4474_v8, %v4475_v20  ;;  %v3521_v29 = vsel %vm3441_vm11, %v3223_v34, %v6590_v36  ;;  %v12274_v34 = vld [vmem:[#allocation46_spill] sm:$0xff] }
 0x886   : > { %v6570_v13 = vunpack.i.h.bf16 %v6568_v10  ;;  %v6569_v58 = vunpack.i.l.bf16 %v6568_v10  ;;  %v11184_v17 = vpop.permute.xlu2 %6622  ;;  %v6605_v62 = vunpack.i.h.bf16 %v11157_v45  ;;  %v6604_v27 = vunpack.i.l.bf16 %v11157_v45 }
 0x887   : > { %v6609_v45 = vunpack.i.l.bf16 %v11162_v47 }
 0x888   : > { %v3520_v63 = vsel %vm3441_vm11, %v3220_v46, %v6569_v58  ;;  %v4321_v21 = vsel %vm3441_vm11, %v12264_v25, %v6570_v13  ;;  %v6610_v13 = vunpack.i.h.bf16 %v11162_v47 }
 0x889   : > { %v3528_v6 = vsel %vm3450_vm13, %v3520_v63, %v6574_v52  ;;  %v4337_v37 = vsel %vm3450_vm13, %v4321_v21, %v6575_v23  ;;  %v12270_v63 = vld [vmem:[#allocation83_spill] sm:$0xff] }
 0x88a   : > { %v3536_v33 = vsel %vm3459_vm15, %v3528_v6, %v6565_v49  ;;  %v4353_v48 = vsel %vm3459_vm15, %v4337_v37, %v6599_v3  ;;  %v4324_v49 = vsel %vm3441_vm11, %v12269_v24, %v6610_v13  ;;  %v4323_v8 = vsel %vm3441_vm11, %v12270_v63, %v6609_v45 }
 0x88b   : > { %4790 = vmatmul.f32.gmra.mxu1 %v3536_v33  ;;  %v4479_v1 = vrot.slane %v4353_v48, 1 }
 0x88c   : > { %4831 = vmatmul.f32.gmra.mxu2 %v4473_v35  ;;  %4872 = vmatmul.f32.gmra.mxu3 %v4476_v44  ;;  %v6625_v35 = vunpack.i.h.bf16 %v11184_v17  ;;  %v6624_v44 = vunpack.i.l.bf16 %v11184_v17 }
 0x88d   : > { %v6583_v51 = vpop.permute.xlu0 %6582  ;;  %v11178_v26 = vpop.permute.xlu1 %6617 }
 0x88e   : > { %v6584_v43 = vunpack.i.l.bf16 %v6583_v51  ;;  %v6585_v38 = vunpack.i.h.bf16 %v6583_v51  ;;  %v11209_v4 = vpop.permute.xlu2 %6637  ;;  %v6619_v20 = vunpack.i.l.bf16 %v11178_v26  ;;  %v12271_v51 = vld [vmem:[#allocation42_spill] sm:$0xff] }
 0x88f   : > { %v6639_v36 = vunpack.i.l.bf16 %v11209_v4 }
 0x890   : > { %v4338_v40 = vsel %vm3450_vm13, %v4322_v53, %v6584_v43  ;;  %v4385_v54 = vsel %vm3450_vm13, %v4369_v22, %v6585_v38  ;;  %v3935_v43 = vrot.slane %v12271_v51, 7  ;;  %v3225_v22 = vrot.slane %v12272_v5, 2  ;;  %v12280_v5 = vld [vmem:[#allocation11_spill] sm:$0xff] }
 0x891   : > { %v4354_v60 = vsel %vm3459_vm15, %v4338_v40, %v6599_v3  ;;  %v4401_v16 = vsel %vm3459_vm15, %v4385_v54, %v6600_v61  ;;  %v6620_v40 = vunpack.i.h.bf16 %v11178_v26  ;;  %v12273_v26 = vld [vmem:[#allocation18_spill] sm:$0xff] }
 0x892   : > { %v4480_v15 = vrot.slane %v4354_v60, 1  ;;  %v4482_v12 = vrot.slane %v4401_v16, 1  ;;  %v4372_v48 = vsel %vm3441_vm11, %v3935_v43, %v6625_v35  ;;  %v4371_v38 = vsel %vm3441_vm11, %v3935_v43, %v6624_v44 }
 0x894   : > { %v4481_v57 = vsel %vm2364_vm7, %v4479_v1, %v4480_v15 }
 0x895   : > { %v6593_v59 = vpop.permute.xlu0 %6592  ;;  %4834 = vmatmul.f32.gmra.mxu2 %v4481_v57  ;;  %v11198_v55 = vpop.permute.xlu1 %6632  ;;  %v3224_v57 = vrot.slane %v12273_v26, 2 }
 0x896   : > { %v6595_v0 = vunpack.i.h.bf16 %v6593_v59  ;;  %v6594_v31 = vunpack.i.l.bf16 %v6593_v59  ;;  %v11227_v37 = vpop.permute.xlu2 %6652  ;;  %v6634_v32 = vunpack.i.l.bf16 %v11198_v55 }
 0x897   : > { %v3226_v59 = vsel %vm2458_vm9, %v3224_v57, %v3225_v22  ;;  %v6655_v35 = vunpack.i.h.bf16 %v11227_v37 }
 0x898   : > { %v4386_v50 = vsel %vm3450_vm13, %v4370_v30, %v6594_v31  ;;  %v3529_v28 = vsel %vm3450_vm13, %v3521_v29, %v6595_v0  ;;  %v6635_v30 = vunpack.i.h.bf16 %v11198_v55  ;;  %v3522_v0 = vsel %vm3441_vm11, %v3226_v59, %v6639_v36 }
 0x899   : > { %v3537_v10 = vsel %vm3459_vm15, %v3529_v28, %v6605_v62  ;;  %v4402_v11 = vsel %vm3459_vm15, %v4386_v50, %v6604_v27  ;;  %v3228_v62 = vrot.slane %v12274_v34, 2  ;;  %v6640_v50 = vunpack.i.h.bf16 %v11209_v4  ;;  %v12275_v28 = vld [vmem:[#allocation41_spill] sm:$0xff] }
 0x89a   : > { %4793 = vmatmul.f32.gmra.mxu1 %v3537_v10  ;;  %v4483_v39 = vrot.slane %v4402_v11, 1  ;;  %v3227_v10 = vrot.slane %v12275_v28, 2  ;;  %v12278_v4 = vld [vmem:[#allocation77_spill] sm:$0xff] }
 0x89c   : > { %v4484_v58 = vsel %vm2364_vm7, %v4482_v12, %v4483_v39  ;;  %v12276_v39 = vld [vmem:[#allocation12_spill] sm:$0xff]  ;;  %v3229_v45 = vsel %vm2458_vm9, %v3227_v10, %v3228_v62 }
 0x89d   : > { %v6613_v52 = vpop.permute.xlu0 %6612  ;;  %4875 = vmatmul.f32.gmra.mxu3 %v4484_v58  ;;  %v11219_v25 = vpop.permute.xlu1 %6647  ;;  %v6654_v58 = vunpack.i.l.bf16 %v11227_v37 }
 0x89e   : > { %v6615_v46 = vunpack.i.h.bf16 %v6613_v52  ;;  %v6614_v2 = vunpack.i.l.bf16 %v6613_v52  ;;  %v4138_v18 = vpop.permute.xlu2 %4137  ;;  %v6649_v31 = vunpack.i.l.bf16 %v11219_v25  ;;  %v6650_v55 = vunpack.i.h.bf16 %v11219_v25  ;;  %v12277_v52 = vld [vmem:[#allocation100_spill] sm:$0xff] }
 0x8a0   : > { %v4339_v21 = vsel %vm3450_vm13, %v4323_v8, %v6614_v2  ;;  %v4340_v47 = vsel %vm3450_vm13, %v4324_v49, %v6615_v46  ;;  %v4326_v13 = vsel %vm3441_vm11, %v12276_v39, %v6649_v31  ;;  %v3936_v46 = vrot.slane %v12277_v52, 7 }
 0x8a1   : > { %v4355_v6 = vsel %vm3459_vm15, %v4339_v21, %v6619_v20  ;;  %v4356_v23 = vsel %vm3459_vm15, %v4340_v47, %v6619_v20  ;;  %v4325_v49 = vsel %vm3441_vm11, %v12278_v4, %v6640_v50  ;;  %v4342_v21 = vsel %vm3450_vm13, %v4326_v13, %v6654_v58  ;;  %v12283_v13 = vld [vmem:[#allocation65_spill] sm:$0xff] }
 0x8a2   : > { %v4487_v33 = vrot.slane %v4355_v6, 1  ;;  %v4488_v7 = vrot.slane %v4356_v23, 1  ;;  %v4373_v47 = vsel %vm3441_vm11, %v3936_v46, %v6650_v55 }
 0x8a4   : > { %v4489_v3 = vsel %vm2364_vm7, %v4487_v33, %v4488_v7 }
 0x8a5   : > { %v6628_v42 = vpop.permute.xlu0 %6627  ;;  %4837 = vmatmul.f32.gmra.mxu2 %v4489_v3  ;;  %v6658_v60 = vpop.permute.xlu1 %6657 }
 0x8a6   : > { %v6630_v9 = vunpack.i.h.bf16 %v6628_v42  ;;  %v6629_v53 = vunpack.i.l.bf16 %v6628_v42  ;;  %v6660_v29 = vunpack.i.h.bf16 %v6658_v60  ;;  %v6659_v63 = vunpack.i.l.bf16 %v6658_v60  ;;  %v3432_v6 = vpop.permute.xlu2 %3431  ;;  %v11278_v60 = vpop.f32.mrf.mxu2 }
 0x8a8   : > { %v4387_v17 = vsel %vm3450_vm13, %v4371_v38, %v6629_v53  ;;  %v4388_v14 = vsel %vm3450_vm13, %v4372_v48, %v6630_v9  ;;  %v3523_v2 = vsel %vm3441_vm11, %v3229_v45, %v6660_v29  ;;  %v4374_v43 = vsel %vm3441_vm11, %v3936_v46, %v6659_v63  ;;  %v12282_v29 = vld [vmem:[#allocation99_spill] sm:$0xff] }
 0x8a9   : > { %v4403_v56 = vsel %vm3459_vm15, %v4387_v17, %v6620_v40  ;;  %v4404_v1 = vsel %vm3459_vm15, %v4388_v14, %v6634_v32  ;;  %v4389_v9 = vsel %vm3450_vm13, %v4373_v47, %v6655_v35  ;;  %v4390_v38 = vsel %vm3450_vm13, %v4374_v43, %v4138_v18  ;;  %v11276_v14 = vpop.f32.mrf.mxu1 }
 0x8aa   : > { %v4490_v15 = vrot.slane %v4403_v56, 1  ;;  %v4491_v19 = vrot.slane %v4404_v1, 1  ;;  %v11283_v56 = vld [vmem:[%s11668_s5] ss:$0 sm:$0xff] }
 0x8ab   : > { %v12279_v1 = vld [vmem:[#allocation30_spill] sm:$0xff] }
 0x8ac   : > { %v4492_v54 = vsel %vm2364_vm7, %v4490_v15, %v4491_v19  ;;  %v4657_v15 = vadd.f32 %v11283_v56, %v12279_v1  ;;  %v11287_v19 = vpop.f32.mrf.mxu3 }
 0x8ad   : > { %4878 = vmatmul.f32.gmra.mxu3 %v4492_v54  ;;  %v6643_v41 = vpop.permute.xlu0 %6642  ;;  %v3377_v12 = vpop.permute.xlu1 %3376  ;;  %v12281_v54 = vld [vmem:[#allocation95_spill] sm:$0xff] }
 0x8ae   : > { %v6644_v61 = vunpack.i.l.bf16 %v6643_v41  ;;  %v6645_v11 = vunpack.i.h.bf16 %v6643_v41  ;;  %v3531_v8 = vsel %vm3450_vm13, %v3523_v2, %v3377_v12  ;;  %v4698_v22 = vadd.f32 %v12280_v5, %v4657_v15 }
 0x8af   : > { %v3539_v44 = vsel %vm3459_vm15, %v3531_v8, %v3432_v6 }
 0x8b0   : > { %v3530_v27 = vsel %vm3450_vm13, %v3522_v0, %v6644_v61  ;;  %v4341_v25 = vsel %vm3450_vm13, %v4325_v49, %v6645_v11  ;;  %v4739_v26 = vadd.f32 %v12281_v54, %v4698_v22  ;;  %v12286_v54 = vld [vmem:[#allocation79_spill] sm:$0xff] }
 0x8b1   : > { %v3538_v16 = vsel %vm3459_vm15, %v3530_v27, %v6635_v30  ;;  %v4902_v30 = vpop.f32.mrf.mxu0 }
 0x8b2   : > { %4796 = vmatmul.f32.gmra.mxu1 %v3538_v16 }
 0x8b5   : > { %v6663_v24 = vpop.permute.xlu0 %6662 }
 0x8b6   : > { %v6664_v20 = vunpack.i.l.bf16 %v6663_v24  ;;  %v6665_v23 = vunpack.i.h.bf16 %v6663_v24 }
 0x8b8   : > { %v4357_v33 = vsel %vm3459_vm15, %v4341_v25, %v6664_v20  ;;  %v4358_v7 = vsel %vm3459_vm15, %v4342_v21, %v6664_v20  ;;  %v4405_v53 = vsel %vm3459_vm15, %v4389_v9, %v6665_v23  ;;  %v12284_v20 = vld [vmem:[#allocation67_spill] sm:$0xff] }
 0x8b9   : > { %v4495_v3 = vrot.slane %v4357_v33, 1  ;;  %v4496_v51 = vrot.slane %v4358_v7, 1  ;;  %v4498_v32 = vrot.slane %v4405_v53, 1  ;;  %v4779_v36 = vpop.f32.mrf.mxu1  ;;  %v4905_v50 = vpop.f32.mrf.mxu0 }
 0x8ba   : > { %4799 = vmatmul.f32.gmra.mxu1 %v3539_v44  ;;  %v4780_v57 = vadd.f32 %v4779_v36, %v4739_v26 }
 0x8bb   : > { %v4497_v42 = vsel %vm2364_vm7, %v4495_v3, %v4496_v51 }
 0x8bc   : > { %4840 = vmatmul.f32.gmra.mxu2 %v4497_v42  ;;  %v12285_v42 = vld [vmem:[#allocation80_spill] sm:$0xff] }
 0x8bd   : > { %v4255_v48 = vpop.permute.xlu0 %4254 }
 0x8be   : > { %v4406_v40 = vsel %vm3459_vm15, %v4390_v38, %v4255_v48 }
 0x8bf   : > { %v4499_v37 = vrot.slane %v4406_v40, 1 }
 0x8c1   : > { %v4500_v17 = vsel %vm2364_vm7, %v4498_v32, %v4499_v37  ;;  %v4908_v4 = vpop.f32.mrf.mxu0 }
 0x8c2   : > { %4881 = vmatmul.f32.gmra.mxu3 %v4500_v17 }
 0x8c9   : > { %v4911_v35 = vpop.f32.mrf.mxu0 }
 0x8d1   : > { %v4914_v1 = vpop.f32.mrf.mxu0 }
 0x8df   : > { %v4820_v41 = vpop.f32.mrf.mxu2  ;;  %v4861_v61 = vpop.f32.mrf.mxu3 }
 0x8e0   : > { %v4821_v18 = vadd.f32 %v4820_v41, %v4780_v57 }
 0x8e2   : > { %v4862_v59 = vadd.f32 %v4861_v61, %v4821_v18 }
 0x8e4   : > { %v4903_v0 = vadd.f32 %v4902_v30, %v4862_v59 }
 0x8e6   : > { %v11291_v31 = vmax.f32 %v4903_v0, 0.0  ;;  %v4782_v27 = vpop.f32.mrf.mxu1 }
 0x8e7   : > { %v4783_v16 = vadd.f32 %v4782_v27, %v12282_v29 }
 0x8e8   : > { %v4962_v34 = vrot.slane %v11291_v31, 3  ;;  %v4938_v62 = vrot.slane %v11291_v31, 1 }
 0x8ea   : > { %4966 = vrot.lane.b32.xlu0 %v4962_v34, %s6796_s22  ;;  %4942 = vrot.lane.b32.xlu2 %v4938_v62, %s6796_s22  ;;  %v4917_v34 = vpop.f32.mrf.mxu0 }
 0x8ee   : > { %v4785_v12 = vpop.f32.mrf.mxu1 }
 0x8ef   : > { %v4786_v45 = vadd.f32 %v4785_v12, %v12283_v13  ;;  %v5253_v13 = vld [vmem:[#allocation6 + $0x70] sm:$0xff] }
 0x8f6   : > { %v4788_v63 = vpop.f32.mrf.mxu1 }
 0x8f7   : > { %v4823_v28 = vpop.f32.mrf.mxu2  ;;  %v4864_v11 = vpop.f32.mrf.mxu3  ;;  %v4789_v25 = vadd.f32 %v4788_v63, %v12284_v20  ;;  %v5251_v20 = vld [vmem:[#allocation6 + $0x60] sm:$0xff] }
 0x8f8   : > { %v4824_v10 = vadd.f32 %v4823_v28, %v4783_v16 }
 0x8fa   : > { %v4865_v55 = vadd.f32 %v4864_v11, %v4824_v10  ;;  %v12287_v10 = vld [vmem:[#allocation39_spill] sm:$0xff] }
 0x8fc   : > { %v4906_v39 = vadd.f32 %v4905_v50, %v4865_v55 }
 0x8fe   : > { %v11299_v58 = vmax.f32 %v4906_v39, 0.0  ;;  %v5254_v39 = vld [vmem:[#allocation6 + $0x78] sm:$0xff] }
 0x8ff   : > { %v4826_v52 = vpop.f32.mrf.mxu2  ;;  %v4867_v2 = vpop.f32.mrf.mxu3  ;;  %5532 = vmatpush.msra.mxu1 %v5254_v39  ;;  %v5267_v39 = vld [vmem:[#allocation6 + $0xe0] sm:$0xff] }
 0x900   : > { %v4827_v46 = vadd.f32 %v4826_v52, %v4786_v45  ;;  %4987 = vrot.lane.b32.xlu1 %v11299_v58, %s6796_s22  ;;  %v4939_v24 = vrot.slane %v11299_v58, 1  ;;  %v4963_v47 = vrot.slane %v11299_v58, 3  ;;  %v4955_v7 = vrot.slane %v11299_v58, 2  ;;  %v5286_v45 = vld [vmem:[#allocation6 + $0x178] sm:$0xff] }
 0x901   : > { %v4979_v55 = vrot.slane %v11299_v58, 4  ;;  %5578 = vmatpush.msra.mxu3 %v5286_v45  ;;  %5533 = vmatpush.msra.mxu1 %v5253_v13 }
 0x902   : > { %v4868_v49 = vadd.f32 %v4867_v2, %v4827_v46  ;;  %4944 = vrot.lane.b32.xlu0 %v4939_v24, %s6796_s22  ;;  %v5285_v46 = vld [vmem:[#allocation6 + $0x170] sm:$0xff] }
 0x903   : > { %5579 = vmatpush.msra.mxu3 %v5285_v46  ;;  %v5278_v46 = vld [vmem:[#allocation6 + $0x138] sm:$0xff] }
 0x904   : > { %v4909_v8 = vadd.f32 %v4908_v4, %v4868_v49  ;;  %v5252_v4 = vld [vmem:[#allocation6 + $0x68] sm:$0xff] }
 0x905   : > { %v5284_v49 = vld [vmem:[#allocation6 + $0x168] sm:$0xff]  ;;  %5534 = vmatpush.msra.mxu1 %v5252_v4 }
 0x906   : > { %v11308_v21 = vmax.f32 %v4909_v8, 0.0  ;;  %5580 = vmatpush.msra.mxu3 %v5284_v49  ;;  %v5244_v49 = vld [vmem:[#allocation6 + $0x28] sm:$0xff] }
 0x907   : > { %v4829_v6 = vpop.f32.mrf.mxu2  ;;  %v4870_v33 = vpop.f32.mrf.mxu3  ;;  %5535 = vmatpush.msra.mxu1 %v5251_v20  ;;  %v5243_v20 = vld [vmem:[#allocation6 + $0x20] sm:$0xff] }
 0x908   : > { %v4830_v23 = vadd.f32 %v4829_v6, %v4789_v25  ;;  %4968 = vrot.lane.b32.xlu1 %v4963_v47, %s6796_s22  ;;  %4989 = vrot.lane.b32.xlu2 %v11308_v21, %s6796_s22  ;;  %v4791_v3 = vpop.f32.mrf.mxu1  ;;  %v4956_v53 = vrot.slane %v11308_v21, 2  ;;  %v4964_v40 = vrot.slane %v11308_v21, 3  ;;  %v4940_v36 = vrot.slane %v11308_v21, 1  ;;  %v5283_v25 = vld [vmem:[#allocation6 + $0x160] sm:$0xff] }
 0x909   : > { %v4792_v9 = vadd.f32 %v4791_v3, %v12285_v42  ;;  %v4980_v12 = vrot.slane %v11308_v21, 4  ;;  %5581 = vmatpush.msra.mxu3 %v5283_v25  ;;  %v5276_v25 = vld [vmem:[#allocation6 + $0x128] sm:$0xff] }
 0x90a   : > { %v4871_v44 = vadd.f32 %v4870_v33, %v4830_v23  ;;  %5005 = vrot.lane.b32.xlu0 %v4955_v7, %s6796_s22  ;;  %v5250_v23 = vld [vmem:[#allocation6 + $0x58] sm:$0xff]  ;;  %v4920_v33 = vpop.f32.mrf.mxu0 }
 0x90b   : > { %5536 = vmatpush.msra.mxu1 %v5250_v23 }
 0x90c   : > { %v4912_v51 = vadd.f32 %v4911_v35, %v4871_v44 }
 0x90e   : > { %v11320_v43 = vmax.f32 %v4912_v51, 0.0  ;;  %v4678_v51 = vadd.f32 %v11283_v56, %v11276_v14  ;;  %v5282_v14 = vld [vmem:[#allocation6 + $0x158] sm:$0xff] }
 0x90f   : > { %v4832_v48 = vpop.f32.mrf.mxu2  ;;  %v4873_v32 = vpop.f32.mrf.mxu3  ;;  %5582 = vmatpush.msra.mxu3 %v5282_v14  ;;  %v5273_v14 = vld [vmem:[#allocation6 + $0x110] sm:$0xff] }
 0x910   : > { %v4833_v38 = vadd.f32 %v4832_v48, %v4792_v9  ;;  %5007 = vrot.lane.b32.xlu1 %v4956_v53, %s6796_s22  ;;  %v4941_v37 = vrot.slane %v11320_v43, 1  ;;  %v4965_v41 = vrot.slane %v11320_v43, 3  ;;  %v4957_v27 = vrot.slane %v11320_v43, 2 }
 0x911   : > { %v4981_v3 = vrot.slane %v11320_v43, 4  ;;  %v4719_v9 = vadd.f32 %v11278_v60, %v4678_v51  ;;  %v5248_v60 = vld [vmem:[#allocation6 + $0x48] sm:$0xff] }
 0x912   : > { %v4874_v17 = vadd.f32 %v4873_v32, %v4833_v38  ;;  %4970 = vrot.lane.b32.xlu0 %v4964_v40, %s6796_s22  ;;  %4948 = vrot.lane.b32.xlu2 %v4941_v37, %s6796_s22  ;;  %v5264_v51 = vld [vmem:[#allocation6 + $0xc8] sm:$0xff] }
 0x913   : > { %v4760_v32 = vadd.f32 %v11287_v19, %v4719_v9  ;;  %v5270_v19 = vld [vmem:[#allocation6 + $0xf8] sm:$0xff]  ;;  %v5263_v9 = vld [vmem:[#allocation6 + $0xc0] sm:$0xff] }
 0x914   : > { %v4915_v15 = vadd.f32 %v4914_v1, %v4874_v17  ;;  %5555 = vmatpush.msra.mxu2 %v5270_v19  ;;  %v5272_v19 = vld [vmem:[#allocation6 + $0x108] sm:$0xff] }
 0x916   : > { %v11335_v5 = vmax.f32 %v4915_v15, 0.0 }
 0x917   : > { %v4794_v22 = vpop.f32.mrf.mxu1 }
 0x918   : > { %4991 = vrot.lane.b32.xlu1 %v11320_v43, %s6796_s22  ;;  %v4795_v26 = vadd.f32 %v4794_v22, %v12286_v54  ;;  %v4835_v57 = vpop.f32.mrf.mxu2  ;;  %v11351_v59 = vrot.slane %v11335_v5, 3  ;;  %v4999_v30 = vrot.slane %v11335_v5, 1  ;;  %v5004_v16 = vrot.slane %v11335_v5, 2  ;;  %v5249_v22 = vld [vmem:[#allocation6 + $0x50] sm:$0xff] }
 0x919   : > { %v5022_v44 = vrot.slane %v11335_v5, 4  ;;  %v5281_v54 = vld [vmem:[#allocation6 + $0x150] sm:$0xff]  ;;  %5537 = vmatpush.msra.mxu1 %v5249_v22  ;;  %v5240_v22 = vld [vmem:[#allocation6 + $0x8] sm:$0xff] }
 0x91a   : > { %4946 = vrot.lane.b32.xlu0 %v4940_v36, %s6796_s22  ;;  %4993 = vrot.lane.b32.xlu2 %v11335_v5, %s6796_s22  ;;  %v4836_v18 = vadd.f32 %v4835_v57, %v4795_v26  ;;  %v5269_v26 = vld [vmem:[#allocation6 + $0xf0] sm:$0xff] }
 0x91b   : > { %5538 = vmatpush.msra.mxu1 %v5248_v60  ;;  %5583 = vmatpush.msra.mxu3 %v5281_v54  ;;  %v5239_v60 = vld [vmem:[#allocation6] sm:$0xff]  ;;  %v5302_v54 = vld [vmem:[#allocation6 + $0x1f8] sm:$0xff] }
 0x91c   : > { %5556 = vmatpush.msra.mxu2 %v5269_v26  ;;  %v5271_v26 = vld [vmem:[#allocation6 + $0x100] sm:$0xff] }
 0x920   : > { %v4876_v61 = vpop.f32.mrf.mxu3  ;;  %4972 = vrot.lane.b32.xlu1 %v4965_v41, %s6796_s22 }
 0x921   : > { %v4877_v0 = vadd.f32 %v4876_v61, %v4836_v18  ;;  %v5247_v18 = vld [vmem:[#allocation6 + $0x40] sm:$0xff]  ;;  %v5280_v61 = vld [vmem:[#allocation6 + $0x148] sm:$0xff] }
 0x922   : > { %5047 = vrot.lane.b32.xlu0 %v11351_v59, %s6796_s22  ;;  %5037 = vrot.lane.b32.xlu2 %v4999_v30, %s6796_s22 }
 0x923   : > { %v4918_v62 = vadd.f32 %v4917_v34, %v4877_v0  ;;  %v5268_v34 = vld [vmem:[#allocation6 + $0xe8] sm:$0xff]  ;;  %5539 = vmatpush.msra.mxu1 %v5247_v18  ;;  %5584 = vmatpush.msra.mxu3 %v5280_v61  ;;  %v5301_v18 = vld [vmem:[#allocation6 + $0x1f0] sm:$0xff]  ;;  %v5334_v61 = vld [vmem:[#allocation6 + $0x2f8] sm:$0xff] }
 0x924   : > { %5557 = vmatpush.msra.mxu2 %v5268_v34  ;;  %v5300_v34 = vld [vmem:[#allocation6 + $0x1e8] sm:$0xff] }
 0x925   : > { %v11360_v29 = vmax.f32 %v4918_v62, 0.0 }
 0x926   : > { %5558 = vmatpush.msra.mxu2 %v5267_v39  ;;  %v5332_v39 = vld [vmem:[#allocation6 + $0x2e8] sm:$0xff] }
 0x927   : > { %v5043_v50 = vrot.slane %v11360_v29, 2  ;;  %v5036_v6 = vrot.slane %v11360_v29, 1  ;;  %v5046_v48 = vrot.slane %v11360_v29, 3 }
 0x928   : > { %5009 = vrot.lane.b32.xlu1 %v4957_v27, %s6796_s22  ;;  %v4838_v52 = vpop.f32.mrf.mxu2 }
 0x92a   : > { %5057 = vrot.lane.b32.xlu0 %v11360_v29, %s6796_s22  ;;  %5011 = vrot.lane.b32.xlu2 %v5004_v16, %s6796_s22 }
 0x92f   : > { %v4797_v28 = vpop.f32.mrf.mxu1 }
 0x930   : > { %v4798_v11 = vadd.f32 %v4797_v28, %v12287_v10  ;;  %5116 = vrot.lane.b32.xlu1 %v5043_v50, %s6796_s22  ;;  %v4879_v63 = vpop.f32.mrf.mxu3  ;;  %v5246_v28 = vld [vmem:[#allocation6 + $0x38] sm:$0xff]  ;;  %v5279_v10 = vld [vmem:[#allocation6 + $0x140] sm:$0xff] }
 0x931   : > { %5540 = vmatpush.msra.mxu1 %v5246_v28  ;;  %5585 = vmatpush.msra.mxu3 %v5279_v10  ;;  %v5258_v28 = vld [vmem:[#allocation6 + $0x98] sm:$0xff]  ;;  %v4954_v10 = vrot.slane %v11291_v31, 2 }
 0x932   : > { %v4839_v2 = vadd.f32 %v4838_v52, %v4798_v11  ;;  %5025 = vrot.lane.b32.xlu0 %v4980_v12, %s6796_s22  ;;  %5023 = vrot.lane.b32.xlu2 %v4979_v55, %s6796_s22  ;;  %v4923_v11 = vpop.f32.mrf.mxu0  ;;  %v5245_v52 = vld [vmem:[#allocation6 + $0x30] sm:$0xff] }
 0x933   : > { %5541 = vmatpush.msra.mxu1 %v5245_v52  ;;  %5586 = vmatpush.msra.mxu3 %v5278_v46 }
 0x934   : > { %v4880_v8 = vadd.f32 %v4879_v63, %v4839_v2  ;;  %v5266_v2 = vld [vmem:[#allocation6 + $0xd8] sm:$0xff]  ;;  %v5277_v63 = vld [vmem:[#allocation6 + $0x130] sm:$0xff] }
 0x935   : > { %5559 = vmatpush.msra.mxu2 %v5266_v2  ;;  %5542 = vmatpush.msra.mxu1 %v5244_v49  ;;  %v5298_v2 = vld [vmem:[#allocation6 + $0x1d8] sm:$0xff]  ;;  %v5331_v49 = vld [vmem:[#allocation6 + $0x2e0] sm:$0xff] }
 0x936   : > { %v4921_v35 = vadd.f32 %v4920_v33, %v4880_v8  ;;  %v5265_v8 = vld [vmem:[#allocation6 + $0xd0] sm:$0xff]  ;;  %5587 = vmatpush.msra.mxu3 %v5277_v63  ;;  %v5242_v33 = vld [vmem:[#allocation6 + $0x18] sm:$0xff] }
 0x937   : > { %v4800_v38 = vpop.f32.mrf.mxu1  ;;  %5560 = vmatpush.msra.mxu2 %v5265_v8  ;;  %5543 = vmatpush.msra.mxu1 %v5243_v20  ;;  %v5257_v20 = vld [vmem:[#allocation6 + $0x90] sm:$0xff] }
 0x938   : > { %5039 = vrot.lane.b32.xlu1 %v5036_v6, %s6796_s22  ;;  %v11398_v42 = vmax.f32 %v4921_v35, 0.0  ;;  %v4801_v56 = vadd.f32 %v4800_v38, %v4760_v32  ;;  %v5275_v35 = vld [vmem:[#allocation6 + $0x120] sm:$0xff]  ;;  %5588 = vmatpush.msra.mxu3 %v5276_v25  ;;  %v5241_v38 = vld [vmem:[#allocation6 + $0x10] sm:$0xff]  ;;  %v5274_v32 = vld [vmem:[#allocation6 + $0x118] sm:$0xff] }
 0x939   : > { %5561 = vmatpush.msra.mxu2 %v5264_v51  ;;  %5544 = vmatpush.msra.mxu1 %v5242_v33  ;;  %v5297_v25 = vld [vmem:[#allocation6 + $0x1d0] sm:$0xff]  ;;  %v5296_v51 = vld [vmem:[#allocation6 + $0x1c8] sm:$0xff] }
 0x93a   : > { %5029 = vrot.lane.b32.xlu0 %v5022_v44, %s6796_s22  ;;  %5027 = vrot.lane.b32.xlu2 %v4981_v3, %s6796_s22  ;;  %v5095_v17 = vrot.slane %v11398_v42, 3  ;;  %v5089_v1 = vrot.slane %v11398_v42, 1  ;;  %v5093_v45 = vrot.slane %v11398_v42, 2 }
 0x93b   : > { %5589 = vmatpush.msra.mxu3 %v5275_v35  ;;  %5562 = vmatpush.msra.mxu2 %v5263_v9  ;;  %v5256_v35 = vld [vmem:[#allocation6 + $0x88] sm:$0xff]  ;;  %v5329_v9 = vld [vmem:[#allocation6 + $0x2d0] sm:$0xff] }
 0x93c   : > { %5545 = vmatpush.msra.mxu1 %v5241_v38  ;;  %v5350_v38 = vld [vmem:[#allocation6 + $0x378] sm:$0xff] }
 0x93d   : > { %5590 = vmatpush.msra.mxu3 %v5274_v32  ;;  %v5255_v32 = vld [vmem:[#allocation6 + $0x80] sm:$0xff]  ;;  %5670 = vmatpush.msra.mxu0 %v5350_v38 }
 0x93e   : > { %5546 = vmatpush.msra.mxu1 %v5240_v22  ;;  %v5328_v22 = vld [vmem:[#allocation6 + $0x2c8] sm:$0xff] }
 0x93f   : > { %v4841_v15 = vpop.f32.mrf.mxu2  ;;  %5591 = vmatpush.msra.mxu3 %v5273_v14  ;;  %v5349_v14 = vld [vmem:[#allocation6 + $0x370] sm:$0xff] }
 0x940   : > { %5049 = vrot.lane.b32.xlu1 %v5046_v48, %s6796_s22  ;;  %v4842_v57 = vadd.f32 %v4841_v15, %v4801_v56  ;;  %v5262_v15 = vld [vmem:[#allocation6 + $0xb8] sm:$0xff]  ;;  %v5261_v56 = vld [vmem:[#allocation6 + $0xb0] sm:$0xff]  ;;  %5547 = vmatpush.msra.mxu1 %v5239_v60 }
 0x941   : > { %5563 = vmatpush.msra.mxu2 %v5262_v15  ;;  %5592 = vmatpush.msra.mxu3 %v5272_v19  ;;  %v5295_v15 = vld [vmem:[#allocation6 + $0x1c0] sm:$0xff]  ;;  %v5318_v60 = vld [vmem:[#allocation6 + $0x278] sm:$0xff]  ;;  %v5348_v19 = vld [vmem:[#allocation6 + $0x368] sm:$0xff] }
 0x942   : > { %5096 = vrot.lane.b32.xlu0 %v5095_v17, %s6796_s22  ;;  %5090 = vrot.lane.b32.xlu2 %v5089_v1, %s6796_s22 }
 0x943   : > { %5564 = vmatpush.msra.mxu2 %v5261_v56  ;;  %5601 = vmatpush.msrb.mxu1 %v5302_v54  ;;  %v5294_v54 = vld [vmem:[#allocation6 + $0x1b8] sm:$0xff] }
 0x944   : > { %5593 = vmatpush.msra.mxu3 %v5271_v26  ;;  %5671 = vmatpush.msra.mxu0 %v5349_v14  ;;  %v5327_v26 = vld [vmem:[#allocation6 + $0x2c0] sm:$0xff]  ;;  %v5320_v14 = vld [vmem:[#allocation6 + $0x288] sm:$0xff] }
 0x945   : > { %v4882_v0 = vpop.f32.mrf.mxu3  ;;  %5602 = vmatpush.msrb.mxu1 %v5301_v18  ;;  %v5293_v18 = vld [vmem:[#allocation6 + $0x1b0] sm:$0xff] }
 0x946   : > { %v4883_v62 = vadd.f32 %v4882_v0, %v4842_v57  ;;  %v5260_v57 = vld [vmem:[#allocation6 + $0xa8] sm:$0xff]  ;;  %v5259_v0 = vld [vmem:[#allocation6 + $0xa0] sm:$0xff]  ;;  %5647 = vmatpush.msrb.mxu3 %v5334_v61  ;;  %5672 = vmatpush.msra.mxu0 %v5348_v19  ;;  %v5326_v61 = vld [vmem:[#allocation6 + $0x2b8] sm:$0xff] }
 0x947   : > { %5565 = vmatpush.msra.mxu2 %v5260_v57  ;;  %5603 = vmatpush.msrb.mxu1 %v5300_v34  ;;  %v5317_v57 = vld [vmem:[#allocation6 + $0x270] sm:$0xff]  ;;  %v5316_v34 = vld [vmem:[#allocation6 + $0x268] sm:$0xff] }
 0x948   : > { %v4924_v13 = vadd.f32 %v4923_v11, %v4883_v62  ;;  %5059 = vrot.lane.b32.xlu1 %v11398_v42, %s6796_s22  ;;  %v5333_v62 = vld [vmem:[#allocation6 + $0x2f0] sm:$0xff]  ;;  %v5299_v11 = vld [vmem:[#allocation6 + $0x1e0] sm:$0xff] }
 0x949   : > { %5566 = vmatpush.msra.mxu2 %v5259_v0  ;;  %5648 = vmatpush.msrb.mxu3 %v5333_v62  ;;  %v5347_v0 = vld [vmem:[#allocation6 + $0x360] sm:$0xff]  ;;  %v5292_v62 = vld [vmem:[#allocation6 + $0x1a8] sm:$0xff] }
 0x94a   : > { %v11417_v4 = vmax.f32 %v4924_v13, 0.0  ;;  %5118 = vrot.lane.b32.xlu0 %v5093_v45, %s6796_s22  ;;  %v4943_v13 = vpop.permute.xlu2 %4942  ;;  %5604 = vmatpush.msrb.mxu1 %v5299_v11  ;;  %v5315_v11 = vld [vmem:[#allocation6 + $0x260] sm:$0xff] }
 0x94b   : > { %5567 = vmatpush.msra.mxu2 %v5258_v28  ;;  %5649 = vmatpush.msrb.mxu3 %v5332_v39  ;;  %v5063_v8 = vsel %vm3450_vm13, %v11291_v31, %v4943_v13  ;;  %v5325_v28 = vld [vmem:[#allocation6 + $0x2b0] sm:$0xff]  ;;  %v5291_v13 = vld [vmem:[#allocation6 + $0x1a0] sm:$0xff] }
 0x94c   : > { %5108 = vrot.lane.b32.xlu2 %v11417_v4, %s6796_s22  ;;  %v5115_v23 = vrot.slane %v11417_v4, 2  ;;  %5605 = vmatpush.msrb.mxu1 %v5298_v2  ;;  %v5345_v39 = vld [vmem:[#allocation6 + $0x350] sm:$0xff]  ;;  %v5314_v2 = vld [vmem:[#allocation6 + $0x258] sm:$0xff] }
 0x94d   : > { %5650 = vmatpush.msrb.mxu3 %v5331_v49  ;;  %5568 = vmatpush.msra.mxu2 %v5257_v20  ;;  %v5344_v49 = vld [vmem:[#allocation6 + $0x348] sm:$0xff]  ;;  %v5313_v20 = vld [vmem:[#allocation6 + $0x250] sm:$0xff] }
 0x94e   : > { %5606 = vmatpush.msrb.mxu1 %v5297_v25  ;;  %5673 = vmatpush.msra.mxu0 %v5347_v0  ;;  %v5289_v25 = vld [vmem:[#allocation6 + $0x190] sm:$0xff]  ;;  %v5339_v0 = vld [vmem:[#allocation6 + $0x320] sm:$0xff] }
 0x94f   : > { %5569 = vmatpush.msra.mxu2 %v5256_v35  ;;  %v5312_v35 = vld [vmem:[#allocation6 + $0x248] sm:$0xff] }
 0x950   : > { %5120 = vrot.lane.b32.xlu1 %v5115_v23, %s6796_s22  ;;  %v5330_v23 = vld [vmem:[#allocation6 + $0x2d8] sm:$0xff]  ;;  %5607 = vmatpush.msrb.mxu1 %v5296_v51  ;;  %v5288_v51 = vld [vmem:[#allocation6 + $0x188] sm:$0xff] }
 0x951   : > { %5651 = vmatpush.msrb.mxu3 %v5330_v23  ;;  %5570 = vmatpush.msra.mxu2 %v5255_v32  ;;  %v5322_v23 = vld [vmem:[#allocation6 + $0x298] sm:$0xff] }
 0x952   : > { %5608 = vmatpush.msrb.mxu1 %v5295_v15  ;;  %v5342_v32 = vld [vmem:[#allocation6 + $0x338] sm:$0xff]  ;;  %v5311_v15 = vld [vmem:[#allocation6 + $0x240] sm:$0xff] }
 0x953   : > { %5652 = vmatpush.msrb.mxu3 %v5329_v9  ;;  %5624 = vmatpush.msrb.mxu2 %v5318_v60  ;;  %v5321_v9 = vld [vmem:[#allocation6 + $0x290] sm:$0xff] }
 0x954   : > { %5609 = vmatpush.msrb.mxu1 %v5294_v54  ;;  %v5341_v60 = vld [vmem:[#allocation6 + $0x330] sm:$0xff] }
 0x955   : > { %5653 = vmatpush.msrb.mxu3 %v5328_v22  ;;  %5625 = vmatpush.msrb.mxu2 %v5317_v57  ;;  %v5287_v22 = vld [vmem:[#allocation6 + $0x180] sm:$0xff]  ;;  %v5340_v57 = vld [vmem:[#allocation6 + $0x328] sm:$0xff] }
 0x956   : > { %5610 = vmatpush.msrb.mxu1 %v5293_v18  ;;  %v5319_v18 = vld [vmem:[#allocation6 + $0x280] sm:$0xff] }
 0x957   : > { %5654 = vmatpush.msrb.mxu3 %v5327_v26  ;;  %5626 = vmatpush.msrb.mxu2 %v5316_v34  ;;  %v5310_v26 = vld [vmem:[#allocation6 + $0x238] sm:$0xff] }
 0x958   : > { %5611 = vmatpush.msrb.mxu1 %v5292_v62 }
 0x959   : > { %5655 = vmatpush.msrb.mxu3 %v5326_v61  ;;  %5627 = vmatpush.msrb.mxu2 %v5315_v11  ;;  %v5309_v61 = vld [vmem:[#allocation6 + $0x230] sm:$0xff] }
 0x95a   : > { %5612 = vmatpush.msrb.mxu1 %v5291_v13 }
 0x95b   : > { %5656 = vmatpush.msrb.mxu3 %v5325_v28  ;;  %5628 = vmatpush.msrb.mxu2 %v5314_v2 }
 0x95c   : > { %v4967_v52 = vpop.permute.xlu0 %4966 }
 0x95d   : > { %v5067_v46 = vsel %vm3450_vm13, %v4954_v10, %v4967_v52  ;;  %v5346_v10 = vld [vmem:[#allocation6 + $0x358] sm:$0xff]  ;;  %v5324_v52 = vld [vmem:[#allocation6 + $0x2a8] sm:$0xff]  ;;  %5629 = vmatpush.msrb.mxu2 %v5313_v20 }
 0x95e   : > { %v5190_v63 = vrot.slane %v5067_v46, 4  ;;  %5674 = vmatpush.msra.mxu0 %v5346_v10  ;;  %5657 = vmatpush.msrb.mxu3 %v5324_v52 }
 0x95f   : > { %5630 = vmatpush.msrb.mxu2 %v5312_v35 }
 0x960   : > { %v5215_v33 = vsel %vm5214_vm8, %v5063_v8, %v5190_v63  ;;  %5675 = vmatpush.msra.mxu0 %v5345_v39  ;;  %v5290_v63 = vld [vmem:[#allocation6 + $0x198] sm:$0xff]  ;;  %v5323_v8 = vld [vmem:[#allocation6 + $0x2a0] sm:$0xff]  ;;  %v4978_v39 = vrot.slane %v11291_v31, 4 }
 0x961   : > { %5443 = vst [vmem:[#allocation1] ss:$2 sm:$0xff] %v5215_v33  ;;  %5613 = vmatpush.msrb.mxu1 %v5290_v63  ;;  %5658 = vmatpush.msrb.mxu3 %v5323_v8  ;;  %v5343_v33 = vld [vmem:[#allocation6 + $0x340] sm:$0xff]  ;;  %v5308_v8 = vld [vmem:[#allocation6 + $0x228] sm:$0xff]  ;;  %v5338_v31 = vld [vmem:[#allocation6 + $0x318] sm:$0xff] }
 0x962   : > { %v11431_v56 = vpop.permute.xlu2 %4989  ;;  %5676 = vmatpush.msra.mxu0 %v5344_v49  ;;  %5631 = vmatpush.msrb.mxu2 %v5311_v15  ;;  %v5366_v15 = vld [vmem:[#allocation6 + $0x3f8] sm:$0xff] }
 0x963   : > { %5614 = vmatpush.msrb.mxu1 %v5289_v25  ;;  %5659 = vmatpush.msrb.mxu3 %v5322_v23  ;;  %v5307_v25 = vld [vmem:[#allocation6 + $0x220] sm:$0xff] }
 0x964   : > { %5677 = vmatpush.msra.mxu0 %v5343_v33  ;;  %5632 = vmatpush.msrb.mxu2 %v5310_v26  ;;  %v5306_v33 = vld [vmem:[#allocation6 + $0x218] sm:$0xff]  ;;  %v5335_v26 = vld [vmem:[#allocation6 + $0x300] sm:$0xff] }
 0x965   : > { %5615 = vmatpush.msrb.mxu1 %v5288_v51  ;;  %5660 = vmatpush.msrb.mxu3 %v5321_v9 }
 0x966   : > { %5678 = vmatpush.msra.mxu0 %v5342_v32  ;;  %5633 = vmatpush.msrb.mxu2 %v5309_v61  ;;  %v5072_v32 = vsel %vm3450_vm13, %v4979_v55, %v11431_v56  ;;  %v5100_v55 = vrot.slane %v11335_v5, 7 }
 0x967   : > { %5616 = vmatpush.msrb.mxu1 %v5287_v22  ;;  %5661 = vmatpush.msrb.mxu3 %v5320_v14 }
 0x968   : > { %5679 = vmatpush.msra.mxu0 %v5341_v60  ;;  %5634 = vmatpush.msrb.mxu2 %v5308_v8  ;;  %v5365_v60 = vld [vmem:[#allocation6 + $0x3f0] sm:$0xff] }
 0x969   : > { %5662 = vmatpush.msrb.mxu3 %v5319_v18  ;;  %v5364_v18 = vld [vmem:[#allocation6 + $0x3e8] sm:$0xff] }
 0x96a   : > { %5680 = vmatpush.msra.mxu0 %v5340_v57  ;;  %5635 = vmatpush.msrb.mxu2 %v5307_v25  ;;  %v5304_v57 = vld [vmem:[#allocation6 + $0x208] sm:$0xff] }
 0x96c   : > { %v11433_v46 = vpop.permute.xlu2 %4948  ;;  %5681 = vmatpush.msra.mxu0 %v5339_v0  ;;  %5636 = vmatpush.msrb.mxu2 %v5306_v33  ;;  %v5303_v0 = vld [vmem:[#allocation6 + $0x200] sm:$0xff]  ;;  %v5361_v33 = vld [vmem:[#allocation6 + $0x3d0] sm:$0xff] }
 0x96e   : > { %5682 = vmatpush.msra.mxu0 %v5338_v31  ;;  %v5381_v31 = vld [vmem:[#allocation6 + $0x470] sm:$0xff] }
 0x972   : > { %v4988_v38 = vpop.permute.xlu1 %4987 }
 0x973   : > { %v5071_v63 = vsel %vm3450_vm13, %v4978_v39, %v4988_v38  ;;  %v5336_v38 = vld [vmem:[#allocation6 + $0x308] sm:$0xff] }
 0x974   : > { %v4945_v19 = vpop.permute.xlu0 %4944  ;;  %v11435_v54 = vpop.permute.xlu2 %4993 }
 0x975   : > { %v5064_v13 = vsel %vm3450_vm13, %v11299_v58, %v4945_v19  ;;  %v5396_v58 = vld [vmem:[#allocation6 + $0x4e8] sm:$0xff] }
 0x97a   : > { %v4969_v34 = vpop.permute.xlu1 %4968 }
 0x97b   : > { %v5068_v62 = vsel %vm3450_vm13, %v4955_v7, %v4969_v34 }
 0x97c   : > { %v5196_v28 = vrot.slane %v5068_v62, 4  ;;  %v5006_v10 = vpop.permute.xlu0 %5005  ;;  %v11440_v11 = vpop.permute.xlu2 %5037  ;;  %v5363_v62 = vld [vmem:[#allocation6 + $0x3e0] sm:$0xff] }
 0x97d   : > { %v5075_v52 = vsel %vm3450_vm13, %v4939_v24, %v5006_v10  ;;  %v5337_v24 = vld [vmem:[#allocation6 + $0x310] sm:$0xff]  ;;  %v5128_v10 = vsel %vm3450_vm13, %v5100_v55, %v11435_v54  ;;  %v5378_v55 = vld [vmem:[#allocation6 + $0x458] sm:$0xff] }
 0x97e   : > { %v5221_v2 = vsel %vm5214_vm8, %v5064_v13, %v5196_v28  ;;  %v5191_v49 = vrot.slane %v5075_v52, 4  ;;  %5683 = vmatpush.msra.mxu0 %v5337_v24  ;;  %v5382_v28 = vld [vmem:[#allocation6 + $0x478] sm:$0xff]  ;;  %v5153_v25 = vrot.slane %v5128_v10, 1  ;;  %v5397_v24 = vld [vmem:[#allocation6 + $0x4f0] sm:$0xff] }
 0x97f   : > { %5445 = vst [vmem:[#allocation1 + $0x1] ss:$2 sm:$0xff] %v5221_v2  ;;  %v5377_v10 = vld [vmem:[#allocation6 + $0x450] sm:$0xff] }
 0x980   : > { %v5216_v7 = vsel %vm5214_vm8, %v5071_v63, %v5191_v49  ;;  %5684 = vmatpush.msra.mxu0 %v5336_v38  ;;  %v5398_v49 = vld [vmem:[#allocation6 + $0x4f8] sm:$0xff] }
 0x981   : > { %5447 = vst [vmem:[#allocation1 + $0x10] ss:$2 sm:$0xff] %v5216_v7  ;;  %v5362_v63 = vld [vmem:[#allocation6 + $0x3d8] sm:$0xff] }
 0x982   : > { %v5008_v20 = vpop.permute.xlu1 %5007  ;;  %5685 = vmatpush.msra.mxu0 %v5335_v26 }
 0x983   : > { %v5076_v23 = vsel %vm3450_vm13, %v4940_v36, %v5008_v20  ;;  %v5305_v36 = vld [vmem:[#allocation6 + $0x210] sm:$0xff] }
 0x984   : > { %v5197_v35 = vrot.slane %v5076_v23, 4  ;;  %v4971_v51 = vpop.permute.xlu0 %4970  ;;  %v5012_v9 = vpop.permute.xlu2 %5011  ;;  %5637 = vmatpush.msrb.mxu2 %v5305_v36  ;;  %v5414_v36 = vld [vmem:[#allocation6 + $0x578] sm:$0xff] }
 0x985   : > { %v11463_v56 = vsel %vm3450_vm13, %v4999_v30, %v5012_v9  ;;  %v11476_v30 = vsel %vm3450_vm13, %v4956_v53, %v4971_v51  ;;  %v11490_v53 = vsel %vm3450_vm13, %v4981_v3, %v11435_v54  ;;  %v5380_v51 = vld [vmem:[#allocation6 + $0x468] sm:$0xff]  ;;  %v11501_v3 = vsel %vm3450_vm13, %v11320_v43, %v11433_v46  ;;  %5762 = vmatpush.msrb.mxu0 %v5414_v36  ;;  %v5411_v36 = vld [vmem:[#allocation6 + $0x560] sm:$0xff] }
 0x986   : > { %v5222_v22 = vsel %vm5214_vm8, %v5072_v32, %v5197_v35  ;;  %v5458_v14 = vld.sshfl [vmem:[#allocation1] sm:$0xff pattern:$0x75316420]  ;;  %v5459_v19 = vld.sshfl [vmem:[#allocation1 + $0x8] sm:$0xff pattern:$0x75316420]  ;;  %5638 = vmatpush.msrb.mxu2 %v5304_v57 }
 0x987   : > { %5449 = vst [vmem:[#allocation1 + $0x11] ss:$2 sm:$0xff] %v5222_v22  ;;  %5548 = vmatmul.f32.vlgmr.msra.gmra.mxu1 %v5458_v14  ;;  %5571 = vmatmul.f32.vlgmr.msra.gmra.mxu2 %v5459_v19  ;;  %v5994_v2 = vrot.slane %v11463_v56, 5  ;;  %v5199_v38 = vrot.slane %v11490_v53, 4  ;;  %v11508_v22 = vsel %vm3450_vm13, %v11335_v5, %v11440_v11  ;;  %v5395_v14 = vld [vmem:[#allocation6 + $0x4e0] sm:$0xff]  ;;  %v5151_v19 = vrot.slane %v11501_v3, 1 }
 0x988   : > { %5693 = vmatpush.msra.mxu1 %v5366_v15  ;;  %5639 = vmatpush.msrb.mxu2 %v5303_v0  ;;  %v5379_v15 = vld [vmem:[#allocation6 + $0x460] sm:$0xff]  ;;  %v5156_v0 = vrot.slane %v11508_v22, 1 }
 0x989   : > { %v5220_v54 = vsel %vm5214_vm8, %v5153_v25, %v5994_v2  ;;  %v5392_v2 = vld [vmem:[#allocation6 + $0x4c8] sm:$0xff]  ;;  %v5391_v25 = vld [vmem:[#allocation6 + $0x4c0] sm:$0xff] }
 0x98a   : > { %v4992_v61 = vpop.permute.xlu1 %4991  ;;  %5694 = vmatpush.msra.mxu1 %v5365_v60  ;;  %5716 = vmatpush.msra.mxu2 %v5382_v28  ;;  %v5359_v60 = vld [vmem:[#allocation6 + $0x3c0] sm:$0xff] }
 0x98b   : > { %v11468_v34 = vsel %vm3450_vm13, %v4980_v12, %v4992_v61  ;;  %v5358_v61 = vld [vmem:[#allocation6 + $0x3b8] sm:$0xff] }
 0x98c   : > { %v5193_v39 = vrot.slane %v11468_v34, 4  ;;  %v4947_v13 = vpop.permute.xlu0 %4946  ;;  %v5024_v52 = vpop.permute.xlu2 %5023  ;;  %5695 = vmatpush.msra.mxu1 %v5364_v18  ;;  %5717 = vmatpush.msra.mxu2 %v5381_v31 }
 0x98d   : > { %v11481_v12 = vsel %vm3450_vm13, %v11308_v21, %v4947_v13  ;;  %v5079_v23 = vsel %vm3450_vm13, %v4963_v47, %v5024_v52  ;;  %v5360_v47 = vld [vmem:[#allocation6 + $0x3c8] sm:$0xff]  ;;  %v5357_v13 = vld [vmem:[#allocation6 + $0x3b0] sm:$0xff] }
 0x98e   : > { %v5218_v7 = vsel %vm5214_vm8, %v11476_v30, %v5193_v39  ;;  %v5192_v8 = vrot.slane %v11481_v12, 4  ;;  %v5460_v20 = vld.sshfl [vmem:[#allocation1 + $0x10] sm:$0xff pattern:$0x75316420]  ;;  %5696 = vmatpush.msra.mxu1 %v5363_v62  ;;  %5718 = vmatpush.msra.mxu2 %v5380_v51  ;;  %v5393_v39 = vld [vmem:[#allocation6 + $0x4d0] sm:$0xff]  ;;  %v5374_v51 = vld [vmem:[#allocation6 + $0x438] sm:$0xff] }
 0x98f   : > { %5455 = vst [vmem:[#allocation1 + $0x30] ss:$2 sm:$0xff] %v5218_v7  ;;  %5594 = vmatmul.f32.vlgmr.msra.gmra.mxu3 %v5460_v20  ;;  %v11496_v9 = vld.sshfl [vmem:[#allocation1 + $0x18] sm:$0xff pattern:$0x75316420]  ;;  %v5376_v52 = vld [vmem:[#allocation6 + $0x448] sm:$0xff] }
 0x990   : > { %v5217_v35 = vsel %vm5214_vm8, %v5079_v23, %v5192_v8  ;;  %5739 = vmatpush.msra.mxu3 %v5398_v49  ;;  %5697 = vmatpush.msra.mxu1 %v5362_v63  ;;  %5468 = vst [vmem:[#allocation1 + $0x10] ss:$2 sm:$0xff] %v5220_v54  ;;  %v5356_v49 = vld [vmem:[#allocation6 + $0x3a8] sm:$0xff]  ;;  %v5375_v8 = vld [vmem:[#allocation6 + $0x440] sm:$0xff]  ;;  %v5202_v20 = vrot.slane %v11476_v30, 4  ;;  %v5413_v54 = vld [vmem:[#allocation6 + $0x570] sm:$0xff] }
 0x991   : > { %5451 = vst [vmem:[#allocation1 + $0x20] ss:$2 sm:$0xff] %v5217_v35  ;;  %5719 = vmatpush.msra.mxu2 %v5379_v15  ;;  %v5355_v23 = vld [vmem:[#allocation6 + $0x3a0] sm:$0xff]  ;;  %v5373_v15 = vld [vmem:[#allocation6 + $0x430] sm:$0xff]  ;;  %5763 = vmatpush.msrb.mxu0 %v5413_v54 }
 0x992   : > { %v4973_v32 = vpop.permute.xlu1 %4972  ;;  %5740 = vmatpush.msra.mxu3 %v5397_v24  ;;  %5698 = vmatpush.msra.mxu1 %v5361_v33  ;;  %v5209_v24 = vrot.slane %v11463_v56, 4  ;;  %v5369_v21 = vld [vmem:[#allocation6 + $0x410] sm:$0xff]  ;;  %v5407_v54 = vld [vmem:[#allocation6 + $0x540] sm:$0xff] }
 0x993   : > { %v5070_v46 = vsel %vm3450_vm13, %v4957_v27, %v4973_v32  ;;  %v5394_v27 = vld [vmem:[#allocation6 + $0x4d8] sm:$0xff]  ;;  %5720 = vmatpush.msra.mxu2 %v5378_v55  ;;  %v5389_v32 = vld [vmem:[#allocation6 + $0x4b0] sm:$0xff] }
 0x994   : > { %v5993_v26 = vrot.slane %v5070_v46, 5  ;;  %v5224_v57 = vsel %vm5214_vm8, %v5070_v46, %v5199_v38  ;;  %v5048_v18 = vpop.permute.xlu0 %5047  ;;  %5741 = vmatpush.msra.mxu3 %v5396_v58  ;;  %5699 = vmatpush.msra.mxu1 %v5360_v47  ;;  %v5208_v63 = vrot.slane %v5070_v46, 4  ;;  %v5227_v58 = vsel %vm5214_vm8, %v11481_v12, %v5202_v20  ;;  %v5354_v38 = vld [vmem:[#allocation6 + $0x398] sm:$0xff]  ;;  %v5412_v46 = vld [vmem:[#allocation6 + $0x568] sm:$0xff]  ;;  %v5353_v12 = vld [vmem:[#allocation6 + $0x390] sm:$0xff] }
 0x995   : > { %5457 = vst [vmem:[#allocation1 + $0x31] ss:$2 sm:$0xff] %v5224_v57  ;;  %v11518_v11 = vsel %vm3450_vm13, %v5004_v16, %v5048_v18  ;;  %5721 = vmatpush.msra.mxu2 %v5377_v10  ;;  %5764 = vmatpush.msrb.mxu0 %v5412_v46  ;;  %v5387_v10 = vld [vmem:[#allocation6 + $0x4a0] sm:$0xff]  ;;  %v5204_v46 = vrot.slane %v11508_v22, 4  ;;  %v5155_v22 = vrot.slane %v11351_v59, 1 }
 0x996   : > { %v5219_v62 = vsel %vm5214_vm8, %v5151_v19, %v5993_v26  ;;  %v5995_v28 = vrot.slane %v11518_v11, 5  ;;  %5742 = vmatpush.msra.mxu3 %v5395_v14  ;;  %5700 = vmatpush.msra.mxu1 %v5359_v60  ;;  %v5233_v56 = vsel %vm5214_vm8, %v11501_v3, %v5208_v63  ;;  %v5101_v14 = vrot.slane %v11360_v29, 7  ;;  %v5372_v60 = vld [vmem:[#allocation6 + $0x428] sm:$0xff]  ;;  %v5370_v63 = vld [vmem:[#allocation6 + $0x418] sm:$0xff] }
 0x997   : > { %5466 = vst [vmem:[#allocation1] ss:$2 sm:$0xff] %v5219_v62  ;;  %5722 = vmatpush.msra.mxu2 %v5376_v52  ;;  %v5234_v19 = vsel %vm5214_vm8, %v11490_v53, %v5209_v24  ;;  %v5371_v53 = vld [vmem:[#allocation6 + $0x420] sm:$0xff]  ;;  %v5410_v62 = vld [vmem:[#allocation6 + $0x558] sm:$0xff]  ;;  %5765 = vmatpush.msrb.mxu0 %v5411_v36  ;;  %v5368_v24 = vld [vmem:[#allocation6 + $0x408] sm:$0xff] }
 0x998   : > { %v5225_v16 = vsel %vm5214_vm8, %v5156_v0, %v5995_v28  ;;  %5743 = vmatpush.msra.mxu3 %v5394_v27  ;;  %5701 = vmatpush.msra.mxu1 %v5358_v61  ;;  %v5388_v27 = vld [vmem:[#allocation6 + $0x4a8] sm:$0xff]  ;;  %v5406_v36 = vld [vmem:[#allocation6 + $0x538] sm:$0xff] }
 0x999   : > { %5467 = vst [vmem:[#allocation1 + $0x1] ss:$2 sm:$0xff] %v5225_v16  ;;  %5723 = vmatpush.msra.mxu2 %v5375_v8  ;;  %v5352_v61 = vld [vmem:[#allocation6 + $0x388] sm:$0xff]  ;;  %5766 = vmatpush.msrb.mxu0 %v5410_v62 }
 0x99a   : > { %v5010_v7 = vpop.permute.xlu1 %5009  ;;  %5744 = vmatpush.msra.mxu3 %v5393_v39  ;;  %5702 = vmatpush.msra.mxu1 %v5357_v13  ;;  %v5351_v39 = vld [vmem:[#allocation6 + $0x380] sm:$0xff]  ;;  %v5428_v62 = vld [vmem:[#allocation6 + $0x5e8] sm:$0xff] }
 0x99b   : > { %v5077_v31 = vsel %vm3450_vm13, %v4941_v37, %v5010_v7  ;;  %v5390_v37 = vld [vmem:[#allocation6 + $0x4b8] sm:$0xff]  ;;  %5724 = vmatpush.msra.mxu2 %v5374_v51  ;;  %v5028_v7 = vpop.permute.xlu2 %5027  ;;  %v5384_v51 = vld [vmem:[#allocation6 + $0x488] sm:$0xff] }
 0x99c   : > { %v11529_v33 = vpop.permute.xlu0 %5057  ;;  %v5464_v35 = vld.sshfl [vmem:[#allocation1 + $0x30] sm:$0xff pattern:$0x75316420]  ;;  %5745 = vmatpush.msra.mxu3 %v5392_v2  ;;  %5703 = vmatpush.msra.mxu1 %v5356_v49  ;;  %v5203_v30 = vrot.slane %v5077_v31, 4  ;;  %v5386_v49 = vld [vmem:[#allocation6 + $0x498] sm:$0xff] }
 0x99d   : > { %v11533_v47 = vld.sshfl [vmem:[#allocation1 + $0x38] sm:$0xff pattern:$0x75316420]  ;;  %5686 = vmatmul.f32.vlgmr.msra.gmra.mxu0 %v5464_v35  ;;  %v5129_v55 = vsel %vm3450_vm13, %v5101_v14, %v11529_v33  ;;  %5725 = vmatpush.msra.mxu2 %v5373_v15  ;;  %v5383_v15 = vld [vmem:[#allocation6 + $0x480] sm:$0xff] }
 0x99e   : > { %5472 = vst [vmem:[#allocation1 + $0x30] ss:$2 sm:$0xff] %v5227_v58  ;;  %5746 = vmatpush.msra.mxu3 %v5391_v25  ;;  %5704 = vmatpush.msra.mxu1 %v5355_v23  ;;  %v5228_v18 = vsel %vm5214_vm8, %v11468_v34, %v5203_v30  ;;  %v5198_v34 = vrot.slane %v11501_v3, 4  ;;  %v5158_v13 = vrot.slane %v5129_v55, 1  ;;  %v5408_v25 = vld [vmem:[#allocation6 + $0x548] sm:$0xff]  ;;  %v5367_v30 = vld [vmem:[#allocation6 + $0x400] sm:$0xff] }
 0x99f   : > { %5473 = vst [vmem:[#allocation1 + $0x31] ss:$2 sm:$0xff] %v5233_v56  ;;  %5726 = vmatpush.msra.mxu2 %v5372_v60  ;;  %v5438_v60 = vld [vmem:[#allocation6 + $0x638] sm:$0xff] }
 0x9a0   : > { %v11540_v26 = vld.sshfl [vmem:[#allocation1] sm:$0xff pattern:$0x75316420]  ;;  %v11542_v57 = vld.sshfl [vmem:[#allocation1 + $0x8] sm:$0xff pattern:$0x75316420]  ;;  %5747 = vmatpush.msra.mxu3 %v5390_v37  ;;  %5705 = vmatpush.msra.mxu1 %v5354_v38  ;;  %v5081_v37 = vsel %vm3450_vm13, %v4965_v41, %v5028_v7 }
 0x9a1   : > { %5482 = vst [vmem:[#allocation1 + $0x1] ss:$2 sm:$0xff] %v5234_v19  ;;  %5727 = vmatpush.msra.mxu2 %v5371_v53  ;;  %v5160_v53 = vrot.slane %v5046_v48, 1 }
 0x9a2   : > { %5481 = vst [vmem:[#allocation1] ss:$2 sm:$0xff] %v5228_v18  ;;  %v5117_v0 = vpop.permute.xlu1 %5116  ;;  %5748 = vmatpush.msra.mxu3 %v5389_v32  ;;  %5706 = vmatpush.msra.mxu1 %v5353_v12  ;;  %v5430_v32 = vld [vmem:[#allocation6 + $0x5f8] sm:$0xff]  ;;  %v5429_v12 = vld [vmem:[#allocation6 + $0x5f0] sm:$0xff]  ;;  %v5229_v18 = vsel %vm5214_vm8, %v5081_v37, %v5204_v46  ;;  %v5423_v37 = vld [vmem:[#allocation6 + $0x5c0] sm:$0xff] }
 0x9a3   : > { %v5132_v28 = vsel %vm3450_vm13, %v5036_v6, %v5117_v0  ;;  %v5409_v6 = vld [vmem:[#allocation6 + $0x550] sm:$0xff]  ;;  %5728 = vmatpush.msra.mxu2 %v5370_v63 }
 0x9a4   : > { %v5996_v16 = vrot.slane %v5132_v28, 5  ;;  %v5026_v52 = vpop.permute.xlu0 %5025  ;;  %5749 = vmatpush.msra.mxu3 %v5388_v27  ;;  %5707 = vmatpush.msra.mxu1 %v5352_v61  ;;  %v5091_v61 = vpop.permute.xlu2 %5090  ;;  %v5437_v0 = vld [vmem:[#allocation6 + $0x630] sm:$0xff] }
 0x9a5   : > { %v5080_v2 = vsel %vm3450_vm13, %v4964_v40, %v5026_v52  ;;  %v5385_v40 = vld [vmem:[#allocation6 + $0x490] sm:$0xff]  ;;  %5767 = vmatpush.msrb.mxu0 %v5409_v6  ;;  %5729 = vmatpush.msra.mxu2 %v5369_v21 }
 0x9a6   : > { %v5226_v8 = vsel %vm5214_vm8, %v5158_v13, %v5996_v16  ;;  %v5223_v20 = vsel %vm5214_vm8, %v5080_v2, %v5198_v34  ;;  %v5479_v3 = vld.sshfl [vmem:[#allocation1 + $0x30] sm:$0xff pattern:$0x75316420]  ;;  %v5480_v31 = vld.sshfl [vmem:[#allocation1 + $0x38] sm:$0xff pattern:$0x75316420]  ;;  %5750 = vmatpush.msra.mxu3 %v5387_v10  ;;  %5708 = vmatpush.msra.mxu1 %v5351_v39  ;;  %v5126_v39 = vsel %vm3450_vm13, %v11398_v42, %v5091_v61 }
 0x9a7   : > { %5453 = vst [vmem:[#allocation1 + $0x21] ss:$2 sm:$0xff] %v5223_v20  ;;  %5551 = vmatmul.f32.gmra.mxu1 %v5479_v3  ;;  %5574 = vmatmul.f32.gmra.mxu2 %v5480_v31  ;;  %v5405_v28 = vld [vmem:[#allocation6 + $0x530] sm:$0xff]  ;;  %v5427_v34 = vld [vmem:[#allocation6 + $0x5e0] sm:$0xff]  ;;  %v5404_v13 = vld [vmem:[#allocation6 + $0x528] sm:$0xff] }
 0x9a8   : > { %5751 = vmatpush.msra.mxu3 %v5386_v49  ;;  %5469 = vst [vmem:[#allocation1 + $0x11] ss:$2 sm:$0xff] %v5226_v8  ;;  %5768 = vmatpush.msrb.mxu0 %v5408_v25  ;;  %v5166_v49 = vrot.slane %v5126_v39, 1  ;;  %v5165_v8 = vrot.slane %v5095_v17, 1  ;;  %v5425_v20 = vld [vmem:[#allocation6 + $0x5d0] sm:$0xff]  ;;  %v5403_v3 = vld [vmem:[#allocation6 + $0x520] sm:$0xff] }
 0x9a9   : > { %v5489_v23 = vld.sshfl [vmem:[#allocation1] sm:$0xff pattern:$0x75316420]  ;;  %5730 = vmatpush.msra.mxu2 %v5368_v24  ;;  %v5490_v7 = vld.sshfl [vmem:[#allocation1 + $0x8] sm:$0xff pattern:$0x75316420] }
 0x9aa   : > { %5597 = vmatmul.f32.gmra.mxu3 %v5489_v23  ;;  %v5040_v35 = vpop.permute.xlu1 %5039  ;;  %5769 = vmatpush.msrb.mxu0 %v5407_v54  ;;  %v5992_v25 = vrot.slane %v11417_v4, 4  ;;  %v5102_v17 = vrot.slane %v11398_v42, 7  ;;  %v5424_v23 = vld [vmem:[#allocation6 + $0x5c8] sm:$0xff]  ;;  %v5434_v24 = vld [vmem:[#allocation6 + $0x618] sm:$0xff]  ;;  %v5401_v46 = vld [vmem:[#allocation6 + $0x510] sm:$0xff] }
 0x9ab   : > { %v11559_v58 = vsel %vm3450_vm13, %v11360_v29, %v5040_v35  ;;  %5752 = vmatpush.msra.mxu3 %v5385_v40  ;;  %5731 = vmatpush.msra.mxu2 %v5367_v30  ;;  %v5402_v54 = vld [vmem:[#allocation6 + $0x518] sm:$0xff]  ;;  %v5421_v42 = vld [vmem:[#allocation6 + $0x5b0] sm:$0xff]  ;;  %v5400_v61 = vld [vmem:[#allocation6 + $0x508] sm:$0xff] }
 0x9ac   : > { %v5210_v38 = vrot.slane %v11559_v58, 4  ;;  %v5030_v56 = vpop.permute.xlu0 %5029  ;;  %5770 = vmatpush.msrb.mxu0 %v5406_v36  ;;  %v5161_v16 = vrot.slane %v11559_v58, 1 }
 0x9ad   : > { %v5082_v14 = vsel %vm3450_vm13, %v11351_v59, %v5030_v56  ;;  %5753 = vmatpush.msra.mxu3 %v5384_v51  ;;  %v5087_v59 = vsel %vm3450_vm13, %v5022_v44, %v11529_v33  ;;  %v5426_v33 = vld [vmem:[#allocation6 + $0x5d8] sm:$0xff] }
 0x9ae   : > { %v5235_v43 = vsel %vm5214_vm8, %v5082_v14, %v5210_v38  ;;  %v5462_v19 = vld.sshfl [vmem:[#allocation1 + $0x20] sm:$0xff pattern:$0x75316420]  ;;  %v5463_v41 = vld.sshfl [vmem:[#allocation1 + $0x28] sm:$0xff pattern:$0x75316420]  ;;  %5771 = vmatpush.msrb.mxu0 %v5405_v28  ;;  %v5109_v14 = vpop.permute.xlu2 %5108 }
 0x9af   : > { %v11570_v55 = vld.sshfl [vmem:[#allocation1 + $0x10] sm:$0xff pattern:$0x75316420]  ;;  %v11572_v27 = vld.sshfl [vmem:[#allocation1 + $0x18] sm:$0xff pattern:$0x75316420]  ;;  %5617 = vmatmul.f32.vlgmr.msrb.gmra.mxu1 %v11496_v9  ;;  %5640 = vmatmul.f32.vlgmr.msrb.gmra.mxu2 %v5462_v19 }
 0x9b0   : > { %5483 = vst [vmem:[#allocation1 + $0x10] ss:$2 sm:$0xff] %v5229_v18  ;;  %5785 = vmatpush.msrb.mxu1 %v5430_v32  ;;  %5754 = vmatpush.msra.mxu3 %v5383_v15  ;;  %v5436_v9 = vld [vmem:[#allocation6 + $0x628] sm:$0xff]  ;;  %v5205_v2 = vrot.slane %v5087_v59, 4  ;;  %v5433_v38 = vld [vmem:[#allocation6 + $0x610] sm:$0xff]  ;;  %v5422_v15 = vld [vmem:[#allocation6 + $0x5b8] sm:$0xff] }
 0x9b1   : > { %5484 = vst [vmem:[#allocation1 + $0x11] ss:$2 sm:$0xff] %v5235_v43  ;;  %5816 = vmatpush.msrb.mxu2 %v5438_v60  ;;  %5772 = vmatpush.msrb.mxu0 %v5404_v13  ;;  %v5103_v43 = vrot.slane %v11417_v4, 7  ;;  %v5432_v19 = vld [vmem:[#allocation6 + $0x608] sm:$0xff]  ;;  %v5111_v18 = vrot.slane %v11417_v4, 1  ;;  %v5399_v28 = vld [vmem:[#allocation6 + $0x500] sm:$0xff] }
 0x9b2   : > { %5470 = vst [vmem:[#allocation1 + $0x20] ss:$2 sm:$0xff] %v5155_v22  ;;  %5663 = vmatmul.f32.vlgmr.msrb.gmra.mxu3 %v5463_v41  ;;  %v5050_v10 = vpop.permute.xlu1 %5049  ;;  %5786 = vmatpush.msrb.mxu1 %v5429_v12  ;;  %v5230_v35 = vsel %vm5214_vm8, %v11518_v11, %v5205_v2  ;;  %v5420_v22 = vld [vmem:[#allocation6 + $0x5a8] sm:$0xff]  ;;  %v5418_v59 = vld [vmem:[#allocation6 + $0x598] sm:$0xff] }
 0x9b3   : > { %5471 = vst [vmem:[#allocation1 + $0x21] ss:$2 sm:$0xff] %v5160_v53  ;;  %v11587_v48 = vsel %vm3450_vm13, %v5043_v50, %v5050_v10  ;;  %6010 = vmatpush.msrb.mxu3 %v5430_v32  ;;  %5817 = vmatpush.msrb.mxu2 %v5437_v0  ;;  %v5435_v50 = vld [vmem:[#allocation6 + $0x620] sm:$0xff]  ;;  %v5131_v41 = vsel %vm3450_vm13, %v5103_v43, %v5109_v14  ;;  %v5416_v13 = vld [vmem:[#allocation6 + $0x588] sm:$0xff] }
 0x9b4   : > { %v5997_v52 = vrot.slane %v11587_v48, 5  ;;  %5787 = vmatpush.msrb.mxu1 %v5428_v62  ;;  %v5097_v5 = vpop.permute.xlu0 %5096  ;;  %5773 = vmatpush.msrb.mxu0 %v5403_v3  ;;  %v5431_v0 = vld [vmem:[#allocation6 + $0x600] sm:$0xff]  ;;  %v5168_v10 = vrot.slane %v5131_v41, 1 }
 0x9b5   : > { %6011 = vmatpush.msrb.mxu3 %v5429_v12  ;;  %v5127_v44 = vsel %vm3450_vm13, %v5093_v45, %v5097_v5  ;;  %5818 = vmatpush.msrb.mxu2 %v5436_v9  ;;  %v5053_v45 = vrot.slane %v11360_v29, 4 }
 0x9b6   : > { %v5231_v63 = vsel %vm5214_vm8, %v5161_v16, %v5997_v52  ;;  %v5999_v6 = vrot.slane %v5127_v44, 5  ;;  %5788 = vmatpush.msrb.mxu1 %v5427_v34  ;;  %5774 = vmatpush.msrb.mxu0 %v5402_v54  ;;  %v5415_v16 = vld [vmem:[#allocation6 + $0x580] sm:$0xff] }
 0x9b7   : > { %5487 = vst [vmem:[#allocation1 + $0x30] ss:$2 sm:$0xff] %v5231_v63  ;;  %5620 = vmatmul.f32.gmra.mxu1 %v5490_v7  ;;  %6012 = vmatpush.msrb.mxu3 %v5428_v62  ;;  %v5419_v62 = vld [vmem:[#allocation6 + $0x5a0] sm:$0xff] }
 0x9b8   : > { %v5237_v31 = vsel %vm5214_vm8, %v5166_v49, %v5999_v6  ;;  %v5491_v21 = vld.sshfl [vmem:[#allocation1 + $0x10] sm:$0xff pattern:$0x75316420]  ;;  %5789 = vmatpush.msrb.mxu1 %v5426_v33  ;;  %v5492_v40 = vld.sshfl [vmem:[#allocation1 + $0x18] sm:$0xff pattern:$0x75316420]  ;;  %5819 = vmatpush.msrb.mxu2 %v5435_v50 }
 0x9b9   : > { %5488 = vst [vmem:[#allocation1 + $0x31] ss:$2 sm:$0xff] %v5237_v31  ;;  %5643 = vmatmul.f32.gmra.mxu2 %v5491_v21  ;;  %6013 = vmatpush.msrb.mxu3 %v5427_v34  ;;  %v5417_v34 = vld [vmem:[#allocation6 + $0x590] sm:$0xff] }
 0x9ba   : > { %v11603_v29 = vld.sshfl [vmem:[#allocation1 + $0x20] sm:$0xff pattern:$0x75316420]  ;;  %5666 = vmatmul.f32.gmra.mxu3 %v5492_v40  ;;  %5499 = vst [vmem:[#allocation1 + $0x10] ss:$2 sm:$0xff] %v5165_v8  ;;  %5790 = vmatpush.msrb.mxu1 %v5425_v20  ;;  %v5060_v51 = vpop.permute.xlu1 %5059 }
 0x9bb   : > { %5485 = vst [vmem:[#allocation1 + $0x20] ss:$2 sm:$0xff] %v5230_v35  ;;  %6014 = vmatpush.msrb.mxu3 %v5426_v33  ;;  %v5088_v58 = vsel %vm3450_vm13, %v5053_v45, %v5060_v51  ;;  %v5130_v30 = vsel %vm3450_vm13, %v5102_v17, %v5060_v51  ;;  %5820 = vmatpush.msrb.mxu2 %v5434_v24 }
 0x9bc   : > { %5500 = vst [vmem:[#allocation1 + $0x11] ss:$2 sm:$0xff] %v5992_v25  ;;  %v5211_v56 = vrot.slane %v5088_v58, 4  ;;  %5791 = vmatpush.msrb.mxu1 %v5424_v23  ;;  %v5119_v11 = vpop.permute.xlu0 %5118  ;;  %v5163_v12 = vrot.slane %v5130_v30, 1  ;;  %5775 = vmatpush.msrb.mxu0 %v5401_v46 }
 0x9bd   : > { %6015 = vmatpush.msrb.mxu3 %v5425_v20  ;;  %v5133_v32 = vsel %vm3450_vm13, %v5089_v1, %v5119_v11  ;;  %5821 = vmatpush.msrb.mxu2 %v5433_v38 }
 0x9be   : > { %v5236_v60 = vsel %vm5214_vm8, %v11587_v48, %v5211_v56  ;;  %v5998_v36 = vrot.slane %v5133_v32, 5  ;;  %5792 = vmatpush.msrb.mxu1 %v5423_v37  ;;  %5776 = vmatpush.msrb.mxu0 %v5400_v61 }
 0x9bf   : > { %5486 = vst [vmem:[#allocation1 + $0x21] ss:$2 sm:$0xff] %v5236_v60  ;;  %5709 = vmatmul.f32.vlgmr.msra.gmra.mxu1 %v11533_v47  ;;  %6016 = vmatpush.msrb.mxu3 %v5424_v23 }
 0x9c0   : > { %v5232_v1 = vsel %vm5214_vm8, %v5163_v12, %v5998_v36  ;;  %5793 = vmatpush.msrb.mxu1 %v5422_v15  ;;  %5822 = vmatpush.msrb.mxu2 %v5432_v19  ;;  %v5495_v39 = vld.sshfl [vmem:[#allocation1 + $0x30] sm:$0xff pattern:$0x75316420]  ;;  %v5496_v48 = vld.sshfl [vmem:[#allocation1 + $0x38] sm:$0xff pattern:$0x75316420] }
 0x9c1   : > { %5497 = vst [vmem:[#allocation1] ss:$2 sm:$0xff] %v5232_v1  ;;  %5732 = vmatmul.f32.vlgmr.msra.gmra.mxu2 %v11540_v26  ;;  %6017 = vmatpush.msrb.mxu3 %v5423_v37 }
 0x9c2   : > { %5755 = vmatmul.f32.vlgmr.msra.gmra.mxu3 %v11542_v57  ;;  %5794 = vmatpush.msrb.mxu1 %v5421_v42  ;;  %v5121_v47 = vpop.permute.xlu1 %5120 }
 0x9c3   : > { %6018 = vmatpush.msrb.mxu3 %v5422_v15  ;;  %v5134_v53 = vsel %vm3450_vm13, %v5111_v18, %v5121_v47  ;;  %5823 = vmatpush.msrb.mxu2 %v5431_v0  ;;  %v5503_v44 = vld.sshfl [vmem:[#allocation1 + $0x10] sm:$0xff pattern:$0x75316420] }
 0x9c4   : > { %v6000_v9 = vrot.slane %v5134_v53, 5  ;;  %5795 = vmatpush.msrb.mxu1 %v5420_v22  ;;  %5777 = vmatpush.msrb.mxu0 %v5399_v28 }
 0x9c5   : > { %6019 = vmatpush.msrb.mxu3 %v5421_v42 }
 0x9c6   : > { %v5238_v4 = vsel %vm5214_vm8, %v5168_v10, %v6000_v9  ;;  %5796 = vmatpush.msrb.mxu1 %v5419_v62  ;;  %v5493_v26 = vld.sshfl [vmem:[#allocation1 + $0x20] sm:$0xff pattern:$0x75316420]  ;;  %v5494_v57 = vld.sshfl [vmem:[#allocation1 + $0x28] sm:$0xff pattern:$0x75316420] }
 0x9c7   : > { %5498 = vst [vmem:[#allocation1 + $0x1] ss:$2 sm:$0xff] %v5238_v4  ;;  %6020 = vmatpush.msrb.mxu3 %v5420_v22  ;;  %5689 = vmatmul.f32.gmra.mxu0 %v5493_v26 }
 0x9c8   : > { %5712 = vmatmul.f32.gmra.mxu1 %v5494_v57 }
 0x9c9   : > { %5735 = vmatmul.f32.gmra.mxu2 %v5495_v39  ;;  %6021 = vmatpush.msrb.mxu3 %v5419_v62 }
 0x9ca   : > { %5797 = vmatpush.msrb.mxu1 %v5418_v59  ;;  %5758 = vmatmul.f32.gmra.mxu3 %v5496_v48 }
 0x9cb   : > { %6022 = vmatpush.msrb.mxu3 %v5418_v59 }
 0x9cc   : > { %5798 = vmatpush.msrb.mxu1 %v5417_v34 }
 0x9cd   : > { %6023 = vmatpush.msrb.mxu3 %v5417_v34 }
 0x9ce   : > { %5799 = vmatpush.msrb.mxu1 %v5416_v13  ;;  %v5502_v52 = vld.sshfl [vmem:[#allocation1 + $0x8] sm:$0xff pattern:$0x75316420]  ;;  %v5501_v5 = vld.sshfl [vmem:[#allocation1] sm:$0xff pattern:$0x75316420] }
 0x9cf   : > { %6024 = vmatpush.msrb.mxu3 %v5416_v13  ;;  %5778 = vmatmul.f32.vlgmr.msrb.gmra.mxu0 %v11570_v55 }
 0x9d0   : > { %5800 = vmatpush.msrb.mxu1 %v5415_v16 }
 0x9d1   : > { %5801 = vmatmul.f32.vlgmr.msrb.gmra.mxu1 %v11572_v27  ;;  %6001 = vmatmul.msk.f32.vlgmr.msrb.gmra.mxu2 %vm3450_vm13, %v11603_v29  ;;  %v6669_v27 = vld [vmem:[%s11670_s7] ss:$0 sm:$0xff] }
 0x9d2   : > { %6025 = vmatpush.msrb.mxu3 %v5415_v16 }
 0x9d3   : > { %5804 = vmatmul.f32.vlgmr.msrb.gmra.mxu3 %v5502_v52 }
 0x9d7   : > { %5781 = vmatmul.f32.gmra.mxu0 %v5501_v5 }
 0x9d9   : > { %6002 = vmatmul.msk.f32.gmra.mxu2 %vm3450_vm13, %v5503_v44 }
 0xa04   : > { %v5549_v33 = vpop.f32.mrf.mxu1 }
 0xa05   : > { %v5550_v8 = vadd.f32 %v6669_v27, %v5549_v33 }
 0xa0a   : > { %v5572_v50 = vpop.f32.mrf.mxu2 }
 0xa0b   : > { %v5573_v3 = vadd.f32 %v5572_v50, %v5550_v8 }
 0xa12   : > { %v5595_v49 = vpop.f32.mrf.mxu3 }
 0xa13   : > { %v5596_v31 = vadd.f32 %v5595_v49, %v5573_v3 }
 0xa1a   : > { %v5687_v40 = vpop.f32.mrf.mxu0 }
 0xa24   : > { %v5552_v2 = vpop.f32.mrf.mxu1 }
 0xa25   : > { %v5553_v17 = vadd.f32 %v6669_v27, %v5552_v2 }
 0xa2a   : > { %v5575_v63 = vpop.f32.mrf.mxu2 }
 0xa2b   : > { %v5576_v35 = vadd.f32 %v5575_v63, %v5553_v17 }
 0xa2c   : > { %v5618_v55 = vpop.f32.mrf.mxu1 }
 0xa2d   : > { %v5598_v6 = vpop.f32.mrf.mxu3  ;;  %v5619_v21 = vadd.f32 %v5618_v55, %v5596_v31 }
 0xa2e   : > { %v5599_v51 = vadd.f32 %v5598_v6, %v5576_v35 }
 0xa32   : > { %v5641_v7 = vpop.f32.mrf.mxu2 }
 0xa33   : > { %v5642_v23 = vadd.f32 %v5641_v7, %v5619_v21 }
 0xa34   : > { %v5621_v45 = vpop.f32.mrf.mxu1 }
 0xa35   : > { %v5664_v20 = vpop.f32.mrf.mxu3  ;;  %v5622_v58 = vadd.f32 %v5621_v45, %v5599_v51 }
 0xa36   : > { %v5665_v54 = vadd.f32 %v5664_v20, %v5642_v23 }
 0xa38   : > { %v5688_v56 = vadd.f32 %v5687_v40, %v5665_v54 }
 0xa3c   : > { %v5644_v25 = vpop.f32.mrf.mxu2  ;;  %v5710_v29 = vpop.f32.mrf.mxu1 }
 0xa3d   : > { %v5667_v24 = vpop.f32.mrf.mxu3  ;;  %v5645_v38 = vadd.f32 %v5644_v25, %v5622_v58  ;;  %v5711_v32 = vadd.f32 %v5710_v29, %v5688_v56 }
 0xa3f   : > { %v5668_v46 = vadd.f32 %v5667_v24, %v5645_v38 }
 0xa44   : > { %v5733_v30 = vpop.f32.mrf.mxu2  ;;  %v5690_v37 = vpop.f32.mrf.mxu0 }
 0xa45   : > { %v5756_v11 = vpop.f32.mrf.mxu3  ;;  %v5713_v15 = vpop.f32.mrf.mxu1  ;;  %v5734_v14 = vadd.f32 %v5733_v30, %v5711_v32  ;;  %v5691_v12 = vadd.f32 %v5690_v37, %v5668_v46 }
 0xa47   : > { %v5757_v43 = vadd.f32 %v5756_v11, %v5734_v14  ;;  %v5714_v42 = vadd.f32 %v5713_v15, %v5691_v12 }
 0xa4c   : > { %v5736_v60 = vpop.f32.mrf.mxu2  ;;  %v5779_v36 = vpop.f32.mrf.mxu0 }
 0xa4d   : > { %v5780_v1 = vadd.f32 %v5779_v36, %v5757_v43  ;;  %v5759_v19 = vpop.f32.mrf.mxu3  ;;  %v5737_v41 = vadd.f32 %v5736_v60, %v5714_v42 }
 0xa4e   : > { %v5802_v18 = vpop.f32.mrf.mxu1 }
 0xa4f   : > { %v5803_v22 = vadd.f32 %v5802_v18, %v5780_v1  ;;  %v5760_v0 = vadd.f32 %v5759_v19, %v5737_v41 }
 0xa54   : > { %v5825_v61 = vpop.f32.mrf.mxu2  ;;  %v5782_v47 = vpop.f32.mrf.mxu0 }
 0xa55   : > { %v5826_v53 = vadd.f32 %v5825_v61, %v5803_v22  ;;  %v5783_v28 = vadd.f32 %v5782_v47, %v5760_v0 }
 0xa56   : > { %v5805_v9 = vpop.f32.mrf.mxu3 }
 0xa57   : > { %v5831_v62 = vmax.f32 %v5826_v53, 0.0  ;;  %v5806_v4 = vadd.f32 %v5805_v9, %v5783_v28 }
 0xa59   : > { %v5835_v10 = vrot.slane %v5831_v62, 4  ;;  %5839 = vst [vmem:[%s329_s24] sm:$0xf] %v5831_v62 }
 0xa5b   : > { %5840 = vst [vmem:[%s329_s24 + $0x4] sm:$0xf] %v5835_v10 }
 0xa5c   : > { %v5828_v26 = vpop.f32.mrf.mxu2 }
 0xa5d   : > { %v5829_v57 = vadd.f32 %v5828_v26, %v5806_v4 }
 0xa5f   : > { %v5832_v59 = vmax.f32 %v5829_v57, 0.0 }
 0xa61   : > { %v5836_v39 = vrot.slane %v5832_v59, 4  ;;  %5841 = vst [vmem:[%s329_s24 + $0x8] sm:$0xf] %v5832_v59 }
 0xa63   : > { %5842 = vst [vmem:[%s329_s24 + $0xc] sm:$0xf] %v5836_v39 }
 0xa64   : > { %6745 = shalt.err (!%p6742_p8)
}
 0xa65   : > { %s6798_s18 = smov 4  }
 0xa66   : > { %6034 = dma.vmem_to_hbm [thread:$0]  (%p6882_p5), %s5857_s10, 256, %s5859_s23, %s5844_s9, %s6796_s22, %s6796_s22, %s6798_s18  }
 0xa67 PF: > { %p6051_p9 = scmp.ge.s32.totalorder %s6788_s30, 2  ;;  %s5873_s24 = sand.u32 1, %s6776_s27  }
 0xa68   : > { %s5874_s26 = scalar_lea.sflag [#allocation4], %s5873_s24 }
 0xa69   : > { %p6044_p10 = pnand %p6051_p9, %p6886_p6 }
 0xa6b   : > { %p6045_p11 = pneg %p6044_p10 }
 0xa6d   : > { %6771 = dma.done.wait (%p6045_p11), %s5874_s26, 256  }
 0xa6e   : > { %6773 = vsyncadd (%p6045_p11), %s5874_s26, 4294967040  ;;  %p20_p12 = scmp.ge.s32.totalorder %s6869_s11, 4   ;;  %s12288_s27 = smov %s6780_s28 }
 0xa6f   : > { %s12289_s28 = smov %s6784_s29  ;;  %s12290_s29 = smov %s6880_s14 }
 0xa70   : > { %s12291_s30 = smov %s6869_s11  ;;  %22 = sbr.rel (!%p20_p12) target bundleno = 5 (0x5), region = 256 }
 0xa75   :  { %5880 = vsyncpa [#allocation3], 1 }
 0xa76   :  { %5882 = vsyncpa [#allocation3 + $0x1], 1 }
 0xa77   :  { %5883 = vsyncpa [#allocation4], 1 }
 0xa78   :  { %5885 = vsyncpa [#allocation4 + $0x1], 1 }
 0xa79   :  { %5886 = vsyncpa [#allocation5], 1 }
 0xa7a   :  { %5888 = vsyncpa [#allocation5 + $0x1], 1 }

</bundles_post_ra>
